<compile_context>
chip_gen: v7x
topology: tpu7x:2x2x1
jax: 0.10.0
libtpu: 0.0.40
codegen_flags: <defaults>
</compile_context>

<pallas_src>
import functools

import jax
import jax.numpy as jnp
from jax.experimental import pallas as pl
from jax.experimental.pallas import tpu as pltpu


# ---------------------------------------------------------------------------
# DynamicPosBias (relative-position bias table) -- plain XLA
# ---------------------------------------------------------------------------
def _layernorm(t, g, b, eps=1e-5):
    mu = jnp.mean(t, axis=-1, keepdims=True)
    var = jnp.mean((t - mu) ** 2, axis=-1, keepdims=True)
    return (t - mu) * jax.lax.rsqrt(var + eps) * g + b


def relative_position_bias(params, H, W, num_heads):
    """Returns the (num_heads, N, N) fp32 relative-position bias (plain XLA)."""
    # bias-table inputs: all (2H-1)*(2W-1) relative offsets
    pbh = jnp.arange(1 - H, H, dtype=jnp.float32)
    pbw = jnp.arange(1 - W, W, dtype=jnp.float32)
    bh, bw = jnp.meshgrid(pbh, pbw, indexing="ij")
    biases = jnp.stack([bh, bw]).reshape(2, -1).T                     # (L, 2)

    t = biases @ params["pos_proj_w"] + params["pos_proj_b"]
    t = _layernorm(t, params["ln1_g"], params["ln1_b"])
    t = jnp.maximum(t, 0.0) @ params["pos1_w"] + params["pos1_b"]
    t = _layernorm(t, params["ln2_g"], params["ln2_b"])
    t = jnp.maximum(t, 0.0) @ params["pos2_w"] + params["pos2_b"]
    t = _layernorm(t, params["ln3_g"], params["ln3_b"])
    pos = jnp.maximum(t, 0.0) @ params["pos3_w"] + params["pos3_b"]   # (L, nH)

    # relative position index (N, N)
    coords_h = jnp.arange(H)
    coords_w = jnp.arange(W)
    ch, cw = jnp.meshgrid(coords_h, coords_w, indexing="ij")
    coords_flatten = jnp.stack([ch, cw]).reshape(2, -1)               # (2, N)
    rel = coords_flatten[:, :, None] - coords_flatten[:, None, :]     # (2, N, N)
    rel = rel.transpose(1, 2, 0) + jnp.array([H - 1, W - 1])
    rel = rel * jnp.array([2 * W - 1, 1])
    idx = rel.sum(-1)                                                 # (N, N)

    N = H * W
    rpb = pos[idx.reshape(-1)].reshape(N, N, num_heads).transpose(2, 0, 1)
    return rpb.astype(jnp.float32)                                    # (nH, N, N)


# ---------------------------------------------------------------------------
# Main attention kernel: block_b windows per grid step
# ---------------------------------------------------------------------------
def _attn_kernel(*refs, num_heads, head_dim, block_b, seq_len, n_mask):
    if n_mask:
        (x_ref, wqkv_ref, bqkv_ref, bias_ref, mask_ref,
         wproj_ref, bproj_ref, o_ref, q_s, k_s, v_s, ctx_s) = refs
    else:
        (x_ref, wqkv_ref, bqkv_ref, bias_ref,
         wproj_ref, bproj_ref, o_ref, q_s, k_s, v_s, ctx_s) = refs
        mask_ref = None

    N = seq_len
    d = head_dim
    C = num_heads * d
    M = block_b * N

    # ---- fused QKV projection: bf16 operands on MXU, fp32 accumulation ----
    x = x_ref[...].reshape(M, C).astype(jnp.bfloat16)
    qkv = jnp.dot(x, wqkv_ref[...], preferred_element_type=jnp.float32)
    qkv = qkv + bqkv_ref[...]                   # (M, 3C); Q columns pre-scaled

    # ---- stage q/k/v head-major into VMEM scratch (bounds live ranges) ----
    for h in range(num_heads):
        q_s[h] = qkv[:, h * d:(h + 1) * d].astype(jnp.bfloat16)
        k_s[h] = qkv[:, C + h * d:C + (h + 1) * d].astype(jnp.bfloat16)
        v_s[h] = qkv[:, 2 * C + h * d:2 * C + (h + 1) * d].astype(jnp.bfloat16)

    # ---- per-window attention, batched over heads --------------------------
    for j in range(block_b):
        r0, r1 = j * N, (j + 1) * N
        q = q_s[:, r0:r1, :]                    # (nH, N, d) bf16 (scale folded)
        k = k_s[:, r0:r1, :]
        v = v_s[:, r0:r1, :]

        s = jnp.einsum("hqd,hkd->hqk", q, k,
                       preferred_element_type=jnp.float32)            # (nH,N,N)
        s = s + bias_ref[...]                                          # fp32
        if mask_ref is not None:
            widx = (pl.program_id(0) * block_b + j) % n_mask
            s = s + mask_ref[pl.ds(widx, 1), :, :]                     # (1,N,N)

        m = jnp.max(s, axis=-1, keepdims=True)
        p = jnp.exp(s - m)                                             # fp32
        l = jnp.sum(p, axis=-1, keepdims=True)                         # (nH,N,1)
        ctx = jnp.einsum("hqk,hkd->hqd", p.astype(jnp.bfloat16), v,
                         preferred_element_type=jnp.float32)           # (nH,N,d)
        # fold softmax normalization into the small (N, d) context (EUP recip)
        ctx = ctx * pl.reciprocal(l, approx=True)

        for h in range(num_heads):
            ctx_s[r0:r1, h * d:(h + 1) * d] = ctx[h].astype(jnp.bfloat16)

    # ---- output projection on the whole (block_b*N, C) slab ---------------
    out = jnp.dot(ctx_s[...], wproj_ref[...],
                  preferred_element_type=jnp.float32) + bproj_ref[...]
    o_ref[...] = out.reshape(block_b, N, C).astype(o_ref.dtype)


def _pick_block_b(B_):
    # Batch several windows per grid step (bigger projection matmuls, fewer
    # per-step overheads) while keeping >= 2 grid steps when possible so both
    # v7x TensorCores get work on the "parallel" axis.
    for cand in (8, 4, 2, 1):
        if cand < B_ and B_ % cand == 0:
            return cand
    return B_


def attention_forward(x, params, H, W, mask=None, *, num_heads, block_b=None):
    """x: (B_, N, C) fp32.  mask: (nP, N, N) fp32 or None.  Returns (B_, N, C)."""
    B_, N, C = x.shape
    assert H * W == N
    head_dim = C // num_heads
    scale = head_dim ** (-0.5)

    if block_b is None:
        block_b = _pick_block_b(B_)
    assert B_ % block_b == 0
    grid = (B_ // block_b,)

    # relative-position bias (nH, N, N): computed once in XLA, VMEM-resident
    # in the kernel via a constant index_map (no (B_, nH, N, N) broadcast).
    rpb = relative_position_bias(params, H, W, num_heads)

    # Fold qk scale into the Q columns of the qkv projection; pre-cast matmul
    # weights to bf16 (fp32 accumulation happens inside the kernel).
    col_scale = jnp.concatenate(
        [jnp.full((C,), scale, jnp.float32), jnp.ones((2 * C,), jnp.float32)])
    wqkv = (params["qkv_w"] * col_scale[None, :]).astype(jnp.bfloat16)
    bqkv = (params["qkv_b"] * col_scale[None, :]).astype(jnp.float32)
    wproj = params["proj_w"].astype(jnp.bfloat16)
    bproj = params["proj_b"].astype(jnp.float32)

    n_mask = None
    inputs = [x, wqkv, bqkv, rpb]
    in_specs = [
        pl.BlockSpec((block_b, N, C), lambda b: (b, 0, 0)),        # x
        pl.BlockSpec((C, 3 * C), lambda b: (0, 0)),                # Wqkv (resident)
        pl.BlockSpec((1, 3 * C), lambda b: (0, 0)),                # bqkv
        pl.BlockSpec((num_heads, N, N), lambda b: (0, 0, 0)),      # bias (resident)
    ]
    if mask is not None:
        n_mask = int(mask.shape[0])
        assert B_ % n_mask == 0
        inputs.append(mask.astype(jnp.float32))
        in_specs.append(pl.BlockSpec((n_mask, N, N), lambda b: (0, 0, 0)))
    inputs += [wproj, bproj]
    in_specs += [
        pl.BlockSpec((C, C), lambda b: (0, 0)),                    # Wproj (resident)
        pl.BlockSpec((1, C), lambda b: (0, 0)),                    # bproj
    ]

    kernel = functools.partial(
        _attn_kernel, num_heads=num_heads, head_dim=head_dim,
        block_b=block_b, seq_len=N, n_mask=n_mask)

    out = pl.pallas_call(
        kernel,
        out_shape=jax.ShapeDtypeStruct((B_, N, C), jnp.float32),
        grid_spec=pltpu.PrefetchScalarGridSpec(
            num_scalar_prefetch=0,
            grid=grid,
            in_specs=in_specs,
            out_specs=pl.BlockSpec((block_b, N, C), lambda b: (b, 0, 0)),
            scratch_shapes=[
                pltpu.VMEM((num_heads, block_b * N, head_dim), jnp.bfloat16),  # q
                pltpu.VMEM((num_heads, block_b * N, head_dim), jnp.bfloat16),  # k
                pltpu.VMEM((num_heads, block_b * N, head_dim), jnp.bfloat16),  # v
                pltpu.VMEM((block_b * N, C), jnp.bfloat16),                    # ctx
            ]),
        compiler_params=pltpu.CompilerParams(
            dimension_semantics=("parallel",)),
    )(*inputs)
    return out


# ---------------------------------------------------------------------------
# Pure-JAX fp32 reference (same math as the torch module)
# ---------------------------------------------------------------------------
def attention_reference(x, params, H, W, mask=None, *, num_heads):
    B_, N, C = x.shape
    head_dim = C // num_heads
    scale = head_dim ** (-0.5)

    rpb = relative_position_bias(params, H, W, num_heads)

    qkv = x @ params["qkv_w"] + params["qkv_b"][0]
    qkv = qkv.reshape(B_, N, 3, num_heads, head_dim).transpose(2, 0, 3, 1, 4)
    q, k, v = qkv[0] * scale, qkv[1], qkv[2]
    attn = jnp.einsum("bhqd,bhkd->bhqk", q, k) + rpb[None]
    if mask is not None:
        nP = mask.shape[0]
        attn = attn + mask[jnp.arange(B_) % nP][:, None, :, :]
    attn = jax.nn.softmax(attn, axis=-1)
    ctx = jnp.einsum("bhqk,bhkd->bhqd", attn, v).transpose(0, 2, 1, 3).reshape(B_, N, C)
    return ctx @ params["proj_w"] + params["proj_b"][0]


# ---------------------------------------------------------------------------
# Deterministic parameter init
# ---------------------------------------------------------------------------
def init_params(key, dim, num_heads):
    pos_dim = (dim // 4) // 4   # DynamicPosBias(dim // 4, ...).pos_dim
    ks = jax.random.split(key, 16)

    def lin(k, fan_in, fan_out):
        w = jax.random.normal(k, (fan_in, fan_out), jnp.float32) * 0.05
        b = jax.random.normal(jax.random.fold_in(k, 1), (1, fan_out), jnp.float32) * 0.02
        return w, b

    p = {}
    p["qkv_w"], p["qkv_b"] = lin(ks[0], dim, 3 * dim)
    p["proj_w"], p["proj_b"] = lin(ks[1], dim, dim)
    p["pos_proj_w"], p["pos_proj_b"] = lin(ks[2], 2, pos_dim)
    p["pos1_w"], p["pos1_b"] = lin(ks[3], pos_dim, pos_dim)
    p["pos2_w"], p["pos2_b"] = lin(ks[4], pos_dim, pos_dim)
    p["pos3_w"], p["pos3_b"] = lin(ks[5], pos_dim, num_heads)
    for nm in ["ln1", "ln2", "ln3"]:
        p[f"{nm}_g"] = jnp.ones((1, pos_dim), jnp.float32)
        p[f"{nm}_b"] = jnp.zeros((1, pos_dim), jnp.float32)
    return p


if __name__ == "__main__":
    dim = 32
    num_heads = 4
    H = W = 8
    N = H * W
    B_ = 8          # num_groups * B  (-> block_b = 4, grid = 2)

    key = jax.random.PRNGKey(0)
    kx, kp, km = jax.random.split(key, 3)
    x = jax.random.normal(kx, (B_, N, dim), jnp.float32)
    params = init_params(kp, dim, num_heads)

    # --- no-mask case ---
    out = attention_forward(x, params, H, W, mask=None, num_heads=num_heads)
    out = jax.block_until_ready(out)
    ref = attention_reference(x, params, H, W, mask=None, num_heads=num_heads)
    assert out.shape == (B_, N, dim)
    err = float(jnp.max(jnp.abs(out - ref)))
    assert jnp.allclose(out, ref, atol=2e-2, rtol=2e-2), err

    # --- masked case (nP groups, like shifted-window attention) ---
    nP = 4
    mask = jnp.where(jax.random.bernoulli(km, 0.5, (nP, N, N)),
                     0.0, -100.0).astype(jnp.float32)
    out_m = attention_forward(x, params, H, W, mask=mask, num_heads=num_heads)
    out_m = jax.block_until_ready(out_m)
    ref_m = attention_reference(x, params, H, W, mask=mask, num_heads=num_heads)
    err_m = float(jnp.max(jnp.abs(out_m - ref_m)))
    assert jnp.allclose(out_m, ref_m, atol=2e-2, rtol=2e-2), err_m

    print("KERNEL_OK")
</pallas_src>

<mosaic_0001>
module attributes {stable_mosaic.version = 11 : i64} {
  func.func @_attn_kernel(%arg0: i32, %arg1: memref<4x64x32xf32, #tpu.memory_space<vmem>>, %arg2: memref<32x96xbf16, #tpu.memory_space<vmem>>, %arg3: memref<1x96xf32, #tpu.memory_space<vmem>>, %arg4: memref<4x64x64xf32, #tpu.memory_space<vmem>>, %arg5: memref<32x32xbf16, #tpu.memory_space<vmem>>, %arg6: memref<1x32xf32, #tpu.memory_space<vmem>>, %arg7: memref<4x64x32xf32, #tpu.memory_space<vmem>>, %arg8: memref<4x256x8xbf16, #tpu.memory_space<vmem>>, %arg9: memref<4x256x8xbf16, #tpu.memory_space<vmem>>, %arg10: memref<4x256x8xbf16, #tpu.memory_space<vmem>>, %arg11: memref<256x32xbf16, #tpu.memory_space<vmem>>) attributes {dimension_semantics = [#tpu.dimension_semantics<parallel>], iteration_bounds = array<i64: 2>, scalar_prefetch = 0 : i64, scratch_operands = 4 : i64, tpu.core_type = #tpu.core_type<tc>, window_params = [{transform_indices = @transform_0, window_bounds = array<i64: 4, 64, 32>}, {pipeline_mode = #tpu.pipeline_mode<synchronous>, transform_indices = @transform_1, window_bounds = array<i64: 32, 96>}, {pipeline_mode = #tpu.pipeline_mode<synchronous>, transform_indices = @transform_2, window_bounds = array<i64: 1, 96>}, {pipeline_mode = #tpu.pipeline_mode<synchronous>, transform_indices = @transform_3, window_bounds = array<i64: 4, 64, 64>}, {pipeline_mode = #tpu.pipeline_mode<synchronous>, transform_indices = @transform_4, window_bounds = array<i64: 32, 32>}, {pipeline_mode = #tpu.pipeline_mode<synchronous>, transform_indices = @transform_5, window_bounds = array<i64: 1, 32>}, {transform_indices = @transform_6, window_bounds = array<i64: 4, 64, 32>}]} {
    %c0 = arith.constant 0 : index
    %c0_0 = arith.constant 0 : index
    %c0_1 = arith.constant 0 : index
    %0 = vector.load %arg1[%c0, %c0_0, %c0_1] : memref<4x64x32xf32, #tpu.memory_space<vmem>>, vector<4x64x32xf32>
    %1 = vector.shape_cast %0 : vector<4x64x32xf32> to vector<256x32xf32>
    %2 = arith.truncf %1 : vector<256x32xf32> to vector<256x32xbf16>
    %c0_2 = arith.constant 0 : index
    %c0_3 = arith.constant 0 : index
    %3 = vector.load %arg2[%c0_2, %c0_3] : memref<32x96xbf16, #tpu.memory_space<vmem>>, vector<32x96xbf16>
    %cst = arith.constant dense<0.000000e+00> : vector<256x96xf32>
    %4 = tpu.matmul %2, %3, %cst {dimension_numbers = #tpu.dot_dimension_numbers<[1], [0], [0], [1], [0, 0, 1, 1], [], []>} : vector<256x32xbf16>, vector<32x96xbf16>, vector<256x96xf32> -> vector<256x96xf32>
    %c0_4 = arith.constant 0 : index
    %c0_5 = arith.constant 0 : index
    %5 = vector.load %arg3[%c0_4, %c0_5] : memref<1x96xf32, #tpu.memory_space<vmem>>, vector<1x96xf32>
    %6 = vector.broadcast %5 : vector<1x96xf32> to vector<256x96xf32>
    %7 = arith.addf %4, %6 : vector<256x96xf32>
    %8 = vector.extract_strided_slice %7 {offsets = [0, 0], sizes = [256, 8], strides = [1, 1]} : vector<256x96xf32> to vector<256x8xf32>
    %9 = arith.truncf %8 : vector<256x8xf32> to vector<256x8xbf16>
    %c0_6 = arith.constant 0 : index
    %c0_7 = arith.constant 0 : index
    %c0_8 = arith.constant 0 : index
    %10 = vector.load %arg8[%c0_6, %c0_7, %c0_8] : memref<4x256x8xbf16, #tpu.memory_space<vmem>>, vector<1x256x8xbf16>
    %11 = vector.shape_cast %10 : vector<1x256x8xbf16> to vector<256x8xbf16>
    %12 = vector.shape_cast %9 : vector<256x8xbf16> to vector<1x256x8xbf16>
    tpu.vector_store %arg8[%c0_6, %c0_7, %c0_8], %12 {strides = array<i32>} : memref<4x256x8xbf16, #tpu.memory_space<vmem>>, vector<1x256x8xbf16>,
    %13 = vector.extract_strided_slice %7 {offsets = [0, 32], sizes = [256, 8], strides = [1, 1]} : vector<256x96xf32> to vector<256x8xf32>
    %14 = arith.truncf %13 : vector<256x8xf32> to vector<256x8xbf16>
    %c0_9 = arith.constant 0 : index
    %c0_10 = arith.constant 0 : index
    %c0_11 = arith.constant 0 : index
    %15 = vector.load %arg9[%c0_9, %c0_10, %c0_11] : memref<4x256x8xbf16, #tpu.memory_space<vmem>>, vector<1x256x8xbf16>
    %16 = vector.shape_cast %15 : vector<1x256x8xbf16> to vector<256x8xbf16>
    %17 = vector.shape_cast %14 : vector<256x8xbf16> to vector<1x256x8xbf16>
    tpu.vector_store %arg9[%c0_9, %c0_10, %c0_11], %17 {strides = array<i32>} : memref<4x256x8xbf16, #tpu.memory_space<vmem>>, vector<1x256x8xbf16>,
    %18 = vector.extract_strided_slice %7 {offsets = [0, 64], sizes = [256, 8], strides = [1, 1]} : vector<256x96xf32> to vector<256x8xf32>
    %19 = arith.truncf %18 : vector<256x8xf32> to vector<256x8xbf16>
    %c0_12 = arith.constant 0 : index
    %c0_13 = arith.constant 0 : index
    %c0_14 = arith.constant 0 : index
    %20 = vector.load %arg10[%c0_12, %c0_13, %c0_14] : memref<4x256x8xbf16, #tpu.memory_space<vmem>>, vector<1x256x8xbf16>
    %21 = vector.shape_cast %20 : vector<1x256x8xbf16> to vector<256x8xbf16>
    %22 = vector.shape_cast %19 : vector<256x8xbf16> to vector<1x256x8xbf16>
    tpu.vector_store %arg10[%c0_12, %c0_13, %c0_14], %22 {strides = array<i32>} : memref<4x256x8xbf16, #tpu.memory_space<vmem>>, vector<1x256x8xbf16>,
    %23 = vector.extract_strided_slice %7 {offsets = [0, 8], sizes = [256, 8], strides = [1, 1]} : vector<256x96xf32> to vector<256x8xf32>
    %24 = arith.truncf %23 : vector<256x8xf32> to vector<256x8xbf16>
    %c1 = arith.constant 1 : index
    %c0_15 = arith.constant 0 : index
    %c0_16 = arith.constant 0 : index
    %25 = vector.load %arg8[%c1, %c0_15, %c0_16] : memref<4x256x8xbf16, #tpu.memory_space<vmem>>, vector<1x256x8xbf16>
    %26 = vector.shape_cast %25 : vector<1x256x8xbf16> to vector<256x8xbf16>
    %27 = vector.shape_cast %24 : vector<256x8xbf16> to vector<1x256x8xbf16>
    tpu.vector_store %arg8[%c1, %c0_15, %c0_16], %27 {strides = array<i32>} : memref<4x256x8xbf16, #tpu.memory_space<vmem>>, vector<1x256x8xbf16>,
    %28 = vector.extract_strided_slice %7 {offsets = [0, 40], sizes = [256, 8], strides = [1, 1]} : vector<256x96xf32> to vector<256x8xf32>
    %29 = arith.truncf %28 : vector<256x8xf32> to vector<256x8xbf16>
    %c1_17 = arith.constant 1 : index
    %c0_18 = arith.constant 0 : index
    %c0_19 = arith.constant 0 : index
    %30 = vector.load %arg9[%c1_17, %c0_18, %c0_19] : memref<4x256x8xbf16, #tpu.memory_space<vmem>>, vector<1x256x8xbf16>
    %31 = vector.shape_cast %30 : vector<1x256x8xbf16> to vector<256x8xbf16>
    %32 = vector.shape_cast %29 : vector<256x8xbf16> to vector<1x256x8xbf16>
    tpu.vector_store %arg9[%c1_17, %c0_18, %c0_19], %32 {strides = array<i32>} : memref<4x256x8xbf16, #tpu.memory_space<vmem>>, vector<1x256x8xbf16>,
    %33 = vector.extract_strided_slice %7 {offsets = [0, 72], sizes = [256, 8], strides = [1, 1]} : vector<256x96xf32> to vector<256x8xf32>
    %34 = arith.truncf %33 : vector<256x8xf32> to vector<256x8xbf16>
    %c1_20 = arith.constant 1 : index
    %c0_21 = arith.constant 0 : index
    %c0_22 = arith.constant 0 : index
    %35 = vector.load %arg10[%c1_20, %c0_21, %c0_22] : memref<4x256x8xbf16, #tpu.memory_space<vmem>>, vector<1x256x8xbf16>
    %36 = vector.shape_cast %35 : vector<1x256x8xbf16> to vector<256x8xbf16>
    %37 = vector.shape_cast %34 : vector<256x8xbf16> to vector<1x256x8xbf16>
    tpu.vector_store %arg10[%c1_20, %c0_21, %c0_22], %37 {strides = array<i32>} : memref<4x256x8xbf16, #tpu.memory_space<vmem>>, vector<1x256x8xbf16>,
    %38 = vector.extract_strided_slice %7 {offsets = [0, 16], sizes = [256, 8], strides = [1, 1]} : vector<256x96xf32> to vector<256x8xf32>
    %39 = arith.truncf %38 : vector<256x8xf32> to vector<256x8xbf16>
    %c2 = arith.constant 2 : index
    %c0_23 = arith.constant 0 : index
    %c0_24 = arith.constant 0 : index
    %40 = vector.load %arg8[%c2, %c0_23, %c0_24] : memref<4x256x8xbf16, #tpu.memory_space<vmem>>, vector<1x256x8xbf16>
    %41 = vector.shape_cast %40 : vector<1x256x8xbf16> to vector<256x8xbf16>
    %42 = vector.shape_cast %39 : vector<256x8xbf16> to vector<1x256x8xbf16>
    tpu.vector_store %arg8[%c2, %c0_23, %c0_24], %42 {strides = array<i32>} : memref<4x256x8xbf16, #tpu.memory_space<vmem>>, vector<1x256x8xbf16>,
    %43 = vector.extract_strided_slice %7 {offsets = [0, 48], sizes = [256, 8], strides = [1, 1]} : vector<256x96xf32> to vector<256x8xf32>
    %44 = arith.truncf %43 : vector<256x8xf32> to vector<256x8xbf16>
    %c2_25 = arith.constant 2 : index
    %c0_26 = arith.constant 0 : index
    %c0_27 = arith.constant 0 : index
    %45 = vector.load %arg9[%c2_25, %c0_26, %c0_27] : memref<4x256x8xbf16, #tpu.memory_space<vmem>>, vector<1x256x8xbf16>
    %46 = vector.shape_cast %45 : vector<1x256x8xbf16> to vector<256x8xbf16>
    %47 = vector.shape_cast %44 : vector<256x8xbf16> to vector<1x256x8xbf16>
    tpu.vector_store %arg9[%c2_25, %c0_26, %c0_27], %47 {strides = array<i32>} : memref<4x256x8xbf16, #tpu.memory_space<vmem>>, vector<1x256x8xbf16>,
    %48 = vector.extract_strided_slice %7 {offsets = [0, 80], sizes = [256, 8], strides = [1, 1]} : vector<256x96xf32> to vector<256x8xf32>
    %49 = arith.truncf %48 : vector<256x8xf32> to vector<256x8xbf16>
    %c2_28 = arith.constant 2 : index
    %c0_29 = arith.constant 0 : index
    %c0_30 = arith.constant 0 : index
    %50 = vector.load %arg10[%c2_28, %c0_29, %c0_30] : memref<4x256x8xbf16, #tpu.memory_space<vmem>>, vector<1x256x8xbf16>
    %51 = vector.shape_cast %50 : vector<1x256x8xbf16> to vector<256x8xbf16>
    %52 = vector.shape_cast %49 : vector<256x8xbf16> to vector<1x256x8xbf16>
    tpu.vector_store %arg10[%c2_28, %c0_29, %c0_30], %52 {strides = array<i32>} : memref<4x256x8xbf16, #tpu.memory_space<vmem>>, vector<1x256x8xbf16>,
    %53 = vector.extract_strided_slice %7 {offsets = [0, 24], sizes = [256, 8], strides = [1, 1]} : vector<256x96xf32> to vector<256x8xf32>
    %54 = arith.truncf %53 : vector<256x8xf32> to vector<256x8xbf16>
    %c3 = arith.constant 3 : index
    %c0_31 = arith.constant 0 : index
    %c0_32 = arith.constant 0 : index
    %55 = vector.load %arg8[%c3, %c0_31, %c0_32] : memref<4x256x8xbf16, #tpu.memory_space<vmem>>, vector<1x256x8xbf16>
    %56 = vector.shape_cast %55 : vector<1x256x8xbf16> to vector<256x8xbf16>
    %57 = vector.shape_cast %54 : vector<256x8xbf16> to vector<1x256x8xbf16>
    tpu.vector_store %arg8[%c3, %c0_31, %c0_32], %57 {strides = array<i32>} : memref<4x256x8xbf16, #tpu.memory_space<vmem>>, vector<1x256x8xbf16>,
    %58 = vector.extract_strided_slice %7 {offsets = [0, 56], sizes = [256, 8], strides = [1, 1]} : vector<256x96xf32> to vector<256x8xf32>
    %59 = arith.truncf %58 : vector<256x8xf32> to vector<256x8xbf16>
    %c3_33 = arith.constant 3 : index
    %c0_34 = arith.constant 0 : index
    %c0_35 = arith.constant 0 : index
    %60 = vector.load %arg9[%c3_33, %c0_34, %c0_35] : memref<4x256x8xbf16, #tpu.memory_space<vmem>>, vector<1x256x8xbf16>
    %61 = vector.shape_cast %60 : vector<1x256x8xbf16> to vector<256x8xbf16>
    %62 = vector.shape_cast %59 : vector<256x8xbf16> to vector<1x256x8xbf16>
    tpu.vector_store %arg9[%c3_33, %c0_34, %c0_35], %62 {strides = array<i32>} : memref<4x256x8xbf16, #tpu.memory_space<vmem>>, vector<1x256x8xbf16>,
    %63 = vector.extract_strided_slice %7 {offsets = [0, 88], sizes = [256, 8], strides = [1, 1]} : vector<256x96xf32> to vector<256x8xf32>
    %64 = arith.truncf %63 : vector<256x8xf32> to vector<256x8xbf16>
    %c3_36 = arith.constant 3 : index
    %c0_37 = arith.constant 0 : index
    %c0_38 = arith.constant 0 : index
    %65 = vector.load %arg10[%c3_36, %c0_37, %c0_38] : memref<4x256x8xbf16, #tpu.memory_space<vmem>>, vector<1x256x8xbf16>
    %66 = vector.shape_cast %65 : vector<1x256x8xbf16> to vector<256x8xbf16>
    %67 = vector.shape_cast %64 : vector<256x8xbf16> to vector<1x256x8xbf16>
    tpu.vector_store %arg10[%c3_36, %c0_37, %c0_38], %67 {strides = array<i32>} : memref<4x256x8xbf16, #tpu.memory_space<vmem>>, vector<1x256x8xbf16>,
    %c0_39 = arith.constant 0 : index
    %c0_40 = arith.constant 0 : index
    %c0_41 = arith.constant 0 : index
    %68 = vector.load %arg8[%c0_39, %c0_40, %c0_41] : memref<4x256x8xbf16, #tpu.memory_space<vmem>>, vector<4x64x8xbf16>
    %c0_42 = arith.constant 0 : index
    %c0_43 = arith.constant 0 : index
    %c0_44 = arith.constant 0 : index
    %69 = vector.load %arg9[%c0_42, %c0_43, %c0_44] : memref<4x256x8xbf16, #tpu.memory_space<vmem>>, vector<4x64x8xbf16>
    %c0_45 = arith.constant 0 : index
    %c0_46 = arith.constant 0 : index
    %c0_47 = arith.constant 0 : index
    %70 = vector.load %arg10[%c0_45, %c0_46, %c0_47] : memref<4x256x8xbf16, #tpu.memory_space<vmem>>, vector<4x64x8xbf16>
    "tpu.trace_start"() <{level = 10 : i32, message = "hqd,hkd->hqk"}> : () -> ()
    %cst_48 = arith.constant dense<0.000000e+00> : vector<4x64x64xf32>
    %71 = tpu.matmul %68, %69, %cst_48 {dimension_numbers = #tpu.dot_dimension_numbers<[2], [2], [1], [1], [0, 0, 0, 1, 1, 1], [0], [0]>} : vector<4x64x8xbf16>, vector<4x64x8xbf16>, vector<4x64x64xf32> -> vector<4x64x64xf32>
    "tpu.trace_stop"() : () -> ()
    %c0_49 = arith.constant 0 : index
    %c0_50 = arith.constant 0 : index
    %c0_51 = arith.constant 0 : index
    %72 = vector.load %arg4[%c0_49, %c0_50, %c0_51] : memref<4x64x64xf32, #tpu.memory_space<vmem>>, vector<4x64x64xf32>
    %73 = arith.addf %71, %72 : vector<4x64x64xf32>
    %cst_52 = arith.constant dense<0xFF800000> : vector<4x64xf32>
    %74 = vector.multi_reduction <maximumf>, %73, %cst_52 [2] : vector<4x64x64xf32> to vector<4x64xf32>
    %75 = vector.shape_cast %74 : vector<4x64xf32> to vector<4x64x1xf32>
    %76 = vector.broadcast %75 : vector<4x64x1xf32> to vector<4x64x64xf32>
    %77 = arith.subf %73, %76 : vector<4x64x64xf32>
    %78 = math.exp %77 : vector<4x64x64xf32>
    %cst_53 = arith.constant dense<0.000000e+00> : vector<4x64xf32>
    %79 = vector.multi_reduction <add>, %78, %cst_53 [2] : vector<4x64x64xf32> to vector<4x64xf32>
    %80 = vector.shape_cast %79 : vector<4x64xf32> to vector<4x64x1xf32>
    %81 = arith.truncf %78 : vector<4x64x64xf32> to vector<4x64x64xbf16>
    "tpu.trace_start"() <{level = 10 : i32, message = "hqk,hkd->hqd"}> : () -> ()
    %cst_54 = arith.constant dense<0.000000e+00> : vector<4x64x8xf32>
    %82 = tpu.matmul %81, %70, %cst_54 {dimension_numbers = #tpu.dot_dimension_numbers<[2], [1], [1], [2], [0, 0, 0, 1, 1, 2], [0], [0]>} : vector<4x64x64xbf16>, vector<4x64x8xbf16>, vector<4x64x8xf32> -> vector<4x64x8xf32>
    "tpu.trace_stop"() : () -> ()
    %83 = tpu.reciprocal %80 {approx = true} : vector<4x64x1xf32> -> vector<4x64x1xf32>
    %84 = vector.broadcast %83 : vector<4x64x1xf32> to vector<4x64x8xf32>
    %85 = arith.mulf %82, %84 : vector<4x64x8xf32>
    %86 = vector.extract_strided_slice %85 {offsets = [0, 0, 0], sizes = [1, 64, 8], strides = [1, 1, 1]} : vector<4x64x8xf32> to vector<1x64x8xf32>
    %87 = vector.shape_cast %86 : vector<1x64x8xf32> to vector<64x8xf32>
    %88 = arith.truncf %87 : vector<64x8xf32> to vector<64x8xbf16>
    %c0_55 = arith.constant 0 : index
    %c0_56 = arith.constant 0 : index
    %89 = vector.load %arg11[%c0_55, %c0_56] : memref<256x32xbf16, #tpu.memory_space<vmem>>, vector<64x8xbf16>
    tpu.vector_store %arg11[%c0_55, %c0_56], %88 {strides = array<i32>} : memref<256x32xbf16, #tpu.memory_space<vmem>>, vector<64x8xbf16>,
    %90 = vector.extract_strided_slice %85 {offsets = [1, 0, 0], sizes = [1, 64, 8], strides = [1, 1, 1]} : vector<4x64x8xf32> to vector<1x64x8xf32>
    %91 = vector.shape_cast %90 : vector<1x64x8xf32> to vector<64x8xf32>
    %92 = arith.truncf %91 : vector<64x8xf32> to vector<64x8xbf16>
    %c0_57 = arith.constant 0 : index
    %c8 = arith.constant 8 : index
    %93 = vector.load %arg11[%c0_57, %c8] : memref<256x32xbf16, #tpu.memory_space<vmem>>, vector<64x8xbf16>
    tpu.vector_store %arg11[%c0_57, %c8], %92 {strides = array<i32>} : memref<256x32xbf16, #tpu.memory_space<vmem>>, vector<64x8xbf16>,
    %94 = vector.extract_strided_slice %85 {offsets = [2, 0, 0], sizes = [1, 64, 8], strides = [1, 1, 1]} : vector<4x64x8xf32> to vector<1x64x8xf32>
    %95 = vector.shape_cast %94 : vector<1x64x8xf32> to vector<64x8xf32>
    %96 = arith.truncf %95 : vector<64x8xf32> to vector<64x8xbf16>
    %c0_58 = arith.constant 0 : index
    %c16 = arith.constant 16 : index
    %97 = vector.load %arg11[%c0_58, %c16] : memref<256x32xbf16, #tpu.memory_space<vmem>>, vector<64x8xbf16>
    tpu.vector_store %arg11[%c0_58, %c16], %96 {strides = array<i32>} : memref<256x32xbf16, #tpu.memory_space<vmem>>, vector<64x8xbf16>,
    %98 = vector.extract_strided_slice %85 {offsets = [3, 0, 0], sizes = [1, 64, 8], strides = [1, 1, 1]} : vector<4x64x8xf32> to vector<1x64x8xf32>
    %99 = vector.shape_cast %98 : vector<1x64x8xf32> to vector<64x8xf32>
    %100 = arith.truncf %99 : vector<64x8xf32> to vector<64x8xbf16>
    %c0_59 = arith.constant 0 : index
    %c24 = arith.constant 24 : index
    %101 = vector.load %arg11[%c0_59, %c24] : memref<256x32xbf16, #tpu.memory_space<vmem>>, vector<64x8xbf16>
    tpu.vector_store %arg11[%c0_59, %c24], %100 {strides = array<i32>} : memref<256x32xbf16, #tpu.memory_space<vmem>>, vector<64x8xbf16>,
    %c0_60 = arith.constant 0 : index
    %c64 = arith.constant 64 : index
    %c0_61 = arith.constant 0 : index
    %102 = vector.load %arg8[%c0_60, %c64, %c0_61] : memref<4x256x8xbf16, #tpu.memory_space<vmem>>, vector<4x64x8xbf16>
    %c0_62 = arith.constant 0 : index
    %c64_63 = arith.constant 64 : index
    %c0_64 = arith.constant 0 : index
    %103 = vector.load %arg9[%c0_62, %c64_63, %c0_64] : memref<4x256x8xbf16, #tpu.memory_space<vmem>>, vector<4x64x8xbf16>
    %c0_65 = arith.constant 0 : index
    %c64_66 = arith.constant 64 : index
    %c0_67 = arith.constant 0 : index
    %104 = vector.load %arg10[%c0_65, %c64_66, %c0_67] : memref<4x256x8xbf16, #tpu.memory_space<vmem>>, vector<4x64x8xbf16>
    "tpu.trace_start"() <{level = 10 : i32, message = "hqd,hkd->hqk"}> : () -> ()
    %cst_68 = arith.constant dense<0.000000e+00> : vector<4x64x64xf32>
    %105 = tpu.matmul %102, %103, %cst_68 {dimension_numbers = #tpu.dot_dimension_numbers<[2], [2], [1], [1], [0, 0, 0, 1, 1, 1], [0], [0]>} : vector<4x64x8xbf16>, vector<4x64x8xbf16>, vector<4x64x64xf32> -> vector<4x64x64xf32>
    "tpu.trace_stop"() : () -> ()
    %c0_69 = arith.constant 0 : index
    %c0_70 = arith.constant 0 : index
    %c0_71 = arith.constant 0 : index
    %106 = vector.load %arg4[%c0_69, %c0_70, %c0_71] : memref<4x64x64xf32, #tpu.memory_space<vmem>>, vector<4x64x64xf32>
    %107 = arith.addf %105, %106 : vector<4x64x64xf32>
    %cst_72 = arith.constant dense<0xFF800000> : vector<4x64xf32>
    %108 = vector.multi_reduction <maximumf>, %107, %cst_72 [2] : vector<4x64x64xf32> to vector<4x64xf32>
    %109 = vector.shape_cast %108 : vector<4x64xf32> to vector<4x64x1xf32>
    %110 = vector.broadcast %109 : vector<4x64x1xf32> to vector<4x64x64xf32>
    %111 = arith.subf %107, %110 : vector<4x64x64xf32>
    %112 = math.exp %111 : vector<4x64x64xf32>
    %cst_73 = arith.constant dense<0.000000e+00> : vector<4x64xf32>
    %113 = vector.multi_reduction <add>, %112, %cst_73 [2] : vector<4x64x64xf32> to vector<4x64xf32>
    %114 = vector.shape_cast %113 : vector<4x64xf32> to vector<4x64x1xf32>
    %115 = arith.truncf %112 : vector<4x64x64xf32> to vector<4x64x64xbf16>
    "tpu.trace_start"() <{level = 10 : i32, message = "hqk,hkd->hqd"}> : () -> ()
    %cst_74 = arith.constant dense<0.000000e+00> : vector<4x64x8xf32>
    %116 = tpu.matmul %115, %104, %cst_74 {dimension_numbers = #tpu.dot_dimension_numbers<[2], [1], [1], [2], [0, 0, 0, 1, 1, 2], [0], [0]>} : vector<4x64x64xbf16>, vector<4x64x8xbf16>, vector<4x64x8xf32> -> vector<4x64x8xf32>
    "tpu.trace_stop"() : () -> ()
    %117 = tpu.reciprocal %114 {approx = true} : vector<4x64x1xf32> -> vector<4x64x1xf32>
    %118 = vector.broadcast %117 : vector<4x64x1xf32> to vector<4x64x8xf32>
    %119 = arith.mulf %116, %118 : vector<4x64x8xf32>
    %120 = vector.extract_strided_slice %119 {offsets = [0, 0, 0], sizes = [1, 64, 8], strides = [1, 1, 1]} : vector<4x64x8xf32> to vector<1x64x8xf32>
    %121 = vector.shape_cast %120 : vector<1x64x8xf32> to vector<64x8xf32>
    %122 = arith.truncf %121 : vector<64x8xf32> to vector<64x8xbf16>
    %c64_75 = arith.constant 64 : index
    %c0_76 = arith.constant 0 : index
    %123 = vector.load %arg11[%c64_75, %c0_76] : memref<256x32xbf16, #tpu.memory_space<vmem>>, vector<64x8xbf16>
    tpu.vector_store %arg11[%c64_75, %c0_76], %122 {strides = array<i32>} : memref<256x32xbf16, #tpu.memory_space<vmem>>, vector<64x8xbf16>,
    %124 = vector.extract_strided_slice %119 {offsets = [1, 0, 0], sizes = [1, 64, 8], strides = [1, 1, 1]} : vector<4x64x8xf32> to vector<1x64x8xf32>
    %125 = vector.shape_cast %124 : vector<1x64x8xf32> to vector<64x8xf32>
    %126 = arith.truncf %125 : vector<64x8xf32> to vector<64x8xbf16>
    %c64_77 = arith.constant 64 : index
    %c8_78 = arith.constant 8 : index
    %127 = vector.load %arg11[%c64_77, %c8_78] : memref<256x32xbf16, #tpu.memory_space<vmem>>, vector<64x8xbf16>
    tpu.vector_store %arg11[%c64_77, %c8_78], %126 {strides = array<i32>} : memref<256x32xbf16, #tpu.memory_space<vmem>>, vector<64x8xbf16>,
    %128 = vector.extract_strided_slice %119 {offsets = [2, 0, 0], sizes = [1, 64, 8], strides = [1, 1, 1]} : vector<4x64x8xf32> to vector<1x64x8xf32>
    %129 = vector.shape_cast %128 : vector<1x64x8xf32> to vector<64x8xf32>
    %130 = arith.truncf %129 : vector<64x8xf32> to vector<64x8xbf16>
    %c64_79 = arith.constant 64 : index
    %c16_80 = arith.constant 16 : index
    %131 = vector.load %arg11[%c64_79, %c16_80] : memref<256x32xbf16, #tpu.memory_space<vmem>>, vector<64x8xbf16>
    tpu.vector_store %arg11[%c64_79, %c16_80], %130 {strides = array<i32>} : memref<256x32xbf16, #tpu.memory_space<vmem>>, vector<64x8xbf16>,
    %132 = vector.extract_strided_slice %119 {offsets = [3, 0, 0], sizes = [1, 64, 8], strides = [1, 1, 1]} : vector<4x64x8xf32> to vector<1x64x8xf32>
    %133 = vector.shape_cast %132 : vector<1x64x8xf32> to vector<64x8xf32>
    %134 = arith.truncf %133 : vector<64x8xf32> to vector<64x8xbf16>
    %c64_81 = arith.constant 64 : index
    %c24_82 = arith.constant 24 : index
    %135 = vector.load %arg11[%c64_81, %c24_82] : memref<256x32xbf16, #tpu.memory_space<vmem>>, vector<64x8xbf16>
    tpu.vector_store %arg11[%c64_81, %c24_82], %134 {strides = array<i32>} : memref<256x32xbf16, #tpu.memory_space<vmem>>, vector<64x8xbf16>,
    %c0_83 = arith.constant 0 : index
    %c128 = arith.constant 128 : index
    %c0_84 = arith.constant 0 : index
    %136 = vector.load %arg8[%c0_83, %c128, %c0_84] : memref<4x256x8xbf16, #tpu.memory_space<vmem>>, vector<4x64x8xbf16>
    %c0_85 = arith.constant 0 : index
    %c128_86 = arith.constant 128 : index
    %c0_87 = arith.constant 0 : index
    %137 = vector.load %arg9[%c0_85, %c128_86, %c0_87] : memref<4x256x8xbf16, #tpu.memory_space<vmem>>, vector<4x64x8xbf16>
    %c0_88 = arith.constant 0 : index
    %c128_89 = arith.constant 128 : index
    %c0_90 = arith.constant 0 : index
    %138 = vector.load %arg10[%c0_88, %c128_89, %c0_90] : memref<4x256x8xbf16, #tpu.memory_space<vmem>>, vector<4x64x8xbf16>
    "tpu.trace_start"() <{level = 10 : i32, message = "hqd,hkd->hqk"}> : () -> ()
    %cst_91 = arith.constant dense<0.000000e+00> : vector<4x64x64xf32>
    %139 = tpu.matmul %136, %137, %cst_91 {dimension_numbers = #tpu.dot_dimension_numbers<[2], [2], [1], [1], [0, 0, 0, 1, 1, 1], [0], [0]>} : vector<4x64x8xbf16>, vector<4x64x8xbf16>, vector<4x64x64xf32> -> vector<4x64x64xf32>
    "tpu.trace_stop"() : () -> ()
    %c0_92 = arith.constant 0 : index
    %c0_93 = arith.constant 0 : index
    %c0_94 = arith.constant 0 : index
    %140 = vector.load %arg4[%c0_92, %c0_93, %c0_94] : memref<4x64x64xf32, #tpu.memory_space<vmem>>, vector<4x64x64xf32>
    %141 = arith.addf %139, %140 : vector<4x64x64xf32>
    %cst_95 = arith.constant dense<0xFF800000> : vector<4x64xf32>
    %142 = vector.multi_reduction <maximumf>, %141, %cst_95 [2] : vector<4x64x64xf32> to vector<4x64xf32>
    %143 = vector.shape_cast %142 : vector<4x64xf32> to vector<4x64x1xf32>
    %144 = vector.broadcast %143 : vector<4x64x1xf32> to vector<4x64x64xf32>
    %145 = arith.subf %141, %144 : vector<4x64x64xf32>
    %146 = math.exp %145 : vector<4x64x64xf32>
    %cst_96 = arith.constant dense<0.000000e+00> : vector<4x64xf32>
    %147 = vector.multi_reduction <add>, %146, %cst_96 [2] : vector<4x64x64xf32> to vector<4x64xf32>
    %148 = vector.shape_cast %147 : vector<4x64xf32> to vector<4x64x1xf32>
    %149 = arith.truncf %146 : vector<4x64x64xf32> to vector<4x64x64xbf16>
    "tpu.trace_start"() <{level = 10 : i32, message = "hqk,hkd->hqd"}> : () -> ()
    %cst_97 = arith.constant dense<0.000000e+00> : vector<4x64x8xf32>
    %150 = tpu.matmul %149, %138, %cst_97 {dimension_numbers = #tpu.dot_dimension_numbers<[2], [1], [1], [2], [0, 0, 0, 1, 1, 2], [0], [0]>} : vector<4x64x64xbf16>, vector<4x64x8xbf16>, vector<4x64x8xf32> -> vector<4x64x8xf32>
    "tpu.trace_stop"() : () -> ()
    %151 = tpu.reciprocal %148 {approx = true} : vector<4x64x1xf32> -> vector<4x64x1xf32>
    %152 = vector.broadcast %151 : vector<4x64x1xf32> to vector<4x64x8xf32>
    %153 = arith.mulf %150, %152 : vector<4x64x8xf32>
    %154 = vector.extract_strided_slice %153 {offsets = [0, 0, 0], sizes = [1, 64, 8], strides = [1, 1, 1]} : vector<4x64x8xf32> to vector<1x64x8xf32>
    %155 = vector.shape_cast %154 : vector<1x64x8xf32> to vector<64x8xf32>
    %156 = arith.truncf %155 : vector<64x8xf32> to vector<64x8xbf16>
    %c128_98 = arith.constant 128 : index
    %c0_99 = arith.constant 0 : index
    %157 = vector.load %arg11[%c128_98, %c0_99] : memref<256x32xbf16, #tpu.memory_space<vmem>>, vector<64x8xbf16>
    tpu.vector_store %arg11[%c128_98, %c0_99], %156 {strides = array<i32>} : memref<256x32xbf16, #tpu.memory_space<vmem>>, vector<64x8xbf16>,
    %158 = vector.extract_strided_slice %153 {offsets = [1, 0, 0], sizes = [1, 64, 8], strides = [1, 1, 1]} : vector<4x64x8xf32> to vector<1x64x8xf32>
    %159 = vector.shape_cast %158 : vector<1x64x8xf32> to vector<64x8xf32>
    %160 = arith.truncf %159 : vector<64x8xf32> to vector<64x8xbf16>
    %c128_100 = arith.constant 128 : index
    %c8_101 = arith.constant 8 : index
    %161 = vector.load %arg11[%c128_100, %c8_101] : memref<256x32xbf16, #tpu.memory_space<vmem>>, vector<64x8xbf16>
    tpu.vector_store %arg11[%c128_100, %c8_101], %160 {strides = array<i32>} : memref<256x32xbf16, #tpu.memory_space<vmem>>, vector<64x8xbf16>,
    %162 = vector.extract_strided_slice %153 {offsets = [2, 0, 0], sizes = [1, 64, 8], strides = [1, 1, 1]} : vector<4x64x8xf32> to vector<1x64x8xf32>
    %163 = vector.shape_cast %162 : vector<1x64x8xf32> to vector<64x8xf32>
    %164 = arith.truncf %163 : vector<64x8xf32> to vector<64x8xbf16>
    %c128_102 = arith.constant 128 : index
    %c16_103 = arith.constant 16 : index
    %165 = vector.load %arg11[%c128_102, %c16_103] : memref<256x32xbf16, #tpu.memory_space<vmem>>, vector<64x8xbf16>
    tpu.vector_store %arg11[%c128_102, %c16_103], %164 {strides = array<i32>} : memref<256x32xbf16, #tpu.memory_space<vmem>>, vector<64x8xbf16>,
    %166 = vector.extract_strided_slice %153 {offsets = [3, 0, 0], sizes = [1, 64, 8], strides = [1, 1, 1]} : vector<4x64x8xf32> to vector<1x64x8xf32>
    %167 = vector.shape_cast %166 : vector<1x64x8xf32> to vector<64x8xf32>
    %168 = arith.truncf %167 : vector<64x8xf32> to vector<64x8xbf16>
    %c128_104 = arith.constant 128 : index
    %c24_105 = arith.constant 24 : index
    %169 = vector.load %arg11[%c128_104, %c24_105] : memref<256x32xbf16, #tpu.memory_space<vmem>>, vector<64x8xbf16>
    tpu.vector_store %arg11[%c128_104, %c24_105], %168 {strides = array<i32>} : memref<256x32xbf16, #tpu.memory_space<vmem>>, vector<64x8xbf16>,
    %c0_106 = arith.constant 0 : index
    %c192 = arith.constant 192 : index
    %c0_107 = arith.constant 0 : index
    %170 = vector.load %arg8[%c0_106, %c192, %c0_107] : memref<4x256x8xbf16, #tpu.memory_space<vmem>>, vector<4x64x8xbf16>
    %c0_108 = arith.constant 0 : index
    %c192_109 = arith.constant 192 : index
    %c0_110 = arith.constant 0 : index
    %171 = vector.load %arg9[%c0_108, %c192_109, %c0_110] : memref<4x256x8xbf16, #tpu.memory_space<vmem>>, vector<4x64x8xbf16>
    %c0_111 = arith.constant 0 : index
    %c192_112 = arith.constant 192 : index
    %c0_113 = arith.constant 0 : index
    %172 = vector.load %arg10[%c0_111, %c192_112, %c0_113] : memref<4x256x8xbf16, #tpu.memory_space<vmem>>, vector<4x64x8xbf16>
    "tpu.trace_start"() <{level = 10 : i32, message = "hqd,hkd->hqk"}> : () -> ()
    %cst_114 = arith.constant dense<0.000000e+00> : vector<4x64x64xf32>
    %173 = tpu.matmul %170, %171, %cst_114 {dimension_numbers = #tpu.dot_dimension_numbers<[2], [2], [1], [1], [0, 0, 0, 1, 1, 1], [0], [0]>} : vector<4x64x8xbf16>, vector<4x64x8xbf16>, vector<4x64x64xf32> -> vector<4x64x64xf32>
    "tpu.trace_stop"() : () -> ()
    %c0_115 = arith.constant 0 : index
    %c0_116 = arith.constant 0 : index
    %c0_117 = arith.constant 0 : index
    %174 = vector.load %arg4[%c0_115, %c0_116, %c0_117] : memref<4x64x64xf32, #tpu.memory_space<vmem>>, vector<4x64x64xf32>
    %175 = arith.addf %173, %174 : vector<4x64x64xf32>
    %cst_118 = arith.constant dense<0xFF800000> : vector<4x64xf32>
    %176 = vector.multi_reduction <maximumf>, %175, %cst_118 [2] : vector<4x64x64xf32> to vector<4x64xf32>
    %177 = vector.shape_cast %176 : vector<4x64xf32> to vector<4x64x1xf32>
    %178 = vector.broadcast %177 : vector<4x64x1xf32> to vector<4x64x64xf32>
    %179 = arith.subf %175, %178 : vector<4x64x64xf32>
    %180 = math.exp %179 : vector<4x64x64xf32>
    %cst_119 = arith.constant dense<0.000000e+00> : vector<4x64xf32>
    %181 = vector.multi_reduction <add>, %180, %cst_119 [2] : vector<4x64x64xf32> to vector<4x64xf32>
    %182 = vector.shape_cast %181 : vector<4x64xf32> to vector<4x64x1xf32>
    %183 = arith.truncf %180 : vector<4x64x64xf32> to vector<4x64x64xbf16>
    "tpu.trace_start"() <{level = 10 : i32, message = "hqk,hkd->hqd"}> : () -> ()
    %cst_120 = arith.constant dense<0.000000e+00> : vector<4x64x8xf32>
    %184 = tpu.matmul %183, %172, %cst_120 {dimension_numbers = #tpu.dot_dimension_numbers<[2], [1], [1], [2], [0, 0, 0, 1, 1, 2], [0], [0]>} : vector<4x64x64xbf16>, vector<4x64x8xbf16>, vector<4x64x8xf32> -> vector<4x64x8xf32>
    "tpu.trace_stop"() : () -> ()
    %185 = tpu.reciprocal %182 {approx = true} : vector<4x64x1xf32> -> vector<4x64x1xf32>
    %186 = vector.broadcast %185 : vector<4x64x1xf32> to vector<4x64x8xf32>
    %187 = arith.mulf %184, %186 : vector<4x64x8xf32>
    %188 = vector.extract_strided_slice %187 {offsets = [0, 0, 0], sizes = [1, 64, 8], strides = [1, 1, 1]} : vector<4x64x8xf32> to vector<1x64x8xf32>
    %189 = vector.shape_cast %188 : vector<1x64x8xf32> to vector<64x8xf32>
    %190 = arith.truncf %189 : vector<64x8xf32> to vector<64x8xbf16>
    %c192_121 = arith.constant 192 : index
    %c0_122 = arith.constant 0 : index
    %191 = vector.load %arg11[%c192_121, %c0_122] : memref<256x32xbf16, #tpu.memory_space<vmem>>, vector<64x8xbf16>
    tpu.vector_store %arg11[%c192_121, %c0_122], %190 {strides = array<i32>} : memref<256x32xbf16, #tpu.memory_space<vmem>>, vector<64x8xbf16>,
    %192 = vector.extract_strided_slice %187 {offsets = [1, 0, 0], sizes = [1, 64, 8], strides = [1, 1, 1]} : vector<4x64x8xf32> to vector<1x64x8xf32>
    %193 = vector.shape_cast %192 : vector<1x64x8xf32> to vector<64x8xf32>
    %194 = arith.truncf %193 : vector<64x8xf32> to vector<64x8xbf16>
    %c192_123 = arith.constant 192 : index
    %c8_124 = arith.constant 8 : index
    %195 = vector.load %arg11[%c192_123, %c8_124] : memref<256x32xbf16, #tpu.memory_space<vmem>>, vector<64x8xbf16>
    tpu.vector_store %arg11[%c192_123, %c8_124], %194 {strides = array<i32>} : memref<256x32xbf16, #tpu.memory_space<vmem>>, vector<64x8xbf16>,
    %196 = vector.extract_strided_slice %187 {offsets = [2, 0, 0], sizes = [1, 64, 8], strides = [1, 1, 1]} : vector<4x64x8xf32> to vector<1x64x8xf32>
    %197 = vector.shape_cast %196 : vector<1x64x8xf32> to vector<64x8xf32>
    %198 = arith.truncf %197 : vector<64x8xf32> to vector<64x8xbf16>
    %c192_125 = arith.constant 192 : index
    %c16_126 = arith.constant 16 : index
    %199 = vector.load %arg11[%c192_125, %c16_126] : memref<256x32xbf16, #tpu.memory_space<vmem>>, vector<64x8xbf16>
    tpu.vector_store %arg11[%c192_125, %c16_126], %198 {strides = array<i32>} : memref<256x32xbf16, #tpu.memory_space<vmem>>, vector<64x8xbf16>,
    %200 = vector.extract_strided_slice %187 {offsets = [3, 0, 0], sizes = [1, 64, 8], strides = [1, 1, 1]} : vector<4x64x8xf32> to vector<1x64x8xf32>
    %201 = vector.shape_cast %200 : vector<1x64x8xf32> to vector<64x8xf32>
    %202 = arith.truncf %201 : vector<64x8xf32> to vector<64x8xbf16>
    %c192_127 = arith.constant 192 : index
    %c24_128 = arith.constant 24 : index
    %203 = vector.load %arg11[%c192_127, %c24_128] : memref<256x32xbf16, #tpu.memory_space<vmem>>, vector<64x8xbf16>
    tpu.vector_store %arg11[%c192_127, %c24_128], %202 {strides = array<i32>} : memref<256x32xbf16, #tpu.memory_space<vmem>>, vector<64x8xbf16>,
    %c0_129 = arith.constant 0 : index
    %c0_130 = arith.constant 0 : index
    %204 = vector.load %arg11[%c0_129, %c0_130] : memref<256x32xbf16, #tpu.memory_space<vmem>>, vector<256x32xbf16>
    %c0_131 = arith.constant 0 : index
    %c0_132 = arith.constant 0 : index
    %205 = vector.load %arg5[%c0_131, %c0_132] : memref<32x32xbf16, #tpu.memory_space<vmem>>, vector<32x32xbf16>
    %cst_133 = arith.constant dense<0.000000e+00> : vector<256x32xf32>
    %206 = tpu.matmul %204, %205, %cst_133 {dimension_numbers = #tpu.dot_dimension_numbers<[1], [0], [0], [1], [0, 0, 1, 1], [], []>} : vector<256x32xbf16>, vector<32x32xbf16>, vector<256x32xf32> -> vector<256x32xf32>
    %c0_134 = arith.constant 0 : index
    %c0_135 = arith.constant 0 : index
    %207 = vector.load %arg6[%c0_134, %c0_135] : memref<1x32xf32, #tpu.memory_space<vmem>>, vector<1x32xf32>
    %208 = vector.broadcast %207 : vector<1x32xf32> to vector<256x32xf32>
    %209 = arith.addf %206, %208 : vector<256x32xf32>
    %210 = vector.shape_cast %209 : vector<256x32xf32> to vector<4x64x32xf32>
    %c0_136 = arith.constant 0 : index
    %c0_137 = arith.constant 0 : index
    %c0_138 = arith.constant 0 : index
    %211 = vector.load %arg7[%c0_136, %c0_137, %c0_138] : memref<4x64x32xf32, #tpu.memory_space<vmem>>, vector<4x64x32xf32>
    tpu.vector_store %arg7[%c0_136, %c0_137, %c0_138], %210 {strides = array<i32>} : memref<4x64x32xf32, #tpu.memory_space<vmem>>, vector<4x64x32xf32>,
    return
  }
  func.func @transform_0(%arg0: i32) -> (i32, i32, i32) {
    %c0_i32 = arith.constant 0 : i32
    %c0_i32_0 = arith.constant 0 : i32
    %c0_i32_1 = arith.constant 0 : i32
    return %arg0, %c0_i32, %c0_i32_0 : i32, i32, i32
  }
  func.func @transform_1(%arg0: i32) -> (i32, i32) {
    %c0_i32 = arith.constant 0 : i32
    %c0_i32_0 = arith.constant 0 : i32
    %c0_i32_1 = arith.constant 0 : i32
    return %c0_i32, %c0_i32_0 : i32, i32
  }
  func.func @transform_2(%arg0: i32) -> (i32, i32) {
    %c0_i32 = arith.constant 0 : i32
    %c0_i32_0 = arith.constant 0 : i32
    %c0_i32_1 = arith.constant 0 : i32
    return %c0_i32, %c0_i32_0 : i32, i32
  }
  func.func @transform_3(%arg0: i32) -> (i32, i32, i32) {
    %c0_i32 = arith.constant 0 : i32
    %c0_i32_0 = arith.constant 0 : i32
    %c0_i32_1 = arith.constant 0 : i32
    %c0_i32_2 = arith.constant 0 : i32
    return %c0_i32, %c0_i32_0, %c0_i32_1 : i32, i32, i32
  }
  func.func @transform_4(%arg0: i32) -> (i32, i32) {
    %c0_i32 = arith.constant 0 : i32
    %c0_i32_0 = arith.constant 0 : i32
    %c0_i32_1 = arith.constant 0 : i32
    return %c0_i32, %c0_i32_0 : i32, i32
  }
  func.func @transform_5(%arg0: i32) -> (i32, i32) {
    %c0_i32 = arith.constant 0 : i32
    %c0_i32_0 = arith.constant 0 : i32
    %c0_i32_1 = arith.constant 0 : i32
    return %c0_i32, %c0_i32_0 : i32, i32
  }
  func.func @transform_6(%arg0: i32) -> (i32, i32, i32) {
    %c0_i32 = arith.constant 0 : i32
    %c0_i32_0 = arith.constant 0 : i32
    %c0_i32_1 = arith.constant 0 : i32
    return %arg0, %c0_i32, %c0_i32_0 : i32, i32, i32
  }
}

</mosaic_0001>

<bundles_post_ra>
// kernel: tpu_custom_call.1
= control target key start
LH: loop header
LB: loop body
LE: loop exit
PB: predicated region body
PF: predicated region fallthrough
CT: control target
= control target key end

     0   :  { %s8132_s21 = smov 0   ;;  %s11764_s0 = inlined_call_operand.vmem [shape: f32[8,64,32], index: 0, kind: input, shape index: {}]   ;;  %s11765_s1 = inlined_call_operand.vmem [shape: bf16[32,96], index: 1, kind: input, shape index: {}]   ;;  %s11766_s2 = inlined_call_operand.vmem [shape: f32[1,96], index: 2, kind: input, shape index: {}]   ;;  %s11767_s3 = inlined_call_operand.vmem [shape: f32[4,64,64], index: 3, kind: input, shape index: {}]   ;;  %s11768_s4 = inlined_call_operand.vmem [shape: bf16[32,32], index: 4, kind: input, shape index: {}]   ;;  %s11769_s5 = inlined_call_operand.vmem [shape: f32[1,32], index: 5, kind: input, shape index: {}]   ;;  %s11770_s6 = inlined_call_operand.vmem [shape: f32[8,64,32], index: 6, kind: output, shape index: {}]  }
   0x1 LB: > { %s6414_s22 = sadd.s32 4294967295, %s8081_s21   ;;  %p6418_p0 = scmp.ge.s32.totalorder %s8081_s21, 1  ;;  %s8081_s21 = sphi %s8132_s21, %s16_s21  }
   0x2   : > { %p214_p1 = scmp.lt.s32.totalorder %s8081_s21, 3 }
   0x4   : > { %p215_p2 = pnand %p6418_p0, %p214_p1 }
   0x6   : > { %218 = sbr.rel (%p215_p2) target bundleno = 2904 (0xb58), region = 44 }
   0xd   : > { %v7557_v0 = vld [vmem:[%s11765_s1] sm:$0xff]   ;;  %s6419_s25 = sshll.u32 %s6414_s22, 2  ;;  %v7558_v1 = vld [vmem:[%s11765_s1 + $0x8] sm:$0xff]   ;;  %vm332_vm0 = vcmask 261120   ;;  %vm558_vm1 = vcmask 64512   ;;  %s8083_s10 = smov 96  }
   0xe   : > { %p247_p3 = scmp.lt.s32.totalorder %s6419_s25, 7  ;;  %6887 = vmatprep.subr.bf16.mxu0 %v7557_v0  ;;  %v8207_v51 = vld [vmem:[%s11766_s2] ss:$0 sm:$0xff]  ;;  %s8084_s11 = smov 88   ;;  %vm1740_vm2 = vcmask 523264   ;;  %vm2445_vm3 = vcmask 130112  }
   0xf   : > { %6888 = vmatpush3.bf16.msra.mxu0 %v7557_v0  ;;  %s8085_s12 = smov 120   ;;  %s8086_s13 = smov 80   ;;  %vm2470_vm4 = vcmask 195712   ;;  %vm2495_vm5 = vcmask 261312  }
  0x10   : > { %s12254_s25 = smov (!%p247_p3, %s6419_s25), 7  ;;  %6889 = vmatprep.subr.bf16.mxu0 %v7558_v1  ;;  %s8087_s14 = smov 72  }
  0x11   : > { %s6593_s28 = sshll.u32 %s12254_s25, 6  ;;  %s8088_s15 = smov 112  }
  0x12   : > { %s8154_s7 = scalar_lea.vmem %s11764_s0, %s6593_s28  ;;  %s8089_s16 = smov 104  }
  0x13   : > { %6890 = vmatpush3.bf16.msra.mxu0 %v7558_v1  ;;  %v261_v2 = vld [vmem:[%s8154_s7] sm:$0xff]  ;;  %v262_v3 = vld [vmem:[%s8154_s7 + $0x8] sm:$0xff]  ;;  %v263_v4 = vld [vmem:[%s8154_s7 + $0x10] sm:$0xff]  ;;  %s8090_s17 = smov 64   ;;  %s8091_s18 = smov 56  }
  0x14   : > { %v293_v5 = vpack.c.bf16 %v262_v3, %v261_v2  ;;  %v264_v6 = vld [vmem:[%s8154_s7 + $0x18] sm:$0xff]  ;;  %v265_v7 = vld [vmem:[%s8154_s7 + $0x20] sm:$0xff]  ;;  %v266_v8 = vld [vmem:[%s8154_s7 + $0x28] sm:$0xff]  ;;  %s8092_s19 = smov 40   ;;  %s8093_s20 = smov 48  }
  0x15   : > { %v294_v9 = vpack.c.bf16 %v264_v6, %v263_v4  ;;  %v295_v10 = vpack.c.bf16 %v266_v8, %v265_v7  ;;  %v267_v11 = vld [vmem:[%s8154_s7 + $0x30] sm:$0xff]  ;;  %v268_v12 = vld [vmem:[%s8154_s7 + $0x38] sm:$0xff]  ;;  %v269_v13 = vld [vmem:[%s8154_s7 + $0x40] sm:$0xff]  ;;  %s8096_s23 = smov 24  }
  0x16   : > { %6891 = vmatprep.mubr.msk.bf16.mxu0 %vm332_vm0, %v293_v5  ;;  %v270_v14 = vld [vmem:[%s8154_s7 + $0x48] sm:$0xff]  ;;  %v296_v15 = vpack.c.bf16 %v268_v12, %v267_v11  ;;  %v271_v17 = vld [vmem:[%s8154_s7 + $0x50] sm:$0xff]  ;;  %v272_v18 = vld [vmem:[%s8154_s7 + $0x58] sm:$0xff] }
  0x17   : > { %6892 = vmatmul.mubr.msk.bf16.vlgmr.msra.gmra.mrb[0].mxu0 %vm332_vm0, %v294_v9  ;;  %v297_v16 = vpack.c.bf16 %v270_v14, %v269_v13  ;;  %v273_v19 = vld [vmem:[%s8154_s7 + $0x60] sm:$0xff]  ;;  %v274_v20 = vld [vmem:[%s8154_s7 + $0x68] sm:$0xff]  ;;  %v298_v21 = vpack.c.bf16 %v272_v18, %v271_v17  ;;  %v275_v23 = vld [vmem:[%s8154_s7 + $0x70] sm:$0xff] }
  0x18   : > { %6895 = vmatprep.mubr.msk.bf16.mxu0 %vm332_vm0, %v295_v10  ;;  %v299_v22 = vpack.c.bf16 %v274_v20, %v273_v19  ;;  %v276_v24 = vld [vmem:[%s8154_s7 + $0x78] sm:$0xff]  ;;  %v277_v25 = vld [vmem:[%s8154_s7 + $0x80] sm:$0xff]  ;;  %v278_v26 = vld [vmem:[%s8154_s7 + $0x88] sm:$0xff] }
  0x19   : > { %v300_v27 = vpack.c.bf16 %v276_v24, %v275_v23  ;;  %v301_v28 = vpack.c.bf16 %v278_v26, %v277_v25  ;;  %v279_v29 = vld [vmem:[%s8154_s7 + $0x90] sm:$0xff]  ;;  %v280_v30 = vld [vmem:[%s8154_s7 + $0x98] sm:$0xff]  ;;  %v281_v31 = vld [vmem:[%s8154_s7 + $0xa0] sm:$0xff] }
  0x1a   : > { %v282_v32 = vld [vmem:[%s8154_s7 + $0xa8] sm:$0xff]  ;;  %v302_v33 = vpack.c.bf16 %v280_v30, %v279_v29  ;;  %v283_v35 = vld [vmem:[%s8154_s7 + $0xb0] sm:$0xff]  ;;  %v284_v36 = vld [vmem:[%s8154_s7 + $0xb8] sm:$0xff] }
  0x1b   : > { %v303_v34 = vpack.c.bf16 %v282_v32, %v281_v31  ;;  %v304_v37 = vpack.c.bf16 %v284_v36, %v283_v35  ;;  %v285_v38 = vld [vmem:[%s8154_s7 + $0xc0] sm:$0xff]  ;;  %v286_v39 = vld [vmem:[%s8154_s7 + $0xc8] sm:$0xff]  ;;  %v287_v41 = vld [vmem:[%s8154_s7 + $0xd0] sm:$0xff] }
  0x1c   : > { %v305_v40 = vpack.c.bf16 %v286_v39, %v285_v38  ;;  %v288_v42 = vld [vmem:[%s8154_s7 + $0xd8] sm:$0xff]  ;;  %v289_v44 = vld [vmem:[%s8154_s7 + $0xe0] sm:$0xff]  ;;  %v290_v45 = vld [vmem:[%s8154_s7 + $0xe8] sm:$0xff] }
  0x1d   : > { %v306_v43 = vpack.c.bf16 %v288_v42, %v287_v41  ;;  %v307_v46 = vpack.c.bf16 %v290_v45, %v289_v44  ;;  %v291_v47 = vld [vmem:[%s8154_s7 + $0xf0] sm:$0xff]  ;;  %v292_v48 = vld [vmem:[%s8154_s7 + $0xf8] sm:$0xff] }
  0x1e   : > { %v308_v49 = vpack.c.bf16 %v292_v48, %v291_v47 }
  0x1f   : > { %6896 = vmatmul.mubr.msk.bf16.gmra.mrb[4].mxu0 %vm332_vm0, %v296_v15 }
  0x20   : > { %6899 = vmatprep.mubr.msk.bf16.mxu0 %vm332_vm0, %v297_v16 }
  0x27   : > { %6900 = vmatmul.mubr.msk.bf16.gmra.mrb[8].mxu0 %vm332_vm0, %v298_v21 }
  0x28   : > { %6903 = vmatprep.mubr.msk.bf16.mxu0 %vm332_vm0, %v299_v22 }
  0x2f   : > { %6904 = vmatmul.mubr.msk.bf16.gmra.mrb[12].mxu0 %vm332_vm0, %v300_v27 }
  0x30   : > { %6907 = vmatprep.mubr.msk.bf16.mxu0 %vm332_vm0, %v301_v28 }
  0x37   : > { %6908 = vmatmul.mubr.msk.bf16.gmra.mrb[16].mxu0 %vm332_vm0, %v302_v33 }
  0x38   : > { %6911 = vmatprep.mubr.msk.bf16.mxu0 %vm332_vm0, %v303_v34 }
  0x3f   : > { %6912 = vmatmul.mubr.msk.bf16.gmra.mrb[20].mxu0 %vm332_vm0, %v304_v37 }
  0x40   : > { %6915 = vmatprep.mubr.msk.bf16.mxu0 %vm332_vm0, %v305_v40 }
  0x47   : > { %6916 = vmatmul.mubr.msk.bf16.gmra.mrb[24].mxu0 %vm332_vm0, %v306_v43 }
  0x48   : > { %6919 = vmatprep.mubr.msk.bf16.mxu0 %vm332_vm0, %v307_v46 }
  0x4f   : > { %6920 = vmatmul.mubr.msk.bf16.gmra.mrb[28].mxu0 %vm332_vm0, %v308_v49 }
  0xea   : > { %v6893_v50 = vpop.f32.mrb[0].mxu0 }
  0xeb   : > { %v415_v52 = vpop.f32.mrb[1].mxu0  ;;  %v424_v54 = vadd.f32 %v6893_v50, %v8207_v51 }
  0xec   : > { %v6894_v53 = vpop.f32.mrb[2].mxu0  ;;  %v416_v57 = vadd.f32 %v8207_v51, %v415_v52 }
  0xed   : > { %v427_v55 = vadd.f32 %v6894_v53, %v8207_v51  ;;  %v418_v56 = vpop.f32.mrb[3].mxu0 }
  0xee   : > { %v419_v58 = vadd.f32 %v8207_v51, %v418_v56 }
  0xef   : > { %v8213_v59 = vpack.c.bf16 %v427_v55, %v424_v54 }
  0xf0   : > { %v8215_v60 = vpack.c.bf16 %v419_v58, %v416_v57 }
  0xf1   : > { %593 = vrot.lane.b32.xlu1 %v8213_v59, %s8083_s10  ;;  %560 = vst.msk [vmem:[#allocation2 + $0x8] sm:$0xff] %vm558_vm1, %v8213_v59 }
  0xf2   : > { %v6897_v61 = vpop.f32.mrb[4].mxu0  ;;  %591 = vrot.lane.b32.xlu0 %v8215_v60, %s8083_s10  ;;  %559 = vst.msk [vmem:[#allocation2] sm:$0xff] %vm558_vm1, %v8215_v60 }
  0xf3   : > { %v440_v62 = vadd.f32 %v6897_v61, %v8207_v51  ;;  %v431_v63 = vpop.f32.mrb[5].mxu0 }
  0xf4   : > { %v432_v0 = vadd.f32 %v8207_v51, %v431_v63  ;;  %v6898_v1 = vpop.f32.mrb[6].mxu0 }
  0xf5   : > { %v443_v2 = vadd.f32 %v6898_v1, %v8207_v51  ;;  %786 = vrot.lane.b32.xlu1 %v8213_v59, %s8084_s11  ;;  %v434_v3 = vpop.f32.mrb[7].mxu0 }
  0xf6   : > { %v435_v4 = vadd.f32 %v8207_v51, %v434_v3  ;;  %784 = vrot.lane.b32.xlu0 %v8215_v60, %s8084_s11 }
  0xf7   : > { %v545_v5 = vpack.c.bf16 %v443_v2, %v440_v62 }
  0xf8   : > { %v544_v6 = vpack.c.bf16 %v435_v4, %v432_v0 }
  0xf9   : > { %v1304_v7 = vld [vmem:[#allocation2] sm:$0xff]  ;;  %562 = vst.msk [vmem:[#allocation2 + $0x18] sm:$0xff] %vm558_vm1, %v545_v5 }
  0xfa   : > { %788 = vrot.lane.b32.xlu1 %v544_v6, %s8084_s11  ;;  %595 = vrot.lane.b32.xlu0 %v544_v6, %s8083_s10  ;;  %561 = vst.msk [vmem:[#allocation2 + $0x10] sm:$0xff] %vm558_vm1, %v544_v6  ;;  %v6901_v8 = vpop.f32.mrb[8].mxu0 }
  0xfb   : > { %6931 = vmatprep.mubr.msk.bf16.mxu0 %vm558_vm1, %v1304_v7  ;;  %v456_v9 = vadd.f32 %v6901_v8, %v8207_v51  ;;  %v447_v10 = vpop.f32.mrb[9].mxu0 }
  0xfc   : > { %v448_v11 = vadd.f32 %v8207_v51, %v447_v10  ;;  %v6902_v12 = vpop.f32.mrb[10].mxu0 }
  0xfd   : > { %v459_v13 = vadd.f32 %v6902_v12, %v8207_v51  ;;  %v450_v14 = vpop.f32.mrb[11].mxu0 }
  0xfe   : > { %790 = vrot.lane.b32.xlu1 %v545_v5, %s8084_s11  ;;  %597 = vrot.lane.b32.xlu0 %v545_v5, %s8083_s10  ;;  %v451_v15 = vadd.f32 %v8207_v51, %v450_v14 }
  0xff   : > { %v8298_v17 = vpack.c.bf16 %v459_v13, %v456_v9 }
 0x100   : > { %v8301_v20 = vpack.c.bf16 %v451_v15, %v448_v11 }
 0x101   : > { %564 = vst.msk [vmem:[#allocation2 + $0x28] sm:$0xff] %vm558_vm1, %v8298_v17 }
 0x102   : > { %719 = vrot.lane.b32.xlu1 %v8215_v60, %s8085_s12  ;;  %979 = vrot.lane.b32.xlu0 %v8215_v60, %s8086_s13  ;;  %v6905_v16 = vpop.f32.mrb[12].mxu0  ;;  %563 = vst.msk [vmem:[#allocation2 + $0x20] sm:$0xff] %vm558_vm1, %v8301_v20 }
 0x103   : > { %v472_v18 = vadd.f32 %v6905_v16, %v8207_v51  ;;  %v463_v19 = vpop.f32.mrb[13].mxu0 }
 0x104   : > { %v464_v21 = vadd.f32 %v8207_v51, %v463_v19  ;;  %v6906_v22 = vpop.f32.mrb[14].mxu0 }
 0x105   : > { %v475_v23 = vadd.f32 %v6906_v22, %v8207_v51  ;;  %v466_v24 = vpop.f32.mrb[15].mxu0 }
 0x106   : > { %721 = vrot.lane.b32.xlu1 %v8213_v59, %s8085_s12  ;;  %1174 = vrot.lane.b32.xlu0 %v8215_v60, %s8087_s14  ;;  %v467_v25 = vadd.f32 %v8207_v51, %v466_v24 }
 0x107   : > { %v8314_v27 = vpack.c.bf16 %v475_v23, %v472_v18 }
 0x108   : > { %v8317_v30 = vpack.c.bf16 %v467_v25, %v464_v21 }
 0x109   : > { %566 = vst.msk [vmem:[#allocation2 + $0x38] sm:$0xff] %vm558_vm1, %v8314_v27 }
 0x10a   : > { %1176 = vrot.lane.b32.xlu1 %v8213_v59, %s8087_s14  ;;  %981 = vrot.lane.b32.xlu0 %v8213_v59, %s8086_s13  ;;  %v6909_v26 = vpop.f32.mrb[16].mxu0  ;;  %565 = vst.msk [vmem:[#allocation2 + $0x30] sm:$0xff] %vm558_vm1, %v8317_v30 }
 0x10b   : > { %v488_v28 = vadd.f32 %v6909_v26, %v8207_v51  ;;  %v479_v29 = vpop.f32.mrb[17].mxu0 }
 0x10c   : > { %v480_v31 = vadd.f32 %v8207_v51, %v479_v29  ;;  %v6910_v32 = vpop.f32.mrb[18].mxu0 }
 0x10d   : > { %v491_v33 = vadd.f32 %v6910_v32, %v8207_v51  ;;  %v482_v34 = vpop.f32.mrb[19].mxu0 }
 0x10e   : > { %1178 = vrot.lane.b32.xlu1 %v544_v6, %s8087_s14  ;;  %983 = vrot.lane.b32.xlu0 %v544_v6, %s8086_s13  ;;  %v483_v35 = vadd.f32 %v8207_v51, %v482_v34 }
 0x10f   : > { %v8330_v37 = vpack.c.bf16 %v491_v33, %v488_v28 }
 0x110   : > { %v8333_v40 = vpack.c.bf16 %v483_v35, %v480_v31 }
 0x111   : > { %568 = vst.msk [vmem:[#allocation2 + $0x48] sm:$0xff] %vm558_vm1, %v8330_v37 }
 0x112   : > { %985 = vrot.lane.b32.xlu1 %v545_v5, %s8086_s13  ;;  %725 = vrot.lane.b32.xlu0 %v545_v5, %s8085_s12  ;;  %v6913_v36 = vpop.f32.mrb[20].mxu0  ;;  %567 = vst.msk [vmem:[#allocation2 + $0x40] sm:$0xff] %vm558_vm1, %v8333_v40 }
 0x113   : > { %v504_v38 = vadd.f32 %v6913_v36, %v8207_v51  ;;  %v495_v39 = vpop.f32.mrb[21].mxu0 }
 0x114   : > { %v496_v41 = vadd.f32 %v8207_v51, %v495_v39  ;;  %v6914_v42 = vpop.f32.mrb[22].mxu0 }
 0x115   : > { %v507_v43 = vadd.f32 %v6914_v42, %v8207_v51  ;;  %v498_v44 = vpop.f32.mrb[23].mxu0 }
 0x116   : > { %1180 = vrot.lane.b32.xlu1 %v545_v5, %s8087_s14  ;;  %723 = vrot.lane.b32.xlu0 %v544_v6, %s8085_s12  ;;  %v499_v45 = vadd.f32 %v8207_v51, %v498_v44 }
 0x117   : > { %v8346_v47 = vpack.c.bf16 %v507_v43, %v504_v38 }
 0x118   : > { %v8349_v50 = vpack.c.bf16 %v499_v45, %v496_v41 }
 0x119   : > { %570 = vst.msk [vmem:[#allocation2 + $0x58] sm:$0xff] %vm558_vm1, %v8346_v47 }
 0x11a   : > { %916 = vrot.lane.b32.xlu1 %v8213_v59, %s8088_s15  ;;  %914 = vrot.lane.b32.xlu0 %v8215_v60, %s8088_s15  ;;  %v6917_v46 = vpop.f32.mrb[24].mxu0  ;;  %569 = vst.msk [vmem:[#allocation2 + $0x50] sm:$0xff] %vm558_vm1, %v8349_v50 }
 0x11b   : > { %v520_v48 = vadd.f32 %v6917_v46, %v8207_v51  ;;  %v511_v49 = vpop.f32.mrb[25].mxu0 }
 0x11c   : > { %v512_v52 = vadd.f32 %v8207_v51, %v511_v49  ;;  %v6918_v53 = vpop.f32.mrb[26].mxu0 }
 0x11d   : > { %v523_v54 = vadd.f32 %v6918_v53, %v8207_v51  ;;  %v514_v55 = vpop.f32.mrb[27].mxu0 }
 0x11e   : > { %1111 = vrot.lane.b32.xlu1 %v8213_v59, %s8089_s16  ;;  %1109 = vrot.lane.b32.xlu0 %v8215_v60, %s8089_s16  ;;  %v515_v56 = vadd.f32 %v8207_v51, %v514_v55  ;;  %v1306_v55 = vld [vmem:[#allocation2 + $0x10] sm:$0xff] }
 0x120   : > { %v8364_v63 = vpack.c.bf16 %v515_v56, %v512_v52 }
 0x122   : > { %920 = vrot.lane.b32.xlu1 %v545_v5, %s8088_s15  ;;  %918 = vrot.lane.b32.xlu0 %v544_v6, %s8088_s15  ;;  %v6921_v57 = vpop.f32.mrb[28].mxu0  ;;  %571 = vst.msk [vmem:[#allocation2 + $0x60] sm:$0xff] %vm558_vm1, %v8364_v63 }
 0x123   : > { %v527_v61 = vpop.f32.mrb[29].mxu0 }
 0x124   : > { %v528_v0 = vadd.f32 %v8207_v51, %v527_v61  ;;  %v6922_v1 = vpop.f32.mrb[30].mxu0 }
 0x125   : > { %v539_v2 = vadd.f32 %v6922_v1, %v8207_v51  ;;  %v530_v3 = vpop.f32.mrb[31].mxu0 }
 0x126   : > { %1115 = vrot.lane.b32.xlu1 %v545_v5, %s8089_s16  ;;  %1113 = vrot.lane.b32.xlu0 %v544_v6, %s8089_s16  ;;  %v531_v4 = vadd.f32 %v8207_v51, %v530_v3 }
 0x128   : > { %v8379_v8 = vpack.c.bf16 %v531_v4, %v528_v0  ;;  %v1307_v4 = vld [vmem:[#allocation2 + $0x18] sm:$0xff] }
 0x12a   : > { %655 = vrot.lane.b32.xlu1 %v8215_v60, %s8090_s17  ;;  %849 = vrot.lane.b32.xlu0 %v8215_v60, %s8091_s18  ;;  %573 = vst.msk [vmem:[#allocation2 + $0x70] sm:$0xff] %vm558_vm1, %v8379_v8 }
 0x12e   : > { %657 = vrot.lane.b32.xlu1 %v8213_v59, %s8090_s17  ;;  %855 = vrot.lane.b32.xlu0 %v545_v5, %s8091_s18 }
 0x132   : > { %661 = vrot.lane.b32.xlu1 %v545_v5, %s8090_s17  ;;  %1239 = vrot.lane.b32.xlu0 %v8215_v60, %s8092_s19 }
 0x136   : > { %851 = vrot.lane.b32.xlu1 %v8213_v59, %s8091_s18  ;;  %1050 = vrot.lane.b32.xlu0 %v545_v5, %s8093_s20 }
 0x13a   : > { %1044 = vrot.lane.b32.xlu1 %v8215_v60, %s8093_s20  ;;  %659 = vrot.lane.b32.xlu0 %v544_v6, %s8090_s17  ;;  %v536_v60 = vadd.f32 %v6921_v57, %v8207_v51 }
 0x13e   : > { %1046 = vrot.lane.b32.xlu1 %v8213_v59, %s8093_s20  ;;  %794 = vrot.lane.b32.xlu0 %v8298_v17, %s8084_s11 }
 0x142   : > { %1241 = vrot.lane.b32.xlu1 %v8213_v59, %s8092_s19  ;;  %599 = vrot.lane.b32.xlu0 %v8301_v20, %s8083_s10  ;;  %v8360_v59 = vpack.c.bf16 %v523_v54, %v520_v48  ;;  %v1305_v54 = vld [vmem:[#allocation2 + $0x8] sm:$0xff] }
 0x144   : > { %572 = vst.msk [vmem:[#allocation2 + $0x68] sm:$0xff] %vm558_vm1, %v8360_v59 }
 0x146   : > { %1245 = vrot.lane.b32.xlu1 %v545_v5, %s8092_s19  ;;  %605 = vrot.lane.b32.xlu0 %v8314_v27, %s8083_s10 }
 0x14a   : > { %853 = vrot.lane.b32.xlu1 %v544_v6, %s8091_s18 }
 0x14e   : > { %1048 = vrot.lane.b32.xlu1 %v544_v6, %s8093_s20 }
 0x152   : > { %1243 = vrot.lane.b32.xlu1 %v544_v6, %s8092_s19  ;;  %v8376_v6 = vpack.c.bf16 %v539_v2, %v536_v60 }
 0x154   : > { %574 = vst.msk [vmem:[#allocation2 + $0x78] sm:$0xff] %vm558_vm1, %v8376_v6 }
 0x156   : > { %601 = vrot.lane.b32.xlu1 %v8298_v17, %s8083_s10 }
 0x15a   : > { %792 = vrot.lane.b32.xlu1 %v8301_v20, %s8084_s11 }
 0x15e   : > { %798 = vrot.lane.b32.xlu1 %v8314_v27, %s8084_s11 }
 0x162   : > { %603 = vrot.lane.b32.xlu1 %v8317_v30, %s8083_s10 }
 0x163   : > { %v594_v58 = vpop.permute.xlu1 %593 }
 0x164   : > { %640 = vst.msk [vmem:[#allocation3 + $0x8] sm:$0xff] %vm558_vm1, %v594_v58  ;;  %v592_v62 = vpop.permute.xlu0 %591 }
 0x165   : > { %639 = vst.msk [vmem:[#allocation3] sm:$0xff] %vm558_vm1, %v592_v62 }
 0x166   : > { %796 = vrot.lane.b32.xlu1 %v8317_v30, %s8084_s11 }
 0x167   : > { %v787_v5 = vpop.permute.xlu1 %786 }
 0x168   : > { %834 = vst.msk [vmem:[#allocation3 + $0x88] sm:$0xff] %vm558_vm1, %v787_v5  ;;  %v785_v7 = vpop.permute.xlu0 %784 }
 0x169   : > { %833 = vst.msk [vmem:[#allocation3 + $0x80] sm:$0xff] %vm558_vm1, %v785_v7 }
 0x16b   : > { %v1321_v12 = vld [vmem:[#allocation3 + $0x8] sm:$0xff] }
 0x16c   : > { %v789_v9 = vpop.permute.xlu1 %788  ;;  %v596_v10 = vpop.permute.xlu0 %595  ;;  %v1320_v11 = vld [vmem:[#allocation3] sm:$0xff]  ;;  %v1400_v23 = vsel %vm558_vm1, %v1321_v12, 0 }
 0x16d   : > { %835 = vst.msk [vmem:[#allocation3 + $0x90] sm:$0xff] %vm558_vm1, %v789_v9  ;;  %641 = vst.msk [vmem:[#allocation3 + $0x10] sm:$0xff] %vm558_vm1, %v596_v10  ;;  %7471 = vmatprep.subr.msk.bf16.mxu0 %vm558_vm1, %v1320_v11  ;;  %v1397_v51 = vsel %vm558_vm1, %v1320_v11, 0 }
 0x16e   : > { %6924 = vmatpush3.bf16.xpose.msra.mxu0 %v1397_v51 }
 0x16f   : > { %7472 = vmatprep.subr.msk.bf16.mxu0 %vm558_vm1, %v1321_v12  ;;  %v1325_v18 = vld [vmem:[#allocation3 + $0x88] sm:$0xff] }
 0x170   : > { %v791_v13 = vpop.permute.xlu1 %790  ;;  %v598_v14 = vpop.permute.xlu0 %597  ;;  %v1324_v15 = vld [vmem:[#allocation3 + $0x80] sm:$0xff]  ;;  %v1489_v28 = vsel %vm558_vm1, %v1325_v18, 0 }
 0x171   : > { %836 = vst.msk [vmem:[#allocation3 + $0x98] sm:$0xff] %vm558_vm1, %v791_v13  ;;  %642 = vst.msk [vmem:[#allocation3 + $0x18] sm:$0xff] %vm558_vm1, %v598_v14  ;;  %7475 = vmatprep.subr.msk.bf16.mxu1 %vm558_vm1, %v1324_v15  ;;  %v1486_v16 = vsel %vm558_vm1, %v1324_v15, 0 }
 0x172   : > { %6940 = vmatpush3.bf16.xpose.msra.mxu1 %v1486_v16 }
 0x173   : > { %7476 = vmatprep.subr.msk.bf16.mxu1 %vm558_vm1, %v1325_v18 }
 0x174   : > { %v720_v19 = vpop.permute.xlu1 %719  ;;  %v980_v21 = vpop.permute.xlu0 %979  ;;  %v1322_v22 = vld [vmem:[#allocation3 + $0x10] sm:$0xff] }
 0x175   : > { %768 = vst.msk [vmem:[#allocation2 + $0x80] sm:$0xff] %vm558_vm1, %v720_v19  ;;  %1028 = vst.msk [vmem:[#allocation3 + $0x100] sm:$0xff] %vm558_vm1, %v980_v21  ;;  %v1326_v26 = vld [vmem:[#allocation3 + $0x90] sm:$0xff]  ;;  %v1403_v33 = vsel %vm558_vm1, %v1322_v22, 0 }
 0x176   : > { %6926 = vmatpush3.bf16.xpose.msra.mxu0 %v1400_v23  ;;  %v1492_v38 = vsel %vm558_vm1, %v1326_v26, 0 }
 0x177   : > { %7473 = vmatprep.subr.msk.bf16.mxu0 %vm558_vm1, %v1322_v22 }
 0x178   : > { %v722_v24 = vpop.permute.xlu1 %721  ;;  %v1175_v25 = vpop.permute.xlu0 %1174  ;;  %v1323_v34 = vld [vmem:[#allocation3 + $0x18] sm:$0xff] }
 0x179   : > { %769 = vst.msk [vmem:[#allocation2 + $0x88] sm:$0xff] %vm558_vm1, %v722_v24  ;;  %1223 = vst.msk [vmem:[#allocation3 + $0x180] sm:$0xff] %vm558_vm1, %v1175_v25  ;;  %v1327_v39 = vld [vmem:[#allocation3 + $0x98] sm:$0xff]  ;;  %v1406_v43 = vsel %vm558_vm1, %v1323_v34, 0 }
 0x17a   : > { %6942 = vmatpush3.bf16.xpose.msra.mxu1 %v1489_v28  ;;  %v1495_v48 = vsel %vm558_vm1, %v1327_v39, 0 }
 0x17b   : > { %7477 = vmatprep.subr.msk.bf16.mxu1 %vm558_vm1, %v1326_v26 }
 0x17c   : > { %v1177_v29 = vpop.permute.xlu1 %1176  ;;  %v982_v31 = vpop.permute.xlu0 %981  ;;  %v1308_v32 = vld [vmem:[#allocation2 + $0x80] sm:$0xff] }
 0x17d   : > { %1224 = vst.msk [vmem:[#allocation3 + $0x188] sm:$0xff] %vm558_vm1, %v1177_v29  ;;  %1029 = vst.msk [vmem:[#allocation3 + $0x108] sm:$0xff] %vm558_vm1, %v982_v31  ;;  %6947 = vmatprep.mubr.msk.bf16.mxu1 %vm558_vm1, %v1308_v32  ;;  %v1328_v44 = vld [vmem:[#allocation3 + $0x100] sm:$0xff] }
 0x17e   : > { %6928 = vmatpush3.bf16.xpose.msra.mxu0 %v1403_v33  ;;  %v1575_v56 = vsel %vm558_vm1, %v1328_v44, 0 }
 0x17f   : > { %7474 = vmatprep.subr.msk.bf16.mxu0 %vm558_vm1, %v1323_v34 }
 0x180   : > { %v1179_v35 = vpop.permute.xlu1 %1178  ;;  %v984_v36 = vpop.permute.xlu0 %983  ;;  %v1332_v49 = vld [vmem:[#allocation3 + $0x180] sm:$0xff]  ;;  %v1309_v61 = vld [vmem:[#allocation2 + $0x88] sm:$0xff] }
 0x181   : > { %1225 = vst.msk [vmem:[#allocation3 + $0x190] sm:$0xff] %vm558_vm1, %v1179_v35  ;;  %1030 = vst.msk [vmem:[#allocation3 + $0x110] sm:$0xff] %vm558_vm1, %v984_v36  ;;  %v1664_v0 = vsel %vm558_vm1, %v1332_v49, 0 }
 0x182   : > { %6944 = vmatpush3.bf16.xpose.msra.mxu1 %v1492_v38 }
 0x183   : > { %7478 = vmatprep.subr.msk.bf16.mxu1 %vm558_vm1, %v1327_v39 }
 0x184   : > { %v986_v41 = vpop.permute.xlu1 %985  ;;  %v726_v42 = vpop.permute.xlu0 %725  ;;  %v1329_v57 = vld [vmem:[#allocation3 + $0x108] sm:$0xff] }
 0x185   : > { %1031 = vst.msk [vmem:[#allocation3 + $0x118] sm:$0xff] %vm558_vm1, %v986_v41  ;;  %771 = vst.msk [vmem:[#allocation2 + $0x98] sm:$0xff] %vm558_vm1, %v726_v42  ;;  %v1333_v1 = vld [vmem:[#allocation3 + $0x188] sm:$0xff]  ;;  %v1578_v7 = vsel %vm558_vm1, %v1329_v57, 0 }
 0x186   : > { %6930 = vmatpush3.bf16.xpose.msra.mxu0 %v1406_v43  ;;  %v1667_v13 = vsel %vm558_vm1, %v1333_v1, 0 }
 0x187   : > { %7479 = vmatprep.subr.msk.bf16.mxu0 %vm558_vm1, %v1328_v44 }
 0x188   : > { %v1181_v45 = vpop.permute.xlu1 %1180  ;;  %v724_v46 = vpop.permute.xlu0 %723  ;;  %v1330_v9 = vld [vmem:[#allocation3 + $0x110] sm:$0xff] }
 0x189   : > { %1226 = vst.msk [vmem:[#allocation3 + $0x198] sm:$0xff] %vm558_vm1, %v1181_v45  ;;  %770 = vst.msk [vmem:[#allocation2 + $0x90] sm:$0xff] %vm558_vm1, %v724_v46  ;;  %v1334_v14 = vld [vmem:[#allocation3 + $0x190] sm:$0xff]  ;;  %v1581_v18 = vsel %vm558_vm1, %v1330_v9, 0 }
 0x18a   : > { %6946 = vmatpush3.bf16.xpose.msra.mxu1 %v1495_v48  ;;  %v1670_v23 = vsel %vm558_vm1, %v1334_v14, 0 }
 0x18b   : > { %7483 = vmatprep.subr.msk.bf16.mxu1 %vm558_vm1, %v1332_v49 }
 0x18c   : > { %v917_v52 = vpop.permute.xlu1 %916  ;;  %v915_v53 = vpop.permute.xlu0 %914  ;;  %v1311_v51 = vld [vmem:[#allocation2 + $0x98] sm:$0xff] }
 0x18d   : > { %964 = vst.msk [vmem:[#allocation2 + $0x108] sm:$0xff] %vm558_vm1, %v917_v52  ;;  %963 = vst.msk [vmem:[#allocation2 + $0x100] sm:$0xff] %vm558_vm1, %v915_v53  ;;  %6932 = vmatmul.mubr.msk.bf16.vlgmr.msra.gmra.mrb[32].mxu0 %vm558_vm1, %v1305_v54  ;;  %v1331_v19 = vld [vmem:[#allocation3 + $0x118] sm:$0xff] }
 0x18e   : > { %6935 = vmatprep.mubr.msk.bf16.mxu0 %vm558_vm1, %v1306_v55  ;;  %6956 = vmatpush3.bf16.xpose.msra.mxu0 %v1575_v56  ;;  %v1584_v28 = vsel %vm558_vm1, %v1331_v19, 0 }
 0x18f   : > { %7480 = vmatprep.subr.msk.bf16.mxu0 %vm558_vm1, %v1329_v57 }
 0x190   : > { %v1112_v58 = vpop.permute.xlu1 %1111  ;;  %v1110_v60 = vpop.permute.xlu0 %1109  ;;  %v1310_v62 = vld [vmem:[#allocation2 + $0x90] sm:$0xff]  ;;  %v1335_v24 = vld [vmem:[#allocation3 + $0x198] sm:$0xff] }
 0x191   : > { %1159 = vst.msk [vmem:[#allocation2 + $0x188] sm:$0xff] %vm558_vm1, %v1112_v58  ;;  %1158 = vst.msk [vmem:[#allocation2 + $0x180] sm:$0xff] %vm558_vm1, %v1110_v60  ;;  %6948 = vmatmul.mubr.msk.bf16.vlgmr.msra.gmra.mrb[0].mxu1 %vm558_vm1, %v1309_v61  ;;  %v1673_v33 = vsel %vm558_vm1, %v1335_v24, 0 }
 0x192   : > { %6951 = vmatprep.mubr.msk.bf16.mxu1 %vm558_vm1, %v1310_v62  ;;  %6972 = vmatpush3.bf16.xpose.msra.mxu1 %v1664_v0 }
 0x193   : > { %7484 = vmatprep.subr.msk.bf16.mxu1 %vm558_vm1, %v1333_v1 }
 0x194   : > { %v921_v2 = vpop.permute.xlu1 %920  ;;  %v919_v3 = vpop.permute.xlu0 %918  ;;  %v1312_v5 = vld [vmem:[#allocation2 + $0x100] sm:$0xff]  ;;  %v1313_v36 = vld [vmem:[#allocation2 + $0x108] sm:$0xff] }
 0x195   : > { %966 = vst.msk [vmem:[#allocation2 + $0x118] sm:$0xff] %vm558_vm1, %v921_v2  ;;  %965 = vst.msk [vmem:[#allocation2 + $0x110] sm:$0xff] %vm558_vm1, %v919_v3  ;;  %6936 = vmatmul.mubr.msk.bf16.gmra.mrb[36].mxu0 %vm558_vm1, %v1307_v4 }
 0x196   : > { %6958 = vmatpush3.bf16.xpose.msra.mxu0 %v1578_v7  ;;  %6963 = vmatprep.mubr.msk.bf16.mxu0 %vm558_vm1, %v1312_v5 }
 0x197   : > { %7481 = vmatprep.subr.msk.bf16.mxu0 %vm558_vm1, %v1330_v9 }
 0x198   : > { %v1116_v10 = vpop.permute.xlu1 %1115  ;;  %v1114_v11 = vpop.permute.xlu0 %1113  ;;  %v1316_v12 = vld [vmem:[#allocation2 + $0x180] sm:$0xff]  ;;  %v1317_v42 = vld [vmem:[#allocation2 + $0x188] sm:$0xff] }
 0x199   : > { %1161 = vst.msk [vmem:[#allocation2 + $0x198] sm:$0xff] %vm558_vm1, %v1116_v10  ;;  %1160 = vst.msk [vmem:[#allocation2 + $0x190] sm:$0xff] %vm558_vm1, %v1114_v11  ;;  %6952 = vmatmul.mubr.msk.bf16.gmra.mrb[4].mxu1 %vm558_vm1, %v1311_v51  ;;  %v1354_v10 = vld [vmem:[%s11767_s3 + $0x10] sm:$0xff]  ;;  %v1352_v51 = vld [vmem:[%s11767_s3] sm:$0xff] }
 0x19a   : > { %6974 = vmatpush3.bf16.xpose.msra.mxu1 %v1667_v13  ;;  %6979 = vmatprep.mubr.msk.bf16.mxu1 %vm558_vm1, %v1316_v12 }
 0x19b   : > { %7485 = vmatprep.subr.msk.bf16.mxu1 %vm558_vm1, %v1334_v14 }
 0x19c   : > { %v656_v15 = vpop.permute.xlu1 %655  ;;  %v850_v16 = vpop.permute.xlu0 %849  ;;  %v1314_v38 = vld [vmem:[#allocation2 + $0x110] sm:$0xff]  ;;  %v1315_v45 = vld [vmem:[#allocation2 + $0x118] sm:$0xff] }
 0x19d   : > { %703 = vst.msk [vmem:[#allocation4] sm:$0xff] %vm558_vm1, %v656_v15  ;;  %898 = vst.msk [vmem:[#allocation4 + $0x80] sm:$0xff] %vm558_vm1, %v850_v16  ;;  %v1362_v15 = vld [vmem:[%s11767_s3 + $0x50] sm:$0xff] }
 0x19e   : > { %6960 = vmatpush3.bf16.xpose.msra.mxu0 %v1581_v18 }
 0x19f   : > { %7482 = vmatprep.subr.msk.bf16.mxu0 %vm558_vm1, %v1331_v19 }
 0x1a0   : > { %v658_v21 = vpop.permute.xlu1 %657  ;;  %v856_v22 = vpop.permute.xlu0 %855  ;;  %v1318_v43 = vld [vmem:[#allocation2 + $0x190] sm:$0xff]  ;;  %v1319_v53 = vld [vmem:[#allocation2 + $0x198] sm:$0xff] }
 0x1a1   : > { %704 = vst.msk [vmem:[#allocation4 + $0x8] sm:$0xff] %vm558_vm1, %v658_v21  ;;  %901 = vst.msk [vmem:[#allocation4 + $0x98] sm:$0xff] %vm558_vm1, %v856_v22  ;;  %v1355_v21 = vld [vmem:[%s11767_s3 + $0x18] sm:$0xff] }
 0x1a2   : > { %6976 = vmatpush3.bf16.xpose.msra.mxu1 %v1670_v23  ;;  %v1360_v23 = vld [vmem:[%s11767_s3 + $0x40] sm:$0xff] }
 0x1a3   : > { %7486 = vmatprep.subr.msk.bf16.mxu1 %vm558_vm1, %v1335_v24 }
 0x1a4   : > { %v662_v25 = vpop.permute.xlu1 %661  ;;  %v1240_v26 = vpop.permute.xlu0 %1239  ;;  %v1336_v29 = vld [vmem:[#allocation4] sm:$0xff] }
 0x1a5   : > { %706 = vst.msk [vmem:[#allocation4 + $0x18] sm:$0xff] %vm558_vm1, %v662_v25  ;;  %1288 = vst.msk [vmem:[#allocation4 + $0x180] sm:$0xff] %vm558_vm1, %v1240_v26  ;;  %v8470_v55 = vld [vmem:[#allocation4 + $0x80] sm:$0xff] }
 0x1a6   : > { %6962 = vmatpush3.bf16.xpose.msra.mxu0 %v1584_v28 }
 0x1a7   : > { %6987 = vmatprep.subr.bf16.mxu0 %v1336_v29 }
 0x1a8   : > { %v852_v31 = vpop.permute.xlu1 %851  ;;  %v1051_v32 = vpop.permute.xlu0 %1050  ;;  %v1337_v39 = vld [vmem:[#allocation4 + $0x8] sm:$0xff] }
 0x1a9   : > { %899 = vst.msk [vmem:[#allocation4 + $0x88] sm:$0xff] %vm558_vm1, %v852_v31  ;;  %1096 = vst.msk [vmem:[#allocation4 + $0x118] sm:$0xff] %vm558_vm1, %v1051_v32 }
 0x1aa   : > { %6978 = vmatpush3.bf16.xpose.msra.mxu1 %v1673_v33 }
 0x1ac   : > { %v1045_v34 = vpop.permute.xlu1 %1044  ;;  %v660_v35 = vpop.permute.xlu0 %659  ;;  %v1339_v49 = vld [vmem:[#allocation4 + $0x18] sm:$0xff] }
 0x1ad   : > { %1093 = vst.msk [vmem:[#allocation4 + $0x100] sm:$0xff] %vm558_vm1, %v1045_v34  ;;  %705 = vst.msk [vmem:[#allocation4 + $0x10] sm:$0xff] %vm558_vm1, %v660_v35  ;;  %6964 = vmatmul.mubr.msk.bf16.vlgmr.msra.gmra.mrb[40].mxu0 %vm558_vm1, %v1313_v36  ;;  %v1363_v34 = vld [vmem:[%s11767_s3 + $0x58] sm:$0xff]  ;;  %v1361_v35 = vld [vmem:[%s11767_s3 + $0x48] sm:$0xff] }
 0x1ae   : > { %6967 = vmatprep.mubr.msk.bf16.mxu0 %vm558_vm1, %v1314_v38  ;;  %6988 = vmatpush3.bf16.msra.mxu0 %v1336_v29 }
 0x1af   : > { %6989 = vmatprep.subr.bf16.mxu0 %v1337_v39 }
 0x1b0   : > { %v1047_v41 = vpop.permute.xlu1 %1046  ;;  %v1347_v61 = vld [vmem:[#allocation4 + $0x118] sm:$0xff]  ;;  %v795_v1 = vpop.permute.xlu0 %794 }
 0x1b1   : > { %1094 = vst.msk [vmem:[#allocation4 + $0x108] sm:$0xff] %vm558_vm1, %v1047_v41  ;;  %6980 = vmatmul.mubr.msk.bf16.vlgmr.msra.gmra.mrb[8].mxu1 %vm558_vm1, %v1317_v42  ;;  %838 = vst.msk [vmem:[#allocation3 + $0xa8] sm:$0xff] %vm558_vm1, %v795_v1 }
 0x1b2   : > { %6983 = vmatprep.mubr.msk.bf16.mxu1 %vm558_vm1, %v1318_v43  ;;  %6990 = vmatpush3.bf16.msra.mxu0 %v1337_v39 }
 0x1b4   : > { %v1242_v44 = vpop.permute.xlu1 %1241  ;;  %v1338_v46 = vld [vmem:[#allocation4 + $0x10] sm:$0xff]  ;;  %v1344_v48 = vld [vmem:[#allocation4 + $0x100] sm:$0xff]  ;;  %v600_v3 = vpop.permute.xlu0 %599 }
 0x1b5   : > { %1289 = vst.msk [vmem:[#allocation4 + $0x188] sm:$0xff] %vm558_vm1, %v1242_v44  ;;  %6968 = vmatmul.mubr.msk.bf16.gmra.mrb[44].mxu0 %vm558_vm1, %v1315_v45  ;;  %6991 = vmatprep.subr.bf16.mxu0 %v1338_v46  ;;  %643 = vst.msk [vmem:[#allocation3 + $0x20] sm:$0xff] %vm558_vm1, %v600_v3 }
 0x1b6   : > { %7019 = vmatprep.subr.bf16.mxu1 %v1344_v48  ;;  %6992 = vmatpush3.bf16.msra.mxu0 %v1338_v46  ;;  %v1353_v46 = vld [vmem:[%s11767_s3 + $0x8] sm:$0xff] }
 0x1b7   : > { %7020 = vmatpush3.bf16.msra.mxu1 %v1344_v48  ;;  %6993 = vmatprep.subr.bf16.mxu0 %v1339_v49  ;;  %v1358_v48 = vld [vmem:[%s11767_s3 + $0x30] sm:$0xff] }
 0x1b8   : > { %v1246_v52 = vpop.permute.xlu1 %1245  ;;  %v1345_v54 = vld [vmem:[#allocation4 + $0x108] sm:$0xff]  ;;  %v606_v7 = vpop.permute.xlu0 %605 }
 0x1b9   : > { %1291 = vst.msk [vmem:[#allocation4 + $0x198] sm:$0xff] %vm558_vm1, %v1246_v52  ;;  %6984 = vmatmul.mubr.msk.bf16.gmra.mrb[12].mxu1 %vm558_vm1, %v1319_v53  ;;  %7021 = vmatprep.subr.bf16.mxu1 %v1345_v54  ;;  %646 = vst.msk [vmem:[#allocation3 + $0x38] sm:$0xff] %vm558_vm1, %v606_v7 }
 0x1ba   : > { %6994 = vmatpush3.bf16.msra.mxu0 %v1339_v49 }
 0x1bb   : > { %7022 = vmatpush3.bf16.msra.mxu1 %v1345_v54  ;;  %7003 = vmatprep.subr.bf16.mxu0 %v8470_v55 }
 0x1bc   : > { %v854_v56 = vpop.permute.xlu1 %853  ;;  %v8482_v9 = vld [vmem:[#allocation3 + $0x20] sm:$0xff] }
 0x1bd   : > { %900 = vst.msk [vmem:[#allocation4 + $0x90] sm:$0xff] %vm558_vm1, %v854_v56 }
 0x1c0   : > { %v1049_v57 = vpop.permute.xlu1 %1048 }
 0x1c1   : > { %1095 = vst.msk [vmem:[#allocation4 + $0x110] sm:$0xff] %vm558_vm1, %v1049_v57 }
 0x1c4   : > { %v1244_v58 = vpop.permute.xlu1 %1243 }
 0x1c5   : > { %1290 = vst.msk [vmem:[#allocation4 + $0x190] sm:$0xff] %vm558_vm1, %v1244_v58 }
 0x1c8   : > { %v1346_v60 = vld [vmem:[#allocation4 + $0x110] sm:$0xff]  ;;  %v602_v62 = vpop.permute.xlu1 %601 }
 0x1c9   : > { %7023 = vmatprep.subr.bf16.mxu1 %v1346_v60  ;;  %644 = vst.msk [vmem:[#allocation3 + $0x28] sm:$0xff] %vm558_vm1, %v602_v62  ;;  %v1366_v62 = vld [vmem:[%s11767_s3 + $0x70] sm:$0xff] }
 0x1ca   : > { %7024 = vmatpush3.bf16.msra.mxu1 %v1346_v60 }
 0x1cb   : > { %7025 = vmatprep.subr.bf16.mxu1 %v1347_v61 }
 0x1cc   : > { %v793_v0 = vpop.permute.xlu1 %792 }
 0x1cd   : > { %837 = vst.msk [vmem:[#allocation3 + $0xa0] sm:$0xff] %vm558_vm1, %v793_v0 }
 0x1ce   : > { %7026 = vmatpush3.bf16.msra.mxu1 %v1347_v61  ;;  %v1356_v61 = vld [vmem:[%s11767_s3 + $0x20] sm:$0xff] }
 0x1cf   : > { %7487 = vmatprep.subr.msk.bf16.mxu1 %vm558_vm1, %v8482_v9 }
 0x1d0   : > { %v799_v2 = vpop.permute.xlu1 %798 }
 0x1d1   : > { %840 = vst.msk [vmem:[#allocation3 + $0xb8] sm:$0xff] %vm558_vm1, %v799_v2 }
 0x1d4   : > { %v604_v4 = vpop.permute.xlu1 %603 }
 0x1d5   : > { %645 = vst.msk [vmem:[#allocation3 + $0x30] sm:$0xff] %vm558_vm1, %v604_v4  ;;  %v1359_v4 = vld [vmem:[%s11767_s3 + $0x38] sm:$0xff] }
 0x1d8   : > { %v797_v5 = vpop.permute.xlu1 %796 }
 0x1d9   : > { %839 = vst.msk [vmem:[#allocation3 + $0xb0] sm:$0xff] %vm558_vm1, %v797_v5  ;;  %v1364_v5 = vld [vmem:[%s11767_s3 + $0x60] sm:$0xff] }
 0x260   : > { %v6933_v11 = vpop.f32.mrb[32].mxu0 }
 0x261   : > { %v8494_v12 = vadd.f32 %v6933_v11, %v1354_v10  ;;  %v1442_v13 = vpop.f32.mrb[33].mxu0 }
 0x262   : > { %v6934_v14 = vpop.f32.mrb[34].mxu0  ;;  %v8499_v16 = vadd.f32 %v1442_v13, %v1352_v51  ;;  %v1367_v13 = vld [vmem:[%s11767_s3 + $0x78] sm:$0xff] }
 0x263   : > { %v1445_v18 = vpop.f32.mrb[35].mxu0  ;;  %v1747_v19 = vsel %vm1740_vm2, %v8494_v12, -inf  ;;  %v8511_v28 = vadd.f32 %v6934_v14, %v1355_v21  ;;  %v1370_v21 = vld [vmem:[%s11767_s3 + $0x90] sm:$0xff] }
 0x264   : > { %v6949_v22 = vpop.f32.mrb[0].mxu1  ;;  %1748 = vmax.xlane.f32.xlu0 %v1747_v19  ;;  %v1741_v33 = vsel %vm1740_vm2, %v8499_v16, -inf  ;;  %v8539_v54 = vadd.f32 %v1445_v18, %v1353_v46  ;;  %v1357_v19 = vld [vmem:[%s11767_s3 + $0x28] sm:$0xff]  ;;  %v1376_v46 = vld [vmem:[%s11767_s3 + $0xc0] sm:$0xff] }
 0x265   : > { %v8509_v24 = vadd.f32 %v6949_v22, %v1362_v15  ;;  %v1531_v25 = vpop.f32.mrb[1].mxu1  ;;  %v1750_v45 = vsel %vm1740_vm2, %v8511_v28, -inf }
 0x266   : > { %v6950_v26 = vpop.f32.mrb[2].mxu1  ;;  %v8513_v29 = vadd.f32 %v1531_v25, %v1360_v23  ;;  %v1744_v2 = vsel %vm1740_vm2, %v8539_v54, -inf  ;;  %v1365_v25 = vld [vmem:[%s11767_s3 + $0x68] sm:$0xff] }
 0x267   : > { %v1534_v31 = vpop.f32.mrb[3].mxu1  ;;  %v1771_v32 = vsel %vm1740_vm2, %v8509_v24, -inf  ;;  %v8525_v41 = vadd.f32 %v6950_v26, %v1363_v34 }
 0x268   : > { %1772 = vmax.xlane.f32.xlu1 %v1771_v32  ;;  %v6937_v36 = vpop.f32.mrb[36].mxu0  ;;  %1742 = vmax.xlane.f32.xlu0 %v1741_v33  ;;  %v8527_v42 = vadd.f32 %v1534_v31, %v1361_v35  ;;  %v1765_v44 = vsel %vm1740_vm2, %v8513_v29, -inf  ;;  %v1368_v31 = vld [vmem:[%s11767_s3 + $0x80] sm:$0xff] }
 0x269   : > { %v1458_v38 = vpop.f32.mrb[37].mxu0  ;;  %v8541_v56 = vadd.f32 %v6937_v36, %v1358_v48  ;;  %v1774_v58 = vsel %vm1740_vm2, %v8525_v41, -inf }
 0x26a   : > { %v6938_v39 = vpop.f32.mrb[38].mxu0  ;;  %v1768_v60 = vsel %vm1740_vm2, %v8527_v42, -inf  ;;  %v8553_v0 = vadd.f32 %v1458_v38, %v1356_v61  ;;  %v1371_v61 = vld [vmem:[%s11767_s3 + $0x98] sm:$0xff] }
 0x26b   : > { %v1461_v43 = vpop.f32.mrb[39].mxu0  ;;  %v1759_v3 = vsel %vm1740_vm2, %v8541_v56, -inf  ;;  %v8567_v7 = vadd.f32 %v6938_v39, %v1359_v4 }
 0x26c   : > { %1766 = vmax.xlane.f32.xlu1 %v1765_v44  ;;  %v6953_v49 = vpop.f32.mrb[4].mxu1  ;;  %1751 = vmax.xlane.f32.xlu0 %v1750_v45  ;;  %v1753_v51 = vsel %vm1740_vm2, %v8553_v0, -inf  ;;  %v8590_v22 = vadd.f32 %v1461_v43, %v1357_v19  ;;  %v1378_v44 = vld [vmem:[%s11767_s3 + $0xd0] sm:$0xff] }
 0x26d   : > { %v1547_v52 = vpop.f32.mrb[5].mxu1  ;;  %v8555_v1 = vadd.f32 %v6953_v49, %v1366_v62  ;;  %v1762_v18 = vsel %vm1740_vm2, %v8567_v7, -inf }
 0x26e   : > { %v6954_v53 = vpop.f32.mrb[6].mxu1  ;;  %v8569_v10 = vadd.f32 %v1547_v52, %v1364_v5  ;;  %v1756_v43 = vsel %vm1740_vm2, %v8590_v22, -inf }
 0x26f   : > { %v1550_v57 = vpop.f32.mrb[7].mxu1  ;;  %v1783_v11 = vsel %vm1740_vm2, %v8555_v1, -inf  ;;  %v8578_v14 = vadd.f32 %v6954_v53, %v1367_v13  ;;  %v1379_v13 = vld [vmem:[%s11767_s3 + $0xd8] sm:$0xff] }
 0x270   : > { %1775 = vmax.xlane.f32.xlu1 %v1774_v58  ;;  %1769 = vmax.xlane.f32.xlu0 %v1768_v60  ;;  %v1777_v15 = vsel %vm1740_vm2, %v8569_v10, -inf  ;;  %v8602_v35 = vadd.f32 %v1550_v57, %v1365_v25 }
 0x271   : > { %v1786_v23 = vsel %vm1740_vm2, %v8578_v14, -inf }
 0x272   : > { %v1780_v60 = vsel %vm1740_vm2, %v8602_v35, -inf }
 0x274   : > { %1745 = vmax.xlane.f32.xlu1 %v1744_v2  ;;  %1760 = vmax.xlane.f32.xlu0 %v1759_v3 }
 0x278   : > { %1784 = vmax.xlane.f32.xlu1 %v1783_v11  ;;  %1754 = vmax.xlane.f32.xlu0 %v1753_v51 }
 0x27c   : > { %1778 = vmax.xlane.f32.xlu1 %v1777_v15  ;;  %1763 = vmax.xlane.f32.xlu0 %v1762_v18 }
 0x280   : > { %v6965_v26 = vpop.f32.mrb[40].mxu0  ;;  %1787 = vmax.xlane.f32.xlu0 %v1786_v23 }
 0x281   : > { %v8600_v32 = vadd.f32 %v6965_v26, %v1370_v21  ;;  %v1620_v33 = vpop.f32.mrb[41].mxu0  ;;  %v1369_v26 = vld [vmem:[%s11767_s3 + $0x88] sm:$0xff] }
 0x282   : > { %v6966_v34 = vpop.f32.mrb[42].mxu0  ;;  %v8604_v36 = vadd.f32 %v1620_v33, %v1368_v31 }
 0x283   : > { %v1623_v38 = vpop.f32.mrb[43].mxu0  ;;  %v1795_v39 = vsel %vm1740_vm2, %v8600_v32, -inf  ;;  %v8627_v4 = vadd.f32 %v6966_v34, %v1371_v61  ;;  %v1377_v34 = vld [vmem:[%s11767_s3 + $0xc8] sm:$0xff] }
 0x284   : > { %v6981_v45 = vpop.f32.mrb[8].mxu1  ;;  %1796 = vmax.xlane.f32.xlu1 %v1795_v39  ;;  %1757 = vmax.xlane.f32.xlu0 %v1756_v43  ;;  %v1789_v58 = vsel %vm1740_vm2, %v8604_v36, -inf  ;;  %v8643_v31 = vadd.f32 %v1623_v38, %v1369_v26  ;;  %v1382_v38 = vld [vmem:[%s11767_s3 + $0xf0] sm:$0xff]  ;;  %v1383_v26 = vld [vmem:[%s11767_s3 + $0xf8] sm:$0xff] }
 0x285   : > { %v1709_v48 = vpop.f32.mrb[9].mxu1  ;;  %v8616_v52 = vadd.f32 %v6981_v45, %v1378_v44  ;;  %v1798_v25 = vsel %vm1740_vm2, %v8627_v4, -inf }
 0x286   : > { %v6982_v49 = vpop.f32.mrb[10].mxu1  ;;  %v8618_v53 = vadd.f32 %v1709_v48, %v1376_v46  ;;  %v1792_v43 = vsel %vm1740_vm2, %v8643_v31, -inf  ;;  %v1380_v46 = vld [vmem:[%s11767_s3 + $0xe0] sm:$0xff] }
 0x287   : > { %v1712_v57 = vpop.f32.mrb[11].mxu1  ;;  %v1819_v51 = vsel %vm1740_vm2, %v8616_v52, -inf  ;;  %v8636_v21 = vadd.f32 %v6982_v49, %v1379_v13  ;;  %v1372_v13 = vld [vmem:[%s11767_s3 + $0xa0] sm:$0xff] }
 0x288   : > { %v6969_v62 = vpop.f32.mrb[44].mxu0  ;;  %1790 = vmax.xlane.f32.xlu1 %v1789_v58  ;;  %1781 = vmax.xlane.f32.xlu0 %v1780_v60  ;;  %v1813_v11 = vsel %vm1740_vm2, %v8618_v53, -inf  ;;  %v8650_v39 = vadd.f32 %v1712_v57, %v1377_v34  ;;  %v1373_v57 = vld [vmem:[%s11767_s3 + $0xa8] sm:$0xff] }
 0x289   : > { %v1636_v2 = vpop.f32.mrb[45].mxu0  ;;  %v1822_v33 = vsel %vm1740_vm2, %v8636_v21, -inf  ;;  %v1381_v34 = vld [vmem:[%s11767_s3 + $0xe8] sm:$0xff] }
 0x28a   : > { %v6970_v3 = vpop.f32.mrb[46].mxu0  ;;  %v1816_v44 = vsel %vm1740_vm2, %v8650_v39, -inf }
 0x28b   : > { %v1639_v5 = vpop.f32.mrb[47].mxu0 }
 0x28c   : > { %v6985_v15 = vpop.f32.mrb[12].mxu1  ;;  %1814 = vmax.xlane.f32.xlu1 %v1813_v11  ;;  %1820 = vmax.xlane.f32.xlu0 %v1819_v51  ;;  %v8675_v58 = vadd.f32 %v1639_v5, %v1373_v57  ;;  %v1374_v11 = vld [vmem:[%s11767_s3 + $0xb0] sm:$0xff]  ;;  %v8689_v5 = vadd.f32 %v1636_v2, %v1372_v13 }
 0x28d   : > { %v1725_v18 = vpop.f32.mrb[13].mxu1  ;;  %v8663_v45 = vadd.f32 %v6985_v15, %v1382_v38  ;;  %v8684_v51 = vadd.f32 %v6969_v62, %v1374_v11 }
 0x28e   : > { %v6986_v19 = vpop.f32.mrb[14].mxu1  ;;  %v8668_v48 = vadd.f32 %v1725_v18, %v1380_v46  ;;  %v1804_v61 = vsel %vm1740_vm2, %v8675_v58, -inf  ;;  %v1375_v18 = vld [vmem:[%s11767_s3 + $0xb8] sm:$0xff]  ;;  %v1801_v62 = vsel %vm1740_vm2, %v8689_v5, -inf }
 0x28f   : > { %v1728_v23 = vpop.f32.mrb[15].mxu1  ;;  %v1831_v49 = vsel %vm1740_vm2, %v8663_v45, -inf  ;;  %v1807_v15 = vsel %vm1740_vm2, %v8684_v51, -inf  ;;  %v8703_v2 = vadd.f32 %v6986_v19, %v1383_v26 }
 0x290   : > { %1799 = vmax.xlane.f32.xlu0 %v1798_v25  ;;  %v1825_v60 = vsel %vm1740_vm2, %v8668_v48, -inf  ;;  %v8696_v25 = vadd.f32 %v6970_v3, %v1375_v18  ;;  %v8712_v3 = vadd.f32 %v1728_v23, %v1381_v34 }
 0x292   : > { %v1828_v19 = vsel %vm1740_vm2, %v8712_v3, -inf }
 0x294   : > { %1823 = vmax.xlane.f32.xlu0 %v1822_v33  ;;  %v1810_v33 = vsel %vm1740_vm2, %v8696_v25, -inf }
 0x298   : > { %1793 = vmax.xlane.f32.xlu0 %v1792_v43  ;;  %v1834_v43 = vsel %vm1740_vm2, %v8703_v2, -inf }
 0x29c   : > { %1817 = vmax.xlane.f32.xlu0 %v1816_v44 }
 0x29d   : > { %727 = vrot.lane.b32.xlu1 %v8301_v20, %s8085_s12 }
 0x2b2   : > { %987 = vrot.lane.b32.xlu0 %v8301_v20, %s8086_s13 }
 0x2c1   : > { %1832 = vmax.xlane.f32.xlu1 %v1831_v49 }
 0x2c5   : > { %1826 = vmax.xlane.f32.xlu1 %v1825_v60 }
 0x2c9   : > { %1805 = vmax.xlane.f32.xlu1 %v1804_v61 }
 0x2d1   : > { %1808 = vmax.xlane.f32.xlu0 %v1807_v15 }
 0x2d5   : > { %1802 = vmax.xlane.f32.xlu0 %v1801_v62 }
 0x2d9   : > { %1811 = vmax.xlane.f32.xlu0 %v1810_v33 }
 0x2da   : > { %729 = vrot.lane.b32.xlu1 %v8298_v17, %s8085_s12 }
 0x2dd   : > { %1835 = vmax.xlane.f32.xlu0 %v1834_v43 }
 0x2de   : > { %1184 = vrot.lane.b32.xlu1 %v8298_v17, %s8087_s14 }
 0x2e1   : > { %1829 = vmax.xlane.f32.xlu0 %v1828_v19 }
 0x2e2   : > { %1186 = vrot.lane.b32.xlu1 %v8317_v30, %s8087_s14 }
 0x2e6   : > { %993 = vrot.lane.b32.xlu1 %v8314_v27, %s8086_s13 }
 0x2ea   : > { %1188 = vrot.lane.b32.xlu1 %v8314_v27, %s8087_s14 }
 0x2ee   : > { %924 = vrot.lane.b32.xlu1 %v8298_v17, %s8088_s15 }
 0x2f1   : > { %v1749_v23 = vpop.xlane.xlu0 %1748 }
 0x2f2   : > { %1119 = vrot.lane.b32.xlu1 %v8298_v17, %s8089_s16  ;;  %v1839_v13 = vsub.f32 %v8494_v12, %v1749_v23 }
 0x2f5   : > { %v8730_v44 = vpop.xlane.xlu1 %1772  ;;  %v1743_v38 = vpop.xlane.xlu0 %1742 }
 0x2f6   : > { %928 = vrot.lane.b32.xlu1 %v8314_v27, %s8088_s15  ;;  %v1837_v57 = vsub.f32 %v8499_v16, %v1743_v38  ;;  %v1873_v16 = vmul.f32 1.442695, %v1839_v13 }
 0x2f7   : > { %1182 = vrot.lane.b32.xlu0 %v8301_v20, %s8087_s14 }
 0x2f8   : > { %v1869_v15 = vmul.f32 1.442695, %v1837_v57 }
 0x2f9   : > { %v1767_v46 = vpop.xlane.xlu1 %1766  ;;  %v1752_v49 = vpop.xlane.xlu0 %1751 }
 0x2fa   : > { %1123 = vrot.lane.b32.xlu1 %v8314_v27, %s8089_s16  ;;  %v1840_v60 = vsub.f32 %v8511_v28, %v1752_v49  ;;  %7561 = vpow2.f32 %v1869_v15  ;;  %v1845_v15 = vsub.f32 %v8513_v29, %v1767_v46 }
 0x2fb   : > { %989 = vrot.lane.b32.xlu0 %v8298_v17, %s8086_s13 }
 0x2fc   : > { %v1875_v18 = vmul.f32 1.442695, %v1840_v60  ;;  %v1885_v46 = vmul.f32 1.442695, %v1845_v15 }
 0x2fd   : > { %v8742_v61 = vpop.xlane.xlu1 %1775  ;;  %v1770_v11 = vpop.xlane.xlu0 %1769 }
 0x2fe   : > { %663 = vrot.lane.b32.xlu1 %v8301_v20, %s8090_s17  ;;  %7563 = vpow2.f32 %v1875_v18  ;;  %v1846_v43 = vsub.f32 %v8527_v42, %v1770_v11 }
 0x2ff   : > { %991 = vrot.lane.b32.xlu0 %v8317_v30, %s8086_s13 }
 0x300   : > { %v1887_v42 = vmul.f32 1.442695, %v1846_v43  ;;  %v1848_v43 = vsub.f32 %v8525_v41, %v8742_v61  ;;  %v1342_v61 = vld [vmem:[#allocation4 + $0x90] sm:$0xff] }
 0x301   : > { %v1746_v62 = vpop.xlane.xlu1 %1745  ;;  %v1761_v26 = vpop.xlane.xlu0 %1760 }
 0x302   : > { %v1838_v33 = vsub.f32 %v8539_v54, %v1746_v62  ;;  %665 = vrot.lane.b32.xlu1 %v8298_v17, %s8090_s17 }
 0x303   : > { %731 = vrot.lane.b32.xlu0 %v8317_v30, %s8085_s12 }
 0x304   : > { %v1871_v28 = vmul.f32 1.442695, %v1838_v33  ;;  %v8768_v49 = vpop.eup %7561 }
 0x305   : > { %v1755_v12 = vpop.xlane.xlu0 %1754  ;;  %v8756_v34 = vpop.xlane.xlu1 %1784  ;;  %11873 = vst [vmem:[#allocation6_spill] sm:$0xff] %v8768_v49 }
 0x306   : > { %7565 = vpow2.f32 %v1871_v28  ;;  %859 = vrot.lane.b32.xlu1 %v8298_v17, %s8091_s18  ;;  %v1841_v19 = vsub.f32 %v8553_v0, %v1755_v12  ;;  %v1843_v0 = vsub.f32 %v8541_v56, %v1761_v26 }
 0x307   : > { %7567 = vpow2.f32 %v1873_v16  ;;  %733 = vrot.lane.b32.xlu0 %v8314_v27, %s8085_s12 }
 0x308   : > { %v8773_v60 = vpop.eup %7563  ;;  %v1877_v18 = vmul.f32 1.442695, %v1841_v19  ;;  %7569 = vpow2.f32 %v1887_v42  ;;  %v1881_v29 = vmul.f32 1.442695, %v1843_v0  ;;  %v1891_v0 = vmul.f32 1.442695, %v1848_v43 }
 0x309   : > { %v1764_v54 = vpop.xlane.xlu0 %1763  ;;  %v1779_v23 = vpop.xlane.xlu1 %1778  ;;  %11874 = vst [vmem:[#allocation7_spill] sm:$0xff] %v8773_v60 }
 0x30a   : > { %667 = vrot.lane.b32.xlu1 %v8317_v30, %s8090_s17  ;;  %v1844_v57 = vsub.f32 %v8567_v7, %v1764_v54  ;;  %7571 = vpow2.f32 %v1877_v18  ;;  %v1341_v54 = vld [vmem:[#allocation4 + $0x88] sm:$0xff]  ;;  %v1343_v18 = vld [vmem:[#allocation4 + $0x98] sm:$0xff] }
 0x30b   : > { %922 = vrot.lane.b32.xlu0 %v8301_v20, %s8088_s15 }
 0x30c   : > { %v1883_v28 = vmul.f32 1.442695, %v1844_v57  ;;  %v1849_v57 = vsub.f32 %v8569_v10, %v1779_v23 }
 0x30d   : > { %v8766_v38 = vpop.xlane.xlu0 %1787 }
 0x30e   : > { %669 = vrot.lane.b32.xlu1 %v8314_v27, %s8090_s17  ;;  %7573 = vpow2.f32 %v1883_v28 }
 0x30f   : > { %1117 = vrot.lane.b32.xlu0 %v8301_v20, %s8089_s16 }
 0x310   : > { %v8777_v13 = vpop.eup %7565 }
 0x311   : > { %11875 = vst [vmem:[#allocation8_spill] sm:$0xff] %v8777_v13  ;;  %v8780_v11 = vpop.eup %7567  ;;  %v8783_v62 = vpop.xlane.xlu1 %1796  ;;  %v2029_v33 = vpack.c.bf16 %v8777_v13, %v8768_v49 }
 0x312   : > { %11876 = vst [vmem:[#allocation9_spill] sm:$0xff] %v8780_v11  ;;  %v1758_v7 = vpop.xlane.xlu0 %1757  ;;  %v2030_v16 = vpack.c.bf16 %v8773_v60, %v8780_v11  ;;  %863 = vrot.lane.b32.xlu1 %v8314_v27, %s8091_s18  ;;  %v8813_v23 = vpop.eup %7569 }
 0x313   : > { %v1842_v12 = vsub.f32 %v8590_v22, %v1758_v7  ;;  %926 = vrot.lane.b32.xlu0 %v8317_v30, %s8088_s15  ;;  %6995 = vmatprep.mubr.msk.bf16.mxu0 %vm1740_vm2, %v2029_v33  ;;  %v1852_v7 = vsub.f32 %v8578_v14, %v8766_v38 }
 0x314   : > { %6996 = vmatmul.mubr.msk.bf16.vlgmr.msra.gmra.mrb[48].mxu0 %vm1740_vm2, %v2030_v16  ;;  %v8820_v33 = vpop.eup %7571  ;;  %v1851_v16 = vsub.f32 %v8555_v1, %v8756_v34 }
 0x315   : > { %v1879_v56 = vmul.f32 1.442695, %v1842_v12  ;;  %7004 = vmatpush3.bf16.msra.mxu0 %v8470_v55  ;;  %v1791_v26 = vpop.xlane.xlu1 %1790  ;;  %v1847_v55 = vsub.f32 %v8509_v24, %v8730_v44  ;;  %v1893_v24 = vmul.f32 1.442695, %v1849_v57  ;;  %11877 = vst [vmem:[#allocation10_spill] sm:$0xff] %v8820_v33 }
 0x316   : > { %v1782_v22 = vpop.xlane.xlu0 %1781  ;;  %7005 = vmatprep.subr.bf16.mxu0 %v1341_v54  ;;  %1052 = vrot.lane.b32.xlu1 %v8301_v20, %s8093_s20  ;;  %v1853_v14 = vsub.f32 %v8604_v36, %v1791_v26  ;;  %v1899_v1 = vmul.f32 1.442695, %v1852_v7  ;;  %v1897_v36 = vmul.f32 1.442695, %v1851_v16  ;;  %v1855_v26 = vsub.f32 %v8600_v32, %v8783_v62  ;;  %v1350_v16 = vld [vmem:[#allocation4 + $0x190] sm:$0xff] }
 0x317   : > { %7575 = vpow2.f32 %v1879_v56  ;;  %v1850_v19 = vsub.f32 %v8602_v35, %v1782_v22  ;;  %1121 = vrot.lane.b32.xlu0 %v8317_v30, %s8089_s16  ;;  %v1889_v15 = vmul.f32 1.442695, %v1847_v55 }
 0x318   : > { %7577 = vpow2.f32 %v1881_v29  ;;  %v8826_v28 = vpop.eup %7573 }
 0x319   : > { %7579 = vpow2.f32 %v1885_v46  ;;  %7006 = vmatpush3.bf16.msra.mxu0 %v1341_v54  ;;  %v1815_v41 = vpop.xlane.xlu1 %1814  ;;  %v1895_v35 = vmul.f32 1.442695, %v1850_v19  ;;  %11878 = vst [vmem:[#allocation11_spill] sm:$0xff] %v8826_v28  ;;  %v1901_v54 = vmul.f32 1.442695, %v1853_v14 }
 0x31a   : > { %v8807_v42 = vpop.xlane.xlu0 %1820  ;;  %7007 = vmatprep.subr.bf16.mxu0 %v1342_v61  ;;  %1054 = vrot.lane.b32.xlu1 %v8298_v17, %s8093_s20  ;;  %7581 = vpow2.f32 %v1891_v0  ;;  %v1861_v22 = vsub.f32 %v8618_v53, %v1815_v41  ;;  %v1905_v53 = vmul.f32 1.442695, %v1855_v26 }
 0x31b   : > { %857 = vrot.lane.b32.xlu0 %v8301_v20, %s8091_s18  ;;  %7583 = vpow2.f32 %v1895_v35  ;;  %v1863_v57 = vsub.f32 %v8616_v52, %v8807_v42 }
 0x31c   : > { %7585 = vpow2.f32 %v1889_v15 }
 0x31d   : > { %7008 = vmatpush3.bf16.msra.mxu0 %v1342_v61  ;;  %v728_v44 = vpop.permute.xlu1 %727  ;;  %7587 = vpow2.f32 %v1893_v24  ;;  %v1921_v52 = vmul.f32 1.442695, %v1863_v57  ;;  %v2521_v57 = vld [vmem:[#allocation3 + $0xa8] sm:$0xff] }
 0x31e   : > { %v1800_v10 = vpop.xlane.xlu0 %1799  ;;  %772 = vst.msk [vmem:[#allocation2 + $0xa0] sm:$0xff] %vm558_vm1, %v728_v44  ;;  %7009 = vmatprep.subr.bf16.mxu0 %v1343_v18  ;;  %1249 = vrot.lane.b32.xlu1 %v8298_v17, %s8092_s19  ;;  %v1348_v17 = vld [vmem:[#allocation4 + $0x180] sm:$0xff]  ;;  %7589 = vpow2.f32 %v1899_v1 }
 0x31f   : > { %861 = vrot.lane.b32.xlu0 %v8317_v30, %s8091_s18  ;;  %v1856_v12 = vsub.f32 %v8627_v4, %v1800_v10  ;;  %7591 = vpow2.f32 %v1897_v36  ;;  %v1351_v36 = vld [vmem:[#allocation4 + $0x198] sm:$0xff] }
 0x320   : > { %7593 = vpow2.f32 %v1901_v54 }
 0x321   : > { %v8829_v38 = vpop.eup %7575  ;;  %7010 = vmatpush3.bf16.msra.mxu0 %v1343_v18  ;;  %v1907_v19 = vmul.f32 1.442695, %v1856_v12 }
 0x322   : > { %11879 = vst [vmem:[#allocation12_spill] sm:$0xff] %v8829_v38  ;;  %v1824_v29 = vpop.xlane.xlu0 %1823  ;;  %v8832_v56 = vpop.eup %7577  ;;  %7035 = vmatprep.subr.bf16.mxu0 %v1348_v17  ;;  %1056 = vrot.lane.b32.xlu1 %v8317_v30, %s8093_s20  ;;  %v2031_v34 = vpack.c.bf16 %v8829_v38, %v8820_v33 }
 0x323   : > { %11880 = vst [vmem:[#allocation13_spill] sm:$0xff] %v8832_v56  ;;  %v8838_v46 = vpop.eup %7579  ;;  %1247 = vrot.lane.b32.xlu0 %v8301_v20, %s8092_s19  ;;  %v2032_v4 = vpack.c.bf16 %v8826_v28, %v8832_v56  ;;  %v1864_v55 = vsub.f32 %v8636_v21, %v1824_v29  ;;  %v1917_v21 = vmul.f32 1.442695, %v1861_v22  ;;  %7595 = vpow2.f32 %v1907_v19 }
 0x324   : > { %6999 = vmatprep.mubr.msk.bf16.mxu0 %vm1740_vm2, %v2031_v34  ;;  %v2033_v43 = vpack.c.bf16 %v8813_v23, %v8838_v46  ;;  %v8858_v62 = vpop.eup %7581  ;;  %v2593_v22 = vsel %vm558_vm1, %v8482_v9, 0 }
 0x325   : > { %7000 = vmatmul.mubr.msk.bf16.gmra.mrb[52].mxu0 %vm1740_vm2, %v2032_v4  ;;  %v8862_v61 = vpop.eup %7583 }
 0x326   : > { %v1794_v32 = vpop.xlane.xlu0 %1793  ;;  %7011 = vmatprep.mubr.msk.bf16.mxu0 %vm1740_vm2, %v2033_v43  ;;  %1251 = vrot.lane.b32.xlu1 %v8317_v30, %s8092_s19  ;;  %v8864_v35 = vpop.eup %7585 }
 0x327   : > { %v1854_v20 = vsub.f32 %v8643_v31, %v1794_v32  ;;  %1058 = vrot.lane.b32.xlu0 %v8314_v27, %s8093_s20  ;;  %v1923_v31 = vmul.f32 1.442695, %v1864_v55  ;;  %v8869_v15 = vpop.eup %7587  ;;  %v2034_v24 = vpack.c.bf16 %v8858_v62, %v8864_v35  ;;  %v2517_v55 = vld [vmem:[#allocation3 + $0x28] sm:$0xff]  ;;  %v2520_v32 = vld [vmem:[#allocation3 + $0xa0] sm:$0xff] }
 0x328   : > { %11881 = vst [vmem:[#allocation14_spill] sm:$0xff] %v8869_v15  ;;  %v2035_v44 = vpack.c.bf16 %v8862_v61, %v8869_v15  ;;  %v8882_v18 = vpop.eup %7589  ;;  %v2596_v9 = vsel %vm558_vm1, %v2517_v55, 0 }
 0x329   : > { %v1903_v41 = vmul.f32 1.442695, %v1854_v20  ;;  %11882 = vst [vmem:[#allocation15_spill] sm:$0xff] %v8882_v18  ;;  %v8886_v10 = vpop.eup %7591 }
 0x32a   : > { %v1818_v0 = vpop.xlane.xlu0 %1817  ;;  %1253 = vrot.lane.b32.xlu1 %v8314_v27, %s8092_s19  ;;  %v1349_v27 = vld [vmem:[#allocation4 + $0x188] sm:$0xff]  ;;  %11883 = vst [vmem:[#allocation16_spill] sm:$0xff] %v8886_v10  ;;  %v8888_v7 = vpop.eup %7593  ;;  %v2036_v12 = vpack.c.bf16 %v8882_v18, %v8886_v10 }
 0x32b   : > { %7597 = vpow2.f32 %v1903_v41  ;;  %v1862_v30 = vsub.f32 %v8650_v39, %v1818_v0  ;;  %607 = vrot.lane.b32.xlu0 %v8333_v40, %s8083_s10  ;;  %v2685_v0 = vsel %vm558_vm1, %v2521_v57, 0 }
 0x32c   : > { %7599 = vpow2.f32 %v1905_v53  ;;  %v2518_v53 = vld [vmem:[#allocation3 + $0x30] sm:$0xff] }
 0x32d   : > { %7601 = vpow2.f32 %v1917_v21  ;;  %v1919_v42 = vmul.f32 1.442695, %v1862_v30  ;;  %7012 = vmatmul.mubr.msk.bf16.vlgmr.msra.gmra.mrb[56].mxu0 %vm1740_vm2, %v2034_v24  ;;  %v8890_v14 = vpop.eup %7595  ;;  %v2682_v21 = vsel %vm558_vm1, %v2520_v32, 0  ;;  %v2599_v41 = vsel %vm558_vm1, %v2518_v53, 0  ;;  %v2522_v30 = vld [vmem:[#allocation3 + $0xb0] sm:$0xff] }
 0x32e   : > { %7603 = vpow2.f32 %v1923_v31  ;;  %v988_v39 = vpop.permute.xlu0 %987  ;;  %7036 = vmatpush3.bf16.msra.mxu0 %v1348_v17  ;;  %7015 = vmatprep.mubr.msk.bf16.mxu0 %vm1740_vm2, %v2035_v44  ;;  %v2519_v31 = vld [vmem:[#allocation3 + $0x38] sm:$0xff] }
 0x32f   : > { %7605 = vpow2.f32 %v1919_v42  ;;  %1032 = vst.msk [vmem:[#allocation3 + $0x120] sm:$0xff] %vm558_vm1, %v988_v39  ;;  %7037 = vmatprep.subr.bf16.mxu0 %v1349_v27  ;;  %800 = vrot.lane.b32.xlu1 %v8333_v40, %s8084_s11  ;;  %v2688_v42 = vsel %vm558_vm1, %v2522_v30, 0 }
 0x330   : > { %7607 = vpow2.f32 %v1921_v52  ;;  %802 = vrot.lane.b32.xlu0 %v8330_v37, %s8084_s11  ;;  %v2602_v52 = vsel %vm558_vm1, %v2519_v31, 0 }
 0x332   : > { %7038 = vmatpush3.bf16.msra.mxu0 %v1349_v27  ;;  %v2523_v27 = vld [vmem:[#allocation3 + $0xb8] sm:$0xff] }
 0x333   : > { %7039 = vmatprep.subr.bf16.mxu0 %v1350_v16  ;;  %609 = vrot.lane.b32.xlu1 %v8330_v37, %s8083_s10 }
 0x334   : > { %613 = vrot.lane.b32.xlu0 %v8346_v47, %s8083_s10 }
 0x335   : > { %v8896_v17 = vpop.eup %7597  ;;  %7016 = vmatmul.mubr.msk.bf16.gmra.mrb[60].mxu0 %vm1740_vm2, %v2036_v12  ;;  %v2691_v12 = vsel %vm558_vm1, %v2523_v27, 0 }
 0x336   : > { %v8900_v29 = vpop.eup %7599  ;;  %v2037_v1 = vpack.c.bf16 %v8896_v17, %v8888_v7  ;;  %7040 = vmatpush3.bf16.msra.mxu0 %v1350_v16  ;;  %v8943_v44 = vld [vmem:[#allocation3 + $0x120] sm:$0xff] }
 0x337   : > { %11884 = vst [vmem:[#allocation17_spill] sm:$0xff] %v8900_v29  ;;  %v8905_v34 = vpop.eup %7601  ;;  %v2038_v4 = vpack.c.bf16 %v8890_v14, %v8900_v29  ;;  %7041 = vmatprep.subr.bf16.mxu0 %v1351_v36  ;;  %611 = vrot.lane.b32.xlu1 %v8349_v50, %s8083_s10 }
 0x338   : > { %11885 = vst [vmem:[#allocation18_spill] sm:$0xff] %v8905_v34  ;;  %v8907_v26 = vpop.eup %7603  ;;  %7027 = vmatprep.mubr.msk.bf16.mxu1 %vm1740_vm2, %v2037_v1 }
 0x339   : > { %v8913_v54 = vpop.eup %7605  ;;  %7028 = vmatmul.mubr.msk.bf16.vlgmr.msra.gmra.mrb[16].mxu1 %vm1740_vm2, %v2038_v4 }
 0x33a   : > { %v2041_v43 = vpack.c.bf16 %v8913_v54, %v8905_v34  ;;  %v8921_v19 = vpop.eup %7607  ;;  %7042 = vmatpush3.bf16.msra.mxu0 %v1351_v36  ;;  %7052 = vmatpush3.bf16.xpose.msra.mxu1 %v2593_v22 }
 0x33b   : > { %11886 = vst [vmem:[#allocation19_spill] sm:$0xff] %v8921_v19  ;;  %v2042_v20 = vpack.c.bf16 %v8907_v26, %v8921_v19  ;;  %7488 = vmatprep.subr.msk.bf16.mxu1 %vm558_vm1, %v2517_v55  ;;  %7491 = vmatprep.subr.msk.bf16.mxu0 %vm558_vm1, %v2520_v32 }
 0x33c   : > { %804 = vrot.lane.b32.xlu1 %v8349_v50, %s8084_s11  ;;  %7043 = vmatprep.mubr.msk.bf16.mxu0 %vm1740_vm2, %v2041_v43 }
 0x33d   : > { %7044 = vmatmul.mubr.msk.bf16.vlgmr.msra.gmra.mrb[64].mxu0 %vm1740_vm2, %v2042_v20 }
 0x340   : > { %806 = vrot.lane.b32.xlu1 %v8346_v47, %s8084_s11 }
 0x342   : > { %7054 = vmatpush3.bf16.xpose.msra.mxu1 %v2596_v9 }
 0x343   : > { %7489 = vmatprep.subr.msk.bf16.mxu1 %vm558_vm1, %v2518_v53  ;;  %7068 = vmatpush3.bf16.xpose.msra.mxu0 %v2682_v21 }
 0x344   : > { %7492 = vmatprep.subr.msk.bf16.mxu0 %vm558_vm1, %v2521_v57 }
 0x34a   : > { %7056 = vmatpush3.bf16.xpose.msra.mxu1 %v2599_v41 }
 0x34b   : > { %7490 = vmatprep.subr.msk.bf16.mxu1 %vm558_vm1, %v2519_v31  ;;  %7070 = vmatpush3.bf16.xpose.msra.mxu0 %v2685_v0 }
 0x34c   : > { %7493 = vmatprep.subr.msk.bf16.mxu0 %vm558_vm1, %v2522_v30 }
 0x34e   : > { %v1833_v24 = vpop.xlane.xlu1 %1832 }
 0x352   : > { %7058 = vmatpush3.bf16.xpose.msra.mxu1 %v2602_v52  ;;  %v1827_v39 = vpop.xlane.xlu1 %1826  ;;  %v1867_v52 = vsub.f32 %v8663_v45, %v1833_v24 }
 0x353   : > { %7072 = vmatpush3.bf16.xpose.msra.mxu0 %v2688_v42  ;;  %7495 = vmatprep.subr.msk.bf16.mxu1 %vm558_vm1, %v8943_v44  ;;  %v1865_v31 = vsub.f32 %v8668_v48, %v1827_v39 }
 0x354   : > { %7494 = vmatprep.subr.msk.bf16.mxu0 %vm558_vm1, %v2523_v27  ;;  %v1929_v39 = vmul.f32 1.442695, %v1867_v52  ;;  %v2771_v52 = vsel %vm558_vm1, %v8943_v44, 0 }
 0x355   : > { %v1925_v42 = vmul.f32 1.442695, %v1865_v31 }
 0x356   : > { %v1806_v16 = vpop.xlane.xlu1 %1805 }
 0x357   : > { %v1858_v36 = vsub.f32 %v8675_v58, %v1806_v16 }
 0x359   : > { %v1911_v43 = vmul.f32 1.442695, %v1858_v36 }
 0x35a   : > { %v730_v1 = vpop.permute.xlu1 %729 }
 0x35b   : > { %7074 = vmatpush3.bf16.xpose.msra.mxu0 %v2691_v12  ;;  %773 = vst.msk [vmem:[#allocation2 + $0xa8] sm:$0xff] %vm558_vm1, %v730_v1  ;;  %7609 = vpow2.f32 %v1911_v43 }
 0x35e   : > { %v1185_v4 = vpop.permute.xlu1 %1184  ;;  %v1809_v22 = vpop.xlane.xlu0 %1808 }
 0x35f   : > { %1228 = vst.msk [vmem:[#allocation3 + $0x1a8] sm:$0xff] %vm558_vm1, %v1185_v4  ;;  %v1859_v55 = vsub.f32 %v8684_v51, %v1809_v22 }
 0x361   : > { %v1913_v21 = vmul.f32 1.442695, %v1859_v55 }
 0x362   : > { %v1187_v32 = vpop.permute.xlu1 %1186  ;;  %v1803_v20 = vpop.xlane.xlu0 %1802 }
 0x363   : > { %1229 = vst.msk [vmem:[#allocation3 + $0x1b0] sm:$0xff] %vm558_vm1, %v1187_v32  ;;  %v1857_v9 = vsub.f32 %v8689_v5, %v1803_v20  ;;  %v2500_v32 = vld [vmem:[#allocation2 + $0x20] sm:$0xff] }
 0x365   : > { %v1909_v53 = vmul.f32 1.442695, %v1857_v9  ;;  %v8963_v48 = vpop.eup %7609 }
 0x366   : > { %v994_v57 = vpop.permute.xlu1 %993  ;;  %v1812_v41 = vpop.xlane.xlu0 %1811  ;;  %11887 = vst [vmem:[#allocation20_spill] sm:$0xff] %v8963_v48 }
 0x367   : > { %7611 = vpow2.f32 %v1909_v53  ;;  %1035 = vst.msk [vmem:[#allocation3 + $0x138] sm:$0xff] %vm558_vm1, %v994_v57  ;;  %v1860_v58 = vsub.f32 %v8696_v25, %v1812_v41 }
 0x368   : > { %7613 = vpow2.f32 %v1913_v21 }
 0x369   : > { %v1915_v0 = vmul.f32 1.442695, %v1860_v58 }
 0x36a   : > { %v1189_v51 = vpop.permute.xlu1 %1188  ;;  %v1836_v30 = vpop.xlane.xlu0 %1835 }
 0x36b   : > { %7615 = vpow2.f32 %v1915_v0  ;;  %1230 = vst.msk [vmem:[#allocation3 + $0x1b8] sm:$0xff] %vm558_vm1, %v1189_v51  ;;  %v1868_v5 = vsub.f32 %v8703_v2, %v1836_v30  ;;  %v2501_v30 = vld [vmem:[#allocation2 + $0x28] sm:$0xff] }
 0x36c   : > { %7617 = vpow2.f32 %v1925_v42  ;;  %v2502_v42 = vld [vmem:[#allocation2 + $0x30] sm:$0xff] }
 0x36d   : > { %v1931_v27 = vmul.f32 1.442695, %v1868_v5 }
 0x36e   : > { %v925_v16 = vpop.permute.xlu1 %924  ;;  %v1830_v12 = vpop.xlane.xlu0 %1829 }
 0x36f   : > { %968 = vst.msk [vmem:[#allocation2 + $0x128] sm:$0xff] %vm558_vm1, %v925_v16  ;;  %v1866_v25 = vsub.f32 %v8712_v3, %v1830_v12  ;;  %7619 = vpow2.f32 %v1931_v27  ;;  %v2504_v12 = vld [vmem:[#allocation2 + $0xa0] sm:$0xff] }
 0x371   : > { %v8965_v1 = vpop.eup %7611  ;;  %v1927_v36 = vmul.f32 1.442695, %v1866_v25 }
 0x372   : > { %11888 = vst [vmem:[#allocation21_spill] sm:$0xff] %v8965_v1  ;;  %v1120_v4 = vpop.permute.xlu1 %1119  ;;  %v1183_v2 = vpop.permute.xlu0 %1182  ;;  %v2039_v45 = vpack.c.bf16 %v8963_v48, %v8965_v1 }
 0x373   : > { %7621 = vpow2.f32 %v1927_v36  ;;  %1163 = vst.msk [vmem:[#allocation2 + $0x1a8] sm:$0xff] %vm558_vm1, %v1120_v4  ;;  %1227 = vst.msk [vmem:[#allocation3 + $0x1a0] sm:$0xff] %vm558_vm1, %v1183_v2  ;;  %v8971_v24 = vpop.eup %7613  ;;  %v2503_v36 = vld [vmem:[#allocation2 + $0x38] sm:$0xff]  ;;  %v2505_v2 = vld [vmem:[#allocation2 + $0xa8] sm:$0xff] }
 0x374   : > { %11889 = vst [vmem:[#allocation22_spill] sm:$0xff] %v8971_v24  ;;  %7623 = vpow2.f32 %v1929_v39  ;;  %7031 = vmatprep.mubr.msk.bf16.mxu1 %vm1740_vm2, %v2039_v45 }
 0x375   : > { %v8974_v3 = vpop.eup %7615 }
 0x376   : > { %11890 = vst [vmem:[#allocation23_spill] sm:$0xff] %v8974_v3  ;;  %v929_v22 = vpop.permute.xlu1 %928  ;;  %v990_v43 = vpop.permute.xlu0 %989  ;;  %v2040_v55 = vpack.c.bf16 %v8974_v3, %v8971_v24 }
 0x377   : > { %970 = vst.msk [vmem:[#allocation2 + $0x138] sm:$0xff] %vm558_vm1, %v929_v22  ;;  %1033 = vst.msk [vmem:[#allocation3 + $0x128] sm:$0xff] %vm558_vm1, %v990_v43  ;;  %v8982_v21 = vpop.eup %7617 }
 0x378   : > { %7032 = vmatmul.mubr.msk.bf16.gmra.mrb[20].mxu1 %vm1740_vm2, %v2040_v55  ;;  %11891 = vst [vmem:[#allocation24_spill] sm:$0xff] %v8982_v21 }
 0x379   : > { %7059 = vmatprep.mubr.msk.bf16.mxu1 %vm558_vm1, %v2500_v32  ;;  %v8987_v57 = vpop.eup %7619  ;;  %v2529_v32 = vld [vmem:[#allocation3 + $0x1a8] sm:$0xff] }
 0x37a   : > { %v1124_v20 = vpop.permute.xlu1 %1123  ;;  %v992_v9 = vpop.permute.xlu0 %991  ;;  %v2528_v53 = vld [vmem:[#allocation3 + $0x1a0] sm:$0xff]  ;;  %11892 = vst [vmem:[#allocation25_spill] sm:$0xff] %v8987_v57 }
 0x37b   : > { %1165 = vst.msk [vmem:[#allocation2 + $0x1b8] sm:$0xff] %vm558_vm1, %v1124_v20  ;;  %1034 = vst.msk [vmem:[#allocation3 + $0x130] sm:$0xff] %vm558_vm1, %v992_v9  ;;  %7499 = vmatprep.subr.msk.bf16.mxu0 %vm558_vm1, %v2528_v53  ;;  %v2860_v22 = vsel %vm558_vm1, %v2528_v53, 0 }
 0x37d   : > { %v8989_v41 = vpop.eup %7621 }
 0x37e   : > { %11893 = vst [vmem:[#allocation26_spill] sm:$0xff] %v8989_v41  ;;  %v8991_v58 = vpop.eup %7623  ;;  %v664_v31 = vpop.permute.xlu1 %663  ;;  %v2043_v51 = vpack.c.bf16 %v8989_v41, %v8982_v21  ;;  %v2525_v27 = vld [vmem:[#allocation3 + $0x128] sm:$0xff] }
 0x37f   : > { %11894 = vst [vmem:[#allocation27_spill] sm:$0xff] %v8991_v58  ;;  %v732_v0 = vpop.permute.xlu0 %731  ;;  %707 = vst.msk [vmem:[#allocation4 + $0x20] sm:$0xff] %vm558_vm1, %v664_v31  ;;  %v2044_v5 = vpack.c.bf16 %v8987_v57, %v8991_v58  ;;  %v2774_v4 = vsel %vm558_vm1, %v2525_v27, 0 }
 0x380   : > { %774 = vst.msk [vmem:[#allocation2 + $0xb0] sm:$0xff] %vm558_vm1, %v732_v0  ;;  %7047 = vmatprep.mubr.msk.bf16.mxu0 %vm1740_vm2, %v2043_v51  ;;  %7060 = vmatmul.mubr.msk.bf16.vlgmr.msra.gmra.mrb[24].mxu1 %vm558_vm1, %v2501_v30  ;;  %v2527_v30 = vld [vmem:[#allocation3 + $0x138] sm:$0xff] }
 0x381   : > { %7084 = vmatpush3.bf16.xpose.msra.mxu1 %v2771_v52  ;;  %7048 = vmatmul.mubr.msk.bf16.gmra.mrb[68].mxu0 %vm1740_vm2, %v2044_v5  ;;  %v2863_v5 = vsel %vm558_vm1, %v2529_v32, 0 }
 0x382   : > { %7063 = vmatprep.mubr.msk.bf16.mxu1 %vm558_vm1, %v2502_v42  ;;  %7496 = vmatprep.subr.msk.bf16.mxu1 %vm558_vm1, %v2525_v27  ;;  %v666_v16 = vpop.permute.xlu1 %665  ;;  %v2526_v45 = vld [vmem:[#allocation3 + $0x130] sm:$0xff] }
 0x383   : > { %v734_v25 = vpop.permute.xlu0 %733  ;;  %708 = vst.msk [vmem:[#allocation4 + $0x28] sm:$0xff] %vm558_vm1, %v666_v16  ;;  %7075 = vmatprep.mubr.msk.bf16.mxu0 %vm558_vm1, %v2504_v12  ;;  %v2777_v53 = vsel %vm558_vm1, %v2526_v45, 0  ;;  %v2530_v42 = vld [vmem:[#allocation3 + $0x1b0] sm:$0xff] }
 0x384   : > { %775 = vst.msk [vmem:[#allocation2 + $0xb8] sm:$0xff] %vm558_vm1, %v734_v25 }
 0x386   : > { %v860_v39 = vpop.permute.xlu1 %859 }
 0x387   : > { %v923_v44 = vpop.permute.xlu0 %922  ;;  %903 = vst.msk [vmem:[#allocation4 + $0xa8] sm:$0xff] %vm558_vm1, %v860_v39  ;;  %v2506_v55 = vld [vmem:[#allocation2 + $0xb0] sm:$0xff]  ;;  %v2780_v39 = vsel %vm558_vm1, %v2527_v30, 0 }
 0x388   : > { %967 = vst.msk [vmem:[#allocation2 + $0x120] sm:$0xff] %vm558_vm1, %v923_v44  ;;  %7064 = vmatmul.mubr.msk.bf16.gmra.mrb[28].mxu1 %vm558_vm1, %v2503_v36  ;;  %v2866_v44 = vsel %vm558_vm1, %v2530_v42, 0  ;;  %v2532_v36 = vld [vmem:[#allocation4 + $0x20] sm:$0xff] }
 0x389   : > { %7086 = vmatpush3.bf16.xpose.msra.mxu1 %v2774_v4  ;;  %7076 = vmatmul.mubr.msk.bf16.vlgmr.msra.gmra.mrb[72].mxu0 %vm558_vm1, %v2505_v2  ;;  %v2531_v2 = vld [vmem:[#allocation3 + $0x1b8] sm:$0xff] }
 0x38a   : > { %7497 = vmatprep.subr.msk.bf16.mxu1 %vm558_vm1, %v2526_v45  ;;  %7100 = vmatpush3.bf16.xpose.msra.mxu0 %v2860_v22  ;;  %v668_v43 = vpop.permute.xlu1 %667 }
 0x38b   : > { %v1118_v20 = vpop.permute.xlu0 %1117  ;;  %709 = vst.msk [vmem:[#allocation4 + $0x30] sm:$0xff] %vm558_vm1, %v668_v43  ;;  %7079 = vmatprep.mubr.msk.bf16.mxu0 %vm558_vm1, %v2506_v55  ;;  %7500 = vmatprep.subr.msk.bf16.mxu0 %vm558_vm1, %v2529_v32  ;;  %v2507_v51 = vld [vmem:[#allocation2 + $0xb8] sm:$0xff]  ;;  %v2509_v55 = vld [vmem:[#allocation2 + $0x128] sm:$0xff] }
 0x38c   : > { %1162 = vst.msk [vmem:[#allocation2 + $0x1a0] sm:$0xff] %vm558_vm1, %v1118_v20  ;;  %v2869_v20 = vsel %vm558_vm1, %v2531_v2, 0 }
 0x38e   : > { %v670_v9 = vpop.permute.xlu1 %669 }
 0x38f   : > { %v927_v31 = vpop.permute.xlu0 %926  ;;  %v2508_v0 = vld [vmem:[#allocation2 + $0x120] sm:$0xff]  ;;  %710 = vst.msk [vmem:[#allocation4 + $0x38] sm:$0xff] %vm558_vm1, %v670_v9  ;;  %v2533_v9 = vld [vmem:[#allocation4 + $0x28] sm:$0xff] }
 0x390   : > { %969 = vst.msk [vmem:[#allocation2 + $0x130] sm:$0xff] %vm558_vm1, %v927_v31  ;;  %7091 = vmatprep.mubr.msk.bf16.mxu1 %vm558_vm1, %v2508_v0 }
 0x391   : > { %7088 = vmatpush3.bf16.xpose.msra.mxu1 %v2777_v53  ;;  %7080 = vmatmul.mubr.msk.bf16.gmra.mrb[76].mxu0 %vm558_vm1, %v2507_v51 }
 0x392   : > { %7498 = vmatprep.subr.msk.bf16.mxu1 %vm558_vm1, %v2527_v30  ;;  %7102 = vmatpush3.bf16.xpose.msra.mxu0 %v2863_v5  ;;  %v864_v52 = vpop.permute.xlu1 %863  ;;  %v2534_v51 = vld [vmem:[#allocation4 + $0x30] sm:$0xff] }
 0x393   : > { %v1122_v27 = vpop.permute.xlu0 %1121  ;;  %v2512_v16 = vld [vmem:[#allocation2 + $0x1a0] sm:$0xff]  ;;  %905 = vst.msk [vmem:[#allocation4 + $0xb8] sm:$0xff] %vm558_vm1, %v864_v52  ;;  %7501 = vmatprep.subr.msk.bf16.mxu0 %vm558_vm1, %v2530_v42  ;;  %v2511_v52 = vld [vmem:[#allocation2 + $0x138] sm:$0xff]  ;;  %v2513_v42 = vld [vmem:[#allocation2 + $0x1a8] sm:$0xff] }
 0x394   : > { %1164 = vst.msk [vmem:[#allocation2 + $0x1b0] sm:$0xff] %vm558_vm1, %v1122_v27  ;;  %7107 = vmatprep.mubr.msk.bf16.mxu0 %vm558_vm1, %v2512_v16 }
 0x396   : > { %v1053_v12 = vpop.permute.xlu1 %1052  ;;  %v2535_v16 = vld [vmem:[#allocation4 + $0x38] sm:$0xff] }
 0x397   : > { %v858_v25 = vpop.permute.xlu0 %857  ;;  %1097 = vst.msk [vmem:[#allocation4 + $0x120] sm:$0xff] %vm558_vm1, %v1053_v12  ;;  %v2510_v32 = vld [vmem:[#allocation2 + $0x130] sm:$0xff] }
 0x398   : > { %902 = vst.msk [vmem:[#allocation4 + $0xa0] sm:$0xff] %vm558_vm1, %v858_v25 }
 0x399   : > { %7090 = vmatpush3.bf16.xpose.msra.mxu1 %v2780_v39  ;;  %v2537_v39 = vld [vmem:[#allocation4 + $0xa8] sm:$0xff] }
 0x39a   : > { %7104 = vmatpush3.bf16.xpose.msra.mxu0 %v2866_v44  ;;  %7115 = vmatprep.subr.bf16.mxu1 %v2532_v36  ;;  %v1055_v4 = vpop.permute.xlu1 %1054 }
 0x39b   : > { %v862_v45 = vpop.permute.xlu0 %861  ;;  %1098 = vst.msk [vmem:[#allocation4 + $0x128] sm:$0xff] %vm558_vm1, %v1055_v4  ;;  %7502 = vmatprep.subr.msk.bf16.mxu0 %vm558_vm1, %v2531_v2  ;;  %v2514_v27 = vld [vmem:[#allocation2 + $0x1b0] sm:$0xff] }
 0x39c   : > { %904 = vst.msk [vmem:[#allocation4 + $0xb0] sm:$0xff] %vm558_vm1, %v862_v45  ;;  %v2515_v45 = vld [vmem:[#allocation2 + $0x1b8] sm:$0xff] }
 0x39e   : > { %v1250_v22 = vpop.permute.xlu1 %1249  ;;  %v9052_v44 = vld [vmem:[#allocation4 + $0x120] sm:$0xff] }
 0x39f   : > { %v1248_v43 = vpop.permute.xlu0 %1247  ;;  %1293 = vst.msk [vmem:[#allocation4 + $0x1a8] sm:$0xff] %vm558_vm1, %v1250_v22  ;;  %v2536_v0 = vld [vmem:[#allocation4 + $0xa0] sm:$0xff] }
 0x3a0   : > { %1292 = vst.msk [vmem:[#allocation4 + $0x1a0] sm:$0xff] %vm558_vm1, %v1248_v43  ;;  %7092 = vmatmul.mubr.msk.bf16.vlgmr.msra.gmra.mrb[32].mxu1 %vm558_vm1, %v2509_v55  ;;  %v2539_v43 = vld [vmem:[#allocation4 + $0xb8] sm:$0xff] }
 0x3a1   : > { %7095 = vmatprep.mubr.msk.bf16.mxu1 %vm558_vm1, %v2510_v32  ;;  %7116 = vmatpush3.bf16.msra.mxu1 %v2532_v36 }
 0x3a2   : > { %7106 = vmatpush3.bf16.xpose.msra.mxu0 %v2869_v20  ;;  %7117 = vmatprep.subr.bf16.mxu1 %v2533_v9  ;;  %v1057_v31 = vpop.permute.xlu1 %1056 }
 0x3a3   : > { %v1059_v53 = vpop.permute.xlu0 %1058  ;;  %1099 = vst.msk [vmem:[#allocation4 + $0x130] sm:$0xff] %vm558_vm1, %v1057_v31  ;;  %7131 = vmatprep.subr.bf16.mxu0 %v2536_v0  ;;  %v2538_v2 = vld [vmem:[#allocation4 + $0xb0] sm:$0xff] }
 0x3a4   : > { %1100 = vst.msk [vmem:[#allocation4 + $0x138] sm:$0xff] %vm558_vm1, %v1059_v53 }
 0x3a5   : > { %7118 = vmatpush3.bf16.msra.mxu1 %v2533_v9 }
 0x3a6   : > { %7119 = vmatprep.subr.bf16.mxu1 %v2534_v51  ;;  %v1252_v30 = vpop.permute.xlu1 %1251 }
 0x3a7   : > { %v608_v5 = vpop.permute.xlu0 %607  ;;  %1294 = vst.msk [vmem:[#allocation4 + $0x1b0] sm:$0xff] %vm558_vm1, %v1252_v30  ;;  %v9060_v32 = vld [vmem:[#allocation4 + $0x1a0] sm:$0xff] }
 0x3a8   : > { %647 = vst.msk [vmem:[#allocation3 + $0x40] sm:$0xff] %vm558_vm1, %v608_v5  ;;  %7096 = vmatmul.mubr.msk.bf16.gmra.mrb[36].mxu1 %vm558_vm1, %v2511_v52 }
 0x3a9   : > { %7108 = vmatmul.mubr.msk.bf16.vlgmr.msra.gmra.mrb[80].mxu0 %vm558_vm1, %v2513_v42  ;;  %7120 = vmatpush3.bf16.msra.mxu1 %v2534_v51 }
 0x3aa   : > { %7111 = vmatprep.mubr.msk.bf16.mxu0 %vm558_vm1, %v2514_v27  ;;  %7121 = vmatprep.subr.bf16.mxu1 %v2535_v16  ;;  %v1254_v12 = vpop.permute.xlu1 %1253 }
 0x3ab   : > { %v803_v25 = vpop.permute.xlu0 %802  ;;  %7132 = vmatpush3.bf16.msra.mxu0 %v2536_v0  ;;  %1295 = vst.msk [vmem:[#allocation4 + $0x1b8] sm:$0xff] %vm558_vm1, %v1254_v12 }
 0x3ac   : > { %842 = vst.msk [vmem:[#allocation3 + $0xc8] sm:$0xff] %vm558_vm1, %v803_v25  ;;  %7133 = vmatprep.subr.bf16.mxu0 %v2537_v39 }
 0x3ad   : > { %7122 = vmatpush3.bf16.msra.mxu1 %v2535_v16 }
 0x3ae   : > { %7147 = vmatprep.subr.bf16.mxu1 %v9052_v44  ;;  %v801_v36 = vpop.permute.xlu1 %800 }
 0x3af   : > { %v614_v4 = vpop.permute.xlu0 %613  ;;  %7134 = vmatpush3.bf16.msra.mxu0 %v2537_v39  ;;  %841 = vst.msk [vmem:[#allocation3 + $0xc0] sm:$0xff] %vm558_vm1, %v801_v36 }
 0x3b0   : > { %650 = vst.msk [vmem:[#allocation3 + $0x58] sm:$0xff] %vm558_vm1, %v614_v4  ;;  %7135 = vmatprep.subr.bf16.mxu0 %v2538_v2 }
 0x3b1   : > { %7112 = vmatmul.mubr.msk.bf16.gmra.mrb[84].mxu0 %vm558_vm1, %v2515_v45 }
 0x3b2   : > { %v610_v22 = vpop.permute.xlu1 %609 }
 0x3b3   : > { %7136 = vmatpush3.bf16.msra.mxu0 %v2538_v2  ;;  %648 = vst.msk [vmem:[#allocation3 + $0x48] sm:$0xff] %vm558_vm1, %v610_v22 }
 0x3b4   : > { %7137 = vmatprep.subr.bf16.mxu0 %v2539_v43 }
 0x3b6   : > { %v612_v55 = vpop.permute.xlu1 %611 }
 0x3b7   : > { %7138 = vmatpush3.bf16.msra.mxu0 %v2539_v43  ;;  %649 = vst.msk [vmem:[#allocation3 + $0x50] sm:$0xff] %vm558_vm1, %v612_v55 }
 0x3b8   : > { %7163 = vmatprep.subr.bf16.mxu0 %v9060_v32 }
 0x3ba   : > { %v805_v20 = vpop.permute.xlu1 %804 }
 0x3bb   : > { %843 = vst.msk [vmem:[#allocation3 + $0xd0] sm:$0xff] %vm558_vm1, %v805_v20 }
 0x3be   : > { %v807_v9 = vpop.permute.xlu1 %806 }
 0x3bf   : > { %844 = vst.msk [vmem:[#allocation3 + $0xd8] sm:$0xff] %vm558_vm1, %v807_v9 }
 0x3e7   : > { %v9065_v31 = vpop.f32.mrb[48].mxu0 }
 0x3e8   : > { %11895 = vst [vmem:[#allocation28_spill] sm:$0xff] %v9065_v31  ;;  %v9067_v0 = vpop.f32.mrb[49].mxu0 }
 0x3e9   : > { %11896 = vst [vmem:[#allocation29_spill] sm:$0xff] %v9067_v0  ;;  %v9069_v53 = vpop.f32.mrb[50].mxu0 }
 0x3ea   : > { %11897 = vst [vmem:[#allocation30_spill] sm:$0xff] %v9069_v53  ;;  %v9071_v51 = vpop.f32.mrb[51].mxu0 }
 0x3eb   : > { %11898 = vst [vmem:[#allocation31_spill] sm:$0xff] %v9071_v51  ;;  %v2550_v51 = vld [vmem:[%s11767_s3 + $0x10] sm:$0xff] }
 0x3f8   : > { %v9073_v30 = vpop.f32.mrb[52].mxu0 }
 0x3f9   : > { %11899 = vst [vmem:[#allocation32_spill] sm:$0xff] %v9073_v30  ;;  %v9075_v5 = vpop.f32.mrb[53].mxu0 }
 0x3fa   : > { %11900 = vst [vmem:[#allocation33_spill] sm:$0xff] %v9075_v5  ;;  %v9077_v52 = vpop.f32.mrb[54].mxu0 }
 0x3fb   : > { %11901 = vst [vmem:[#allocation34_spill] sm:$0xff] %v9077_v52  ;;  %v9079_v42 = vpop.f32.mrb[55].mxu0 }
 0x3fc   : > { %11902 = vst [vmem:[#allocation35_spill] sm:$0xff] %v9079_v42 }
 0x400   : > { %v9081_v27 = vpop.f32.mrb[56].mxu0 }
 0x401   : > { %11903 = vst [vmem:[#allocation36_spill] sm:$0xff] %v9081_v27  ;;  %v9083_v16 = vpop.f32.mrb[57].mxu0  ;;  %v2557_v27 = vld [vmem:[%s11767_s3 + $0x48] sm:$0xff] }
 0x402   : > { %11904 = vst [vmem:[#allocation37_spill] sm:$0xff] %v9083_v16  ;;  %v9085_v12 = vpop.f32.mrb[58].mxu0 }
 0x403   : > { %11905 = vst [vmem:[#allocation38_spill] sm:$0xff] %v9085_v12  ;;  %v9087_v25 = vpop.f32.mrb[59].mxu0 }
 0x404   : > { %11906 = vst [vmem:[#allocation39_spill] sm:$0xff] %v9087_v25 }
 0x408   : > { %v9089_v39 = vpop.f32.mrb[60].mxu0 }
 0x409   : > { %11907 = vst [vmem:[#allocation40_spill] sm:$0xff] %v9089_v39  ;;  %v9091_v36 = vpop.f32.mrb[61].mxu0 }
 0x40a   : > { %11908 = vst [vmem:[#allocation41_spill] sm:$0xff] %v9091_v36  ;;  %v9093_v4 = vpop.f32.mrb[62].mxu0 }
 0x40b   : > { %11909 = vst [vmem:[#allocation42_spill] sm:$0xff] %v9093_v4  ;;  %v9095_v2 = vpop.f32.mrb[63].mxu0  ;;  %v2548_v4 = vld [vmem:[%s11767_s3] sm:$0xff] }
 0x40c   : > { %11910 = vst [vmem:[#allocation43_spill] sm:$0xff] %v9095_v2  ;;  %v9097_v45 = vpop.f32.mrb[16].mxu1 }
 0x40d   : > { %11911 = vst [vmem:[#allocation44_spill] sm:$0xff] %v9097_v45  ;;  %v9099_v22 = vpop.f32.mrb[17].mxu1 }
 0x40e   : > { %11912 = vst [vmem:[#allocation45_spill] sm:$0xff] %v9099_v22  ;;  %v9101_v43 = vpop.f32.mrb[18].mxu1 }
 0x40f   : > { %11913 = vst [vmem:[#allocation46_spill] sm:$0xff] %v9101_v43  ;;  %v9103_v55 = vpop.f32.mrb[19].mxu1 }
 0x410   : > { %11914 = vst [vmem:[#allocation47_spill] sm:$0xff] %v9103_v55  ;;  %v9105_v20 = vpop.f32.mrb[64].mxu0 }
 0x411   : > { %11915 = vst [vmem:[#allocation48_spill] sm:$0xff] %v9105_v20  ;;  %v9107_v9 = vpop.f32.mrb[65].mxu0 }
 0x412   : > { %11916 = vst [vmem:[#allocation49_spill] sm:$0xff] %v9107_v9  ;;  %v9109_v52 = vpop.f32.mrb[66].mxu0 }
 0x413   : > { %11917 = vst [vmem:[#allocation50_spill] sm:$0xff] %v9109_v52  ;;  %v9111_v30 = vpop.f32.mrb[67].mxu0 }
 0x414   : > { %11918 = vst [vmem:[#allocation51_spill] sm:$0xff] %v9111_v30 }
 0x44b   : > { %v9113_v5 = vpop.f32.mrb[20].mxu1 }
 0x44c   : > { %11919 = vst [vmem:[#allocation52_spill] sm:$0xff] %v9113_v5  ;;  %v9115_v42 = vpop.f32.mrb[21].mxu1 }
 0x44d   : > { %11920 = vst [vmem:[#allocation53_spill] sm:$0xff] %v9115_v42  ;;  %v9117_v31 = vpop.f32.mrb[22].mxu1 }
 0x44e   : > { %11921 = vst [vmem:[#allocation54_spill] sm:$0xff] %v9117_v31  ;;  %v9119_v53 = vpop.f32.mrb[23].mxu1  ;;  %v2549_v31 = vld [vmem:[%s11767_s3 + $0x8] sm:$0xff] }
 0x44f   : > { %11922 = vst [vmem:[#allocation55_spill] sm:$0xff] %v9119_v53 }
 0x453   : > { %v7061_v0 = vpop.f32.mrb[24].mxu1 }
 0x454   : > { %v9127_v39 = vadd.f32 %v7061_v0, %v2550_v51  ;;  %v9129_v2 = vpop.f32.mrb[68].mxu0  ;;  %v2638_v5 = vpop.f32.mrb[25].mxu1  ;;  %v2551_v0 = vld [vmem:[%s11767_s3 + $0x18] sm:$0xff] }
 0x455   : > { %11923 = vst [vmem:[#allocation56_spill] sm:$0xff] %v9129_v2  ;;  %v9134_v42 = vpop.f32.mrb[69].mxu0  ;;  %v7062_v53 = vpop.f32.mrb[26].mxu1  ;;  %v9136_v36 = vadd.f32 %v2638_v5, %v2548_v4 }
 0x456   : > { %11924 = vst [vmem:[#allocation57_spill] sm:$0xff] %v9134_v42  ;;  %v9138_v52 = vpop.f32.mrb[70].mxu0  ;;  %v2641_v20 = vpop.f32.mrb[27].mxu1  ;;  %v2942_v30 = vsel %vm1740_vm2, %v9127_v39, -inf  ;;  %v9151_v5 = vadd.f32 %v7062_v53, %v2551_v0  ;;  %v2559_v53 = vld [vmem:[%s11767_s3 + $0x58] sm:$0xff] }
 0x457   : > { %11925 = vst [vmem:[#allocation58_spill] sm:$0xff] %v9138_v52  ;;  %v9145_v51 = vadd.f32 %v2641_v20, %v2549_v31  ;;  %2943 = vmax.xlane.f32.xlu0 %v2942_v30  ;;  %v9147_v2 = vpop.f32.mrb[71].mxu0  ;;  %v2936_v4 = vsel %vm1740_vm2, %v9136_v36, -inf  ;;  %v2558_v52 = vld [vmem:[%s11767_s3 + $0x50] sm:$0xff]  ;;  %v2556_v30 = vld [vmem:[%s11767_s3 + $0x40] sm:$0xff] }
 0x458   : > { %11926 = vst [vmem:[#allocation59_spill] sm:$0xff] %v9147_v2  ;;  %v2945_v55 = vsel %vm1740_vm2, %v9151_v5, -inf }
 0x459   : > { %v2939_v42 = vsel %vm1740_vm2, %v9145_v51, -inf }
 0x45a   : > { %2940 = vmax.xlane.f32.xlu1 %v2939_v42 }
 0x45b   : > { %v7065_v9 = vpop.f32.mrb[28].mxu1  ;;  %2937 = vmax.xlane.f32.xlu0 %v2936_v4 }
 0x45c   : > { %v2654_v31 = vpop.f32.mrb[29].mxu1  ;;  %v7077_v20 = vpop.f32.mrb[72].mxu0 }
 0x45d   : > { %v9164_v42 = vadd.f32 %v7077_v20, %v2558_v52  ;;  %v7066_v0 = vpop.f32.mrb[30].mxu1  ;;  %v2727_v2 = vpop.f32.mrb[73].mxu0  ;;  %v2553_v20 = vld [vmem:[%s11767_s3 + $0x28] sm:$0xff] }
 0x45e   : > { %v2657_v43 = vpop.f32.mrb[31].mxu1  ;;  %v7078_v45 = vpop.f32.mrb[74].mxu0  ;;  %v9168_v4 = vadd.f32 %v2727_v2, %v2556_v30 }
 0x45f   : > { %v9170_v22 = vadd.f32 %v7078_v45, %v2559_v53  ;;  %2946 = vmax.xlane.f32.xlu0 %v2945_v55  ;;  %v2730_v12 = vpop.f32.mrb[75].mxu0  ;;  %v2966_v52 = vsel %vm1740_vm2, %v9164_v42, -inf  ;;  %v2554_v45 = vld [vmem:[%s11767_s3 + $0x30] sm:$0xff]  ;;  %v9187_v55 = vadd.f32 %v2657_v43, %v2553_v20  ;;  %v2552_v43 = vld [vmem:[%s11767_s3 + $0x20] sm:$0xff] }
 0x460   : > { %2967 = vmax.xlane.f32.xlu1 %v2966_v52  ;;  %v9182_v30 = vadd.f32 %v2730_v12, %v2557_v27  ;;  %v2960_v53 = vsel %vm1740_vm2, %v9168_v4, -inf  ;;  %v2560_v52 = vld [vmem:[%s11767_s3 + $0x60] sm:$0xff]  ;;  %v9194_v56 = vadd.f32 %v7065_v9, %v2554_v45  ;;  %v9205_v33 = vadd.f32 %v2654_v31, %v2552_v43  ;;  %v2555_v45 = vld [vmem:[%s11767_s3 + $0x38] sm:$0xff]  ;;  %v2562_v31 = vld [vmem:[%s11767_s3 + $0x70] sm:$0xff] }
 0x461   : > { %v2969_v2 = vsel %vm1740_vm2, %v9170_v22, -inf  ;;  %v2566_v43 = vld [vmem:[%s11767_s3 + $0x90] sm:$0xff] }
 0x462   : > { %v2963_v12 = vsel %vm1740_vm2, %v9182_v30, -inf  ;;  %v2954_v9 = vsel %vm1740_vm2, %v9194_v56, -inf }
 0x463   : > { %2970 = vmax.xlane.f32.xlu0 %v2969_v2 }
 0x464   : > { %2961 = vmax.xlane.f32.xlu1 %v2960_v53  ;;  %v7081_v25 = vpop.f32.mrb[76].mxu0  ;;  %v2951_v53 = vsel %vm1740_vm2, %v9187_v55, -inf }
 0x465   : > { %v2743_v16 = vpop.f32.mrb[77].mxu0 }
 0x466   : > { %v7082_v27 = vpop.f32.mrb[78].mxu0  ;;  %v9201_v20 = vadd.f32 %v2743_v16, %v2560_v52  ;;  %v9214_v52 = vadd.f32 %v7066_v0, %v2555_v45  ;;  %v2563_v0 = vld [vmem:[%s11767_s3 + $0x78] sm:$0xff] }
 0x467   : > { %2964 = vmax.xlane.f32.xlu0 %v2963_v12  ;;  %v2746_v2 = vpop.f32.mrb[79].mxu0  ;;  %v2948_v12 = vsel %vm1740_vm2, %v9205_v33, -inf  ;;  %v9236_v28 = vadd.f32 %v7082_v27, %v2563_v0  ;;  %v2567_v0 = vld [vmem:[%s11767_s3 + $0x98] sm:$0xff] }
 0x468   : > { %2952 = vmax.xlane.f32.xlu1 %v2951_v53  ;;  %v2972_v16 = vsel %vm1740_vm2, %v9201_v20, -inf  ;;  %v9224_v53 = vadd.f32 %v7081_v25, %v2562_v31 }
 0x46a   : > { %v2978_v60 = vsel %vm1740_vm2, %v9224_v53, -inf }
 0x46b   : > { %2955 = vmax.xlane.f32.xlu0 %v2954_v9  ;;  %v2957_v9 = vsel %vm1740_vm2, %v9214_v52, -inf }
 0x46c   : > { %2973 = vmax.xlane.f32.xlu1 %v2972_v16  ;;  %v2564_v16 = vld [vmem:[%s11767_s3 + $0x80] sm:$0xff] }
 0x46f   : > { %2949 = vmax.xlane.f32.xlu0 %v2948_v12 }
 0x473   : > { %v7093_v45 = vpop.f32.mrb[32].mxu1  ;;  %2958 = vmax.xlane.f32.xlu0 %v2957_v9  ;;  %v2561_v9 = vld [vmem:[%s11767_s3 + $0x68] sm:$0xff] }
 0x474   : > { %v9234_v12 = vadd.f32 %v7093_v45, %v2566_v43  ;;  %v2816_v11 = vpop.f32.mrb[33].mxu1  ;;  %v9247_v43 = vadd.f32 %v2746_v2, %v2561_v9 }
 0x475   : > { %v7094_v49 = vpop.f32.mrb[34].mxu1  ;;  %v9238_v25 = vadd.f32 %v2816_v11, %v2564_v16  ;;  %v2981_v11 = vsel %vm1740_vm2, %v9236_v28, -inf }
 0x476   : > { %v2819_v31 = vpop.f32.mrb[35].mxu1  ;;  %v2990_v38 = vsel %vm1740_vm2, %v9234_v12, -inf  ;;  %v9259_v13 = vadd.f32 %v7094_v49, %v2567_v0  ;;  %v2975_v1 = vsel %vm1740_vm2, %v9247_v43, -inf  ;;  %v2574_v0 = vld [vmem:[%s11767_s3 + $0xd0] sm:$0xff] }
 0x477   : > { %2991 = vmax.xlane.f32.xlu1 %v2990_v38  ;;  %2979 = vmax.xlane.f32.xlu0 %v2978_v60  ;;  %v2984_v27 = vsel %vm1740_vm2, %v9238_v25, -inf  ;;  %v2572_v38 = vld [vmem:[%s11767_s3 + $0xc0] sm:$0xff] }
 0x478   : > { %v2993_v49 = vsel %vm1740_vm2, %v9259_v13, -inf }
 0x47b   : > { %2985 = vmax.xlane.f32.xlu1 %v2984_v27  ;;  %v7097_v45 = vpop.f32.mrb[36].mxu1  ;;  %2982 = vmax.xlane.f32.xlu0 %v2981_v11  ;;  %v2565_v27 = vld [vmem:[%s11767_s3 + $0x88] sm:$0xff] }
 0x47c   : > { %v2832_v60 = vpop.f32.mrb[37].mxu1  ;;  %v7109_v2 = vpop.f32.mrb[80].mxu0  ;;  %v9270_v10 = vadd.f32 %v2819_v31, %v2565_v27 }
 0x47d   : > { %v7098_v16 = vpop.f32.mrb[38].mxu1  ;;  %v2905_v9 = vpop.f32.mrb[81].mxu0  ;;  %v9277_v41 = vadd.f32 %v7109_v2, %v2574_v0  ;;  %v2573_v2 = vld [vmem:[%s11767_s3 + $0xc8] sm:$0xff] }
 0x47e   : > { %v9261_v58 = vadd.f32 %v2905_v9, %v2572_v38  ;;  %v2835_v21 = vpop.f32.mrb[39].mxu1  ;;  %v7110_v24 = vpop.f32.mrb[82].mxu0 }
 0x47f   : > { %v2908_v11 = vpop.f32.mrb[83].mxu0  ;;  %2976 = vmax.xlane.f32.xlu0 %v2975_v1  ;;  %v2987_v1 = vsel %vm1740_vm2, %v9270_v10, -inf  ;;  %v3014_v3 = vsel %vm1740_vm2, %v9277_v41, -inf }
 0x480   : > { %v3008_v57 = vsel %vm1740_vm2, %v9261_v58, -inf }
 0x481   : > { %3009 = vmax.xlane.f32.xlu1 %v3008_v57  ;;  %v2575_v57 = vld [vmem:[%s11767_s3 + $0xd8] sm:$0xff] }
 0x482   : > { %v9284_v27 = vadd.f32 %v7110_v24, %v2575_v57 }
 0x483   : > { %2994 = vmax.xlane.f32.xlu0 %v2993_v49  ;;  %v9291_v49 = vadd.f32 %v2908_v11, %v2573_v2 }
 0x484   : > { %v7113_v38 = vpop.f32.mrb[84].mxu0  ;;  %v3017_v0 = vsel %vm1740_vm2, %v9284_v27, -inf }
 0x485   : > { %v2921_v9 = vpop.f32.mrb[85].mxu0  ;;  %v3011_v24 = vsel %vm1740_vm2, %v9291_v49, -inf }
 0x486   : > { %v7114_v15 = vpop.f32.mrb[86].mxu0 }
 0x487   : > { %v2924_v31 = vpop.f32.mrb[87].mxu0  ;;  %2988 = vmax.xlane.f32.xlu0 %v2987_v1  ;;  %v2578_v1 = vld [vmem:[%s11767_s3 + $0xf0] sm:$0xff] }
 0x488   : > { %v9309_v57 = vadd.f32 %v7113_v38, %v2578_v1  ;;  %v2570_v38 = vld [vmem:[%s11767_s3 + $0xb0] sm:$0xff] }
 0x489   : > { %v9325_v1 = vadd.f32 %v7097_v45, %v2570_v38  ;;  %v2579_v38 = vld [vmem:[%s11767_s3 + $0xf8] sm:$0xff] }
 0x48b   : > { %3015 = vmax.xlane.f32.xlu0 %v3014_v3  ;;  %v2569_v3 = vld [vmem:[%s11767_s3 + $0xa8] sm:$0xff] }
 0x48c   : > { %v9304_v11 = vadd.f32 %v2835_v21, %v2569_v3  ;;  %v3026_v21 = vsel %vm1740_vm2, %v9309_v57, -inf }
 0x48e   : > { %v2999_v2 = vsel %vm1740_vm2, %v9304_v11, -inf }
 0x48f   : > { %3018 = vmax.xlane.f32.xlu0 %v3017_v0  ;;  %v2576_v0 = vld [vmem:[%s11767_s3 + $0xe0] sm:$0xff] }
 0x492   : > { %735 = vrot.lane.b32.xlu1 %v8333_v40, %s8085_s12 }
 0x493   : > { %3012 = vmax.xlane.f32.xlu0 %v3011_v24  ;;  %v9316_v24 = vadd.f32 %v2921_v9, %v2576_v0  ;;  %v3002_v0 = vsel %vm1740_vm2, %v9325_v1, -inf }
 0x495   : > { %v3020_v3 = vsel %vm1740_vm2, %v9316_v24, -inf }
 0x4a9   : > { %995 = vrot.lane.b32.xlu0 %v8333_v40, %s8086_s13 }
 0x4b6   : > { %3000 = vmax.xlane.f32.xlu1 %v2999_v2  ;;  %v2568_v2 = vld [vmem:[%s11767_s3 + $0xa0] sm:$0xff] }
 0x4b7   : > { %v9330_v9 = vadd.f32 %v2832_v60, %v2568_v2  ;;  %v9344_v60 = vadd.f32 %v7114_v15, %v2579_v38 }
 0x4b9   : > { %v2996_v45 = vsel %vm1740_vm2, %v9330_v9, -inf  ;;  %v3029_v15 = vsel %vm1740_vm2, %v9344_v60, -inf }
 0x4ba   : > { %3027 = vmax.xlane.f32.xlu1 %v3026_v21  ;;  %v2571_v21 = vld [vmem:[%s11767_s3 + $0xb8] sm:$0xff] }
 0x4be   : > { %3021 = vmax.xlane.f32.xlu1 %v3020_v3  ;;  %v9337_v3 = vadd.f32 %v7098_v16, %v2571_v21  ;;  %v2577_v16 = vld [vmem:[%s11767_s3 + $0xe8] sm:$0xff] }
 0x4c0   : > { %v3005_v2 = vsel %vm1740_vm2, %v9337_v3, -inf }
 0x4c8   : > { %3003 = vmax.xlane.f32.xlu0 %v3002_v0  ;;  %v9353_v0 = vadd.f32 %v2924_v31, %v2577_v16 }
 0x4ca   : > { %v3023_v21 = vsel %vm1740_vm2, %v9353_v0, -inf }
 0x4cc   : > { %2997 = vmax.xlane.f32.xlu0 %v2996_v45 }
 0x4cf   : > { %737 = vrot.lane.b32.xlu1 %v8330_v37, %s8085_s12 }
 0x4d0   : > { %3006 = vmax.xlane.f32.xlu0 %v3005_v2 }
 0x4d3   : > { %1192 = vrot.lane.b32.xlu1 %v8330_v37, %s8087_s14 }
 0x4d4   : > { %3030 = vmax.xlane.f32.xlu0 %v3029_v15 }
 0x4d7   : > { %1194 = vrot.lane.b32.xlu1 %v8349_v50, %s8087_s14 }
 0x4d8   : > { %3024 = vmax.xlane.f32.xlu0 %v3023_v21 }
 0x4db   : > { %1001 = vrot.lane.b32.xlu1 %v8346_v47, %s8086_s13 }
 0x4df   : > { %1196 = vrot.lane.b32.xlu1 %v8346_v47, %s8087_s14 }
 0x4e3   : > { %932 = vrot.lane.b32.xlu1 %v8330_v37, %s8088_s15 }
 0x4e4   : > { %v2944_v31 = vpop.xlane.xlu0 %2943 }
 0x4e5   : > { %v3034_v38 = vsub.f32 %v9127_v39, %v2944_v31 }
 0x4e7   : > { %1127 = vrot.lane.b32.xlu1 %v8330_v37, %s8089_s16  ;;  %v2941_v45 = vpop.xlane.xlu1 %2940  ;;  %v3068_v48 = vmul.f32 1.442695, %v3034_v38 }
 0x4e8   : > { %v3033_v2 = vsub.f32 %v9145_v51, %v2941_v45  ;;  %v2938_v16 = vpop.xlane.xlu0 %2937 }
 0x4e9   : > { %v3032_v15 = vsub.f32 %v9136_v36, %v2938_v16 }
 0x4ea   : > { %v3066_v21 = vmul.f32 1.442695, %v3033_v2 }
 0x4eb   : > { %v3064_v19 = vmul.f32 1.442695, %v3032_v15  ;;  %936 = vrot.lane.b32.xlu1 %v8346_v47, %s8088_s15 }
 0x4ec   : > { %7625 = vpow2.f32 %v3066_v21  ;;  %v2947_v34 = vpop.xlane.xlu0 %2946 }
 0x4ed   : > { %7627 = vpow2.f32 %v3064_v19  ;;  %v3035_v18 = vsub.f32 %v9151_v5, %v2947_v34  ;;  %v2968_v29 = vpop.xlane.xlu1 %2967 }
 0x4ee   : > { %1190 = vrot.lane.b32.xlu0 %v8333_v40, %s8087_s14  ;;  %7629 = vpow2.f32 %v3068_v48  ;;  %v3042_v34 = vsub.f32 %v9164_v42, %v2968_v29 }
 0x4ef   : > { %v3070_v39 = vmul.f32 1.442695, %v3035_v18  ;;  %1131 = vrot.lane.b32.xlu1 %v8346_v47, %s8089_s16 }
 0x4f0   : > { %v2971_v36 = vpop.xlane.xlu0 %2970 }
 0x4f1   : > { %7631 = vpow2.f32 %v3070_v39  ;;  %v3043_v51 = vsub.f32 %v9170_v22, %v2971_v36  ;;  %v2962_v31 = vpop.xlane.xlu1 %2961 }
 0x4f2   : > { %v3040_v45 = vsub.f32 %v9168_v4, %v2962_v31  ;;  %997 = vrot.lane.b32.xlu0 %v8330_v37, %s8086_s13  ;;  %v3084_v4 = vmul.f32 1.442695, %v3042_v34  ;;  %v2541_v34 = vld [vmem:[#allocation4 + $0x128] sm:$0xff] }
 0x4f3   : > { %v3086_v19 = vmul.f32 1.442695, %v3043_v51  ;;  %671 = vrot.lane.b32.xlu1 %v8333_v40, %s8090_s17 }
 0x4f4   : > { %v3080_v18 = vmul.f32 1.442695, %v3040_v45  ;;  %v2965_v5 = vpop.xlane.xlu0 %2964 }
 0x4f5   : > { %v3041_v48 = vsub.f32 %v9182_v30, %v2965_v5  ;;  %v2953_v38 = vpop.xlane.xlu1 %2952  ;;  %7633 = vpow2.f32 %v3086_v19 }
 0x4f6   : > { %v9389_v2 = vpop.eup %7625  ;;  %999 = vrot.lane.b32.xlu0 %v8349_v50, %s8086_s13  ;;  %7635 = vpow2.f32 %v3080_v18  ;;  %v3037_v29 = vsub.f32 %v9187_v55, %v2953_v38 }
 0x4f7   : > { %11927 = vst [vmem:[#allocation60_spill] sm:$0xff] %v9389_v2  ;;  %v9393_v22 = vpop.eup %7627  ;;  %v3082_v16 = vmul.f32 1.442695, %v3041_v48  ;;  %673 = vrot.lane.b32.xlu1 %v8330_v37, %s8090_s17 }
 0x4f8   : > { %11928 = vst [vmem:[#allocation61_spill] sm:$0xff] %v9393_v22  ;;  %v2956_v42 = vpop.xlane.xlu0 %2955  ;;  %v3224_v30 = vpack.c.bf16 %v9389_v2, %v9393_v22  ;;  %v9400_v15 = vpop.eup %7629  ;;  %v3074_v39 = vmul.f32 1.442695, %v3037_v29 }
 0x4f9   : > { %7637 = vpow2.f32 %v3082_v16  ;;  %11929 = vst [vmem:[#allocation62_spill] sm:$0xff] %v9400_v15  ;;  %v3038_v36 = vsub.f32 %v9194_v56, %v2956_v42  ;;  %v2974_v18 = vpop.xlane.xlu1 %2973 }
 0x4fa   : > { %739 = vrot.lane.b32.xlu0 %v8349_v50, %s8085_s12  ;;  %7123 = vmatprep.mubr.msk.bf16.mxu1 %vm1740_vm2, %v3224_v30  ;;  %7639 = vpow2.f32 %v3084_v4 }
 0x4fb   : > { %v9405_v21 = vpop.eup %7631  ;;  %867 = vrot.lane.b32.xlu1 %v8330_v37, %s8091_s18  ;;  %7641 = vpow2.f32 %v3074_v39  ;;  %v3076_v19 = vmul.f32 1.442695, %v3038_v36  ;;  %v2543_v39 = vld [vmem:[#allocation4 + $0x138] sm:$0xff] }
 0x4fc   : > { %11930 = vst [vmem:[#allocation63_spill] sm:$0xff] %v9405_v21  ;;  %v3225_v55 = vpack.c.bf16 %v9405_v21, %v9400_v15  ;;  %v2950_v51 = vpop.xlane.xlu0 %2949  ;;  %v3749_v15 = vld [vmem:[%s11767_s3 + $0x48] sm:$0xff] }
 0x4fd   : > { %v3036_v31 = vsub.f32 %v9205_v33, %v2950_v51  ;;  %v2545_v51 = vld [vmem:[#allocation4 + $0x1a8] sm:$0xff] }
 0x4fe   : > { %741 = vrot.lane.b32.xlu0 %v8346_v47, %s8085_s12  ;;  %7124 = vmatmul.mubr.msk.bf16.vlgmr.msra.gmra.mrb[40].mxu1 %vm1740_vm2, %v3225_v55  ;;  %v3044_v55 = vsub.f32 %v9201_v20, %v2974_v18 }
 0x4ff   : > { %v3072_v45 = vmul.f32 1.442695, %v3036_v31  ;;  %675 = vrot.lane.b32.xlu1 %v8349_v50, %s8090_s17  ;;  %7148 = vmatpush3.bf16.msra.mxu1 %v9052_v44  ;;  %v9419_v5 = vpop.eup %7633  ;;  %v2542_v44 = vld [vmem:[#allocation4 + $0x130] sm:$0xff] }
 0x500   : > { %7149 = vmatprep.subr.bf16.mxu1 %v2541_v34  ;;  %v2959_v56 = vpop.xlane.xlu0 %2958  ;;  %v9422_v48 = vpop.eup %7635  ;;  %v3088_v18 = vmul.f32 1.442695, %v3044_v55 }
 0x501   : > { %7643 = vpow2.f32 %v3072_v45  ;;  %v3039_v33 = vsub.f32 %v9214_v52, %v2959_v56 }
 0x502   : > { %930 = vrot.lane.b32.xlu0 %v8333_v40, %s8088_s15  ;;  %7645 = vpow2.f32 %v3076_v19 }
 0x503   : > { %v9426_v38 = vpop.eup %7637  ;;  %v3078_v4 = vmul.f32 1.442695, %v3039_v33  ;;  %677 = vrot.lane.b32.xlu1 %v8346_v47, %s8090_s17  ;;  %7150 = vmatpush3.bf16.msra.mxu1 %v2541_v34  ;;  %v2546_v33 = vld [vmem:[#allocation4 + $0x1b0] sm:$0xff] }
 0x504   : > { %v9430_v16 = vpop.xlane.xlu1 %2991  ;;  %7151 = vmatprep.subr.bf16.mxu1 %v2542_v44  ;;  %v2980_v29 = vpop.xlane.xlu0 %2979  ;;  %v3228_v52 = vpack.c.bf16 %v9426_v38, %v9422_v48 }
 0x505   : > { %v9434_v42 = vpop.eup %7639  ;;  %7647 = vpow2.f32 %v3078_v4  ;;  %v3046_v34 = vsub.f32 %v9224_v53, %v2980_v29 }
 0x506   : > { %v3229_v30 = vpack.c.bf16 %v9419_v5, %v9434_v42  ;;  %1125 = vrot.lane.b32.xlu0 %v8333_v40, %s8089_s16  ;;  %7139 = vmatprep.mubr.msk.bf16.mxu0 %vm1740_vm2, %v3228_v52  ;;  %v9447_v45 = vpop.eup %7641  ;;  %7649 = vpow2.f32 %v3088_v18 }
 0x507   : > { %871 = vrot.lane.b32.xlu1 %v8346_v47, %s8091_s18  ;;  %7152 = vmatpush3.bf16.msra.mxu1 %v2542_v44  ;;  %11931 = vst [vmem:[#allocation64_spill] sm:$0xff] %v9447_v45  ;;  %v3092_v29 = vmul.f32 1.442695, %v3046_v34  ;;  %v3050_v34 = vsub.f32 %v9234_v12, %v9430_v16 }
 0x508   : > { %7140 = vmatmul.mubr.msk.bf16.vlgmr.msra.gmra.mrb[88].mxu0 %vm1740_vm2, %v3229_v30  ;;  %7153 = vmatprep.subr.bf16.mxu1 %v2543_v39  ;;  %v2983_v36 = vpop.xlane.xlu0 %2982  ;;  %v2986_v19 = vpop.xlane.xlu1 %2985 }
 0x509   : > { %7164 = vmatpush3.bf16.msra.mxu0 %v9060_v32  ;;  %v3047_v31 = vsub.f32 %v9236_v28, %v2983_v36  ;;  %v9456_v32 = vld [vmem:[#allocation3 + $0x40] sm:$0xff]  ;;  %v3048_v55 = vsub.f32 %v9238_v25, %v2986_v19  ;;  %v3100_v16 = vmul.f32 1.442695, %v3050_v34 }
 0x50a   : > { %7165 = vmatprep.subr.bf16.mxu0 %v2545_v51  ;;  %934 = vrot.lane.b32.xlu0 %v8349_v50, %s8088_s15 }
 0x50b   : > { %v9452_v20 = vpop.eup %7643  ;;  %1060 = vrot.lane.b32.xlu1 %v8333_v40, %s8093_s20  ;;  %7154 = vmatpush3.bf16.msra.mxu1 %v2543_v39  ;;  %v3094_v56 = vmul.f32 1.442695, %v3047_v31  ;;  %v3096_v19 = vmul.f32 1.442695, %v3048_v55 }
 0x50c   : > { %11932 = vst [vmem:[#allocation65_spill] sm:$0xff] %v9452_v20  ;;  %7503 = vmatprep.subr.msk.bf16.mxu1 %vm558_vm1, %v9456_v32  ;;  %v2977_v28 = vpop.xlane.xlu0 %2976  ;;  %v3226_v53 = vpack.c.bf16 %v9447_v45, %v9452_v20  ;;  %v9463_v44 = vpop.eup %7645 }
 0x50d   : > { %7166 = vmatpush3.bf16.msra.mxu0 %v2545_v51  ;;  %v3045_v4 = vsub.f32 %v9247_v43, %v2977_v28  ;;  %11933 = vst [vmem:[#allocation66_spill] sm:$0xff] %v9463_v44  ;;  %7651 = vpow2.f32 %v3094_v56  ;;  %v2547_v51 = vld [vmem:[#allocation4 + $0x1b8] sm:$0xff] }
 0x50e   : > { %7167 = vmatprep.subr.bf16.mxu0 %v2546_v33  ;;  %v3010_v52 = vpop.xlane.xlu1 %3009  ;;  %1129 = vrot.lane.b32.xlu0 %v8349_v50, %s8089_s16 }
 0x50f   : > { %v9467_v30 = vpop.eup %7647  ;;  %v3090_v39 = vmul.f32 1.442695, %v3045_v4  ;;  %1062 = vrot.lane.b32.xlu1 %v8330_v37, %s8093_s20  ;;  %7127 = vmatprep.mubr.msk.bf16.mxu1 %vm1740_vm2, %v3226_v53  ;;  %v3056_v4 = vsub.f32 %v9261_v58, %v3010_v52 }
 0x510   : > { %11934 = vst [vmem:[#allocation67_spill] sm:$0xff] %v9467_v30  ;;  %v2995_v43 = vpop.xlane.xlu0 %2994  ;;  %v3227_v36 = vpack.c.bf16 %v9467_v30, %v9463_v44  ;;  %v9493_v53 = vpop.eup %7649 }
 0x511   : > { %7653 = vpow2.f32 %v3090_v39  ;;  %7168 = vmatpush3.bf16.msra.mxu0 %v2546_v33  ;;  %v3051_v31 = vsub.f32 %v9259_v13, %v2995_v43  ;;  %v9484_v13 = vld [vmem:[#allocation3 + $0xc0] sm:$0xff]  ;;  %11935 = vst [vmem:[#allocation68_spill] sm:$0xff] %v9493_v53  ;;  %v3112_v58 = vmul.f32 1.442695, %v3056_v4 }
 0x512   : > { %7655 = vpow2.f32 %v3092_v29  ;;  %7169 = vmatprep.subr.bf16.mxu0 %v2547_v51  ;;  %v736_v25 = vpop.permute.xlu1 %735  ;;  %865 = vrot.lane.b32.xlu0 %v8333_v40, %s8091_s18 }
 0x513   : > { %776 = vst.msk [vmem:[#allocation2 + $0xc0] sm:$0xff] %vm558_vm1, %v736_v25  ;;  %1257 = vrot.lane.b32.xlu1 %v8330_v37, %s8092_s19  ;;  %7128 = vmatmul.mubr.msk.bf16.gmra.mrb[44].mxu1 %vm1740_vm2, %v3227_v36  ;;  %v3102_v18 = vmul.f32 1.442695, %v3051_v31  ;;  %7657 = vpow2.f32 %v3096_v19 }
 0x514   : > { %v2989_v56 = vpop.xlane.xlu0 %2988 }
 0x515   : > { %7170 = vmatpush3.bf16.msra.mxu0 %v2547_v51  ;;  %v3049_v12 = vsub.f32 %v9270_v10, %v2989_v56  ;;  %7659 = vpow2.f32 %v3102_v18  ;;  %v3785_v56 = vsel %vm558_vm1, %v9456_v32, 0 }
 0x516   : > { %7507 = vmatprep.subr.msk.bf16.mxu0 %vm558_vm1, %v9484_v13  ;;  %869 = vrot.lane.b32.xlu0 %v8349_v50, %s8091_s18 }
 0x517   : > { %v3098_v28 = vmul.f32 1.442695, %v3049_v12  ;;  %1064 = vrot.lane.b32.xlu1 %v8349_v50, %s8093_s20  ;;  %v9495_v33 = vpop.eup %7651  ;;  %v3709_v12 = vld [vmem:[#allocation3 + $0x48] sm:$0xff] }
 0x518   : > { %v3016_v37 = vpop.xlane.xlu0 %3015  ;;  %11936 = vst [vmem:[#allocation69_spill] sm:$0xff] %v9495_v33  ;;  %v3788_v32 = vsel %vm558_vm1, %v3709_v12, 0 }
 0x519   : > { %7661 = vpow2.f32 %v3098_v28 }
 0x51a   : > { %7663 = vpow2.f32 %v3100_v16  ;;  %1255 = vrot.lane.b32.xlu0 %v8333_v40, %s8092_s19  ;;  %v3058_v40 = vsub.f32 %v9277_v41, %v3016_v37 }
 0x51b   : > { %v9499_v10 = vpop.eup %7653  ;;  %1259 = vrot.lane.b32.xlu1 %v8349_v50, %s8092_s19  ;;  %7665 = vpow2.f32 %v3112_v58 }
 0x51c   : > { %v9504_v29 = vpop.eup %7655  ;;  %v3019_v55 = vpop.xlane.xlu0 %3018  ;;  %v3230_v39 = vpack.c.bf16 %v9499_v10, %v9493_v53  ;;  %v3116_v41 = vmul.f32 1.442695, %v3058_v40  ;;  %v3713_v40 = vld [vmem:[#allocation3 + $0xc8] sm:$0xff] }
 0x51d   : > { %11937 = vst [vmem:[#allocation70_spill] sm:$0xff] %v9504_v29  ;;  %v3059_v43 = vsub.f32 %v9284_v27, %v3019_v55  ;;  %v3231_v36 = vpack.c.bf16 %v9495_v33, %v9504_v29  ;;  %v9518_v51 = vpop.eup %7657  ;;  %v3710_v55 = vld [vmem:[#allocation3 + $0x50] sm:$0xff] }
 0x51e   : > { %1066 = vrot.lane.b32.xlu0 %v8346_v47, %s8093_s20  ;;  %7143 = vmatprep.mubr.msk.bf16.mxu0 %vm1740_vm2, %v3230_v39  ;;  %v3791_v58 = vsel %vm558_vm1, %v3710_v55, 0 }
 0x51f   : > { %1261 = vrot.lane.b32.xlu1 %v8346_v47, %s8092_s19  ;;  %7144 = vmatmul.mubr.msk.bf16.gmra.mrb[92].mxu0 %vm1740_vm2, %v3231_v36  ;;  %v3118_v50 = vmul.f32 1.442695, %v3059_v43  ;;  %v9521_v31 = vpop.eup %7659  ;;  %v3874_v36 = vsel %vm558_vm1, %v9484_v13, 0  ;;  %v3877_v13 = vsel %vm558_vm1, %v3713_v40, 0 }
 0x520   : > { %v3013_v52 = vpop.xlane.xlu0 %3012 }
 0x521   : > { %v3057_v27 = vsub.f32 %v9291_v49, %v3013_v52  ;;  %7667 = vpow2.f32 %v3118_v50  ;;  %v3711_v50 = vld [vmem:[#allocation3 + $0x58] sm:$0xff]  ;;  %v3714_v52 = vld [vmem:[#allocation3 + $0xd0] sm:$0xff] }
 0x522   : > { %615 = vrot.lane.b32.xlu0 %v8364_v63, %s8083_s10 }
 0x523   : > { %v9525_v34 = vpop.eup %7661  ;;  %v3114_v25 = vmul.f32 1.442695, %v3057_v27  ;;  %808 = vrot.lane.b32.xlu1 %v8364_v63, %s8084_s11  ;;  %v3794_v27 = vsel %vm558_vm1, %v3711_v50, 0 }
 0x524   : > { %v9529_v47 = vpop.eup %7663  ;;  %v996_v19 = vpop.permute.xlu0 %995  ;;  %v3232_v49 = vpack.c.bf16 %v9525_v34, %v9518_v51 }
 0x525   : > { %11938 = vst [vmem:[#allocation71_spill] sm:$0xff] %v9529_v47  ;;  %v3233_v18 = vpack.c.bf16 %v9521_v31, %v9529_v47  ;;  %7669 = vpow2.f32 %v3114_v25  ;;  %1036 = vst.msk [vmem:[#allocation3 + $0x140] sm:$0xff] %vm558_vm1, %v996_v19  ;;  %v9549_v16 = vpop.eup %7665  ;;  %v3880_v19 = vsel %vm558_vm1, %v3714_v52, 0 }
 0x526   : > { %7671 = vpow2.f32 %v3116_v41  ;;  %810 = vrot.lane.b32.xlu0 %v8360_v59, %s8084_s11  ;;  %7155 = vmatprep.mubr.msk.bf16.mxu1 %vm1740_vm2, %v3232_v49  ;;  %11939 = vst [vmem:[#allocation72_spill] sm:$0xff] %v9549_v16  ;;  %v3715_v49 = vld [vmem:[#allocation3 + $0xd8] sm:$0xff] }
 0x527   : > { %617 = vrot.lane.b32.xlu1 %v8360_v59, %s8083_s10  ;;  %7156 = vmatmul.mubr.msk.bf16.vlgmr.msra.gmra.mrb[48].mxu1 %vm1740_vm2, %v3233_v18 }
 0x528   : > { %7180 = vmatpush3.bf16.xpose.msra.mxu1 %v3785_v56 }
 0x529   : > { %7504 = vmatprep.subr.msk.bf16.mxu1 %vm558_vm1, %v3709_v12  ;;  %v3883_v12 = vsel %vm558_vm1, %v3715_v49, 0 }
 0x52a   : > { %621 = vrot.lane.b32.xlu0 %v8376_v6, %s8083_s10 }
 0x52b   : > { %619 = vrot.lane.b32.xlu1 %v8379_v8, %s8083_s10  ;;  %v9551_v28 = vpop.eup %7667 }
 0x52c   : > { %v9593_v41 = vld [vmem:[#allocation3 + $0x140] sm:$0xff] }
 0x52e   : > { %1003 = vrot.lane.b32.xlu0 %v8364_v63, %s8086_s13 }
 0x52f   : > { %v9555_v37 = vpop.eup %7669  ;;  %812 = vrot.lane.b32.xlu1 %v8379_v8, %s8084_s11 }
 0x530   : > { %v9560_v4 = vpop.eup %7671  ;;  %7182 = vmatpush3.bf16.xpose.msra.mxu1 %v3788_v32  ;;  %v3236_v39 = vpack.c.bf16 %v9555_v37, %v9549_v16 }
 0x531   : > { %11940 = vst [vmem:[#allocation73_spill] sm:$0xff] %v9560_v4  ;;  %v3237_v43 = vpack.c.bf16 %v9551_v28, %v9560_v4  ;;  %7505 = vmatprep.subr.msk.bf16.mxu1 %vm558_vm1, %v3710_v55 }
 0x532   : > { %1198 = vrot.lane.b32.xlu0 %v8364_v63, %s8087_s14  ;;  %7171 = vmatprep.mubr.msk.bf16.mxu0 %vm1740_vm2, %v3236_v39 }
 0x533   : > { %814 = vrot.lane.b32.xlu1 %v8376_v6, %s8084_s11  ;;  %7172 = vmatmul.mubr.msk.bf16.vlgmr.msra.gmra.mrb[96].mxu0 %vm1740_vm2, %v3237_v43 }
 0x534   : > { %7196 = vmatpush3.bf16.xpose.msra.mxu0 %v3874_v36 }
 0x535   : > { %7508 = vmatprep.subr.msk.bf16.mxu0 %vm558_vm1, %v3713_v40 }
 0x536   : > { %1005 = vrot.lane.b32.xlu0 %v8360_v59, %s8086_s13 }
 0x537   : > { %743 = vrot.lane.b32.xlu1 %v8364_v63, %s8085_s12 }
 0x538   : > { %7184 = vmatpush3.bf16.xpose.msra.mxu1 %v3791_v58 }
 0x539   : > { %7506 = vmatprep.subr.msk.bf16.mxu1 %vm558_vm1, %v3711_v50 }
 0x53a   : > { %1007 = vrot.lane.b32.xlu0 %v8379_v8, %s8086_s13 }
 0x53b   : > { %745 = vrot.lane.b32.xlu1 %v8360_v59, %s8085_s12 }
 0x53c   : > { %7198 = vmatpush3.bf16.xpose.msra.mxu0 %v3877_v13 }
 0x53d   : > { %7509 = vmatprep.subr.msk.bf16.mxu0 %vm558_vm1, %v3714_v52 }
 0x53e   : > { %747 = vrot.lane.b32.xlu0 %v8379_v8, %s8085_s12 }
 0x53f   : > { %1200 = vrot.lane.b32.xlu1 %v8360_v59, %s8087_s14 }
 0x540   : > { %7186 = vmatpush3.bf16.xpose.msra.mxu1 %v3794_v27 }
 0x541   : > { %7511 = vmatprep.subr.msk.bf16.mxu1 %vm558_vm1, %v9593_v41 }
 0x542   : > { %749 = vrot.lane.b32.xlu0 %v8376_v6, %s8085_s12 }
 0x543   : > { %v3001_v25 = vpop.xlane.xlu1 %3000  ;;  %1202 = vrot.lane.b32.xlu1 %v8379_v8, %s8087_s14 }
 0x544   : > { %7200 = vmatpush3.bf16.xpose.msra.mxu0 %v3880_v19  ;;  %v3053_v39 = vsub.f32 %v9304_v11, %v3001_v25 }
 0x545   : > { %7510 = vmatprep.subr.msk.bf16.mxu0 %vm558_vm1, %v3715_v49 }
 0x546   : > { %938 = vrot.lane.b32.xlu0 %v8364_v63, %s8088_s15  ;;  %v3106_v40 = vmul.f32 1.442695, %v3053_v39 }
 0x547   : > { %v3028_v18 = vpop.xlane.xlu1 %3027  ;;  %1009 = vrot.lane.b32.xlu1 %v8376_v6, %s8086_s13  ;;  %s11608_s13 = scalar_lea.vmem %s11770_s6, %s6593_s28 }
 0x548   : > { %7673 = vpow2.f32 %v3106_v40 }
 0x54a   : > { %1133 = vrot.lane.b32.xlu0 %v8364_v63, %s8089_s16 }
 0x54b   : > { %1204 = vrot.lane.b32.xlu1 %v8376_v6, %s8087_s14  ;;  %v3022_v56 = vpop.xlane.xlu1 %3021 }
 0x54c   : > { %7202 = vmatpush3.bf16.xpose.msra.mxu0 %v3883_v12 }
 0x54e   : > { %942 = vrot.lane.b32.xlu0 %v8379_v8, %s8088_s15 }
 0x54f   : > { %940 = vrot.lane.b32.xlu1 %v8360_v59, %s8088_s15  ;;  %v738_v32 = vpop.permute.xlu1 %737 }
 0x550   : > { %777 = vst.msk [vmem:[#allocation2 + $0xc8] sm:$0xff] %vm558_vm1, %v738_v32 }
 0x552   : > { %1137 = vrot.lane.b32.xlu0 %v8379_v8, %s8089_s16 }
 0x553   : > { %1135 = vrot.lane.b32.xlu1 %v8360_v59, %s8089_s16  ;;  %v1193_v55 = vpop.permute.xlu1 %1192 }
 0x554   : > { %1232 = vst.msk [vmem:[#allocation3 + $0x1c8] sm:$0xff] %vm558_vm1, %v1193_v55 }
 0x555   : > { %v3004_v43 = vpop.xlane.xlu0 %3003 }
 0x556   : > { %873 = vrot.lane.b32.xlu0 %v8364_v63, %s8091_s18  ;;  %v3054_v58 = vsub.f32 %v9325_v1, %v3004_v43 }
 0x557   : > { %944 = vrot.lane.b32.xlu1 %v8376_v6, %s8088_s15  ;;  %v1195_v36 = vpop.permute.xlu1 %1194 }
 0x558   : > { %1233 = vst.msk [vmem:[#allocation3 + $0x1d0] sm:$0xff] %vm558_vm1, %v1195_v36  ;;  %v3108_v27 = vmul.f32 1.442695, %v3054_v58 }
 0x559   : > { %v2998_v50 = vpop.xlane.xlu0 %2997 }
 0x55a   : > { %v3052_v13 = vsub.f32 %v9330_v9, %v2998_v50  ;;  %875 = vrot.lane.b32.xlu0 %v8360_v59, %s8091_s18  ;;  %v3060_v9 = vsub.f32 %v9316_v24, %v3022_v56 }
 0x55b   : > { %1139 = vrot.lane.b32.xlu1 %v8376_v6, %s8089_s16  ;;  %v1002_v11 = vpop.permute.xlu1 %1001 }
 0x55c   : > { %v3104_v52 = vmul.f32 1.442695, %v3052_v13  ;;  %1039 = vst.msk [vmem:[#allocation3 + $0x158] sm:$0xff] %vm558_vm1, %v1002_v11  ;;  %v3120_v39 = vmul.f32 1.442695, %v3060_v9 }
 0x55d   : > { %v3007_v25 = vpop.xlane.xlu0 %3006 }
 0x55e   : > { %7675 = vpow2.f32 %v3104_v52  ;;  %v3055_v19 = vsub.f32 %v9337_v3, %v3007_v25  ;;  %877 = vrot.lane.b32.xlu0 %v8379_v8, %s8091_s18  ;;  %v3062_v3 = vsub.f32 %v9309_v57, %v3028_v18  ;;  %v3692_v25 = vld [vmem:[#allocation2 + $0x40] sm:$0xff] }
 0x55f   : > { %679 = vrot.lane.b32.xlu1 %v8364_v63, %s8090_s17  ;;  %v1197_v1 = vpop.permute.xlu1 %1196  ;;  %7677 = vpow2.f32 %v3108_v27 }
 0x560   : > { %v3110_v49 = vmul.f32 1.442695, %v3055_v19  ;;  %1234 = vst.msk [vmem:[#allocation3 + $0x1d8] sm:$0xff] %vm558_vm1, %v1197_v1  ;;  %v3124_v36 = vmul.f32 1.442695, %v3062_v3 }
 0x561   : > { %v3031_v12 = vpop.xlane.xlu0 %3030 }
 0x562   : > { %7679 = vpow2.f32 %v3110_v49  ;;  %v3063_v32 = vsub.f32 %v9344_v60, %v3031_v12  ;;  %685 = vrot.lane.b32.xlu0 %v8376_v6, %s8090_s17  ;;  %v9652_v60 = vpop.eup %7673 }
 0x563   : > { %681 = vrot.lane.b32.xlu1 %v8360_v59, %s8090_s17  ;;  %v933_v55 = vpop.permute.xlu1 %932  ;;  %11941 = vst [vmem:[#allocation74_spill] sm:$0xff] %v9652_v60  ;;  %7681 = vpow2.f32 %v3120_v39 }
 0x564   : > { %972 = vst.msk [vmem:[#allocation2 + $0x148] sm:$0xff] %vm558_vm1, %v933_v55  ;;  %v3126_v24 = vmul.f32 1.442695, %v3063_v32 }
 0x565   : > { %v3025_v56 = vpop.xlane.xlu0 %3024 }
 0x566   : > { %v3061_v43 = vsub.f32 %v9353_v0, %v3025_v56  ;;  %1068 = vrot.lane.b32.xlu0 %v8364_v63, %s8093_s20  ;;  %7683 = vpow2.f32 %v3126_v24  ;;  %v3693_v24 = vld [vmem:[#allocation2 + $0x48] sm:$0xff] }
 0x567   : > { %683 = vrot.lane.b32.xlu1 %v8379_v8, %s8090_s17  ;;  %v1128_v57 = vpop.permute.xlu1 %1127 }
 0x568   : > { %v9656_v18 = vpop.eup %7675  ;;  %v3122_v40 = vmul.f32 1.442695, %v3061_v43  ;;  %1167 = vst.msk [vmem:[#allocation2 + $0x1c8] sm:$0xff] %vm558_vm1, %v1128_v57  ;;  %v3694_v57 = vld [vmem:[#allocation2 + $0x50] sm:$0xff] }
 0x569   : > { %11942 = vst [vmem:[#allocation75_spill] sm:$0xff] %v9656_v18  ;;  %v1191_v58 = vpop.permute.xlu0 %1190  ;;  %v3234_v0 = vpack.c.bf16 %v9652_v60, %v9656_v18  ;;  %v9664_v50 = vpop.eup %7677 }
 0x56a   : > { %7685 = vpow2.f32 %v3122_v40  ;;  %1231 = vst.msk [vmem:[#allocation3 + $0x1c0] sm:$0xff] %vm558_vm1, %v1191_v58  ;;  %1263 = vrot.lane.b32.xlu0 %v8364_v63, %s8092_s19  ;;  %11943 = vst [vmem:[#allocation76_spill] sm:$0xff] %v9664_v50  ;;  %v3696_v58 = vld [vmem:[#allocation2 + $0xc0] sm:$0xff] }
 0x56b   : > { %7687 = vpow2.f32 %v3124_v36  ;;  %879 = vrot.lane.b32.xlu1 %v8376_v6, %s8091_s18  ;;  %v937_v13 = vpop.permute.xlu1 %936  ;;  %7159 = vmatprep.mubr.msk.bf16.mxu1 %vm1740_vm2, %v3234_v0  ;;  %v3963_v36 = vsel %vm558_vm1, %v9593_v41, 0 }
 0x56c   : > { %v9669_v11 = vpop.eup %7679  ;;  %974 = vst.msk [vmem:[#allocation2 + $0x158] sm:$0xff] %vm558_vm1, %v937_v13 }
 0x56d   : > { %11944 = vst [vmem:[#allocation77_spill] sm:$0xff] %v9669_v11  ;;  %v998_v52 = vpop.permute.xlu0 %997  ;;  %v3235_v27 = vpack.c.bf16 %v9669_v11, %v9664_v50  ;;  %v9680_v9 = vpop.eup %7681  ;;  %v3757_v11 = vld [vmem:[%s11767_s3 + $0x88] sm:$0xff] }
 0x56e   : > { %1037 = vst.msk [vmem:[#allocation3 + $0x148] sm:$0xff] %vm558_vm1, %v998_v52  ;;  %11945 = vst [vmem:[#allocation78_spill] sm:$0xff] %v9680_v9  ;;  %v3695_v52 = vld [vmem:[#allocation2 + $0x58] sm:$0xff] }
 0x56f   : > { %1070 = vrot.lane.b32.xlu1 %v8360_v59, %s8093_s20  ;;  %v1132_v63 = vpop.permute.xlu1 %1131  ;;  %7160 = vmatmul.mubr.msk.bf16.gmra.mrb[52].mxu1 %vm1740_vm2, %v3235_v27 }
 0x570   : > { %1169 = vst.msk [vmem:[#allocation2 + $0x1d8] sm:$0xff] %vm558_vm1, %v1132_v63  ;;  %7187 = vmatprep.mubr.msk.bf16.mxu1 %vm558_vm1, %v3692_v25  ;;  %v9684_v49 = vpop.eup %7683  ;;  %v3697_v25 = vld [vmem:[#allocation2 + $0xc8] sm:$0xff] }
 0x571   : > { %v1000_v19 = vpop.permute.xlu0 %999  ;;  %v3720_v1 = vld [vmem:[#allocation3 + $0x1c0] sm:$0xff]  ;;  %11946 = vst [vmem:[#allocation79_spill] sm:$0xff] %v9684_v49 }
 0x572   : > { %1038 = vst.msk [vmem:[#allocation3 + $0x150] sm:$0xff] %vm558_vm1, %v1000_v19  ;;  %7515 = vmatprep.subr.msk.bf16.mxu0 %vm558_vm1, %v3720_v1 }
 0x573   : > { %v672_v12 = vpop.permute.xlu1 %671 }
 0x574   : > { %v9686_v32 = vpop.eup %7685  ;;  %711 = vst.msk [vmem:[#allocation4 + $0x40] sm:$0xff] %vm558_vm1, %v672_v12  ;;  %v4052_v12 = vsel %vm558_vm1, %v3720_v1, 0 }
 0x575   : > { %11947 = vst [vmem:[#allocation80_spill] sm:$0xff] %v9686_v32  ;;  %v9689_v3 = vpop.eup %7687  ;;  %v740_v55 = vpop.permute.xlu0 %739  ;;  %v3238_v39 = vpack.c.bf16 %v9686_v32, %v9680_v9  ;;  %v3717_v40 = vld [vmem:[#allocation3 + $0x148] sm:$0xff] }
 0x576   : > { %11948 = vst [vmem:[#allocation81_spill] sm:$0xff] %v9689_v3  ;;  %778 = vst.msk [vmem:[#allocation2 + $0xd0] sm:$0xff] %vm558_vm1, %v740_v55  ;;  %v3239_v56 = vpack.c.bf16 %v9684_v49, %v9689_v3  ;;  %v3966_v63 = vsel %vm558_vm1, %v3717_v40, 0  ;;  %v3761_v49 = vld [vmem:[%s11767_s3 + $0xa8] sm:$0xff] }
 0x577   : > { %v674_v43 = vpop.permute.xlu1 %673  ;;  %7175 = vmatprep.mubr.msk.bf16.mxu0 %vm1740_vm2, %v3238_v39  ;;  %7188 = vmatmul.mubr.msk.bf16.vlgmr.msra.gmra.mrb[56].mxu1 %vm558_vm1, %v3693_v24  ;;  %v3721_v39 = vld [vmem:[#allocation3 + $0x1c8] sm:$0xff] }
 0x578   : > { %712 = vst.msk [vmem:[#allocation4 + $0x48] sm:$0xff] %vm558_vm1, %v674_v43  ;;  %7212 = vmatpush3.bf16.xpose.msra.mxu1 %v3963_v36  ;;  %7176 = vmatmul.mubr.msk.bf16.gmra.mrb[100].mxu0 %vm1740_vm2, %v3239_v56 }
 0x579   : > { %7191 = vmatprep.mubr.msk.bf16.mxu1 %vm558_vm1, %v3694_v57  ;;  %7512 = vmatprep.subr.msk.bf16.mxu1 %vm558_vm1, %v3717_v40  ;;  %v742_v0 = vpop.permute.xlu0 %741  ;;  %v3718_v19 = vld [vmem:[#allocation3 + $0x150] sm:$0xff] }
 0x57a   : > { %7203 = vmatprep.mubr.msk.bf16.mxu0 %vm558_vm1, %v3696_v58  ;;  %779 = vst.msk [vmem:[#allocation2 + $0xd8] sm:$0xff] %vm558_vm1, %v742_v0  ;;  %v3969_v57 = vsel %vm558_vm1, %v3718_v19, 0  ;;  %v3719_v58 = vld [vmem:[#allocation3 + $0x158] sm:$0xff]  ;;  %v4055_v0 = vsel %vm558_vm1, %v3721_v39, 0 }
 0x57b   : > { %v868_v13 = vpop.permute.xlu1 %867 }
 0x57c   : > { %907 = vst.msk [vmem:[#allocation4 + $0xc8] sm:$0xff] %vm558_vm1, %v868_v13  ;;  %v3722_v13 = vld [vmem:[#allocation3 + $0x1d0] sm:$0xff] }
 0x57d   : > { %v931_v41 = vpop.permute.xlu0 %930  ;;  %v3698_v55 = vld [vmem:[#allocation2 + $0xd0] sm:$0xff] }
 0x57e   : > { %971 = vst.msk [vmem:[#allocation2 + $0x140] sm:$0xff] %vm558_vm1, %v931_v41 }
 0x57f   : > { %v676_v27 = vpop.permute.xlu1 %675  ;;  %7192 = vmatmul.mubr.msk.bf16.gmra.mrb[60].mxu1 %vm558_vm1, %v3695_v52 }
 0x580   : > { %713 = vst.msk [vmem:[#allocation4 + $0x50] sm:$0xff] %vm558_vm1, %v676_v27  ;;  %7214 = vmatpush3.bf16.xpose.msra.mxu1 %v3966_v63  ;;  %7204 = vmatmul.mubr.msk.bf16.vlgmr.msra.gmra.mrb[104].mxu0 %vm558_vm1, %v3697_v25 }
 0x581   : > { %7513 = vmatprep.subr.msk.bf16.mxu1 %vm558_vm1, %v3718_v19  ;;  %7228 = vmatpush3.bf16.xpose.msra.mxu0 %v4052_v12  ;;  %v1126_v24 = vpop.permute.xlu0 %1125  ;;  %v3699_v40 = vld [vmem:[#allocation2 + $0xd8] sm:$0xff]  ;;  %v3972_v19 = vsel %vm558_vm1, %v3719_v58, 0  ;;  %v4058_v12 = vsel %vm558_vm1, %v3722_v13, 0 }
 0x582   : > { %7207 = vmatprep.mubr.msk.bf16.mxu0 %vm558_vm1, %v3698_v55  ;;  %7516 = vmatprep.subr.msk.bf16.mxu0 %vm558_vm1, %v3721_v39  ;;  %1166 = vst.msk [vmem:[#allocation2 + $0x1c0] sm:$0xff] %vm558_vm1, %v1126_v24  ;;  %v3724_v55 = vld [vmem:[#allocation4 + $0x40] sm:$0xff]  ;;  %v3723_v39 = vld [vmem:[#allocation3 + $0x1d8] sm:$0xff] }
 0x583   : > { %v678_v56 = vpop.permute.xlu1 %677 }
 0x584   : > { %714 = vst.msk [vmem:[#allocation4 + $0x58] sm:$0xff] %vm558_vm1, %v678_v56 }
 0x585   : > { %v935_v43 = vpop.permute.xlu0 %934  ;;  %v3700_v36 = vld [vmem:[#allocation2 + $0x140] sm:$0xff] }
 0x586   : > { %973 = vst.msk [vmem:[#allocation2 + $0x150] sm:$0xff] %vm558_vm1, %v935_v43  ;;  %7219 = vmatprep.mubr.msk.bf16.mxu1 %vm558_vm1, %v3700_v36  ;;  %v3701_v36 = vld [vmem:[#allocation2 + $0x148] sm:$0xff] }
 0x587   : > { %v872_v1 = vpop.permute.xlu1 %871 }
 0x588   : > { %909 = vst.msk [vmem:[#allocation4 + $0xd8] sm:$0xff] %vm558_vm1, %v872_v1  ;;  %7216 = vmatpush3.bf16.xpose.msra.mxu1 %v3969_v57  ;;  %7208 = vmatmul.mubr.msk.bf16.gmra.mrb[108].mxu0 %vm558_vm1, %v3699_v40  ;;  %v4061_v40 = vsel %vm558_vm1, %v3723_v39, 0 }
 0x589   : > { %7514 = vmatprep.subr.msk.bf16.mxu1 %vm558_vm1, %v3719_v58  ;;  %7230 = vmatpush3.bf16.xpose.msra.mxu0 %v4055_v0  ;;  %v1130_v41 = vpop.permute.xlu0 %1129  ;;  %v3704_v52 = vld [vmem:[#allocation2 + $0x1c0] sm:$0xff]  ;;  %v3725_v58 = vld [vmem:[#allocation4 + $0x48] sm:$0xff] }
 0x58a   : > { %7517 = vmatprep.subr.msk.bf16.mxu0 %vm558_vm1, %v3722_v13  ;;  %1168 = vst.msk [vmem:[#allocation2 + $0x1d0] sm:$0xff] %vm558_vm1, %v1130_v41  ;;  %7235 = vmatprep.mubr.msk.bf16.mxu0 %vm558_vm1, %v3704_v52  ;;  %v3726_v52 = vld [vmem:[#allocation4 + $0x50] sm:$0xff] }
 0x58b   : > { %v1061_v27 = vpop.permute.xlu1 %1060 }
 0x58c   : > { %1101 = vst.msk [vmem:[#allocation4 + $0x140] sm:$0xff] %vm558_vm1, %v1061_v27 }
 0x58d   : > { %v866_v63 = vpop.permute.xlu0 %865  ;;  %v3702_v57 = vld [vmem:[#allocation2 + $0x150] sm:$0xff] }
 0x58e   : > { %906 = vst.msk [vmem:[#allocation4 + $0xc0] sm:$0xff] %vm558_vm1, %v866_v63  ;;  %v3703_v63 = vld [vmem:[#allocation2 + $0x158] sm:$0xff] }
 0x58f   : > { %v1063_v25 = vpop.permute.xlu1 %1062 }
 0x590   : > { %1102 = vst.msk [vmem:[#allocation4 + $0x148] sm:$0xff] %vm558_vm1, %v1063_v25  ;;  %7218 = vmatpush3.bf16.xpose.msra.mxu1 %v3972_v19  ;;  %v3705_v19 = vld [vmem:[#allocation2 + $0x1c8] sm:$0xff] }
 0x591   : > { %7232 = vmatpush3.bf16.xpose.msra.mxu0 %v4058_v12  ;;  %7243 = vmatprep.subr.bf16.mxu1 %v3724_v55  ;;  %v870_v24 = vpop.permute.xlu0 %869  ;;  %v3706_v12 = vld [vmem:[#allocation2 + $0x1d0] sm:$0xff] }
 0x592   : > { %7518 = vmatprep.subr.msk.bf16.mxu0 %vm558_vm1, %v3723_v39  ;;  %908 = vst.msk [vmem:[#allocation4 + $0xd0] sm:$0xff] %vm558_vm1, %v870_v24  ;;  %v3729_v24 = vld [vmem:[#allocation4 + $0xc8] sm:$0xff] }
 0x593   : > { %v1258_v56 = vpop.permute.xlu1 %1257 }
 0x594   : > { %1297 = vst.msk [vmem:[#allocation4 + $0x1c8] sm:$0xff] %vm558_vm1, %v1258_v56 }
 0x595   : > { %v1256_v43 = vpop.permute.xlu0 %1255  ;;  %v3728_v0 = vld [vmem:[#allocation4 + $0xc0] sm:$0xff] }
 0x596   : > { %1296 = vst.msk [vmem:[#allocation4 + $0x1c0] sm:$0xff] %vm558_vm1, %v1256_v43  ;;  %v9750_v43 = vld [vmem:[#allocation4 + $0x140] sm:$0xff] }
 0x597   : > { %v1065_v1 = vpop.permute.xlu1 %1064  ;;  %7220 = vmatmul.mubr.msk.bf16.vlgmr.msra.gmra.mrb[64].mxu1 %vm558_vm1, %v3701_v36 }
 0x598   : > { %1103 = vst.msk [vmem:[#allocation4 + $0x150] sm:$0xff] %vm558_vm1, %v1065_v1  ;;  %7223 = vmatprep.mubr.msk.bf16.mxu1 %vm558_vm1, %v3702_v57  ;;  %7244 = vmatpush3.bf16.msra.mxu1 %v3724_v55  ;;  %v3727_v55 = vld [vmem:[#allocation4 + $0x58] sm:$0xff] }
 0x599   : > { %7234 = vmatpush3.bf16.xpose.msra.mxu0 %v4061_v40  ;;  %7245 = vmatprep.subr.bf16.mxu1 %v3725_v58  ;;  %v1067_v13 = vpop.permute.xlu0 %1066  ;;  %v3730_v1 = vld [vmem:[#allocation4 + $0xd0] sm:$0xff]  ;;  %v3707_v40 = vld [vmem:[#allocation2 + $0x1d8] sm:$0xff] }
 0x59a   : > { %7259 = vmatprep.subr.bf16.mxu0 %v3728_v0  ;;  %1104 = vst.msk [vmem:[#allocation4 + $0x158] sm:$0xff] %vm558_vm1, %v1067_v13 }
 0x59b   : > { %v1260_v41 = vpop.permute.xlu1 %1259 }
 0x59c   : > { %1298 = vst.msk [vmem:[#allocation4 + $0x1d0] sm:$0xff] %vm558_vm1, %v1260_v41  ;;  %7246 = vmatpush3.bf16.msra.mxu1 %v3725_v58 }
 0x59d   : > { %7247 = vmatprep.subr.bf16.mxu1 %v3726_v52  ;;  %v616_v27 = vpop.permute.xlu0 %615 }
 0x59e   : > { %651 = vst.msk [vmem:[#allocation3 + $0x60] sm:$0xff] %vm558_vm1, %v616_v27 }
 0x59f   : > { %v1262_v25 = vpop.permute.xlu1 %1261  ;;  %7224 = vmatmul.mubr.msk.bf16.gmra.mrb[68].mxu1 %vm558_vm1, %v3703_v63 }
 0x5a0   : > { %1299 = vst.msk [vmem:[#allocation4 + $0x1d8] sm:$0xff] %vm558_vm1, %v1262_v25  ;;  %7236 = vmatmul.mubr.msk.bf16.vlgmr.msra.gmra.mrb[112].mxu0 %vm558_vm1, %v3705_v19  ;;  %7248 = vmatpush3.bf16.msra.mxu1 %v3726_v52  ;;  %v9758_v52 = vld [vmem:[#allocation4 + $0x1c0] sm:$0xff] }
 0x5a1   : > { %7239 = vmatprep.mubr.msk.bf16.mxu0 %vm558_vm1, %v3706_v12  ;;  %7249 = vmatprep.subr.bf16.mxu1 %v3727_v55  ;;  %v811_v39 = vpop.permute.xlu0 %810 }
 0x5a2   : > { %7260 = vmatpush3.bf16.msra.mxu0 %v3728_v0  ;;  %846 = vst.msk [vmem:[#allocation3 + $0xe8] sm:$0xff] %vm558_vm1, %v811_v39  ;;  %v3731_v0 = vld [vmem:[#allocation4 + $0xd8] sm:$0xff] }
 0x5a3   : > { %7261 = vmatprep.subr.bf16.mxu0 %v3729_v24  ;;  %v809_v56 = vpop.permute.xlu1 %808 }
 0x5a4   : > { %845 = vst.msk [vmem:[#allocation3 + $0xe0] sm:$0xff] %vm558_vm1, %v809_v56  ;;  %7250 = vmatpush3.bf16.msra.mxu1 %v3727_v55 }
 0x5a5   : > { %7275 = vmatprep.subr.bf16.mxu1 %v9750_v43  ;;  %v622_v36 = vpop.permute.xlu0 %621 }
 0x5a6   : > { %7262 = vmatpush3.bf16.msra.mxu0 %v3729_v24  ;;  %654 = vst.msk [vmem:[#allocation3 + $0x78] sm:$0xff] %vm558_vm1, %v622_v36 }
 0x5a7   : > { %7263 = vmatprep.subr.bf16.mxu0 %v3730_v1  ;;  %v618_v57 = vpop.permute.xlu1 %617 }
 0x5a8   : > { %652 = vst.msk [vmem:[#allocation3 + $0x68] sm:$0xff] %vm558_vm1, %v618_v57  ;;  %7240 = vmatmul.mubr.msk.bf16.gmra.mrb[116].mxu0 %vm558_vm1, %v3707_v40 }
 0x5a9   : > { %v1004_v58 = vpop.permute.xlu0 %1003 }
 0x5aa   : > { %7264 = vmatpush3.bf16.msra.mxu0 %v3730_v1  ;;  %1040 = vst.msk [vmem:[#allocation3 + $0x160] sm:$0xff] %vm558_vm1, %v1004_v58 }
 0x5ab   : > { %7265 = vmatprep.subr.bf16.mxu0 %v3731_v0  ;;  %v620_v13 = vpop.permute.xlu1 %619 }
 0x5ac   : > { %653 = vst.msk [vmem:[#allocation3 + $0x70] sm:$0xff] %vm558_vm1, %v620_v13 }
 0x5ad   : > { %v1199_v41 = vpop.permute.xlu0 %1198 }
 0x5ae   : > { %7266 = vmatpush3.bf16.msra.mxu0 %v3731_v0  ;;  %1235 = vst.msk [vmem:[#allocation3 + $0x1e0] sm:$0xff] %vm558_vm1, %v1199_v41 }
 0x5af   : > { %7291 = vmatprep.subr.bf16.mxu0 %v9758_v52  ;;  %v813_v27 = vpop.permute.xlu1 %812 }
 0x5b0   : > { %847 = vst.msk [vmem:[#allocation3 + $0xf0] sm:$0xff] %vm558_vm1, %v813_v27 }
 0x5b1   : > { %v1006_v63 = vpop.permute.xlu0 %1005 }
 0x5b2   : > { %1041 = vst.msk [vmem:[#allocation3 + $0x168] sm:$0xff] %vm558_vm1, %v1006_v63 }
 0x5b3   : > { %v815_v25 = vpop.permute.xlu1 %814 }
 0x5b4   : > { %848 = vst.msk [vmem:[#allocation3 + $0xf8] sm:$0xff] %vm558_vm1, %v815_v25 }
 0x5b5   : > { %v1008_v19 = vpop.permute.xlu0 %1007 }
 0x5b6   : > { %1042 = vst.msk [vmem:[#allocation3 + $0x170] sm:$0xff] %vm558_vm1, %v1008_v19 }
 0x5b7   : > { %v744_v12 = vpop.permute.xlu1 %743 }
 0x5b8   : > { %780 = vst.msk [vmem:[#allocation2 + $0xe0] sm:$0xff] %vm558_vm1, %v744_v12 }
 0x5b9   : > { %v748_v55 = vpop.permute.xlu0 %747 }
 0x5ba   : > { %782 = vst.msk [vmem:[#allocation2 + $0xf0] sm:$0xff] %vm558_vm1, %v748_v55 }
 0x5bb   : > { %v746_v39 = vpop.permute.xlu1 %745 }
 0x5bc   : > { %781 = vst.msk [vmem:[#allocation2 + $0xe8] sm:$0xff] %vm558_vm1, %v746_v39 }
 0x5bd   : > { %v750_v24 = vpop.permute.xlu0 %749 }
 0x5be   : > { %783 = vst.msk [vmem:[#allocation2 + $0xf8] sm:$0xff] %vm558_vm1, %v750_v24 }
 0x5bf   : > { %v1201_v56 = vpop.permute.xlu1 %1200 }
 0x5c0   : > { %1236 = vst.msk [vmem:[#allocation3 + $0x1e8] sm:$0xff] %vm558_vm1, %v1201_v56 }
 0x5c1   : > { %v939_v36 = vpop.permute.xlu0 %938 }
 0x5c2   : > { %975 = vst.msk [vmem:[#allocation2 + $0x160] sm:$0xff] %vm558_vm1, %v939_v36 }
 0x5c3   : > { %v1203_v1 = vpop.permute.xlu1 %1202 }
 0x5c4   : > { %1237 = vst.msk [vmem:[#allocation3 + $0x1f0] sm:$0xff] %vm558_vm1, %v1203_v1 }
 0x5c5   : > { %v1134_v57 = vpop.permute.xlu0 %1133 }
 0x5c6   : > { %1170 = vst.msk [vmem:[#allocation2 + $0x1e0] sm:$0xff] %vm558_vm1, %v1134_v57 }
 0x5c7   : > { %v1010_v40 = vpop.permute.xlu1 %1009 }
 0x5c8   : > { %1043 = vst.msk [vmem:[#allocation3 + $0x178] sm:$0xff] %vm558_vm1, %v1010_v40 }
 0x5c9   : > { %v943_v58 = vpop.permute.xlu0 %942 }
 0x5ca   : > { %977 = vst.msk [vmem:[#allocation2 + $0x170] sm:$0xff] %vm558_vm1, %v943_v58 }
 0x5cb   : > { %v1205_v0 = vpop.permute.xlu1 %1204 }
 0x5cc   : > { %1238 = vst.msk [vmem:[#allocation3 + $0x1f8] sm:$0xff] %vm558_vm1, %v1205_v0 }
 0x5cd   : > { %v1138_v13 = vpop.permute.xlu0 %1137 }
 0x5ce   : > { %1172 = vst.msk [vmem:[#allocation2 + $0x1f0] sm:$0xff] %vm558_vm1, %v1138_v13 }
 0x5cf   : > { %v941_v41 = vpop.permute.xlu1 %940 }
 0x5d0   : > { %976 = vst.msk [vmem:[#allocation2 + $0x168] sm:$0xff] %vm558_vm1, %v941_v41 }
 0x5d1   : > { %v9779_v27 = vpop.f32.mrb[40].mxu1  ;;  %v874_v63 = vpop.permute.xlu0 %873 }
 0x5d2   : > { %11949 = vst [vmem:[#allocation82_spill] sm:$0xff] %v9779_v27  ;;  %910 = vst.msk [vmem:[#allocation4 + $0xe0] sm:$0xff] %vm558_vm1, %v874_v63  ;;  %v9782_v25 = vpop.f32.mrb[41].mxu1 }
 0x5d3   : > { %11950 = vst [vmem:[#allocation83_spill] sm:$0xff] %v9782_v25  ;;  %v1136_v19 = vpop.permute.xlu1 %1135  ;;  %v9784_v12 = vpop.f32.mrb[42].mxu1 }
 0x5d4   : > { %11951 = vst [vmem:[#allocation84_spill] sm:$0xff] %v9784_v12  ;;  %1171 = vst.msk [vmem:[#allocation2 + $0x1e8] sm:$0xff] %vm558_vm1, %v1136_v19  ;;  %v9787_v55 = vpop.f32.mrb[43].mxu1 }
 0x5d5   : > { %11952 = vst [vmem:[#allocation85_spill] sm:$0xff] %v9787_v55  ;;  %v876_v39 = vpop.permute.xlu0 %875 }
 0x5d6   : > { %911 = vst.msk [vmem:[#allocation4 + $0xe8] sm:$0xff] %vm558_vm1, %v876_v39 }
 0x5d7   : > { %v945_v24 = vpop.permute.xlu1 %944 }
 0x5d8   : > { %978 = vst.msk [vmem:[#allocation2 + $0x178] sm:$0xff] %vm558_vm1, %v945_v24 }
 0x5d9   : > { %v878_v56 = vpop.permute.xlu0 %877 }
 0x5da   : > { %912 = vst.msk [vmem:[#allocation4 + $0xf0] sm:$0xff] %vm558_vm1, %v878_v56 }
 0x5db   : > { %v1140_v36 = vpop.permute.xlu1 %1139  ;;  %v9792_v1 = vpop.f32.mrb[88].mxu0 }
 0x5dc   : > { %11953 = vst [vmem:[#allocation86_spill] sm:$0xff] %v9792_v1  ;;  %1173 = vst.msk [vmem:[#allocation2 + $0x1f8] sm:$0xff] %vm558_vm1, %v1140_v36  ;;  %v9795_v57 = vpop.f32.mrb[89].mxu0 }
 0x5dd   : > { %11954 = vst [vmem:[#allocation87_spill] sm:$0xff] %v9795_v57  ;;  %v9797_v40 = vpop.f32.mrb[90].mxu0  ;;  %v686_v58 = vpop.permute.xlu0 %685 }
 0x5de   : > { %11955 = vst [vmem:[#allocation88_spill] sm:$0xff] %v9797_v40  ;;  %v9799_v0 = vpop.f32.mrb[91].mxu0  ;;  %718 = vst.msk [vmem:[#allocation4 + $0x78] sm:$0xff] %vm558_vm1, %v686_v58 }
 0x5df   : > { %11956 = vst [vmem:[#allocation89_spill] sm:$0xff] %v9799_v0  ;;  %v680_v13 = vpop.permute.xlu1 %679 }
 0x5e0   : > { %715 = vst.msk [vmem:[#allocation4 + $0x60] sm:$0xff] %vm558_vm1, %v680_v13 }
 0x5e1   : > { %v1069_v41 = vpop.permute.xlu0 %1068 }
 0x5e2   : > { %1105 = vst.msk [vmem:[#allocation4 + $0x160] sm:$0xff] %vm558_vm1, %v1069_v41 }
 0x5e3   : > { %v682_v63 = vpop.permute.xlu1 %681 }
 0x5e4   : > { %716 = vst.msk [vmem:[#allocation4 + $0x68] sm:$0xff] %vm558_vm1, %v682_v63 }
 0x5e5   : > { %v1264_v19 = vpop.permute.xlu0 %1263 }
 0x5e6   : > { %v9805_v39 = vpop.f32.mrb[44].mxu1  ;;  %1300 = vst.msk [vmem:[#allocation4 + $0x1e0] sm:$0xff] %vm558_vm1, %v1264_v19 }
 0x5e7   : > { %11957 = vst [vmem:[#allocation90_spill] sm:$0xff] %v9805_v39  ;;  %v684_v24 = vpop.permute.xlu1 %683  ;;  %v9808_v56 = vpop.f32.mrb[45].mxu1 }
 0x5e8   : > { %11958 = vst [vmem:[#allocation91_spill] sm:$0xff] %v9808_v56  ;;  %717 = vst.msk [vmem:[#allocation4 + $0x70] sm:$0xff] %vm558_vm1, %v684_v24  ;;  %v9811_v36 = vpop.f32.mrb[46].mxu1 }
 0x5e9   : > { %11959 = vst [vmem:[#allocation92_spill] sm:$0xff] %v9811_v36  ;;  %v9813_v58 = vpop.f32.mrb[47].mxu1 }
 0x5ea   : > { %11960 = vst [vmem:[#allocation93_spill] sm:$0xff] %v9813_v58 }
 0x5eb   : > { %v880_v13 = vpop.permute.xlu1 %879 }
 0x5ec   : > { %913 = vst.msk [vmem:[#allocation4 + $0xf8] sm:$0xff] %vm558_vm1, %v880_v13 }
 0x5ef   : > { %v1071_v41 = vpop.permute.xlu1 %1070 }
 0x5f0   : > { %1106 = vst.msk [vmem:[#allocation4 + $0x168] sm:$0xff] %vm558_vm1, %v1071_v41 }
 0x5f2   : > { %v9817_v63 = vpop.f32.mrb[92].mxu0 }
 0x5f3   : > { %11961 = vst [vmem:[#allocation94_spill] sm:$0xff] %v9817_v63  ;;  %v9819_v39 = vpop.f32.mrb[93].mxu0 }
 0x5f4   : > { %11962 = vst [vmem:[#allocation95_spill] sm:$0xff] %v9819_v39  ;;  %v9821_v19 = vpop.f32.mrb[94].mxu0  ;;  %v3742_v39 = vld [vmem:[%s11767_s3 + $0x10] sm:$0xff] }
 0x5f5   : > { %11963 = vst [vmem:[#allocation96_spill] sm:$0xff] %v9821_v19  ;;  %v9823_v12 = vpop.f32.mrb[95].mxu0 }
 0x5f6   : > { %11964 = vst [vmem:[#allocation97_spill] sm:$0xff] %v9823_v12 }
 0x5fa   : > { %v9825_v56 = vpop.f32.mrb[48].mxu1 }
 0x5fb   : > { %11965 = vst [vmem:[#allocation98_spill] sm:$0xff] %v9825_v56  ;;  %v9827_v24 = vpop.f32.mrb[49].mxu1 }
 0x5fc   : > { %11966 = vst [vmem:[#allocation99_spill] sm:$0xff] %v9827_v24  ;;  %v9829_v36 = vpop.f32.mrb[50].mxu1 }
 0x5fd   : > { %11967 = vst [vmem:[#allocation100_spill] sm:$0xff] %v9829_v36  ;;  %v9831_v58 = vpop.f32.mrb[51].mxu1 }
 0x5fe   : > { %11968 = vst [vmem:[#allocation101_spill] sm:$0xff] %v9831_v58 }
 0x606   : > { %v9833_v13 = vpop.f32.mrb[96].mxu0 }
 0x607   : > { %11969 = vst [vmem:[#allocation102_spill] sm:$0xff] %v9833_v13  ;;  %v9835_v27 = vpop.f32.mrb[97].mxu0  ;;  %v3740_v13 = vld [vmem:[%s11767_s3] sm:$0xff] }
 0x608   : > { %11970 = vst [vmem:[#allocation103_spill] sm:$0xff] %v9835_v27  ;;  %v9837_v41 = vpop.f32.mrb[98].mxu0 }
 0x609   : > { %11971 = vst [vmem:[#allocation104_spill] sm:$0xff] %v9837_v41  ;;  %v9839_v25 = vpop.f32.mrb[99].mxu0 }
 0x60a   : > { %11972 = vst [vmem:[#allocation105_spill] sm:$0xff] %v9839_v25 }
 0x642   : > { %v9841_v55 = vpop.f32.mrb[52].mxu1 }
 0x643   : > { %11973 = vst [vmem:[#allocation106_spill] sm:$0xff] %v9841_v55  ;;  %v9843_v19 = vpop.f32.mrb[53].mxu1 }
 0x644   : > { %11974 = vst [vmem:[#allocation107_spill] sm:$0xff] %v9843_v19  ;;  %v9845_v63 = vpop.f32.mrb[54].mxu1 }
 0x645   : > { %11975 = vst [vmem:[#allocation108_spill] sm:$0xff] %v9845_v63  ;;  %v9847_v12 = vpop.f32.mrb[55].mxu1  ;;  %v3741_v63 = vld [vmem:[%s11767_s3 + $0x8] sm:$0xff] }
 0x646   : > { %11976 = vst [vmem:[#allocation109_spill] sm:$0xff] %v9847_v12 }
 0x64a   : > { %v7189_v36 = vpop.f32.mrb[56].mxu1 }
 0x64b   : > { %v9855_v41 = vadd.f32 %v7189_v36, %v3742_v39  ;;  %v9857_v25 = vpop.f32.mrb[100].mxu0  ;;  %v3830_v55 = vpop.f32.mrb[57].mxu1  ;;  %v3743_v39 = vld [vmem:[%s11767_s3 + $0x18] sm:$0xff] }
 0x64c   : > { %11977 = vst [vmem:[#allocation110_spill] sm:$0xff] %v9857_v25  ;;  %v9862_v19 = vpop.f32.mrb[101].mxu0  ;;  %v7190_v12 = vpop.f32.mrb[58].mxu1  ;;  %v9864_v27 = vadd.f32 %v3830_v55, %v3740_v13 }
 0x64d   : > { %11978 = vst [vmem:[#allocation111_spill] sm:$0xff] %v9862_v19  ;;  %v9866_v56 = vpop.f32.mrb[102].mxu0  ;;  %v3833_v58 = vpop.f32.mrb[59].mxu1  ;;  %v4134_v24 = vsel %vm1740_vm2, %v9855_v41, -inf  ;;  %v9879_v55 = vadd.f32 %v7190_v12, %v3743_v39  ;;  %v3751_v12 = vld [vmem:[%s11767_s3 + $0x58] sm:$0xff] }
 0x64e   : > { %11979 = vst [vmem:[#allocation112_spill] sm:$0xff] %v9866_v56  ;;  %v9873_v36 = vadd.f32 %v3833_v58, %v3741_v63  ;;  %4135 = vmax.xlane.f32.xlu0 %v4134_v24  ;;  %v9875_v25 = vpop.f32.mrb[103].mxu0  ;;  %v4128_v13 = vsel %vm1740_vm2, %v9864_v27, -inf  ;;  %v3750_v56 = vld [vmem:[%s11767_s3 + $0x50] sm:$0xff]  ;;  %v3748_v24 = vld [vmem:[%s11767_s3 + $0x40] sm:$0xff] }
 0x64f   : > { %11980 = vst [vmem:[#allocation113_spill] sm:$0xff] %v9875_v25  ;;  %v4137_v57 = vsel %vm1740_vm2, %v9879_v55, -inf }
 0x650   : > { %v4131_v19 = vsel %vm1740_vm2, %v9873_v36, -inf }
 0x651   : > { %4132 = vmax.xlane.f32.xlu1 %v4131_v19 }
 0x652   : > { %v7193_v40 = vpop.f32.mrb[60].mxu1  ;;  %4129 = vmax.xlane.f32.xlu0 %v4128_v13 }
 0x653   : > { %v3846_v58 = vpop.f32.mrb[61].mxu1  ;;  %v7205_v63 = vpop.f32.mrb[104].mxu0 }
 0x654   : > { %v9892_v19 = vadd.f32 %v7205_v63, %v3750_v56  ;;  %v7194_v39 = vpop.f32.mrb[62].mxu1  ;;  %v3919_v25 = vpop.f32.mrb[105].mxu0  ;;  %v3745_v63 = vld [vmem:[%s11767_s3 + $0x28] sm:$0xff] }
 0x655   : > { %v3849_v1 = vpop.f32.mrb[63].mxu1  ;;  %v7206_v0 = vpop.f32.mrb[106].mxu0  ;;  %v9896_v13 = vadd.f32 %v3919_v25, %v3748_v24 }
 0x656   : > { %v9898_v44 = vadd.f32 %v7206_v0, %v3751_v12  ;;  %4138 = vmax.xlane.f32.xlu0 %v4137_v57  ;;  %v3922_v20 = vpop.f32.mrb[107].mxu0  ;;  %v4158_v56 = vsel %vm1740_vm2, %v9892_v19, -inf  ;;  %v3746_v57 = vld [vmem:[%s11767_s3 + $0x30] sm:$0xff]  ;;  %v9915_v0 = vadd.f32 %v3849_v1, %v3745_v63  ;;  %v3744_v1 = vld [vmem:[%s11767_s3 + $0x20] sm:$0xff] }
 0x657   : > { %4159 = vmax.xlane.f32.xlu1 %v4158_v56  ;;  %v9910_v24 = vadd.f32 %v3922_v20, %v3749_v15  ;;  %v4152_v12 = vsel %vm1740_vm2, %v9896_v13, -inf  ;;  %v3752_v56 = vld [vmem:[%s11767_s3 + $0x60] sm:$0xff]  ;;  %v9922_v45 = vadd.f32 %v7193_v40, %v3746_v57  ;;  %v9933_v21 = vadd.f32 %v3846_v58, %v3744_v1  ;;  %v3747_v57 = vld [vmem:[%s11767_s3 + $0x38] sm:$0xff]  ;;  %v3754_v58 = vld [vmem:[%s11767_s3 + $0x70] sm:$0xff] }
 0x658   : > { %v4161_v25 = vsel %vm1740_vm2, %v9898_v44, -inf  ;;  %v3758_v1 = vld [vmem:[%s11767_s3 + $0x90] sm:$0xff] }
 0x659   : > { %v4155_v20 = vsel %vm1740_vm2, %v9910_v24, -inf  ;;  %v4146_v40 = vsel %vm1740_vm2, %v9922_v45, -inf }
 0x65a   : > { %4162 = vmax.xlane.f32.xlu0 %v4161_v25 }
 0x65b   : > { %4153 = vmax.xlane.f32.xlu1 %v4152_v12  ;;  %v7209_v22 = vpop.f32.mrb[108].mxu0  ;;  %v4143_v12 = vsel %vm1740_vm2, %v9915_v0, -inf }
 0x65c   : > { %v3935_v30 = vpop.f32.mrb[109].mxu0 }
 0x65d   : > { %v7210_v15 = vpop.f32.mrb[110].mxu0  ;;  %v9929_v63 = vadd.f32 %v3935_v30, %v3752_v56  ;;  %v9942_v56 = vadd.f32 %v7194_v39, %v3747_v57  ;;  %v3755_v39 = vld [vmem:[%s11767_s3 + $0x78] sm:$0xff] }
 0x65e   : > { %4156 = vmax.xlane.f32.xlu0 %v4155_v20  ;;  %v3938_v25 = vpop.f32.mrb[111].mxu0  ;;  %v4140_v20 = vsel %vm1740_vm2, %v9933_v21, -inf  ;;  %v9964_v9 = vadd.f32 %v7210_v15, %v3755_v39  ;;  %v3759_v39 = vld [vmem:[%s11767_s3 + $0x98] sm:$0xff] }
 0x65f   : > { %4144 = vmax.xlane.f32.xlu1 %v4143_v12  ;;  %v4164_v30 = vsel %vm1740_vm2, %v9929_v63, -inf  ;;  %v9952_v12 = vadd.f32 %v7209_v22, %v3754_v58 }
 0x661   : > { %v4170_v18 = vsel %vm1740_vm2, %v9952_v12, -inf }
 0x662   : > { %4147 = vmax.xlane.f32.xlu0 %v4146_v40  ;;  %v4149_v40 = vsel %vm1740_vm2, %v9942_v56, -inf }
 0x663   : > { %4165 = vmax.xlane.f32.xlu1 %v4164_v30  ;;  %v3756_v30 = vld [vmem:[%s11767_s3 + $0x80] sm:$0xff] }
 0x666   : > { %4141 = vmax.xlane.f32.xlu0 %v4140_v20 }
 0x66a   : > { %v7221_v57 = vpop.f32.mrb[64].mxu1  ;;  %4150 = vmax.xlane.f32.xlu0 %v4149_v40  ;;  %v3753_v40 = vld [vmem:[%s11767_s3 + $0x68] sm:$0xff] }
 0x66b   : > { %v9962_v20 = vadd.f32 %v7221_v57, %v3758_v1  ;;  %v4008_v2 = vpop.f32.mrb[65].mxu1  ;;  %v9975_v1 = vadd.f32 %v3938_v25, %v3753_v40 }
 0x66c   : > { %v7222_v3 = vpop.f32.mrb[66].mxu1  ;;  %v9966_v22 = vadd.f32 %v4008_v2, %v3756_v30  ;;  %v4173_v2 = vsel %vm1740_vm2, %v9964_v9, -inf }
 0x66d   : > { %v4011_v58 = vpop.f32.mrb[67].mxu1  ;;  %v4182_v50 = vsel %vm1740_vm2, %v9962_v20, -inf  ;;  %v9990_v29 = vadd.f32 %v7222_v3, %v3759_v39 }
 0x66e   : > { %4183 = vmax.xlane.f32.xlu1 %v4182_v50  ;;  %4171 = vmax.xlane.f32.xlu0 %v4170_v18  ;;  %v4176_v15 = vsel %vm1740_vm2, %v9966_v22, -inf  ;;  %v3764_v50 = vld [vmem:[%s11767_s3 + $0xc0] sm:$0xff]  ;;  %v10003_v3 = vadd.f32 %v4011_v58, %v3757_v11 }
 0x66f   : > { %v4185_v39 = vsel %vm1740_vm2, %v9990_v29, -inf  ;;  %v3768_v11 = vld [vmem:[%s11767_s3 + $0xe0] sm:$0xff] }
 0x670   : > { %v4179_v33 = vsel %vm1740_vm2, %v10003_v3, -inf }
 0x672   : > { %4177 = vmax.xlane.f32.xlu1 %v4176_v15  ;;  %v7225_v57 = vpop.f32.mrb[68].mxu1  ;;  %4174 = vmax.xlane.f32.xlu0 %v4173_v2  ;;  %v4167_v2 = vsel %vm1740_vm2, %v9975_v1, -inf }
 0x673   : > { %v4024_v18 = vpop.f32.mrb[69].mxu1  ;;  %v7237_v25 = vpop.f32.mrb[112].mxu0 }
 0x674   : > { %v7226_v30 = vpop.f32.mrb[70].mxu1  ;;  %v4097_v40 = vpop.f32.mrb[113].mxu0 }
 0x675   : > { %v9992_v32 = vadd.f32 %v4097_v40, %v3764_v50  ;;  %v4027_v53 = vpop.f32.mrb[71].mxu1  ;;  %v7238_v15 = vpop.f32.mrb[114].mxu0  ;;  %v3770_v50 = vld [vmem:[%s11767_s3 + $0xf0] sm:$0xff] }
 0x676   : > { %v4100_v4 = vpop.f32.mrb[115].mxu0  ;;  %4168 = vmax.xlane.f32.xlu0 %v4167_v2  ;;  %v9999_v60 = vadd.f32 %v4027_v53, %v3761_v49  ;;  %v3766_v40 = vld [vmem:[%s11767_s3 + $0xd0] sm:$0xff] }
 0x677   : > { %11981 = vst [vmem:[#allocation114_spill] sm:$0xff] %v9992_v32  ;;  %v4200_v16 = vsel %vm1740_vm2, %v9992_v32, -inf  ;;  %v10020_v58 = vadd.f32 %v7237_v25, %v3766_v40  ;;  %v3765_v40 = vld [vmem:[%s11767_s3 + $0xc8] sm:$0xff] }
 0x678   : > { %11982 = vst [vmem:[#allocation115_spill] sm:$0xff] %v9999_v60  ;;  %4201 = vmax.xlane.f32.xlu1 %v4200_v16  ;;  %v4191_v49 = vsel %vm1740_vm2, %v9999_v60, -inf }
 0x679   : > { %v4206_v25 = vsel %vm1740_vm2, %v10020_v58, -inf }
 0x67a   : > { %4186 = vmax.xlane.f32.xlu0 %v4185_v39  ;;  %v3767_v39 = vld [vmem:[%s11767_s3 + $0xd8] sm:$0xff] }
 0x67b   : > { %v7241_v53 = vpop.f32.mrb[116].mxu0 }
 0x67c   : > { %v10015_v2 = vadd.f32 %v7241_v53, %v3770_v50  ;;  %4192 = vmax.xlane.f32.xlu1 %v4191_v49  ;;  %v4113_v16 = vpop.f32.mrb[117].mxu0  ;;  %v10031_v49 = vadd.f32 %v7238_v15, %v3767_v39  ;;  %v3762_v15 = vld [vmem:[%s11767_s3 + $0xb0] sm:$0xff] }
 0x67d   : > { %v7242_v32 = vpop.f32.mrb[118].mxu0  ;;  %v10029_v53 = vadd.f32 %v4113_v16, %v3768_v11  ;;  %v10047_v11 = vadd.f32 %v7225_v57, %v3762_v15 }
 0x67e   : > { %v4116_v47 = vpop.f32.mrb[119].mxu0  ;;  %4180 = vmax.xlane.f32.xlu0 %v4179_v33  ;;  %v4218_v50 = vsel %vm1740_vm2, %v10015_v2, -inf  ;;  %v10040_v33 = vadd.f32 %v4100_v4, %v3765_v40  ;;  %v4209_v16 = vsel %vm1740_vm2, %v10031_v49, -inf }
 0x67f   : > { %v4212_v60 = vsel %vm1740_vm2, %v10029_v53, -inf }
 0x680   : > { %4219 = vmax.xlane.f32.xlu1 %v4218_v50  ;;  %v4203_v39 = vsel %vm1740_vm2, %v10040_v33, -inf  ;;  %v3760_v50 = vld [vmem:[%s11767_s3 + $0xa0] sm:$0xff] }
 0x681   : > { %v10054_v4 = vadd.f32 %v4024_v18, %v3760_v50 }
 0x682   : > { %4207 = vmax.xlane.f32.xlu0 %v4206_v25  ;;  %v3763_v25 = vld [vmem:[%s11767_s3 + $0xb8] sm:$0xff] }
 0x683   : > { %v10061_v57 = vadd.f32 %v7226_v30, %v3763_v25  ;;  %v4188_v40 = vsel %vm1740_vm2, %v10054_v4, -inf  ;;  %v3769_v30 = vld [vmem:[%s11767_s3 + $0xe8] sm:$0xff]  ;;  %v1990_v25 = vsel %vm1740_vm2, %v8890_v14, 0.0  ;;  %v1981_v14 = vsel %vm1740_vm2, %v8888_v7, 0.0 }
 0x684   : > { %4213 = vmax.xlane.f32.xlu1 %v4212_v60  ;;  %v4194_v60 = vsel %vm1740_vm2, %v10047_v11, -inf }
 0x685   : > { %v4197_v15 = vsel %vm1740_vm2, %v10061_v57, -inf }
 0x686   : > { %4210 = vmax.xlane.f32.xlu0 %v4209_v16  ;;  %v3771_v16 = vld [vmem:[%s11767_s3 + $0xf8] sm:$0xff] }
 0x687   : > { %v10068_v18 = vadd.f32 %v7242_v32, %v3771_v16 }
 0x689   : > { %v4221_v32 = vsel %vm1740_vm2, %v10068_v18, -inf }
 0x68a   : > { %4204 = vmax.xlane.f32.xlu0 %v4203_v39  ;;  %v10077_v39 = vadd.f32 %v4116_v47, %v3769_v30  ;;  %v1966_v47 = vsel %vm1740_vm2, %v8858_v62, 0.0  ;;  %v2014_v62 = vsel %vm1740_vm2, %v8907_v26, 0.0 }
 0x68c   : > { %v4215_v50 = vsel %vm1740_vm2, %v10077_v39, -inf }
 0x68e   : > { %4195 = vmax.xlane.f32.xlu0 %v4194_v60  ;;  %v1984_v60 = vsel %vm1740_vm2, %v8896_v17, 0.0 }
 0x692   : > { %4189 = vmax.xlane.f32.xlu0 %v4188_v40 }
 0x695   : > { %1072 = vrot.lane.b32.xlu1 %v8379_v8, %s8093_s20 }
 0x696   : > { %4198 = vmax.xlane.f32.xlu0 %v4197_v15 }
 0x699   : > { %1267 = vrot.lane.b32.xlu1 %v8379_v8, %s8092_s19  ;;  %v1957_v8 = vsel %vm1740_vm2, %v8838_v46, 0.0  ;;  %v1963_v46 = vsel %vm1740_vm2, %v8864_v35, 0.0 }
 0x69a   : > { %4222 = vmax.xlane.f32.xlu0 %v4221_v32  ;;  %v11984_v32 = vld [vmem:[#allocation15_spill] sm:$0xff] }
 0x69b   : > { %v1978_v7 = vsel %vm1740_vm2, %v11984_v32, 0.0 }
 0x69d   : > { %1074 = vrot.lane.b32.xlu1 %v8376_v6, %s8093_s20  ;;  %s8095_s20 = smov 16  }
 0x69e   : > { %4216 = vmax.xlane.f32.xlu0 %v4215_v50 }
 0x6a1   : > { %1269 = vrot.lane.b32.xlu1 %v8376_v6, %s8092_s19  ;;  %v1960_v6 = vsel %vm1740_vm2, %v8813_v23, 0.0  ;;  %v1972_v23 = vsel %vm1740_vm2, %v8862_v61, 0.0  ;;  %v11985_v61 = vld [vmem:[#allocation18_spill] sm:$0xff] }
 0x6b4   : > { %1265 = vrot.lane.b32.xlu0 %v8360_v59, %s8092_s19  ;;  %v2008_v59 = vsel %vm1740_vm2, %v8913_v54, 0.0  ;;  %v11983_v54 = vld [vmem:[#allocation17_spill] sm:$0xff]  ;;  %s8094_s19 = smov 8  }
 0x6b5   : > { %v1987_v16 = vsel %vm1740_vm2, %v11983_v54, 0.0 }
 0x6c5   : > { %1958 = vadd.xlane.f32.xlu1 %v1957_v8 }
 0x6c9   : > { %1967 = vadd.xlane.f32.xlu1 %v1966_v47  ;;  %v2005_v47 = vsel %vm1740_vm2, %v11985_v61, 0.0 }
 0x6cd   : > { %1985 = vadd.xlane.f32.xlu1 %v1984_v60 }
 0x6d1   : > { %1991 = vadd.xlane.f32.xlu1 %v1990_v25 }
 0x6d3   : > { %1961 = vadd.xlane.f32.xlu0 %v1960_v6  ;;  %v11986_v6 = vld [vmem:[#allocation20_spill] sm:$0xff] }
 0x6d5   : > { %2009 = vadd.xlane.f32.xlu1 %v2008_v59 }
 0x6d7   : > { %1964 = vadd.xlane.f32.xlu0 %v1963_v46  ;;  %v11987_v46 = vld [vmem:[#allocation19_spill] sm:$0xff] }
 0x6d9   : > { %2015 = vadd.xlane.f32.xlu1 %v2014_v62  ;;  %v2011_v62 = vsel %vm1740_vm2, %v11987_v46, 0.0 }
 0x6db   : > { %1982 = vadd.xlane.f32.xlu0 %v1981_v14  ;;  %v4136_v17 = vpop.xlane.xlu0 %4135 }
 0x6dc   : > { %v4226_v35 = vsub.f32 %v9855_v41, %v4136_v17 }
 0x6dd   : > { %1973 = vadd.xlane.f32.xlu1 %v1972_v23 }
 0x6de   : > { %v4133_v40 = vpop.xlane.xlu1 %4132  ;;  %v4260_v60 = vmul.f32 1.442695, %v4226_v35 }
 0x6df   : > { %v4225_v15 = vsub.f32 %v9873_v36, %v4133_v40  ;;  %1988 = vadd.xlane.f32.xlu0 %v1987_v16  ;;  %v4130_v26 = vpop.xlane.xlu0 %4129  ;;  %v11988_v40 = vld [vmem:[#allocation23_spill] sm:$0xff] }
 0x6e0   : > { %v4224_v30 = vsub.f32 %v9864_v27, %v4130_v26  ;;  %v1996_v27 = vsel %vm1740_vm2, %v11986_v6, 0.0  ;;  %v2002_v54 = vsel %vm1740_vm2, %v11988_v40, 0.0  ;;  %v11992_v6 = vld [vmem:[#allocation25_spill] sm:$0xff] }
 0x6e1   : > { %v4258_v50 = vmul.f32 1.442695, %v4225_v15  ;;  %1979 = vadd.xlane.f32.xlu1 %v1978_v7  ;;  %v11989_v15 = vld [vmem:[#allocation14_spill] sm:$0xff] }
 0x6e2   : > { %v4256_v8 = vmul.f32 1.442695, %v4224_v30  ;;  %v1969_v26 = vsel %vm1740_vm2, %v11989_v15, 0.0  ;;  %v11994_v15 = vld [vmem:[#allocation22_spill] sm:$0xff] }
 0x6e3   : > { %7689 = vpow2.f32 %v4258_v50  ;;  %2006 = vadd.xlane.f32.xlu0 %v2005_v47  ;;  %v4139_v25 = vpop.xlane.xlu0 %4138 }
 0x6e4   : > { %7691 = vpow2.f32 %v4256_v8  ;;  %v4227_v41 = vsub.f32 %v9879_v55, %v4139_v25  ;;  %v4160_v36 = vpop.xlane.xlu1 %4159 }
 0x6e5   : > { %1997 = vadd.xlane.f32.xlu1 %v1996_v27  ;;  %7693 = vpow2.f32 %v4260_v60  ;;  %v4234_v55 = vsub.f32 %v9892_v19, %v4160_v36  ;;  %v11991_v60 = vld [vmem:[#allocation16_spill] sm:$0xff]  ;;  %v2026_v27 = vsel %vm1740_vm2, %v11992_v6, 0.0  ;;  %v3735_v6 = vld [vmem:[#allocation4 + $0x158] sm:$0xff] }
 0x6e6   : > { %v4262_v59 = vmul.f32 1.442695, %v4227_v41  ;;  %v1975_v25 = vsel %vm1740_vm2, %v11991_v60, 0.0 }
 0x6e7   : > { %2012 = vadd.xlane.f32.xlu0 %v2011_v62  ;;  %v4163_v14 = vpop.xlane.xlu0 %4162  ;;  %v4276_v47 = vmul.f32 1.442695, %v4234_v55  ;;  %v11993_v62 = vld [vmem:[#allocation21_spill] sm:$0xff]  ;;  %v3155_v55 = vsel %vm1740_vm2, %v9426_v38, 0.0 }
 0x6e8   : > { %7695 = vpow2.f32 %v4262_v59  ;;  %v4235_v17 = vsub.f32 %v9898_v44, %v4163_v14  ;;  %v4154_v23 = vpop.xlane.xlu1 %4153  ;;  %v11990_v44 = vld [vmem:[#allocation26_spill] sm:$0xff] }
 0x6e9   : > { %v4232_v16 = vsub.f32 %v9896_v13, %v4154_v23  ;;  %2003 = vadd.xlane.f32.xlu1 %v2002_v54  ;;  %v2020_v8 = vsel %vm1740_vm2, %v11990_v44, 0.0 }
 0x6ea   : > { %v4278_v35 = vmul.f32 1.442695, %v4235_v17 }
 0x6eb   : > { %v4272_v30 = vmul.f32 1.442695, %v4232_v16  ;;  %1970 = vadd.xlane.f32.xlu0 %v1969_v26  ;;  %v4157_v32 = vpop.xlane.xlu0 %4156  ;;  %v1999_v26 = vsel %vm1740_vm2, %v11994_v15, 0.0 }
 0x6ec   : > { %v4233_v7 = vsub.f32 %v9910_v24, %v4157_v32  ;;  %v4145_v50 = vpop.xlane.xlu1 %4144  ;;  %7697 = vpow2.f32 %v4278_v35  ;;  %v3733_v35 = vld [vmem:[#allocation4 + $0x148] sm:$0xff] }
 0x6ed   : > { %v10135_v61 = vpop.eup %7689  ;;  %2021 = vadd.xlane.f32.xlu1 %v2020_v8  ;;  %7699 = vpow2.f32 %v4272_v30  ;;  %v4229_v41 = vsub.f32 %v9915_v0, %v4145_v50  ;;  %v1993_v0 = vsel %vm1740_vm2, %v11993_v62, 0.0  ;;  %v3734_v8 = vld [vmem:[#allocation4 + $0x150] sm:$0xff] }
 0x6ee   : > { %v10137_v19 = vpop.eup %7691  ;;  %v4274_v13 = vmul.f32 1.442695, %v4233_v7  ;;  %v3161_v7 = vsel %vm1740_vm2, %v9419_v5, 0.0 }
 0x6ef   : > { %1976 = vadd.xlane.f32.xlu0 %v1975_v25  ;;  %v4148_v24 = vpop.xlane.xlu0 %4147  ;;  %v4416_v36 = vpack.c.bf16 %v10135_v61, %v10137_v19  ;;  %v10146_v59 = vpop.eup %7693  ;;  %v4266_v17 = vmul.f32 1.442695, %v4229_v41 }
 0x6f0   : > { %7701 = vpow2.f32 %v4274_v13  ;;  %v4230_v23 = vsub.f32 %v9922_v45, %v4148_v24  ;;  %v4166_v45 = vpop.xlane.xlu1 %4165  ;;  %v3179_v24 = vsel %vm1740_vm2, %v9525_v34, 0.0 }
 0x6f1   : > { %7703 = vpow2.f32 %v4276_v47  ;;  %2027 = vadd.xlane.f32.xlu1 %v2026_v27  ;;  %7251 = vmatprep.mubr.msk.bf16.mxu1 %vm1740_vm2, %v4416_v36  ;;  %v11995_v47 = vld [vmem:[#allocation24_spill] sm:$0xff]  ;;  %v4236_v36 = vsub.f32 %v9929_v63, %v4166_v45  ;;  %v11996_v27 = vld [vmem:[#allocation27_spill] sm:$0xff] }
 0x6f2   : > { %v10149_v46 = vpop.eup %7695  ;;  %7705 = vpow2.f32 %v4266_v17  ;;  %v4268_v30 = vmul.f32 1.442695, %v4230_v23  ;;  %v2017_v13 = vsel %vm1740_vm2, %v11995_v47, 0.0  ;;  %v2023_v62 = vsel %vm1740_vm2, %v11996_v27, 0.0 }
 0x6f3   : > { %v4417_v14 = vpack.c.bf16 %v10149_v46, %v10146_v59  ;;  %1994 = vadd.xlane.f32.xlu0 %v1993_v0  ;;  %v4142_v40 = vpop.xlane.xlu0 %4141  ;;  %v3737_v0 = vld [vmem:[#allocation4 + $0x1c8] sm:$0xff]  ;;  %v3185_v17 = vsel %vm1740_vm2, %v9521_v31, 0.0  ;;  %v3152_v31 = vsel %vm1740_vm2, %v9422_v48, 0.0 }
 0x6f4   : > { %v4228_v54 = vsub.f32 %v9933_v21, %v4142_v40 }
 0x6f5   : > { %3156 = vadd.xlane.f32.xlu1 %v3155_v55  ;;  %7252 = vmatmul.mubr.msk.bf16.vlgmr.msra.gmra.mrb[72].mxu1 %vm1740_vm2, %v4417_v14  ;;  %v10198_v55 = vld [vmem:[#allocation3 + $0x60] sm:$0xff] }
 0x6f6   : > { %v4264_v16 = vmul.f32 1.442695, %v4228_v54  ;;  %7276 = vmatpush3.bf16.msra.mxu1 %v9750_v43  ;;  %v10163_v21 = vpop.eup %7697 }
 0x6f7   : > { %7277 = vmatprep.subr.bf16.mxu1 %v3733_v35  ;;  %2000 = vadd.xlane.f32.xlu0 %v1999_v26  ;;  %v4151_v32 = vpop.xlane.xlu0 %4150  ;;  %v10168_v50 = vpop.eup %7699  ;;  %v3203_v26 = vsel %vm1740_vm2, %v9555_v37, 0.0  ;;  %v3739_v37 = vld [vmem:[#allocation4 + $0x1d8] sm:$0xff] }
 0x6f8   : > { %7707 = vpow2.f32 %v4264_v16  ;;  %v4231_v38 = vsub.f32 %v9942_v56, %v4151_v32 }
 0x6f9   : > { %3162 = vadd.xlane.f32.xlu1 %v3161_v7  ;;  %7709 = vpow2.f32 %v4268_v30 }
 0x6fa   : > { %v10170_v43 = vpop.eup %7701  ;;  %v4270_v44 = vmul.f32 1.442695, %v4231_v38  ;;  %7278 = vmatpush3.bf16.msra.mxu1 %v3733_v35 }
 0x6fb   : > { %v10174_v60 = vpop.eup %7703  ;;  %v10176_v25 = vpop.xlane.xlu1 %4183  ;;  %7279 = vmatprep.subr.bf16.mxu1 %v3734_v8  ;;  %2018 = vadd.xlane.f32.xlu0 %v2017_v13  ;;  %v4420_v5 = vpack.c.bf16 %v10170_v43, %v10168_v50  ;;  %v3209_v13 = vsel %vm1740_vm2, %v9551_v28, 0.0 }
 0x6fc   : > { %v4172_v56 = vpop.xlane.xlu0 %4171  ;;  %v4421_v41 = vpack.c.bf16 %v10163_v21, %v10174_v60  ;;  %7711 = vpow2.f32 %v4270_v44  ;;  %v10193_v63 = vpop.eup %7705 }
 0x6fd   : > { %3180 = vadd.xlane.f32.xlu1 %v3179_v24  ;;  %7267 = vmatprep.mubr.msk.bf16.mxu0 %vm1740_vm2, %v4420_v5  ;;  %11997 = vst [vmem:[#allocation17_spill] sm:$0xff] %v10193_v63  ;;  %v4238_v23 = vsub.f32 %v9952_v12, %v4172_v56  ;;  %v10231_v24 = vld [vmem:[#allocation3 + $0xe0] sm:$0xff] }
 0x6fe   : > { %7280 = vmatpush3.bf16.msra.mxu1 %v3734_v8  ;;  %7268 = vmatmul.mubr.msk.bf16.vlgmr.msra.gmra.mrb[120].mxu0 %vm1740_vm2, %v4421_v41  ;;  %v3176_v41 = vsel %vm1740_vm2, %v9518_v51, 0.0  ;;  %v12001_v51 = vld [vmem:[#allocation71_spill] sm:$0xff] }
 0x6ff   : > { %7281 = vmatprep.subr.bf16.mxu1 %v3735_v6  ;;  %7292 = vmatpush3.bf16.msra.mxu0 %v9758_v52  ;;  %v4178_v40 = vpop.xlane.xlu1 %4177  ;;  %v4280_v52 = vmul.f32 1.442695, %v4236_v36  ;;  %v4284_v45 = vmul.f32 1.442695, %v4238_v23  ;;  %v3182_v27 = vsel %vm1740_vm2, %v12001_v51, 0.0  ;;  %v12003_v23 = vld [vmem:[#allocation114_spill] sm:$0xff] }
 0x700   : > { %v4175_v14 = vpop.xlane.xlu0 %4174  ;;  %2024 = vadd.xlane.f32.xlu0 %v2023_v62  ;;  %7293 = vmatprep.subr.bf16.mxu0 %v3737_v0  ;;  %v4240_v38 = vsub.f32 %v9966_v22, %v4178_v40  ;;  %v4242_v22 = vsub.f32 %v9962_v20, %v10176_v25  ;;  %v3167_v20 = vsel %vm1740_vm2, %v9499_v10, 0.0 }
 0x701   : > { %v4239_v34 = vsub.f32 %v9964_v9, %v4175_v14  ;;  %3186 = vadd.xlane.f32.xlu1 %v3185_v17  ;;  %v3738_v9 = vld [vmem:[#allocation4 + $0x1d0] sm:$0xff]  ;;  %7713 = vpow2.f32 %v4280_v52  ;;  %v12002_v14 = vld [vmem:[#allocation69_spill] sm:$0xff] }
 0x702   : > { %v10196_v54 = vpop.eup %7707  ;;  %7282 = vmatpush3.bf16.msra.mxu1 %v3735_v6  ;;  %v4292_v25 = vmul.f32 1.442695, %v4242_v22 }
 0x703   : > { %11998 = vst [vmem:[#allocation15_spill] sm:$0xff] %v10196_v54  ;;  %v4286_v16 = vmul.f32 1.442695, %v4239_v34  ;;  %7294 = vmatpush3.bf16.msra.mxu0 %v3737_v0  ;;  %7519 = vmatprep.subr.msk.bf16.mxu1 %vm558_vm1, %v10198_v55  ;;  %v4418_v12 = vpack.c.bf16 %v10193_v63, %v10196_v54  ;;  %v10209_v30 = vpop.eup %7709 }
 0x704   : > { %v4169_v35 = vpop.xlane.xlu0 %4168  ;;  %3153 = vadd.xlane.f32.xlu0 %v3152_v31  ;;  %7295 = vmatprep.subr.bf16.mxu0 %v3738_v9  ;;  %11999 = vst [vmem:[#allocation18_spill] sm:$0xff] %v10209_v30 }
 0x705   : > { %v4237_v15 = vsub.f32 %v9975_v1, %v4169_v35  ;;  %v10211_v32 = vpop.xlane.xlu1 %4201  ;;  %3204 = vadd.xlane.f32.xlu1 %v3203_v26  ;;  %7255 = vmatprep.mubr.msk.bf16.mxu1 %vm1740_vm2, %v4418_v12  ;;  %7715 = vpow2.f32 %v4286_v16  ;;  %v3158_v1 = vsel %vm1740_vm2, %v9434_v42, 0.0  ;;  %v4288_v42 = vmul.f32 1.442695, %v4240_v38  ;;  %v12004_v16 = vld [vmem:[#allocation72_spill] sm:$0xff] }
 0x706   : > { %v10214_v48 = vpop.eup %7711  ;;  %v4248_v40 = vsub.f32 %v12003_v23, %v10211_v32  ;;  %v3200_v31 = vsel %vm1740_vm2, %v12004_v16, 0.0 }
 0x707   : > { %12000 = vst [vmem:[#allocation20_spill] sm:$0xff] %v10214_v48  ;;  %v4282_v7 = vmul.f32 1.442695, %v4237_v15  ;;  %7296 = vmatpush3.bf16.msra.mxu0 %v3738_v9  ;;  %v4419_v8 = vpack.c.bf16 %v10214_v48, %v10209_v30  ;;  %v12005_v15 = vld [vmem:[#allocation74_spill] sm:$0xff] }
 0x708   : > { %v4187_v44 = vpop.xlane.xlu0 %4186  ;;  %3159 = vadd.xlane.f32.xlu0 %v3158_v1  ;;  %7297 = vmatprep.subr.bf16.mxu0 %v3739_v37  ;;  %v3191_v26 = vsel %vm1740_vm2, %v12005_v15, 0.0 }
 0x709   : > { %7717 = vpow2.f32 %v4282_v7  ;;  %v4243_v47 = vsub.f32 %v9990_v29, %v4187_v44  ;;  %v10226_v56 = vpop.xlane.xlu1 %4192  ;;  %3210 = vadd.xlane.f32.xlu1 %v3209_v13  ;;  %7256 = vmatmul.mubr.msk.bf16.gmra.mrb[76].mxu1 %vm1740_vm2, %v4419_v8  ;;  %v4304_v7 = vmul.f32 1.442695, %v4248_v40 }
 0x70a   : > { %7719 = vpow2.f32 %v4284_v45 }
 0x70b   : > { %v4294_v5 = vmul.f32 1.442695, %v4243_v47  ;;  %7298 = vmatpush3.bf16.msra.mxu0 %v3739_v37  ;;  %7721 = vpow2.f32 %v4288_v42  ;;  %v10242_v0 = vpop.eup %7713  ;;  %v12006_v37 = vld [vmem:[#allocation73_spill] sm:$0xff] }
 0x70c   : > { %v4181_v29 = vpop.xlane.xlu0 %4180  ;;  %3177 = vadd.xlane.f32.xlu0 %v3176_v41  ;;  %7523 = vmatprep.subr.msk.bf16.mxu0 %vm558_vm1, %v10231_v24 }
 0x70d   : > { %v4241_v28 = vsub.f32 %v10003_v3, %v4181_v29  ;;  %v10238_v36 = vpop.xlane.xlu1 %4219  ;;  %3168 = vadd.xlane.f32.xlu1 %v3167_v20  ;;  %7723 = vpow2.f32 %v4294_v5  ;;  %v3173_v3 = vsel %vm1740_vm2, %v12002_v14, 0.0  ;;  %v12008_v20 = vld [vmem:[#allocation115_spill] sm:$0xff]  ;;  %v12010_v14 = vld [vmem:[#allocation80_spill] sm:$0xff] }
 0x70f   : > { %v4290_v6 = vmul.f32 1.442695, %v4241_v28  ;;  %v10246_v34 = vpop.eup %7715 }
 0x710   : > { %v4208_v62 = vpop.xlane.xlu0 %4207  ;;  %3183 = vadd.xlane.f32.xlu0 %v3182_v27 }
 0x711   : > { %7725 = vpow2.f32 %v4290_v6  ;;  %3174 = vadd.xlane.f32.xlu1 %v3173_v3  ;;  %v10248_v10 = vpop.xlane.xlu1 %4213  ;;  %v4250_v32 = vsub.f32 %v10020_v58, %v4208_v62  ;;  %v12007_v58 = vld [vmem:[#allocation77_spill] sm:$0xff]  ;;  %v3215_v3 = vsel %vm1740_vm2, %v12010_v14, 0.0 }
 0x712   : > { %7727 = vpow2.f32 %v4292_v25  ;;  %v3197_v13 = vsel %vm1740_vm2, %v12007_v58, 0.0  ;;  %v4245_v25 = vsub.f32 %v12008_v20, %v10226_v56  ;;  %v4977_v56 = vsel %vm558_vm1, %v10198_v55, 0  ;;  %v12015_v20 = vld [vmem:[#allocation76_spill] sm:$0xff] }
 0x713   : > { %v10250_v17 = vpop.eup %7717  ;;  %v4308_v42 = vmul.f32 1.442695, %v4250_v32  ;;  %7729 = vpow2.f32 %v4304_v7 }
 0x714   : > { %v10254_v52 = vpop.eup %7719  ;;  %v4211_v9 = vpop.xlane.xlu0 %4210  ;;  %v4422_v35 = vpack.c.bf16 %v10250_v17, %v10242_v0  ;;  %3201 = vadd.xlane.f32.xlu0 %v3200_v31  ;;  %v4298_v40 = vmul.f32 1.442695, %v4245_v25  ;;  %v12011_v31 = vld [vmem:[#allocation70_spill] sm:$0xff]  ;;  %v4902_v25 = vld [vmem:[#allocation3 + $0x70] sm:$0xff] }
 0x715   : > { %v4251_v12 = vsub.f32 %v10031_v49, %v4211_v9  ;;  %v4423_v45 = vpack.c.bf16 %v10246_v34, %v10254_v52  ;;  %3192 = vadd.xlane.f32.xlu1 %v3191_v26  ;;  %v1073_v38 = vpop.permute.xlu1 %1072  ;;  %v3206_v49 = vsel %vm1740_vm2, %v12006_v37, 0.0  ;;  %v10271_v8 = vpop.eup %7721  ;;  %v3170_v9 = vsel %vm1740_vm2, %v12011_v31, 0.0  ;;  %v12012_v26 = vld [vmem:[#allocation79_spill] sm:$0xff] }
 0x716   : > { %7271 = vmatprep.mubr.msk.bf16.mxu0 %vm1740_vm2, %v4422_v35  ;;  %1107 = vst.msk [vmem:[#allocation4 + $0x170] sm:$0xff] %vm558_vm1, %v1073_v38  ;;  %v4901_v35 = vld [vmem:[#allocation3 + $0x68] sm:$0xff] }
 0x717   : > { %7272 = vmatmul.mubr.msk.bf16.gmra.mrb[124].mxu0 %vm1740_vm2, %v4423_v45  ;;  %v4310_v1 = vmul.f32 1.442695, %v4251_v12  ;;  %v10276_v22 = vpop.eup %7723  ;;  %v3221_v45 = vsel %vm1740_vm2, %v12012_v26, 0.0  ;;  %v12013_v38 = vld [vmem:[#allocation75_spill] sm:$0xff]  ;;  %v12019_v26 = vld [vmem:[#allocation81_spill] sm:$0xff] }
 0x718   : > { %v4205_v44 = vpop.xlane.xlu0 %4204  ;;  %3207 = vadd.xlane.f32.xlu0 %v3206_v49  ;;  %v3188_v7 = vsel %vm1740_vm2, %v12013_v38, 0.0  ;;  %v12014_v49 = vld [vmem:[#allocation8_spill] sm:$0xff] }
 0x719   : > { %v4249_v47 = vsub.f32 %v10040_v33, %v4205_v44  ;;  %3198 = vadd.xlane.f32.xlu1 %v3197_v13  ;;  %v1268_v5 = vpop.permute.xlu1 %1267  ;;  %7731 = vpow2.f32 %v4310_v1  ;;  %v12009_v33 = vld [vmem:[#allocation68_spill] sm:$0xff]  ;;  %v1936_v44 = vsel %vm1740_vm2, %v12014_v49, 0.0  ;;  %v4252_v13 = vsub.f32 %v10029_v53, %v10248_v10  ;;  %v12016_v10 = vld [vmem:[#allocation7_spill] sm:$0xff]  ;;  %v12021_v49 = vld [vmem:[#allocation6_spill] sm:$0xff] }
 0x71a   : > { %1302 = vst.msk [vmem:[#allocation4 + $0x1f0] sm:$0xff] %vm558_vm1, %v1268_v5  ;;  %v3164_v6 = vsel %vm1740_vm2, %v12009_v33, 0.0  ;;  %v4980_v5 = vsel %vm558_vm1, %v4901_v35, 0 }
 0x71b   : > { %v10278_v41 = vpop.eup %7725  ;;  %v4306_v29 = vmul.f32 1.442695, %v4249_v47  ;;  %v4312_v14 = vmul.f32 1.442695, %v4252_v13  ;;  %v4906_v13 = vld [vmem:[#allocation3 + $0xf0] sm:$0xff] }
 0x71c   : > { %v10281_v28 = vpop.eup %7727  ;;  %v4196_v51 = vpop.xlane.xlu0 %4195  ;;  %v4424_v27 = vpack.c.bf16 %v10278_v41, %v10271_v8  ;;  %3165 = vadd.xlane.f32.xlu0 %v3164_v6 }
 0x71d   : > { %v4425_v62 = vpack.c.bf16 %v10276_v22, %v10281_v28  ;;  %7733 = vpow2.f32 %v4306_v29  ;;  %3216 = vadd.xlane.f32.xlu1 %v3215_v3  ;;  %v1075_v23 = vpop.permute.xlu1 %1074  ;;  %v4246_v16 = vsub.f32 %v10047_v11, %v4196_v51  ;;  %v10308_v37 = vpop.eup %7729  ;;  %v5066_v3 = vsel %vm558_vm1, %v10231_v24, 0 }
 0x71e   : > { %7735 = vpow2.f32 %v4308_v42  ;;  %7283 = vmatprep.mubr.msk.bf16.mxu1 %vm1740_vm2, %v4424_v27  ;;  %1108 = vst.msk [vmem:[#allocation4 + $0x178] sm:$0xff] %vm558_vm1, %v1075_v23  ;;  %v1942_v27 = vsel %vm1740_vm2, %v12016_v10, 0.0  ;;  %v12024_v10 = vld [vmem:[#allocation63_spill] sm:$0xff] }
 0x71f   : > { %7284 = vmatmul.mubr.msk.bf16.vlgmr.msra.gmra.mrb[80].mxu1 %vm1740_vm2, %v4425_v62  ;;  %7737 = vpow2.f32 %v4298_v40  ;;  %v4300_v11 = vmul.f32 1.442695, %v4246_v16  ;;  %v4254_v62 = vsub.f32 %v10015_v2, %v10238_v36  ;;  %v4905_v40 = vld [vmem:[#allocation3 + $0xe8] sm:$0xff]  ;;  %v12018_v36 = vld [vmem:[#allocation12_spill] sm:$0xff] }
 0x720   : > { %7308 = vmatpush3.bf16.xpose.msra.mxu1 %v4977_v56  ;;  %v4190_v12 = vpop.xlane.xlu0 %4189  ;;  %3171 = vadd.xlane.f32.xlu0 %v3170_v9  ;;  %v12017_v56 = vld [vmem:[#allocation78_spill] sm:$0xff]  ;;  %v1948_v31 = vsel %vm1740_vm2, %v12018_v36, 0.0 }
 0x721   : > { %7520 = vmatprep.subr.msk.bf16.mxu1 %vm558_vm1, %v4901_v35  ;;  %v4244_v15 = vsub.f32 %v10054_v4, %v4190_v12  ;;  %3222 = vadd.xlane.f32.xlu1 %v3221_v45  ;;  %v1270_v32 = vpop.permute.xlu1 %1269  ;;  %v4316_v35 = vmul.f32 1.442695, %v4254_v62  ;;  %v3218_v45 = vsel %vm1740_vm2, %v12019_v26, 0.0  ;;  %v12027_v26 = vld [vmem:[#allocation13_spill] sm:$0xff] }
 0x722   : > { %1303 = vst.msk [vmem:[#allocation4 + $0x1f8] sm:$0xff] %vm558_vm1, %v1270_v32  ;;  %v4903_v32 = vld [vmem:[#allocation3 + $0x78] sm:$0xff] }
 0x723   : > { %v4296_v55 = vmul.f32 1.442695, %v4244_v15  ;;  %v10313_v47 = vpop.eup %7731  ;;  %v4983_v15 = vsel %vm558_vm1, %v4902_v25, 0 }
 0x724   : > { %v4199_v1 = vpop.xlane.xlu0 %4198  ;;  %3189 = vadd.xlane.f32.xlu0 %v3188_v7 }
 0x725   : > { %7739 = vpow2.f32 %v4296_v55  ;;  %v4247_v4 = vsub.f32 %v10061_v57, %v4199_v1  ;;  %1937 = vadd.xlane.f32.xlu1 %v1936_v44  ;;  %v3194_v57 = vsel %vm1740_vm2, %v12015_v20, 0.0  ;;  %v1933_v44 = vsel %vm1740_vm2, %v12021_v49, 0.0 }
 0x726   : > { %7741 = vpow2.f32 %v4300_v11  ;;  %v12020_v11 = vld [vmem:[#allocation11_spill] sm:$0xff] }
 0x727   : > { %v10315_v58 = vpop.eup %7733  ;;  %v4302_v42 = vmul.f32 1.442695, %v4247_v4  ;;  %v1954_v38 = vsel %vm1740_vm2, %v12020_v11, 0.0  ;;  %v5069_v4 = vsel %vm558_vm1, %v4905_v40, 0 }
 0x728   : > { %v10320_v29 = vpop.eup %7735  ;;  %7310 = vmatpush3.bf16.xpose.msra.mxu1 %v4980_v5  ;;  %v4223_v33 = vpop.xlane.xlu0 %4222  ;;  %v4428_v6 = vpack.c.bf16 %v10315_v58, %v10308_v37  ;;  %3195 = vadd.xlane.f32.xlu0 %v3194_v57  ;;  %v12022_v5 = vld [vmem:[#allocation60_spill] sm:$0xff]  ;;  %v4884_v57 = vld [vmem:[#allocation2 + $0x60] sm:$0xff] }
 0x729   : > { %v4429_v51 = vpack.c.bf16 %v10313_v47, %v10320_v29  ;;  %7743 = vpow2.f32 %v4302_v42  ;;  %7521 = vmatprep.subr.msk.bf16.mxu1 %vm558_vm1, %v4902_v25  ;;  %v4255_v53 = vsub.f32 %v10068_v18, %v4223_v33  ;;  %1943 = vadd.xlane.f32.xlu1 %v1942_v27  ;;  %v3212_v18 = vsel %vm1740_vm2, %v12017_v56, 0.0  ;;  %v10344_v9 = vpop.eup %7737  ;;  %v12023_v33 = vld [vmem:[#allocation9_spill] sm:$0xff]  ;;  %v12025_v56 = vld [vmem:[#allocation10_spill] sm:$0xff] }
 0x72a   : > { %7299 = vmatprep.mubr.msk.bf16.mxu0 %vm1740_vm2, %v4428_v6  ;;  %7745 = vpow2.f32 %v4312_v14  ;;  %v3131_v20 = vsel %vm1740_vm2, %v12022_v5, 0.0  ;;  %v4986_v25 = vsel %vm558_vm1, %v4903_v32, 0  ;;  %v1939_v6 = vsel %vm1740_vm2, %v12023_v33, 0.0  ;;  %v4892_v5 = vld [vmem:[#allocation2 + $0x160] sm:$0xff]  ;;  %v4889_v33 = vld [vmem:[#allocation2 + $0xe8] sm:$0xff] }
 0x72b   : > { %7300 = vmatmul.mubr.msk.bf16.vlgmr.msra.gmra.mrb[128].mxu0 %vm1740_vm2, %v4429_v51  ;;  %v4318_v23 = vmul.f32 1.442695, %v4255_v53  ;;  %v4908_v51 = vld [vmem:[#allocation3 + $0x160] sm:$0xff]  ;;  %v3137_v27 = vsel %vm1740_vm2, %v12024_v10, 0.0  ;;  %v12031_v10 = vld [vmem:[#allocation65_spill] sm:$0xff] }
 0x72c   : > { %7324 = vmatpush3.bf16.xpose.msra.mxu0 %v5066_v3  ;;  %v4217_v16 = vpop.xlane.xlu0 %4216  ;;  %3213 = vadd.xlane.f32.xlu0 %v3212_v18  ;;  %v5072_v3 = vsel %vm558_vm1, %v4906_v13, 0  ;;  %v1945_v18 = vsel %vm1740_vm2, %v12025_v56, 0.0 }
 0x72d   : > { %7524 = vmatprep.subr.msk.bf16.mxu0 %vm558_vm1, %v4905_v40  ;;  %v4253_v2 = vsub.f32 %v10077_v39, %v4217_v16  ;;  %1949 = vadd.xlane.f32.xlu1 %v1948_v31  ;;  %7747 = vpow2.f32 %v4318_v23  ;;  %v4907_v40 = vld [vmem:[#allocation3 + $0xf8] sm:$0xff] }
 0x72f   : > { %v10346_v24 = vpop.eup %7739  ;;  %v4314_v12 = vmul.f32 1.442695, %v4253_v2  ;;  %v12026_v2 = vld [vmem:[#allocation64_spill] sm:$0xff] }
 0x730   : > { %7312 = vmatpush3.bf16.xpose.msra.mxu1 %v4983_v15  ;;  %v1266_v39 = vpop.permute.xlu0 %1265  ;;  %v4426_v55 = vpack.c.bf16 %v10344_v9, %v10346_v24  ;;  %3219 = vadd.xlane.f32.xlu0 %v3218_v45  ;;  %v10357_v7 = vpop.eup %7741  ;;  %v3143_v36 = vsel %vm1740_vm2, %v12026_v2, 0.0  ;;  %v5155_v15 = vsel %vm558_vm1, %v4908_v51, 0  ;;  %v1951_v45 = vsel %vm1740_vm2, %v12027_v26, 0.0  ;;  %v4891_v2 = vld [vmem:[#allocation2 + $0xf8] sm:$0xff] }
 0x731   : > { %7749 = vpow2.f32 %v4314_v12  ;;  %7522 = vmatprep.subr.msk.bf16.mxu1 %vm558_vm1, %v4903_v32  ;;  %1301 = vst.msk [vmem:[#allocation4 + $0x1e8] sm:$0xff] %vm558_vm1, %v1266_v39  ;;  %1955 = vadd.xlane.f32.xlu1 %v1954_v38  ;;  %v4886_v12 = vld [vmem:[#allocation2 + $0x70] sm:$0xff]  ;;  %v4888_v32 = vld [vmem:[#allocation2 + $0xe0] sm:$0xff]  ;;  %v4909_v39 = vld [vmem:[#allocation3 + $0x168] sm:$0xff]  ;;  %v5075_v38 = vsel %vm558_vm1, %v4907_v40, 0 }
 0x732   : > { %7751 = vpow2.f32 %v4316_v35  ;;  %7287 = vmatprep.mubr.msk.bf16.mxu1 %vm1740_vm2, %v4426_v55  ;;  %v4885_v35 = vld [vmem:[#allocation2 + $0x68] sm:$0xff] }
 0x733   : > { %v10360_v1 = vpop.eup %7743  ;;  %v12028_v55 = vld [vmem:[#allocation67_spill] sm:$0xff] }
 0x734   : > { %7326 = vmatpush3.bf16.xpose.msra.mxu0 %v5069_v4  ;;  %v4427_v42 = vpack.c.bf16 %v10360_v1, %v10357_v7  ;;  %1934 = vadd.xlane.f32.xlu0 %v1933_v44  ;;  %v10375_v53 = vpop.eup %7745  ;;  %v3149_v11 = vsel %vm1740_vm2, %v12028_v55, 0.0  ;;  %v12029_v4 = vld [vmem:[#allocation61_spill] sm:$0xff]  ;;  %v4912_v44 = vld [vmem:[#allocation3 + $0x1e0] sm:$0xff] }
 0x735   : > { %7525 = vmatprep.subr.msk.bf16.mxu0 %vm558_vm1, %v4906_v13  ;;  %3132 = vadd.xlane.f32.xlu1 %v3131_v20  ;;  %v3128_v49 = vsel %vm1740_vm2, %v12029_v4, 0.0  ;;  %v4887_v13 = vld [vmem:[#allocation2 + $0x78] sm:$0xff]  ;;  %v12030_v20 = vld [vmem:[#allocation62_spill] sm:$0xff]  ;;  %v4894_v4 = vld [vmem:[#allocation2 + $0x170] sm:$0xff] }
 0x736   : > { %7288 = vmatmul.mubr.msk.bf16.gmra.mrb[84].mxu1 %vm1740_vm2, %v4427_v42  ;;  %v5158_v42 = vsel %vm558_vm1, %v4909_v39, 0  ;;  %v4915_v55 = vld [vmem:[#allocation3 + $0x1f8] sm:$0xff] }
 0x737   : > { %7315 = vmatprep.mubr.msk.bf16.mxu1 %vm558_vm1, %v4884_v57  ;;  %v10380_v62 = vpop.eup %7747  ;;  %v3134_v57 = vsel %vm1740_vm2, %v12030_v20, 0.0  ;;  %v4920_v20 = vld [vmem:[#allocation4 + $0xe0] sm:$0xff] }
 0x738   : > { %7314 = vmatpush3.bf16.xpose.msra.mxu1 %v4986_v25  ;;  %1940 = vadd.xlane.f32.xlu0 %v1939_v6  ;;  %v4910_v25 = vld [vmem:[#allocation3 + $0x170] sm:$0xff] }
 0x739   : > { %7527 = vmatprep.subr.msk.bf16.mxu1 %vm558_vm1, %v4908_v51  ;;  %3138 = vadd.xlane.f32.xlu1 %v3137_v27  ;;  %v4890_v6 = vld [vmem:[#allocation2 + $0xf0] sm:$0xff]  ;;  %v5244_v51 = vsel %vm558_vm1, %v4912_v44, 0  ;;  %v3140_v27 = vsel %vm1740_vm2, %v12031_v10, 0.0  ;;  %v5161_v56 = vsel %vm558_vm1, %v4910_v25, 0 }
 0x73b   : > { %v10382_v14 = vpop.eup %7749 }
 0x73c   : > { %v10385_v23 = vpop.eup %7751  ;;  %7328 = vmatpush3.bf16.xpose.msra.mxu0 %v5072_v3  ;;  %v4430_v16 = vpack.c.bf16 %v10382_v14, %v10375_v53  ;;  %1946 = vadd.xlane.f32.xlu0 %v1945_v18  ;;  %v4913_v3 = vld [vmem:[#allocation3 + $0x1e8] sm:$0xff]  ;;  %v12032_v18 = vld [vmem:[#allocation66_spill] sm:$0xff] }
 0x73d   : > { %7526 = vmatprep.subr.msk.bf16.mxu0 %vm558_vm1, %v4907_v40  ;;  %v4431_v31 = vpack.c.bf16 %v10380_v62, %v10385_v23  ;;  %3144 = vadd.xlane.f32.xlu1 %v3143_v36  ;;  %v3146_v40 = vsel %vm1740_vm2, %v12032_v18, 0.0 }
 0x73e   : > { %7303 = vmatprep.mubr.msk.bf16.mxu0 %vm1740_vm2, %v4430_v16  ;;  %v4911_v16 = vld [vmem:[#allocation3 + $0x178] sm:$0xff] }
 0x73f   : > { %7316 = vmatmul.mubr.msk.bf16.vlgmr.msra.gmra.mrb[88].mxu1 %vm558_vm1, %v4885_v35  ;;  %7304 = vmatmul.mubr.msk.bf16.gmra.mrb[132].mxu0 %vm1740_vm2, %v4431_v31  ;;  %v5247_v31 = vsel %vm558_vm1, %v4913_v3, 0  ;;  %v4896_v35 = vld [vmem:[#allocation2 + $0x1e0] sm:$0xff]  ;;  %v5164_v26 = vsel %vm558_vm1, %v4911_v16, 0 }
 0x740   : > { %7319 = vmatprep.mubr.msk.bf16.mxu1 %vm558_vm1, %v4886_v12  ;;  %7340 = vmatpush3.bf16.xpose.msra.mxu1 %v5155_v15  ;;  %v4914_v12 = vld [vmem:[#allocation3 + $0x1f0] sm:$0xff] }
 0x741   : > { %1952 = vadd.xlane.f32.xlu0 %v1951_v45  ;;  %7331 = vmatprep.mubr.msk.bf16.mxu0 %vm558_vm1, %v4888_v32  ;;  %v4916_v45 = vld [vmem:[#allocation4 + $0x60] sm:$0xff] }
 0x742   : > { %7528 = vmatprep.subr.msk.bf16.mxu1 %vm558_vm1, %v4909_v39  ;;  %3150 = vadd.xlane.f32.xlu1 %v3149_v11  ;;  %v5250_v39 = vsel %vm558_vm1, %v4914_v12, 0  ;;  %v4893_v11 = vld [vmem:[#allocation2 + $0x168] sm:$0xff] }
 0x744   : > { %7330 = vmatpush3.bf16.xpose.msra.mxu0 %v5075_v38 }
 0x745   : > { %3129 = vadd.xlane.f32.xlu0 %v3128_v49  ;;  %7531 = vmatprep.subr.msk.bf16.mxu0 %vm558_vm1, %v4912_v44  ;;  %v4917_v49 = vld [vmem:[#allocation4 + $0x68] sm:$0xff] }
 0x747   : > { %7320 = vmatmul.mubr.msk.bf16.gmra.mrb[92].mxu1 %vm558_vm1, %v4887_v13 }
 0x748   : > { %7342 = vmatpush3.bf16.xpose.msra.mxu1 %v5158_v42  ;;  %7347 = vmatprep.mubr.msk.bf16.mxu1 %vm558_vm1, %v4892_v5  ;;  %v5253_v42 = vsel %vm558_vm1, %v4915_v55, 0  ;;  %v4918_v5 = vld [vmem:[#allocation4 + $0x70] sm:$0xff] }
 0x749   : > { %3135 = vadd.xlane.f32.xlu0 %v3134_v57  ;;  %7529 = vmatprep.subr.msk.bf16.mxu1 %vm558_vm1, %v4910_v25  ;;  %v4895_v25 = vld [vmem:[#allocation2 + $0x178] sm:$0xff] }
 0x74b   : > { %7332 = vmatmul.mubr.msk.bf16.vlgmr.msra.gmra.mrb[136].mxu0 %vm558_vm1, %v4889_v33 }
 0x74c   : > { %7335 = vmatprep.mubr.msk.bf16.mxu0 %vm558_vm1, %v4890_v6  ;;  %7356 = vmatpush3.bf16.xpose.msra.mxu0 %v5244_v51  ;;  %v4919_v6 = vld [vmem:[#allocation4 + $0x78] sm:$0xff] }
 0x74d   : > { %3141 = vadd.xlane.f32.xlu0 %v3140_v27  ;;  %7532 = vmatprep.subr.msk.bf16.mxu0 %vm558_vm1, %v4913_v3  ;;  %v4897_v27 = vld [vmem:[#allocation2 + $0x1e8] sm:$0xff] }
 0x750   : > { %7344 = vmatpush3.bf16.xpose.msra.mxu1 %v5161_v56  ;;  %v4898_v56 = vld [vmem:[#allocation2 + $0x1f0] sm:$0xff] }
 0x751   : > { %3147 = vadd.xlane.f32.xlu0 %v3146_v40  ;;  %7530 = vmatprep.subr.msk.bf16.mxu1 %vm558_vm1, %v4911_v16  ;;  %v4924_v40 = vld [vmem:[#allocation4 + $0x160] sm:$0xff]  ;;  %v4921_v16 = vld [vmem:[#allocation4 + $0xe8] sm:$0xff] }
 0x752   : > { %v1959_v36 = vpop.xlane.xlu1 %1958 }
 0x753   : > { %7336 = vmatmul.mubr.msk.bf16.gmra.mrb[140].mxu0 %vm558_vm1, %v4891_v2  ;;  %7753 = vrcp.f32 %v1959_v36  ;;  %v12033_v36 = vld [vmem:[#allocation37_spill] sm:$0xff] }
 0x754   : > { %7358 = vmatpush3.bf16.xpose.msra.mxu0 %v5247_v31  ;;  %7363 = vmatprep.mubr.msk.bf16.mxu0 %vm558_vm1, %v4896_v35  ;;  %v12034_v35 = vld [vmem:[#allocation39_spill] sm:$0xff] }
 0x755   : > { %7533 = vmatprep.subr.msk.bf16.mxu0 %vm558_vm1, %v4914_v12 }
 0x756   : > { %v1968_v15 = vpop.xlane.xlu1 %1967 }
 0x758   : > { %7346 = vmatpush3.bf16.xpose.msra.mxu1 %v5164_v26 }
 0x759   : > { %7371 = vmatprep.subr.bf16.mxu1 %v4916_v45 }
 0x75a   : > { %v1986_v32 = vpop.xlane.xlu1 %1985 }
 0x75c   : > { %7360 = vmatpush3.bf16.xpose.msra.mxu0 %v5250_v39  ;;  %v4922_v39 = vld [vmem:[#allocation4 + $0xf0] sm:$0xff] }
 0x75d   : > { %7534 = vmatprep.subr.msk.bf16.mxu0 %vm558_vm1, %v4915_v55  ;;  %v7754_v10 = vpop.eup %7753 }
 0x75e   : > { %v1992_v38 = vpop.xlane.xlu1 %1991  ;;  %v2393_v31 = vmul.f32 %v7754_v10, %v12033_v36  ;;  %v12038_v10 = vld [vmem:[#allocation47_spill] sm:$0xff]  ;;  %v12039_v36 = vld [vmem:[#allocation44_spill] sm:$0xff] }
 0x75f   : > { %7348 = vmatmul.mubr.msk.bf16.vlgmr.msra.gmra.mrb[96].mxu1 %vm558_vm1, %v4893_v11  ;;  %v12035_v11 = vld [vmem:[#allocation36_spill] sm:$0xff] }
 0x760   : > { %7351 = vmatprep.mubr.msk.bf16.mxu1 %vm558_vm1, %v4894_v4  ;;  %7372 = vmatpush3.bf16.msra.mxu1 %v4916_v45  ;;  %v1962_v44 = vpop.xlane.xlu0 %1961  ;;  %v12036_v4 = vld [vmem:[#allocation38_spill] sm:$0xff] }
 0x761   : > { %7373 = vmatprep.subr.bf16.mxu1 %v4917_v49  ;;  %7755 = vrcp.f32 %v1962_v44 }
 0x762   : > { %v2010_v13 = vpop.xlane.xlu1 %2009  ;;  %7757 = vrcp.f32 %v1968_v15 }
 0x764   : > { %7362 = vmatpush3.bf16.xpose.msra.mxu0 %v5253_v42  ;;  %7374 = vmatpush3.bf16.msra.mxu1 %v4917_v49  ;;  %v1965_v57 = vpop.xlane.xlu0 %1964  ;;  %v4899_v42 = vld [vmem:[#allocation2 + $0x1f8] sm:$0xff] }
 0x765   : > { %7375 = vmatprep.subr.bf16.mxu1 %v4918_v5  ;;  %7387 = vmatprep.subr.bf16.mxu0 %v4920_v20  ;;  %7759 = vrcp.f32 %v1965_v57 }
 0x766   : > { %v2016_v33 = vpop.xlane.xlu1 %2015  ;;  %7761 = vrcp.f32 %v1986_v32 }
 0x767   : > { %7352 = vmatmul.mubr.msk.bf16.gmra.mrb[100].mxu1 %vm558_vm1, %v4895_v25 }
 0x768   : > { %7376 = vmatpush3.bf16.msra.mxu1 %v4918_v5  ;;  %v1983_v51 = vpop.xlane.xlu0 %1982 }
 0x769   : > { %7377 = vmatprep.subr.bf16.mxu1 %v4919_v6  ;;  %7763 = vrcp.f32 %v1983_v51 }
 0x76a   : > { %v1974_v3 = vpop.xlane.xlu1 %1973  ;;  %7765 = vrcp.f32 %v1992_v38 }
 0x76b   : > { %7364 = vmatmul.mubr.msk.bf16.vlgmr.msra.gmra.mrb[144].mxu0 %vm558_vm1, %v4897_v27  ;;  %v7756_v18 = vpop.eup %7755 }
 0x76c   : > { %7367 = vmatprep.mubr.msk.bf16.mxu0 %vm558_vm1, %v4898_v56  ;;  %7378 = vmatpush3.bf16.msra.mxu1 %v4919_v6  ;;  %v1989_v2 = vpop.xlane.xlu0 %1988  ;;  %v2394_v12 = vmul.f32 %v7756_v18, %v12034_v35  ;;  %v7758_v15 = vpop.eup %7757  ;;  %v12037_v6 = vld [vmem:[#allocation45_spill] sm:$0xff]  ;;  %v12040_v35 = vld [vmem:[#allocation46_spill] sm:$0xff] }
 0x76d   : > { %7388 = vmatpush3.bf16.msra.mxu0 %v4920_v20  ;;  %7403 = vmatprep.subr.bf16.mxu1 %v4924_v40  ;;  %7767 = vrcp.f32 %v1989_v2  ;;  %v2396_v49 = vmul.f32 %v7758_v15, %v12036_v4  ;;  %v4928_v2 = vld [vmem:[#allocation4 + $0x1e0] sm:$0xff] }
 0x76e   : > { %7389 = vmatprep.subr.bf16.mxu0 %v4921_v16  ;;  %v1980_v26 = vpop.xlane.xlu1 %1979  ;;  %v2425_v45 = vpack.c.bf16 %v2394_v12, %v2393_v31  ;;  %7769 = vrcp.f32 %v2010_v13  ;;  %v4923_v13 = vld [vmem:[#allocation4 + $0xf8] sm:$0xff] }
 0x76f   : > { %v7760_v32 = vpop.eup %7759 }
 0x770   : > { %2433 = vrot.lane.b32.xlu0 %v2425_v45, %s8094_s19  ;;  %v2007_v55 = vpop.xlane.xlu0 %2006  ;;  %v2395_v38 = vmul.f32 %v7760_v32, %v12035_v11  ;;  %v7762_v44 = vpop.eup %7761 }
 0x771   : > { %7390 = vmatpush3.bf16.msra.mxu0 %v4921_v16  ;;  %7771 = vrcp.f32 %v2007_v55  ;;  %v2402_v27 = vmul.f32 %v7762_v44, %v12038_v10  ;;  %v12041_v55 = vld [vmem:[#allocation49_spill] sm:$0xff] }
 0x772   : > { %7391 = vmatprep.subr.bf16.mxu0 %v4922_v39  ;;  %v1998_v5 = vpop.xlane.xlu1 %1997  ;;  %v2426_v20 = vpack.c.bf16 %v2396_v49, %v2395_v38  ;;  %7773 = vrcp.f32 %v2016_v33  ;;  %v12042_v38 = vld [vmem:[#allocation51_spill] sm:$0xff] }
 0x773   : > { %7368 = vmatmul.mubr.msk.bf16.gmra.mrb[148].mxu0 %vm558_vm1, %v4899_v42  ;;  %v7764_v57 = vpop.eup %7763 }
 0x774   : > { %2435 = vrot.lane.b32.xlu1 %v2426_v20, %s8094_s19  ;;  %v2013_v25 = vpop.xlane.xlu0 %2012  ;;  %v2401_v51 = vmul.f32 %v7764_v57, %v12037_v6  ;;  %v7766_v56 = vpop.eup %7765 }
 0x775   : > { %7392 = vmatpush3.bf16.msra.mxu0 %v4922_v39  ;;  %7775 = vrcp.f32 %v2013_v25  ;;  %v10454_v12 = vmul.f32 %v7766_v56, %v12040_v35 }
 0x776   : > { %7393 = vmatprep.subr.bf16.mxu0 %v4923_v13  ;;  %v2004_v18 = vpop.xlane.xlu1 %2003  ;;  %v2450_v40 = vpack.c.bf16 %v2402_v27, %v2401_v51  ;;  %7777 = vrcp.f32 %v1974_v3  ;;  %v4356_v27 = vsel %vm1740_vm2, %v10242_v0, 0.0 }
 0x777   : > { %v7768_v16 = vpop.eup %7767 }
 0x778   : > { %2458 = vrot.lane.b32.xlu1 %v2450_v40, %s8095_s20  ;;  %v1971_v33 = vpop.xlane.xlu0 %1970  ;;  %v10451_v31 = vmul.f32 %v7768_v16, %v12039_v36  ;;  %v7770_v15 = vpop.eup %7769  ;;  %v12045_v16 = vld [vmem:[#allocation41_spill] sm:$0xff] }
 0x779   : > { %7394 = vmatpush3.bf16.msra.mxu0 %v4923_v13  ;;  %7779 = vrcp.f32 %v1971_v33  ;;  %v10462_v4 = vmul.f32 %v7770_v15, %v12042_v38  ;;  %v12043_v13 = vld [vmem:[#allocation48_spill] sm:$0xff]  ;;  %v4344_v15 = vsel %vm1740_vm2, %v10168_v50, 0.0 }
 0x77a   : > { %7419 = vmatprep.subr.bf16.mxu0 %v4928_v2  ;;  %v2022_v45 = vpop.xlane.xlu1 %2021  ;;  %7781 = vrcp.f32 %v1980_v26  ;;  %v12044_v26 = vld [vmem:[#allocation50_spill] sm:$0xff] }
 0x77b   : > { %v7772_v3 = vpop.eup %7771 }
 0x77c   : > { %v1977_v39 = vpop.xlane.xlu0 %1976  ;;  %v10459_v11 = vmul.f32 %v7772_v3, %v12041_v55  ;;  %v7774_v49 = vpop.eup %7773  ;;  %v12049_v55 = vld [vmem:[#allocation40_spill] sm:$0xff] }
 0x77d   : > { %7783 = vrcp.f32 %v1977_v39  ;;  %v10470_v6 = vmul.f32 %v7774_v49, %v12044_v26 }
 0x77e   : > { %v2028_v44 = vpop.xlane.xlu1 %2027  ;;  %7785 = vrcp.f32 %v1998_v5  ;;  %v12047_v5 = vld [vmem:[#allocation43_spill] sm:$0xff] }
 0x77f   : > { %v7776_v20 = vpop.eup %7775 }
 0x780   : > { %v1995_v57 = vpop.xlane.xlu0 %1994  ;;  %v10467_v25 = vmul.f32 %v7776_v20, %v12043_v13  ;;  %v7778_v51 = vpop.eup %7777  ;;  %v4362_v13 = vsel %vm1740_vm2, %v10254_v52, 0.0  ;;  %v4353_v52 = vsel %vm1740_vm2, %v10163_v21, 0.0  ;;  %v4347_v21 = vsel %vm1740_vm2, %v10170_v43, 0.0 }
 0x781   : > { %7787 = vrcp.f32 %v1995_v57  ;;  %v10478_v33 = vmul.f32 %v7778_v51, %v12047_v5  ;;  %v12051_v51 = vld [vmem:[#allocation53_spill] sm:$0xff]  ;;  %v4365_v43 = vsel %vm1740_vm2, %v10246_v34, 0.0  ;;  %v4359_v34 = vsel %vm1740_vm2, %v10250_v17, 0.0 }
 0x782   : > { %v3157_v10 = vpop.xlane.xlu1 %3156  ;;  %7789 = vrcp.f32 %v2004_v18  ;;  %v12050_v18 = vld [vmem:[#allocation42_spill] sm:$0xff]  ;;  %v4377_v17 = vsel %vm1740_vm2, %v10276_v22, 0.0  ;;  %v4371_v22 = vsel %vm1740_vm2, %v10278_v41, 0.0  ;;  %v4401_v41 = vsel %vm1740_vm2, %v10313_v47, 0.0 }
 0x783   : > { %v7780_v56 = vpop.eup %7779  ;;  %12048 = vst [vmem:[#allocation23_spill] sm:$0xff] %v10478_v33  ;;  %v4395_v47 = vsel %vm1740_vm2, %v10315_v58, 0.0  ;;  %v4389_v58 = vsel %vm1740_vm2, %v10360_v1, 0.0 }
 0x784   : > { %v2001_v40 = vpop.xlane.xlu0 %2000  ;;  %v10475_v2 = vmul.f32 %v7780_v56, %v12045_v16  ;;  %v7782_v36 = vpop.eup %7781 }
 0x785   : > { %7791 = vrcp.f32 %v2001_v40  ;;  %v10486_v49 = vmul.f32 %v7782_v36, %v12050_v18  ;;  %v12052_v40 = vld [vmem:[#allocation55_spill] sm:$0xff]  ;;  %v4350_v36 = vsel %vm1740_vm2, %v10174_v60, 0.0 }
 0x786   : > { %12046 = vst [vmem:[#allocation19_spill] sm:$0xff] %v10475_v2  ;;  %v3163_v35 = vpop.xlane.xlu1 %3162  ;;  %7793 = vrcp.f32 %v2022_v45 }
 0x787   : > { %v7784_v3 = vpop.eup %7783 }
 0x788   : > { %v2019_v39 = vpop.xlane.xlu0 %2018  ;;  %v10483_v38 = vmul.f32 %v7784_v3, %v12049_v55  ;;  %v7786_v20 = vpop.eup %7785 }
 0x789   : > { %7795 = vrcp.f32 %v2019_v39  ;;  %v10494_v45 = vmul.f32 %v7786_v20, %v12052_v40 }
 0x78a   : > { %v3181_v57 = vpop.xlane.xlu1 %3180  ;;  %7797 = vrcp.f32 %v2028_v44  ;;  %v12053_v44 = vld [vmem:[#allocation52_spill] sm:$0xff] }
 0x78b   : > { %v7788_v26 = vpop.eup %7787 }
 0x78c   : > { %v10491_v56 = vmul.f32 %v7788_v26, %v12051_v51  ;;  %v7790_v16 = vpop.eup %7789  ;;  %v12055_v26 = vld [vmem:[#allocation54_spill] sm:$0xff] }
 0x78d   : > { %v2025_v5 = vpop.xlane.xlu0 %2024  ;;  %v10504_v51 = vmul.f32 %v7790_v16, %v12055_v26 }
 0x78e   : > { %7799 = vrcp.f32 %v2025_v5  ;;  %v3187_v3 = vpop.xlane.xlu1 %3186 }
 0x78f   : > { %v7792_v55 = vpop.eup %7791  ;;  %4351 = vadd.xlane.f32.xlu0 %v4350_v36  ;;  %7801 = vrcp.f32 %v3157_v10  ;;  %12056 = vst [vmem:[#allocation26_spill] sm:$0xff] %v10504_v51  ;;  %v12057_v10 = vld [vmem:[#allocation57_spill] sm:$0xff] }
 0x790   : > { %v10501_v18 = vmul.f32 %v7792_v55, %v12053_v44  ;;  %v7794_v20 = vpop.eup %7793  ;;  %v12058_v55 = vld [vmem:[#allocation59_spill] sm:$0xff] }
 0x791   : > { %v3154_v40 = vpop.xlane.xlu0 %3153  ;;  %v10514_v44 = vmul.f32 %v7794_v20, %v12058_v55 }
 0x792   : > { %12054 = vst [vmem:[#allocation14_spill] sm:$0xff] %v10501_v18  ;;  %7803 = vrcp.f32 %v3154_v40  ;;  %v3205_v5 = vpop.xlane.xlu1 %3204 }
 0x793   : > { %v7796_v39 = vpop.eup %7795  ;;  %4345 = vadd.xlane.f32.xlu0 %v4344_v15  ;;  %7805 = vrcp.f32 %v3163_v35  ;;  %v12059_v15 = vld [vmem:[#allocation56_spill] sm:$0xff] }
 0x794   : > { %v10511_v36 = vmul.f32 %v7796_v39, %v12057_v10  ;;  %v7798_v26 = vpop.eup %7797  ;;  %v12061_v10 = vld [vmem:[#allocation58_spill] sm:$0xff] }
 0x795   : > { %v3160_v16 = vpop.xlane.xlu0 %3159  ;;  %v10524_v20 = vmul.f32 %v7798_v26, %v12061_v10  ;;  %v12065_v10 = vld [vmem:[#allocation89_spill] sm:$0xff] }
 0x796   : > { %7807 = vrcp.f32 %v3160_v16  ;;  %v3211_v40 = vpop.xlane.xlu1 %3210 }
 0x797   : > { %4363 = vadd.xlane.f32.xlu0 %v4362_v13  ;;  %7809 = vrcp.f32 %v3181_v57  ;;  %12062 = vst [vmem:[#allocation25_spill] sm:$0xff] %v10524_v20 }
 0x798   : > { %v7800_v60 = vpop.eup %7799 }
 0x799   : > { %v3178_v35 = vpop.xlane.xlu0 %3177  ;;  %v10521_v39 = vmul.f32 %v7800_v60, %v12059_v15  ;;  %v7802_v55 = vpop.eup %7801  ;;  %v12063_v15 = vld [vmem:[#allocation87_spill] sm:$0xff] }
 0x79a   : > { %7811 = vrcp.f32 %v3178_v35  ;;  %v3169_v16 = vpop.xlane.xlu1 %3168  ;;  %v10536_v35 = vmul.f32 %v7802_v55, %v12065_v10  ;;  %v12069_v10 = vld [vmem:[#allocation88_spill] sm:$0xff] }
 0x79b   : > { %12060 = vst [vmem:[#allocation16_spill] sm:$0xff] %v10521_v39  ;;  %4357 = vadd.xlane.f32.xlu0 %v4356_v27  ;;  %7813 = vrcp.f32 %v3187_v3  ;;  %v4374_v27 = vsel %vm1740_vm2, %v10281_v28, 0.0  ;;  %v4941_v39 = vld [vmem:[%s11767_s3 + $0x48] sm:$0xff] }
 0x79c   : > { %v7804_v13 = vpop.eup %7803  ;;  %4354 = vadd.xlane.f32.xlu1 %v4353_v52  ;;  %12066 = vst [vmem:[#allocation22_spill] sm:$0xff] %v10536_v35 }
 0x79d   : > { %v3184_v60 = vpop.xlane.xlu0 %3183  ;;  %v10533_v26 = vmul.f32 %v7804_v13, %v12063_v15  ;;  %v7806_v50 = vpop.eup %7805  ;;  %v12067_v15 = vld [vmem:[#allocation86_spill] sm:$0xff] }
 0x79e   : > { %7815 = vrcp.f32 %v3184_v60  ;;  %v3175_v0 = vpop.xlane.xlu1 %3174  ;;  %v10548_v60 = vmul.f32 %v7806_v50, %v12069_v10  ;;  %v12073_v10 = vld [vmem:[#allocation101_spill] sm:$0xff] }
 0x79f   : > { %12064 = vst [vmem:[#allocation21_spill] sm:$0xff] %v10533_v26  ;;  %4375 = vadd.xlane.f32.xlu0 %v4374_v27  ;;  %7817 = vrcp.f32 %v3205_v5  ;;  %v4368_v27 = vsel %vm1740_vm2, %v10271_v8, 0.0 }
 0x7a0   : > { %v7808_v52 = vpop.eup %7807  ;;  %4348 = vadd.xlane.f32.xlu1 %v4347_v21  ;;  %12070 = vst [vmem:[#allocation27_spill] sm:$0xff] %v10548_v60 }
 0x7a1   : > { %v3202_v13 = vpop.xlane.xlu0 %3201  ;;  %v10545_v55 = vmul.f32 %v7808_v52, %v12067_v15  ;;  %v7810_v57 = vpop.eup %7809  ;;  %v12071_v15 = vld [vmem:[#allocation99_spill] sm:$0xff] }
 0x7a2   : > { %7819 = vrcp.f32 %v3202_v13  ;;  %v3193_v28 = vpop.xlane.xlu1 %3192  ;;  %v10560_v13 = vmul.f32 %v7810_v57, %v12073_v10  ;;  %v12077_v10 = vld [vmem:[#allocation100_spill] sm:$0xff] }
 0x7a3   : > { %12068 = vst [vmem:[#allocation24_spill] sm:$0xff] %v10545_v55  ;;  %4369 = vadd.xlane.f32.xlu0 %v4368_v27  ;;  %7821 = vrcp.f32 %v3211_v40  ;;  %v4398_v27 = vsel %vm1740_vm2, %v10320_v29, 0.0 }
 0x7a4   : > { %v7812_v21 = vpop.eup %7811  ;;  %4366 = vadd.xlane.f32.xlu1 %v4365_v43  ;;  %12074 = vst [vmem:[#allocation69_spill] sm:$0xff] %v10560_v13  ;;  %v4942_v13 = vld [vmem:[%s11767_s3 + $0x50] sm:$0xff] }
 0x7a5   : > { %v3208_v52 = vpop.xlane.xlu0 %3207  ;;  %v10557_v50 = vmul.f32 %v7812_v21, %v12071_v15  ;;  %v7814_v3 = vpop.eup %7813  ;;  %v12075_v15 = vld [vmem:[#allocation98_spill] sm:$0xff] }
 0x7a6   : > { %7823 = vrcp.f32 %v3208_v52  ;;  %v3199_v8 = vpop.xlane.xlu1 %3198  ;;  %v10572_v52 = vmul.f32 %v7814_v3, %v12077_v10  ;;  %v12081_v10 = vld [vmem:[#allocation105_spill] sm:$0xff] }
 0x7a7   : > { %12072 = vst [vmem:[#allocation71_spill] sm:$0xff] %v10557_v50  ;;  %4399 = vadd.xlane.f32.xlu0 %v4398_v27  ;;  %7825 = vrcp.f32 %v3169_v16  ;;  %v4392_v27 = vsel %vm1740_vm2, %v10308_v37, 0.0 }
 0x7a8   : > { %v7816_v43 = vpop.eup %7815  ;;  %4360 = vadd.xlane.f32.xlu1 %v4359_v34  ;;  %12078 = vst [vmem:[#allocation72_spill] sm:$0xff] %v10572_v52 }
 0x7a9   : > { %v3166_v21 = vpop.xlane.xlu0 %3165  ;;  %v10569_v57 = vmul.f32 %v7816_v43, %v12075_v15  ;;  %v7818_v5 = vpop.eup %7817  ;;  %v12079_v15 = vld [vmem:[#allocation103_spill] sm:$0xff] }
 0x7aa   : > { %7827 = vrcp.f32 %v3166_v21  ;;  %v3217_v29 = vpop.xlane.xlu1 %3216  ;;  %v10584_v21 = vmul.f32 %v7818_v5, %v12081_v10  ;;  %v12085_v10 = vld [vmem:[#allocation104_spill] sm:$0xff] }
 0x7ab   : > { %12076 = vst [vmem:[#allocation114_spill] sm:$0xff] %v10569_v57  ;;  %4393 = vadd.xlane.f32.xlu0 %v4392_v27  ;;  %7829 = vrcp.f32 %v3175_v0  ;;  %v4386_v27 = vsel %vm1740_vm2, %v10357_v7, 0.0 }
 0x7ac   : > { %v7820_v34 = vpop.eup %7819  ;;  %4378 = vadd.xlane.f32.xlu1 %v4377_v17  ;;  %12082 = vst [vmem:[#allocation73_spill] sm:$0xff] %v10584_v21 }
 0x7ad   : > { %v3172_v43 = vpop.xlane.xlu0 %3171  ;;  %v10581_v3 = vmul.f32 %v7820_v34, %v12079_v15  ;;  %v7822_v40 = vpop.eup %7821  ;;  %v12083_v15 = vld [vmem:[#allocation102_spill] sm:$0xff] }
 0x7ae   : > { %7831 = vrcp.f32 %v3172_v43  ;;  %v3223_v37 = vpop.xlane.xlu1 %3222  ;;  %v10596_v43 = vmul.f32 %v7822_v40, %v12085_v10  ;;  %v12089_v10 = vld [vmem:[#allocation97_spill] sm:$0xff] }
 0x7af   : > { %12080 = vst [vmem:[#allocation74_spill] sm:$0xff] %v10581_v3  ;;  %4387 = vadd.xlane.f32.xlu0 %v4386_v27  ;;  %7833 = vrcp.f32 %v3193_v28  ;;  %v4380_v27 = vsel %vm1740_vm2, %v10346_v24, 0.0 }
 0x7b0   : > { %v7824_v17 = vpop.eup %7823  ;;  %4372 = vadd.xlane.f32.xlu1 %v4371_v22  ;;  %12086 = vst [vmem:[#allocation115_spill] sm:$0xff] %v10596_v43 }
 0x7b1   : > { %v3190_v34 = vpop.xlane.xlu0 %3189  ;;  %v10593_v5 = vmul.f32 %v7824_v17, %v12083_v15  ;;  %v7826_v16 = vpop.eup %7825  ;;  %v12087_v15 = vld [vmem:[#allocation95_spill] sm:$0xff] }
 0x7b2   : > { %7835 = vrcp.f32 %v3190_v34  ;;  %v1938_v7 = vpop.xlane.xlu1 %1937  ;;  %v10608_v34 = vmul.f32 %v7826_v16, %v12089_v10  ;;  %v12093_v10 = vld [vmem:[#allocation96_spill] sm:$0xff] }
 0x7b3   : > { %12084 = vst [vmem:[#allocation77_spill] sm:$0xff] %v10593_v5  ;;  %4381 = vadd.xlane.f32.xlu0 %v4380_v27  ;;  %7837 = vrcp.f32 %v3199_v8  ;;  %v4410_v27 = vsel %vm1740_vm2, %v10385_v23, 0.0  ;;  %v4404_v23 = vsel %vm1740_vm2, %v10375_v53, 0.0  ;;  %v4383_v53 = vsel %vm1740_vm2, %v10344_v9, 0.0 }
 0x7b4   : > { %v7828_v22 = vpop.eup %7827  ;;  %4402 = vadd.xlane.f32.xlu1 %v4401_v41  ;;  %12090 = vst [vmem:[#allocation80_spill] sm:$0xff] %v10608_v34  ;;  %v12121_v34 = vld [vmem:[#allocation32_spill] sm:$0xff] }
 0x7b5   : > { %v3196_v17 = vpop.xlane.xlu0 %3195  ;;  %v10605_v40 = vmul.f32 %v7828_v22, %v12087_v15  ;;  %v7830_v0 = vpop.eup %7829  ;;  %v12091_v15 = vld [vmem:[#allocation94_spill] sm:$0xff] }
 0x7b6   : > { %7839 = vrcp.f32 %v3196_v17  ;;  %v1944_v24 = vpop.xlane.xlu1 %1943  ;;  %v10620_v17 = vmul.f32 %v7830_v0, %v12093_v10  ;;  %v12097_v10 = vld [vmem:[#allocation109_spill] sm:$0xff] }
 0x7b7   : > { %12088 = vst [vmem:[#allocation68_spill] sm:$0xff] %v10605_v40  ;;  %4411 = vadd.xlane.f32.xlu0 %v4410_v27  ;;  %7841 = vrcp.f32 %v3217_v29  ;;  %v12099_v29 = vld [vmem:[#allocation106_spill] sm:$0xff] }
 0x7b8   : > { %v7832_v41 = vpop.eup %7831  ;;  %4396 = vadd.xlane.f32.xlu1 %v4395_v47  ;;  %12094 = vst [vmem:[#allocation79_spill] sm:$0xff] %v10620_v17 }
 0x7b9   : > { %v3214_v22 = vpop.xlane.xlu0 %3213  ;;  %v10617_v16 = vmul.f32 %v7832_v41, %v12091_v15  ;;  %v7834_v28 = vpop.eup %7833  ;;  %v12095_v15 = vld [vmem:[#allocation107_spill] sm:$0xff] }
 0x7ba   : > { %7843 = vrcp.f32 %v3214_v22  ;;  %v1950_v27 = vpop.xlane.xlu1 %1949  ;;  %v10632_v22 = vmul.f32 %v7834_v28, %v12097_v10 }
 0x7bb   : > { %12092 = vst [vmem:[#allocation70_spill] sm:$0xff] %v10617_v16  ;;  %4405 = vadd.xlane.f32.xlu0 %v4404_v23  ;;  %7845 = vrcp.f32 %v3223_v37 }
 0x7bc   : > { %v7836_v47 = vpop.eup %7835  ;;  %4390 = vadd.xlane.f32.xlu1 %v4389_v58  ;;  %12098 = vst [vmem:[#allocation8_spill] sm:$0xff] %v10632_v22  ;;  %v4933_v22 = vld [vmem:[%s11767_s3 + $0x8] sm:$0xff] }
 0x7bd   : > { %v3220_v41 = vpop.xlane.xlu0 %3219  ;;  %v10629_v0 = vmul.f32 %v7836_v47, %v12095_v15  ;;  %v7838_v8 = vpop.eup %7837  ;;  %v12101_v47 = vld [vmem:[#allocation108_spill] sm:$0xff] }
 0x7be   : > { %7847 = vrcp.f32 %v3220_v41  ;;  %v1956_v37 = vpop.xlane.xlu1 %1955  ;;  %v10642_v15 = vmul.f32 %v7838_v8, %v12101_v47  ;;  %v4413_v41 = vsel %vm1740_vm2, %v10380_v62, 0.0 }
 0x7bf   : > { %12096 = vst [vmem:[#allocation75_spill] sm:$0xff] %v10629_v0  ;;  %7849 = vrcp.f32 %v1938_v7 }
 0x7c0   : > { %v7840_v23 = vpop.eup %7839  ;;  %4384 = vadd.xlane.f32.xlu1 %v4383_v53  ;;  %12102 = vst [vmem:[#allocation7_spill] sm:$0xff] %v10642_v15  ;;  %v12103_v53 = vld [vmem:[#allocation111_spill] sm:$0xff] }
 0x7c1   : > { %v1935_v58 = vpop.xlane.xlu0 %1934  ;;  %v10639_v32 = vmul.f32 %v7840_v23, %v12099_v29  ;;  %v7842_v28 = vpop.eup %7841  ;;  %v12105_v29 = vld [vmem:[#allocation113_spill] sm:$0xff] }
 0x7c2   : > { %7851 = vrcp.f32 %v1935_v58  ;;  %v10652_v23 = vmul.f32 %v7842_v28, %v12105_v29  ;;  %v3133_v47 = vpop.xlane.xlu1 %3132  ;;  %v4407_v58 = vsel %vm1740_vm2, %v10382_v14, 0.0  ;;  %v12111_v29 = vld [vmem:[#allocation112_spill] sm:$0xff] }
 0x7c3   : > { %12100 = vst [vmem:[#allocation76_spill] sm:$0xff] %v10639_v32  ;;  %7853 = vrcp.f32 %v1944_v24 }
 0x7c4   : > { %v7844_v10 = vpop.eup %7843  ;;  %4414 = vadd.xlane.f32.xlu1 %v4413_v41  ;;  %12106 = vst [vmem:[#allocation12_spill] sm:$0xff] %v10652_v23  ;;  %v12115_v23 = vld [vmem:[#allocation29_spill] sm:$0xff] }
 0x7c5   : > { %v1941_v7 = vpop.xlane.xlu0 %1940  ;;  %v10649_v1 = vmul.f32 %v7844_v10, %v12103_v53  ;;  %v7846_v8 = vpop.eup %7845  ;;  %v12109_v53 = vld [vmem:[#allocation110_spill] sm:$0xff] }
 0x7c6   : > { %7855 = vrcp.f32 %v1941_v7  ;;  %v10666_v7 = vmul.f32 %v7846_v8, %v12111_v29 }
 0x7c7   : > { %12104 = vst [vmem:[#allocation78_spill] sm:$0xff] %v10649_v1  ;;  %7857 = vrcp.f32 %v1950_v27 }
 0x7c8   : > { %v7848_v9 = vpop.eup %7847  ;;  %v10658_v24 = vpop.f32.mrb[72].mxu1  ;;  %4408 = vadd.xlane.f32.xlu1 %v4407_v58  ;;  %12112 = vst [vmem:[#allocation60_spill] sm:$0xff] %v10666_v7 }
 0x7c9   : > { %12107 = vst [vmem:[#allocation81_spill] sm:$0xff] %v10658_v24  ;;  %v1947_v41 = vpop.xlane.xlu0 %1946  ;;  %v10660_v10 = vpop.f32.mrb[73].mxu1  ;;  %v10663_v28 = vmul.f32 %v7848_v9, %v12109_v53  ;;  %v12116_v9 = vld [vmem:[#allocation31_spill] sm:$0xff] }
 0x7ca   : > { %12108 = vst [vmem:[#allocation11_spill] sm:$0xff] %v10660_v10  ;;  %v7850_v42 = vpop.eup %7849  ;;  %7859 = vrcp.f32 %v1947_v41  ;;  %v10668_v14 = vpop.f32.mrb[74].mxu1 }
 0x7cb   : > { %12110 = vst [vmem:[#allocation6_spill] sm:$0xff] %v10663_v28  ;;  %12113 = vst [vmem:[#allocation9_spill] sm:$0xff] %v10668_v14  ;;  %v10670_v32 = vpop.f32.mrb[75].mxu1  ;;  %7861 = vrcp.f32 %v1956_v37  ;;  %v3139_v58 = vpop.xlane.xlu1 %3138  ;;  %v2386_v53 = vmul.f32 %v7850_v42, %v12116_v9  ;;  %v12118_v28 = vld [vmem:[#allocation28_spill] sm:$0xff]  ;;  %v12119_v9 = vld [vmem:[#allocation35_spill] sm:$0xff] }
 0x7cc   : > { %12114 = vst [vmem:[#allocation63_spill] sm:$0xff] %v10670_v32  ;;  %v7852_v62 = vpop.eup %7851  ;;  %v12117_v32 = vld [vmem:[#allocation30_spill] sm:$0xff] }
 0x7cd   : > { %v2385_v24 = vmul.f32 %v7852_v62, %v12115_v23  ;;  %v7854_v10 = vpop.eup %7853 }
 0x7ce   : > { %v1953_v1 = vpop.xlane.xlu0 %1952  ;;  %v2388_v27 = vmul.f32 %v7854_v10, %v12117_v32  ;;  %v12120_v32 = vld [vmem:[#allocation33_spill] sm:$0xff] }
 0x7cf   : > { %7863 = vrcp.f32 %v1953_v1  ;;  %v2417_v8 = vpack.c.bf16 %v2386_v53, %v2385_v24  ;;  %v3145_v23 = vpop.xlane.xlu1 %3144 }
 0x7d0   : > { %v7856_v29 = vpop.eup %7855  ;;  %7865 = vrcp.f32 %v3133_v47 }
 0x7d1   : > { %v10676_v14 = vpop.f32.mrb[120].mxu0  ;;  %2421 = vst.msk [vmem:[#allocation5] sm:$0xff] %vm558_vm1, %v2417_v8  ;;  %v2387_v37 = vmul.f32 %v7856_v29, %v12118_v28  ;;  %v7858_v7 = vpop.eup %7857 }
 0x7d2   : > { %v3130_v41 = vpop.xlane.xlu0 %3129  ;;  %v10681_v15 = vpop.f32.mrb[121].mxu0  ;;  %v2390_v53 = vmul.f32 %v7858_v7, %v12119_v9 }
 0x7d3   : > { %7867 = vrcp.f32 %v3130_v41  ;;  %v10683_v42 = vpop.f32.mrb[122].mxu0  ;;  %v2418_v1 = vpack.c.bf16 %v2388_v27, %v2387_v37  ;;  %v3151_v41 = vpop.xlane.xlu1 %3150  ;;  %v12122_v37 = vld [vmem:[#allocation34_spill] sm:$0xff] }
 0x7d4   : > { %v7860_v62 = vpop.eup %7859  ;;  %7869 = vrcp.f32 %v3139_v58  ;;  %v10685_v47 = vpop.f32.mrb[123].mxu0 }
 0x7d5   : > { %2422 = vst.msk [vmem:[#allocation5 + $0x8] sm:$0xff] %vm558_vm1, %v2418_v1  ;;  %v2389_v10 = vmul.f32 %v7860_v62, %v12120_v32  ;;  %v7862_v28 = vpop.eup %7861 }
 0x7d6   : > { %v3136_v24 = vpop.xlane.xlu0 %3135  ;;  %v2392_v58 = vmul.f32 %v7862_v28, %v12122_v37 }
 0x7d7   : > { %7871 = vrcp.f32 %v3136_v24  ;;  %v2419_v8 = vpack.c.bf16 %v2390_v53, %v2389_v10  ;;  %v12126_v53 = vld [vmem:[#allocation83_spill] sm:$0xff] }
 0x7d8   : > { %7873 = vrcp.f32 %v3145_v23  ;;  %v12125_v23 = vld [vmem:[#allocation85_spill] sm:$0xff] }
 0x7d9   : > { %v7864_v29 = vpop.eup %7863  ;;  %2423 = vst.msk [vmem:[#allocation5 + $0x10] sm:$0xff] %vm558_vm1, %v2419_v8 }
 0x7da   : > { %v3142_v40 = vpop.xlane.xlu0 %3141  ;;  %v2391_v27 = vmul.f32 %v7864_v29, %v12121_v34  ;;  %v7866_v57 = vpop.eup %7865  ;;  %v12129_v29 = vld [vmem:[#allocation82_spill] sm:$0xff] }
 0x7db   : > { %7875 = vrcp.f32 %v3142_v40  ;;  %v3581_v9 = vmul.f32 %v7866_v57, %v12125_v23 }
 0x7dc   : > { %v2420_v1 = vpack.c.bf16 %v2392_v58, %v2391_v27  ;;  %7877 = vrcp.f32 %v3151_v41  ;;  %v10693_v7 = vpop.f32.mrb[76].mxu1  ;;  %v12130_v27 = vld [vmem:[#allocation84_spill] sm:$0xff] }
 0x7dd   : > { %v7868_v52 = vpop.eup %7867  ;;  %12123 = vst [vmem:[#allocation10_spill] sm:$0xff] %v10693_v7  ;;  %v10695_v24 = vpop.f32.mrb[77].mxu1 }
 0x7de   : > { %v3148_v62 = vpop.xlane.xlu0 %3147  ;;  %12124 = vst [vmem:[#allocation64_spill] sm:$0xff] %v10695_v24  ;;  %2424 = vst.msk [vmem:[#allocation5 + $0x18] sm:$0xff] %vm558_vm1, %v2420_v1  ;;  %v3580_v34 = vmul.f32 %v7868_v52, %v12126_v53  ;;  %v7870_v32 = vpop.eup %7869  ;;  %v12132_v53 = vld [vmem:[#allocation91_spill] sm:$0xff]  ;;  %v4932_v24 = vld [vmem:[%s11767_s3] sm:$0xff] }
 0x7df   : > { %7879 = vrcp.f32 %v3148_v62  ;;  %v10700_v10 = vpop.f32.mrb[78].mxu1  ;;  %v3583_v37 = vmul.f32 %v7870_v32, %v12130_v27  ;;  %v12131_v62 = vld [vmem:[#allocation93_spill] sm:$0xff] }
 0x7e0   : > { %12127 = vst [vmem:[#allocation13_spill] sm:$0xff] %v10700_v10  ;;  %v10702_v28 = vpop.f32.mrb[79].mxu1  ;;  %v3612_v40 = vpack.c.bf16 %v3581_v9, %v3580_v34 }
 0x7e1   : > { %12128 = vst [vmem:[#allocation67_spill] sm:$0xff] %v10702_v28  ;;  %v7872_v8 = vpop.eup %7871 }
 0x7e2   : > { %v3582_v41 = vmul.f32 %v7872_v8, %v12129_v29  ;;  %3616 = vst.msk [vmem:[#allocation5 + $0x20] sm:$0xff] %vm558_vm1, %v3612_v40  ;;  %v7874_v58 = vpop.eup %7873  ;;  %v2434_v1 = vpop.permute.xlu0 %2433  ;;  %v12133_v29 = vld [vmem:[#allocation90_spill] sm:$0xff] }
 0x7e3   : > { %2446 = vst.msk [vmem:[#allocation5] sm:$0xff] %vm2445_vm3, %v2434_v1  ;;  %v3585_v23 = vmul.f32 %v7874_v58, %v12131_v62  ;;  %v12134_v1 = vld [vmem:[#allocation92_spill] sm:$0xff] }
 0x7e4   : > { %v3613_v57 = vpack.c.bf16 %v3583_v37, %v3582_v41 }
 0x7e5   : > { %v7876_v52 = vpop.eup %7875 }
 0x7e6   : > { %3617 = vst.msk [vmem:[#allocation5 + $0x28] sm:$0xff] %vm558_vm1, %v3613_v57  ;;  %v3584_v9 = vmul.f32 %v7876_v52, %v12132_v53  ;;  %v7878_v34 = vpop.eup %7877  ;;  %v2436_v10 = vpop.permute.xlu1 %2435 }
 0x7e7   : > { %2447 = vst.msk [vmem:[#allocation5 + $0x8] sm:$0xff] %vm2445_vm3, %v2436_v10  ;;  %v3587_v41 = vmul.f32 %v7878_v34, %v12134_v1 }
 0x7e8   : > { %v3614_v8 = vpack.c.bf16 %v3585_v23, %v3584_v9 }
 0x7e9   : > { %v7880_v32 = vpop.eup %7879 }
 0x7ea   : > { %v10712_v40 = vpop.f32.mrb[124].mxu0  ;;  %v3586_v27 = vmul.f32 %v7880_v32, %v12133_v29  ;;  %3618 = vst.msk [vmem:[#allocation5 + $0x30] sm:$0xff] %vm558_vm1, %v3614_v8  ;;  %v2459_v58 = vpop.permute.xlu1 %2458 }
 0x7eb   : > { %v10717_v37 = vpop.f32.mrb[125].mxu0  ;;  %2471 = vst.msk [vmem:[#allocation5] sm:$0xff] %vm2470_vm4, %v2459_v58 }
 0x7ec   : > { %v10720_v57 = vpop.f32.mrb[126].mxu0  ;;  %v3615_v52 = vpack.c.bf16 %v3587_v41, %v3586_v27 }
 0x7ed   : > { %v10722_v10 = vpop.f32.mrb[127].mxu0 }
 0x7ee   : > { %3619 = vst.msk [vmem:[#allocation5 + $0x38] sm:$0xff] %vm558_vm1, %v3615_v52  ;;  %v4934_v52 = vld [vmem:[%s11767_s3 + $0x10] sm:$0xff] }
 0x7f2   : > { %v10725_v62 = vpop.f32.mrb[80].mxu1 }
 0x7f3   : > { %v10727_v23 = vpop.f32.mrb[81].mxu1 }
 0x7f4   : > { %v10729_v53 = vpop.f32.mrb[82].mxu1 }
 0x7f5   : > { %v10731_v9 = vpop.f32.mrb[83].mxu1 }
 0x7fe   : > { %v10733_v34 = vpop.f32.mrb[128].mxu0 }
 0x7ff   : > { %v10735_v8 = vpop.f32.mrb[129].mxu0 }
 0x800   : > { %v10737_v32 = vpop.f32.mrb[130].mxu0 }
 0x801   : > { %v10739_v29 = vpop.f32.mrb[131].mxu0 }
 0x809   : > { %v10741_v27 = vpop.f32.mrb[84].mxu1 }
 0x80a   : > { %v10743_v1 = vpop.f32.mrb[85].mxu1 }
 0x80b   : > { %v10745_v41 = vpop.f32.mrb[86].mxu1 }
 0x80c   : > { %v10747_v58 = vpop.f32.mrb[87].mxu1 }
 0x812   : > { %v7317_v7 = vpop.f32.mrb[88].mxu1  ;;  %v10752_v28 = vpop.f32.mrb[132].mxu0 }
 0x813   : > { %v10757_v26 = vadd.f32 %v7317_v7, %v4934_v52  ;;  %v5022_v35 = vpop.f32.mrb[89].mxu1  ;;  %v10759_v0 = vpop.f32.mrb[133].mxu0  ;;  %v4935_v7 = vld [vmem:[%s11767_s3 + $0x18] sm:$0xff] }
 0x814   : > { %v7318_v16 = vpop.f32.mrb[90].mxu1  ;;  %v10764_v17 = vpop.f32.mrb[134].mxu0  ;;  %v10766_v48 = vadd.f32 %v5022_v35, %v4932_v24 }
 0x815   : > { %v5025_v5 = vpop.f32.mrb[91].mxu1  ;;  %v10768_v43 = vpop.f32.mrb[135].mxu0  ;;  %v5326_v30 = vsel %vm1740_vm2, %v10757_v26, -inf  ;;  %v10779_v21 = vadd.f32 %v7318_v16, %v4935_v7  ;;  %v4943_v16 = vld [vmem:[%s11767_s3 + $0x58] sm:$0xff] }
 0x816   : > { %v10775_v52 = vadd.f32 %v5025_v5, %v4933_v22  ;;  %5327 = vmax.xlane.f32.xlu0 %v5326_v30  ;;  %v5320_v35 = vsel %vm1740_vm2, %v10766_v48, -inf }
 0x817   : > { %12135 = vst [vmem:[#allocation61_spill] sm:$0xff] %v10779_v21  ;;  %v5329_v30 = vsel %vm1740_vm2, %v10779_v21, -inf }
 0x818   : > { %v5323_v3 = vsel %vm1740_vm2, %v10775_v52, -inf }
 0x819   : > { %5324 = vmax.xlane.f32.xlu1 %v5323_v3  ;;  %v4940_v3 = vld [vmem:[%s11767_s3 + $0x40] sm:$0xff] }
 0x81a   : > { %v7321_v24 = vpop.f32.mrb[92].mxu1  ;;  %5321 = vmax.xlane.f32.xlu0 %v5320_v35 }
 0x81b   : > { %v5038_v54 = vpop.f32.mrb[93].mxu1 }
 0x81c   : > { %v7322_v50 = vpop.f32.mrb[94].mxu1  ;;  %v4352_v22 = vpop.xlane.xlu0 %4351 }
 0x81d   : > { %v5041_v5 = vpop.f32.mrb[95].mxu1  ;;  %7881 = vrcp.f32 %v4352_v22  ;;  %v4937_v22 = vld [vmem:[%s11767_s3 + $0x28] sm:$0xff] }
 0x81e   : > { %v7333_v55 = vpop.f32.mrb[136].mxu0  ;;  %5330 = vmax.xlane.f32.xlu0 %v5329_v30 }
 0x81f   : > { %v10794_v7 = vadd.f32 %v7333_v55, %v4942_v13  ;;  %v5111_v35 = vpop.f32.mrb[137].mxu0  ;;  %v4938_v55 = vld [vmem:[%s11767_s3 + $0x30] sm:$0xff] }
 0x820   : > { %v7334_v60 = vpop.f32.mrb[138].mxu0  ;;  %v10799_v20 = vadd.f32 %v5111_v35, %v4940_v3  ;;  %v4346_v51 = vpop.xlane.xlu0 %4345  ;;  %v10815_v3 = vadd.f32 %v7321_v24, %v4938_v55 }
 0x821   : > { %12136 = vst [vmem:[#allocation62_spill] sm:$0xff] %v10794_v7  ;;  %v10801_v63 = vadd.f32 %v7334_v60, %v4943_v16  ;;  %v5114_v30 = vpop.f32.mrb[139].mxu0  ;;  %v5350_v18 = vsel %vm1740_vm2, %v10794_v7, -inf  ;;  %v4936_v60 = vld [vmem:[%s11767_s3 + $0x20] sm:$0xff] }
 0x822   : > { %12137 = vst [vmem:[#allocation65_spill] sm:$0xff] %v10799_v20  ;;  %5351 = vmax.xlane.f32.xlu1 %v5350_v18  ;;  %v10808_v13 = vadd.f32 %v5114_v30, %v4941_v39  ;;  %12140 = vst [vmem:[#allocation39_spill] sm:$0xff] %v10815_v3  ;;  %v5344_v16 = vsel %vm1740_vm2, %v10799_v20, -inf  ;;  %v4946_v18 = vld [vmem:[%s11767_s3 + $0x70] sm:$0xff]  ;;  %v10822_v30 = vadd.f32 %v5038_v54, %v4936_v60  ;;  %v4944_v54 = vld [vmem:[%s11767_s3 + $0x60] sm:$0xff] }
 0x823   : > { %12138 = vst [vmem:[#allocation66_spill] sm:$0xff] %v10801_v63  ;;  %v5353_v2 = vsel %vm1740_vm2, %v10801_v63, -inf  ;;  %v5338_v63 = vsel %vm1740_vm2, %v10815_v3, -inf }
 0x824   : > { %12139 = vst [vmem:[#allocation37_spill] sm:$0xff] %v10808_v13  ;;  %5354 = vmax.xlane.f32.xlu0 %v5353_v2  ;;  %v4364_v35 = vpop.xlane.xlu0 %4363  ;;  %12141 = vst [vmem:[#allocation36_spill] sm:$0xff] %v10822_v30  ;;  %v5347_v7 = vsel %vm1740_vm2, %v10808_v13, -inf  ;;  %v4939_v2 = vld [vmem:[%s11767_s3 + $0x38] sm:$0xff] }
 0x825   : > { %v10836_v13 = vadd.f32 %v7322_v50, %v4939_v2  ;;  %v10850_v2 = vadd.f32 %v5041_v5, %v4937_v22  ;;  %v4950_v5 = vld [vmem:[%s11767_s3 + $0x90] sm:$0xff] }
 0x826   : > { %v7337_v39 = vpop.f32.mrb[140].mxu0  ;;  %5345 = vmax.xlane.f32.xlu1 %v5344_v16 }
 0x827   : > { %v5127_v33 = vpop.f32.mrb[141].mxu0  ;;  %v10829_v55 = vadd.f32 %v7337_v39, %v4946_v18  ;;  %12143 = vst [vmem:[#allocation45_spill] sm:$0xff] %v10836_v13  ;;  %12145 = vst [vmem:[#allocation44_spill] sm:$0xff] %v10850_v2 }
 0x828   : > { %v7338_v24 = vpop.f32.mrb[142].mxu0  ;;  %5348 = vmax.xlane.f32.xlu0 %v5347_v7  ;;  %v4358_v16 = vpop.xlane.xlu0 %4357  ;;  %v5332_v7 = vsel %vm1740_vm2, %v10822_v30, -inf  ;;  %v10843_v18 = vadd.f32 %v5127_v33, %v4944_v54  ;;  %v4947_v33 = vld [vmem:[%s11767_s3 + $0x78] sm:$0xff] }
 0x829   : > { %12142 = vst [vmem:[#allocation38_spill] sm:$0xff] %v10829_v55  ;;  %v5130_v20 = vpop.f32.mrb[143].mxu0  ;;  %v4355_v60 = vpop.xlane.xlu1 %4354  ;;  %v5362_v39 = vsel %vm1740_vm2, %v10829_v55, -inf  ;;  %v10864_v55 = vadd.f32 %v7338_v24, %v4947_v33 }
 0x82a   : > { %5339 = vmax.xlane.f32.xlu1 %v5338_v63  ;;  %7883 = vrcp.f32 %v4355_v60  ;;  %12144 = vst [vmem:[#allocation47_spill] sm:$0xff] %v10843_v18  ;;  %v4945_v63 = vld [vmem:[%s11767_s3 + $0x68] sm:$0xff]  ;;  %v5341_v60 = vsel %vm1740_vm2, %v10836_v13, -inf  ;;  %v5356_v54 = vsel %vm1740_vm2, %v10843_v18, -inf }
 0x82b   : > { %7885 = vrcp.f32 %v4346_v51  ;;  %v10857_v51 = vadd.f32 %v5130_v20, %v4945_v63  ;;  %v5335_v20 = vsel %vm1740_vm2, %v10850_v2, -inf  ;;  %v4949_v63 = vld [vmem:[%s11767_s3 + $0x88] sm:$0xff] }
 0x82c   : > { %5333 = vmax.xlane.f32.xlu0 %v5332_v7  ;;  %v4376_v3 = vpop.xlane.xlu0 %4375 }
 0x82d   : > { %v4349_v50 = vpop.xlane.xlu1 %4348  ;;  %12146 = vst [vmem:[#allocation46_spill] sm:$0xff] %v10857_v51  ;;  %v5359_v24 = vsel %vm1740_vm2, %v10857_v51, -inf }
 0x82e   : > { %5363 = vmax.xlane.f32.xlu1 %v5362_v39  ;;  %7887 = vrcp.f32 %v4349_v50  ;;  %v7882_v50 = vpop.eup %7881 }
 0x82f   : > { %7889 = vrcp.f32 %v4364_v35 }
 0x830   : > { %5342 = vmax.xlane.f32.xlu0 %v5341_v60  ;;  %v4370_v7 = vpop.xlane.xlu0 %4369 }
 0x831   : > { %v4367_v39 = vpop.xlane.xlu1 %4366 }
 0x832   : > { %v7349_v22 = vpop.f32.mrb[96].mxu1  ;;  %5357 = vmax.xlane.f32.xlu1 %v5356_v54  ;;  %7891 = vrcp.f32 %v4367_v39  ;;  %v4948_v39 = vld [vmem:[%s11767_s3 + $0x80] sm:$0xff] }
 0x833   : > { %v5200_v13 = vpop.f32.mrb[97].mxu1  ;;  %7893 = vrcp.f32 %v4358_v16  ;;  %v10871_v18 = vadd.f32 %v7349_v22, %v4950_v5  ;;  %v5365_v22 = vsel %vm1740_vm2, %v10864_v55, -inf }
 0x834   : > { %v7350_v35 = vpop.f32.mrb[98].mxu1  ;;  %5336 = vmax.xlane.f32.xlu0 %v5335_v20  ;;  %v7884_v60 = vpop.eup %7883  ;;  %v10879_v20 = vmul.f32 %v7882_v50, %v10676_v14  ;;  %v4952_v50 = vld [vmem:[%s11767_s3 + $0xa0] sm:$0xff] }
 0x835   : > { %v5203_v54 = vpop.f32.mrb[99].mxu1  ;;  %v4400_v33 = vpop.xlane.xlu0 %4399  ;;  %v10882_v30 = vmul.f32 %v7884_v60, %v10683_v42  ;;  %v5374_v14 = vsel %vm1740_vm2, %v10871_v18, -inf }
 0x836   : > { %5360 = vmax.xlane.f32.xlu1 %v5359_v24  ;;  %v4361_v2 = vpop.xlane.xlu1 %4360  ;;  %12147 = vst [vmem:[#allocation49_spill] sm:$0xff] %v10879_v20  ;;  %v7886_v16 = vpop.eup %7885  ;;  %v10884_v5 = vadd.f32 %v5203_v54, %v4949_v63  ;;  %v10890_v24 = vadd.f32 %v5200_v13, %v4948_v39 }
 0x837   : > { %12148 = vst [vmem:[#allocation51_spill] sm:$0xff] %v10882_v30  ;;  %7895 = vrcp.f32 %v4361_v2  ;;  %v4951_v2 = vld [vmem:[%s11767_s3 + $0x98] sm:$0xff] }
 0x838   : > { %5366 = vmax.xlane.f32.xlu0 %v5365_v22  ;;  %v7888_v21 = vpop.eup %7887  ;;  %7897 = vrcp.f32 %v4376_v3  ;;  %12149 = vst [vmem:[#allocation48_spill] sm:$0xff] %v10890_v24  ;;  %v10903_v3 = vmul.f32 %v7886_v16, %v10681_v15  ;;  %v5371_v22 = vsel %vm1740_vm2, %v10884_v5, -inf  ;;  %v10916_v15 = vadd.f32 %v7350_v35, %v4951_v2  ;;  %v4958_v16 = vld [vmem:[%s11767_s3 + $0xd0] sm:$0xff] }
 0x839   : > { %v4394_v42 = vpop.xlane.xlu0 %4393  ;;  %v10906_v13 = vmul.f32 %v7888_v21, %v10685_v47  ;;  %v7890_v54 = vpop.eup %7889  ;;  %v5368_v47 = vsel %vm1740_vm2, %v10890_v24, -inf }
 0x83a   : > { %v10900_v63 = vpop.f32.mrb[100].mxu1  ;;  %5375 = vmax.xlane.f32.xlu1 %v5374_v14  ;;  %v4379_v60 = vpop.xlane.xlu1 %4378  ;;  %12150 = vst [vmem:[#allocation50_spill] sm:$0xff] %v10903_v3 }
 0x83b   : > { %12151 = vst [vmem:[#allocation41_spill] sm:$0xff] %v10906_v13  ;;  %v5216_v39 = vpop.f32.mrb[101].mxu1  ;;  %7899 = vrcp.f32 %v4379_v60 }
 0x83c   : > { %v10910_v51 = vadd.f32 %v5216_v39, %v4952_v50  ;;  %v10912_v20 = vpop.f32.mrb[102].mxu1  ;;  %5372 = vmax.xlane.f32.xlu0 %v5371_v22  ;;  %v7892_v30 = vpop.eup %7891  ;;  %7901 = vrcp.f32 %v4370_v7  ;;  %v10928_v22 = vmul.f32 %v7890_v54, %v10712_v40  ;;  %v5377_v40 = vsel %vm1740_vm2, %v10916_v15, -inf }
 0x83d   : > { %v10918_v21 = vpop.f32.mrb[103].mxu1  ;;  %v10931_v7 = vmul.f32 %v7892_v30, %v10720_v57  ;;  %v7894_v35 = vpop.eup %7893  ;;  %v4956_v57 = vld [vmem:[%s11767_s3 + $0xc0] sm:$0xff] }
 0x83e   : > { %12152 = vst [vmem:[#allocation43_spill] sm:$0xff] %v10910_v51  ;;  %v7365_v50 = vpop.f32.mrb[144].mxu0  ;;  %5369 = vmax.xlane.f32.xlu1 %v5368_v47  ;;  %v4373_v60 = vpop.xlane.xlu1 %4372  ;;  %v5380_v39 = vsel %vm1740_vm2, %v10910_v51, -inf  ;;  %12153 = vst [vmem:[#allocation40_spill] sm:$0xff] %v10928_v22  ;;  %v10943_v54 = vmul.f32 %v7894_v35, %v10717_v37  ;;  %v4960_v37 = vld [vmem:[%s11767_s3 + $0xe0] sm:$0xff] }
 0x83f   : > { %12154 = vst [vmem:[#allocation42_spill] sm:$0xff] %v10931_v7  ;;  %v4388_v2 = vpop.xlane.xlu0 %4387  ;;  %v5289_v14 = vpop.f32.mrb[145].mxu0  ;;  %7903 = vrcp.f32 %v4373_v60  ;;  %v10935_v24 = vadd.f32 %v7365_v50, %v4958_v16 }
 0x840   : > { %v7366_v3 = vpop.f32.mrb[146].mxu0  ;;  %5381 = vmax.xlane.f32.xlu0 %v5380_v39  ;;  %7905 = vrcp.f32 %v4400_v33  ;;  %12155 = vst [vmem:[#allocation53_spill] sm:$0xff] %v10943_v54  ;;  %v10950_v50 = vadd.f32 %v5289_v14, %v4956_v57 }
 0x841   : > { %v7896_v47 = vpop.eup %7895  ;;  %v5292_v51 = vpop.f32.mrb[147].mxu0 }
 0x842   : > { %5378 = vmax.xlane.f32.xlu1 %v5377_v40  ;;  %v4403_v30 = vpop.xlane.xlu1 %4402  ;;  %v10946_v60 = vmul.f32 %v7896_v47, %v10722_v10  ;;  %v7898_v39 = vpop.eup %7897  ;;  %v5398_v40 = vsel %vm1740_vm2, %v10935_v24, -inf  ;;  %v4959_v10 = vld [vmem:[%s11767_s3 + $0xd8] sm:$0xff] }
 0x843   : > { %7907 = vrcp.f32 %v4403_v30  ;;  %v4382_v13 = vpop.xlane.xlu0 %4381 }
 0x844   : > { %12156 = vst [vmem:[#allocation55_spill] sm:$0xff] %v10946_v60  ;;  %7909 = vrcp.f32 %v4394_v42  ;;  %v10963_v42 = vmul.f32 %v7898_v39, %v10725_v62  ;;  %v5392_v62 = vsel %vm1740_vm2, %v10950_v50, -inf }
 0x845   : > { %v7900_v16 = vpop.eup %7899 }
 0x846   : > { %v10960_v35 = vpop.f32.mrb[148].mxu0  ;;  %5399 = vmax.xlane.f32.xlu1 %v5398_v40  ;;  %v4397_v47 = vpop.xlane.xlu1 %4396  ;;  %v10966_v14 = vmul.f32 %v7900_v16, %v10729_v53  ;;  %v10974_v40 = vadd.f32 %v7366_v3, %v4959_v10  ;;  %v4957_v53 = vld [vmem:[%s11767_s3 + $0xc8] sm:$0xff] }
 0x847   : > { %v7902_v57 = vpop.eup %7901  ;;  %v5305_v30 = vpop.f32.mrb[149].mxu0  ;;  %7911 = vrcp.f32 %v4397_v47  ;;  %v10993_v60 = vadd.f32 %v5292_v51, %v4957_v53  ;;  %v12192_v47 = vld [vmem:[#allocation15_spill] sm:$0xff] }
 0x848   : > { %v10968_v33 = vadd.f32 %v5305_v30, %v4960_v37  ;;  %v10970_v54 = vpop.f32.mrb[150].mxu0  ;;  %7913 = vrcp.f32 %v4388_v2  ;;  %v10986_v37 = vmul.f32 %v7902_v57, %v10727_v23  ;;  %v4412_v10 = vpop.xlane.xlu0 %4411  ;;  %v4954_v23 = vld [vmem:[%s11767_s3 + $0xb0] sm:$0xff] }
 0x849   : > { %v7904_v22 = vpop.eup %7903  ;;  %v10976_v7 = vpop.f32.mrb[151].mxu0  ;;  %v11009_v53 = vadd.f32 %v10900_v63, %v4954_v23 }
 0x84a   : > { %5393 = vmax.xlane.f32.xlu1 %v5392_v62  ;;  %v4391_v39 = vpop.xlane.xlu1 %4390  ;;  %v5404_v16 = vsel %vm1740_vm2, %v10968_v33, -inf  ;;  %v10989_v3 = vmul.f32 %v7904_v22, %v10731_v9  ;;  %v7906_v2 = vpop.eup %7905  ;;  %v5401_v62 = vsel %vm1740_vm2, %v10974_v40, -inf }
 0x84b   : > { %7915 = vrcp.f32 %v4391_v39  ;;  %5405 = vmax.xlane.f32.xlu0 %v5404_v16  ;;  %v11001_v22 = vmul.f32 %v7906_v2, %v10733_v34  ;;  %v5395_v16 = vsel %vm1740_vm2, %v10993_v60, -inf  ;;  %v4955_v34 = vld [vmem:[%s11767_s3 + $0xb8] sm:$0xff] }
 0x84c   : > { %7917 = vrcp.f32 %v4382_v13  ;;  %v4406_v2 = vpop.xlane.xlu0 %4405  ;;  %v11025_v23 = vadd.f32 %v10912_v20, %v4955_v34 }
 0x84d   : > { %v7908_v30 = vpop.eup %7907 }
 0x84e   : > { %5402 = vmax.xlane.f32.xlu1 %v5401_v62  ;;  %v4385_v9 = vpop.xlane.xlu1 %4384  ;;  %v11004_v57 = vmul.f32 %v7908_v30, %v10737_v32  ;;  %v7910_v39 = vpop.eup %7909  ;;  %v5389_v63 = vsel %vm1740_vm2, %v11025_v23, -inf }
 0x84f   : > { %7919 = vrcp.f32 %v4385_v9  ;;  %v11017_v30 = vmul.f32 %v7910_v39, %v10735_v8  ;;  %v4953_v8 = vld [vmem:[%s11767_s3 + $0xa8] sm:$0xff] }
 0x850   : > { %v4861_v51 = vpack.c.bf16 %v11004_v57, %v11001_v22  ;;  %7921 = vrcp.f32 %v4412_v10 }
 0x851   : > { %v7912_v13 = vpop.eup %7911 }
 0x852   : > { %5396 = vmax.xlane.f32.xlu1 %v5395_v16  ;;  %v4415_v32 = vpop.xlane.xlu1 %4414  ;;  %v11020_v62 = vmul.f32 %v7912_v13, %v10739_v29  ;;  %v7914_v9 = vpop.eup %7913  ;;  %v5386_v16 = vsel %vm1740_vm2, %v11009_v53, -inf }
 0x853   : > { %7923 = vrcp.f32 %v4415_v32  ;;  %v11033_v39 = vmul.f32 %v7914_v9, %v10741_v27  ;;  %v4962_v27 = vld [vmem:[%s11767_s3 + $0xf0] sm:$0xff] }
 0x854   : > { %7925 = vrcp.f32 %v4406_v2  ;;  %v11041_v2 = vadd.f32 %v10918_v21, %v4953_v8  ;;  %v11057_v8 = vadd.f32 %v10960_v35, %v4962_v27 }
 0x855   : > { %v7916_v10 = vpop.eup %7915 }
 0x856   : > { %5387 = vmax.xlane.f32.xlu1 %v5386_v16  ;;  %v4409_v29 = vpop.xlane.xlu1 %4408  ;;  %v11036_v13 = vmul.f32 %v7916_v10, %v10745_v41  ;;  %v7918_v32 = vpop.eup %7917  ;;  %v12157_v16 = vpack.c.bf16 %v10462_v4, %v10459_v11 }
 0x857   : > { %7927 = vrcp.f32 %v4409_v29  ;;  %v11049_v41 = vmul.f32 %v7918_v32, %v10743_v1  ;;  %v5383_v29 = vsel %vm1740_vm2, %v11041_v2, -inf }
 0x858   : > { %v12244_v22 = vpack.c.bf16 %v11036_v13, %v11033_v39  ;;  %v12247_v39 = vpack.c.bf16 %v11020_v62, %v11017_v30  ;;  %v12248_v13 = vld [vmem:[#allocation55_spill] sm:$0xff] }
 0x859   : > { %v7920_v34 = vpop.eup %7919 }
 0x85a   : > { %5390 = vmax.xlane.f32.xlu1 %v5389_v63  ;;  %v11052_v9 = vmul.f32 %v7920_v34, %v10747_v58  ;;  %v7922_v10 = vpop.eup %7921  ;;  %v4963_v63 = vld [vmem:[%s11767_s3 + $0xf8] sm:$0xff] }
 0x85b   : > { %v11065_v1 = vmul.f32 %v7922_v10, %v10752_v28  ;;  %v11073_v27 = vadd.f32 %v10970_v54, %v4963_v63  ;;  %v5410_v28 = vsel %vm1740_vm2, %v11057_v8, -inf  ;;  %v12161_v63 = vpack.c.bf16 %v10494_v45, %v10491_v56  ;;  %v12189_v34 = vld [vmem:[#allocation69_spill] sm:$0xff] }
 0x85d   : > { %v7924_v21 = vpop.eup %7923  ;;  %v5413_v4 = vsel %vm1740_vm2, %v11073_v27, -inf }
 0x85e   : > { %5384 = vmax.xlane.f32.xlu1 %v5383_v29  ;;  %v11068_v58 = vmul.f32 %v7924_v21, %v10764_v17  ;;  %v7926_v32 = vpop.eup %7925  ;;  %v4961_v17 = vld [vmem:[%s11767_s3 + $0xe8] sm:$0xff]  ;;  %v12160_v29 = vpack.c.bf16 %v10486_v49, %v10483_v38  ;;  %v4329_v38 = vsel %vm1740_vm2, %v10149_v46, 0.0 }
 0x85f   : > { %v11085_v10 = vmul.f32 %v7926_v32, %v10759_v0  ;;  %v11093_v11 = vadd.f32 %v10976_v7, %v4961_v17  ;;  %v12158_v0 = vpack.c.bf16 %v10454_v12, %v10451_v31  ;;  %v12159_v7 = vpack.c.bf16 %v10470_v6, %v10467_v25 }
 0x860   : > { %v4320_v31 = vsel %vm1740_vm2, %v10137_v19, 0.0  ;;  %v4326_v12 = vsel %vm1740_vm2, %v10146_v59, 0.0  ;;  %v12163_v59 = vld [vmem:[#allocation61_spill] sm:$0xff] }
 0x861   : > { %v7928_v35 = vpop.eup %7927  ;;  %2483 = vrot.lane.b32.xlu0 %v12157_v16, %s8096_s23  ;;  %v5407_v16 = vsel %vm1740_vm2, %v11093_v11, -inf }
 0x862   : > { %5411 = vmax.xlane.f32.xlu1 %v5410_v28  ;;  %v11088_v54 = vmul.f32 %v7928_v35, %v10768_v43  ;;  %v4323_v43 = vsel %vm1740_vm2, %v10135_v61, 0.0  ;;  %v12162_v61 = vpack.c.bf16 %v10514_v44, %v10511_v36 }
 0x864   : > { %v12252_v62 = vpack.c.bf16 %v11088_v54, %v11085_v10 }
 0x866   : > { %5414 = vmax.xlane.f32.xlu1 %v5413_v4 }
 0x86a   : > { %5408 = vmax.xlane.f32.xlu1 %v5407_v16 }
 0x87b   : > { %2460 = vrot.lane.b32.xlu1 %v12158_v0, %s8095_s20 }
 0x880   : > { %4324 = vadd.xlane.f32.xlu0 %v4323_v43 }
 0x896   : > { %2485 = vrot.lane.b32.xlu0 %v12159_v7, %s8096_s23 }
 0x89a   : > { %2439 = vrot.lane.b32.xlu0 %v12160_v29, %s8094_s19 }
 0x89e   : > { %2462 = vrot.lane.b32.xlu0 %v12161_v63, %s8095_s20 }
 0x89f   : > { %4321 = vadd.xlane.f32.xlu1 %v4320_v31 }
 0x8a2   : > { %2487 = vrot.lane.b32.xlu0 %v12162_v61, %s8096_s23 }
 0x8a3   : > { %4327 = vadd.xlane.f32.xlu1 %v4326_v12  ;;  %v5328_v25 = vpop.xlane.xlu0 %5327 }
 0x8a4   : > { %v5418_v49 = vsub.f32 %v10757_v26, %v5328_v25  ;;  %v12164_v26 = vld [vmem:[#allocation66_spill] sm:$0xff]  ;;  %v12167_v25 = vld [vmem:[#allocation37_spill] sm:$0xff] }
 0x8a6   : > { %v5325_v6 = vpop.xlane.xlu1 %5324  ;;  %v5452_v44 = vmul.f32 1.442695, %v5418_v49 }
 0x8a7   : > { %v5417_v56 = vsub.f32 %v10775_v52, %v5325_v6  ;;  %4330 = vadd.xlane.f32.xlu1 %v4329_v38  ;;  %v5322_v19 = vpop.xlane.xlu0 %5321  ;;  %v12165_v52 = vld [vmem:[#allocation62_spill] sm:$0xff] }
 0x8a8   : > { %v5416_v45 = vsub.f32 %v10766_v48, %v5322_v19  ;;  %v12166_v48 = vld [vmem:[#allocation65_spill] sm:$0xff] }
 0x8a9   : > { %v5450_v32 = vmul.f32 1.442695, %v5417_v56 }
 0x8aa   : > { %v5448_v36 = vmul.f32 1.442695, %v5416_v45  ;;  %v12168_v45 = vld [vmem:[#allocation23_spill] sm:$0xff] }
 0x8ab   : > { %7929 = vpow2.f32 %v5450_v32  ;;  %v5331_v35 = vpop.xlane.xlu0 %5330  ;;  %v12169_v32 = vld [vmem:[#allocation19_spill] sm:$0xff] }
 0x8ac   : > { %7931 = vpow2.f32 %v5448_v36  ;;  %v5419_v28 = vsub.f32 %v12163_v59, %v5331_v35  ;;  %v12170_v36 = vpack.c.bf16 %v12168_v45, %v12169_v32  ;;  %v12179_v32 = vld [vmem:[#allocation38_spill] sm:$0xff] }
 0x8ad   : > { %7933 = vpow2.f32 %v5452_v44 }
 0x8ae   : > { %v5454_v17 = vmul.f32 1.442695, %v5419_v28 }
 0x8af   : > { %v5352_v4 = vpop.xlane.xlu1 %5351 }
 0x8b0   : > { %7935 = vpow2.f32 %v5454_v17  ;;  %v5426_v0 = vsub.f32 %v12165_v52, %v5352_v4  ;;  %v12171_v17 = vld [vmem:[#allocation39_spill] sm:$0xff]  ;;  %v12173_v52 = vld [vmem:[#allocation26_spill] sm:$0xff] }
 0x8b1   : > { %v5355_v46 = vpop.xlane.xlu0 %5354 }
 0x8b2   : > { %v5427_v16 = vsub.f32 %v12164_v26, %v5355_v46  ;;  %v5468_v38 = vmul.f32 1.442695, %v5426_v0  ;;  %v12172_v26 = vld [vmem:[#allocation36_spill] sm:$0xff]  ;;  %v12174_v0 = vld [vmem:[#allocation14_spill] sm:$0xff] }
 0x8b3   : > { %v5346_v43 = vpop.xlane.xlu1 %5345 }
 0x8b4   : > { %v5470_v7 = vmul.f32 1.442695, %v5427_v16  ;;  %v5424_v29 = vsub.f32 %v12166_v48, %v5346_v43  ;;  %v12175_v43 = vpack.c.bf16 %v12173_v52, %v12174_v0  ;;  %v8073_v48 = vld [vmem:[#allocation4 + $0x160] sm:$0xff]  ;;  %v4926_v0 = vld [vmem:[#allocation4 + $0x170] sm:$0xff] }
 0x8b5   : > { %v11134_v63 = vpop.eup %7929  ;;  %v5349_v31 = vpop.xlane.xlu0 %5348 }
 0x8b6   : > { %v11136_v61 = vpop.eup %7931  ;;  %v5464_v12 = vmul.f32 1.442695, %v5424_v29  ;;  %v5425_v6 = vsub.f32 %v12167_v25, %v5349_v31  ;;  %7937 = vpow2.f32 %v5470_v7  ;;  %v12176_v29 = vld [vmem:[#allocation45_spill] sm:$0xff] }
 0x8b7   : > { %v5340_v49 = vpop.xlane.xlu1 %5339  ;;  %v5608_v56 = vpack.c.bf16 %v11134_v63, %v11136_v61  ;;  %v11145_v44 = vpop.eup %7933 }
 0x8b8   : > { %v5466_v19 = vmul.f32 1.442695, %v5425_v6  ;;  %2437 = vrot.lane.b32.xlu1 %v12170_v36, %s8094_s19  ;;  %7939 = vpow2.f32 %v5464_v12  ;;  %v5422_v4 = vsub.f32 %v12171_v17, %v5340_v49  ;;  %v4925_v12 = vld [vmem:[#allocation4 + $0x168] sm:$0xff] }
 0x8b9   : > { %7379 = vmatprep.mubr.msk.bf16.mxu1 %vm1740_vm2, %v5608_v56  ;;  %v5334_v35 = vpop.xlane.xlu0 %5333  ;;  %v12177_v49 = vld [vmem:[#allocation47_spill] sm:$0xff] }
 0x8ba   : > { %v11148_v59 = vpop.eup %7935  ;;  %7941 = vpow2.f32 %v5466_v19  ;;  %v5420_v16 = vsub.f32 %v12172_v26, %v5334_v35  ;;  %v5460_v25 = vmul.f32 1.442695, %v5422_v4  ;;  %v12178_v19 = vld [vmem:[#allocation17_spill] sm:$0xff]  ;;  %v12180_v26 = vld [vmem:[#allocation44_spill] sm:$0xff] }
 0x8bb   : > { %v5609_v28 = vpack.c.bf16 %v11148_v59, %v11145_v44  ;;  %7943 = vpow2.f32 %v5468_v38  ;;  %v5364_v46 = vpop.xlane.xlu1 %5363  ;;  %v4335_v45 = vsel %vm1740_vm2, %v12178_v19, 0.0 }
 0x8bc   : > { %2464 = vrot.lane.b32.xlu1 %v12175_v43, %s8095_s20  ;;  %v5456_v38 = vmul.f32 1.442695, %v5420_v16  ;;  %v5430_v36 = vsub.f32 %v12179_v32, %v5364_v46  ;;  %7945 = vpow2.f32 %v5460_v25  ;;  %v12181_v46 = vld [vmem:[#allocation46_spill] sm:$0xff] }
 0x8bd   : > { %7380 = vmatmul.mubr.msk.bf16.vlgmr.msra.gmra.mrb[104].mxu1 %vm1740_vm2, %v5609_v28  ;;  %v5343_v7 = vpop.xlane.xlu0 %5342  ;;  %v11183_v32 = vld [vmem:[%s11768_s4] sm:$0xff]  }
 0x8be   : > { %7404 = vmatpush3.bf16.msra.mxu1 %v8073_v48  ;;  %v5423_v31 = vsub.f32 %v12176_v29, %v5343_v7  ;;  %7947 = vpow2.f32 %v5456_v38  ;;  %v4927_v38 = vld [vmem:[#allocation4 + $0x178] sm:$0xff] }
 0x8bf   : > { %7405 = vmatprep.subr.bf16.mxu1 %v4925_v12  ;;  %v5358_v6 = vpop.xlane.xlu1 %5357 }
 0x8c0   : > { %v5428_v56 = vsub.f32 %v12177_v49, %v5358_v6  ;;  %v5462_v35 = vmul.f32 1.442695, %v5423_v31  ;;  %v11164_v17 = vpop.eup %7937  ;;  %v5476_v6 = vmul.f32 1.442695, %v5430_v36 }
 0x8c1   : > { %4336 = vadd.xlane.f32.xlu0 %v4335_v45  ;;  %v5337_v28 = vpop.xlane.xlu0 %5336 }
 0x8c2   : > { %7406 = vmatpush3.bf16.msra.mxu1 %v4925_v12  ;;  %v5421_v52 = vsub.f32 %v12180_v26, %v5337_v28  ;;  %v11167_v4 = vpop.eup %7939  ;;  %v5472_v16 = vmul.f32 1.442695, %v5428_v56  ;;  %7949 = vpow2.f32 %v5462_v35  ;;  %v8074_v35 = vld [vmem:[#allocation4 + $0x1e0] sm:$0xff]  ;;  %v4929_v28 = vld [vmem:[#allocation4 + $0x1e8] sm:$0xff] }
 0x8c3   : > { %7407 = vmatprep.subr.bf16.mxu1 %v4926_v0  ;;  %v5361_v43 = vpop.xlane.xlu1 %5360 }
 0x8c4   : > { %v11169_v7 = vpop.eup %7941  ;;  %v5458_v48 = vmul.f32 1.442695, %v5421_v52  ;;  %v5429_v29 = vsub.f32 %v12181_v46, %v5361_v43  ;;  %v12182_v43 = vld [vmem:[#allocation48_spill] sm:$0xff] }
 0x8c5   : > { %v11172_v31 = vpop.eup %7943  ;;  %v5367_v12 = vpop.xlane.xlu0 %5366  ;;  %v5612_v49 = vpack.c.bf16 %v11169_v7, %v11167_v4 }
 0x8c6   : > { %v5613_v25 = vpack.c.bf16 %v11164_v17, %v11172_v31  ;;  %7951 = vpow2.f32 %v5458_v48  ;;  %v5474_v56 = vmul.f32 1.442695, %v5429_v29  ;;  %7408 = vmatpush3.bf16.msra.mxu1 %v4926_v0  ;;  %v5431_v19 = vsub.f32 %v10864_v55, %v5367_v12  ;;  %v11190_v46 = vpop.eup %7945  ;;  %v4930_v29 = vld [vmem:[#allocation4 + $0x1f0] sm:$0xff] }
 0x8c7   : > { %7953 = vpow2.f32 %v5472_v16  ;;  %7409 = vmatprep.subr.bf16.mxu1 %v4927_v38  ;;  %v5376_v45 = vpop.xlane.xlu1 %5375  ;;  %7395 = vmatprep.mubr.msk.bf16.mxu0 %vm1740_vm2, %v5612_v49 }
 0x8c8   : > { %7955 = vpow2.f32 %v5474_v56  ;;  %v5478_v36 = vmul.f32 1.442695, %v5431_v19  ;;  %7396 = vmatmul.mubr.msk.bf16.vlgmr.msra.gmra.mrb[152].mxu0 %vm1740_vm2, %v5613_v25  ;;  %v5434_v52 = vsub.f32 %v10871_v18, %v5376_v45 }
 0x8c9   : > { %7957 = vpow2.f32 %v5476_v6  ;;  %7420 = vmatpush3.bf16.msra.mxu0 %v8074_v35  ;;  %v5373_v55 = vpop.xlane.xlu0 %5372  ;;  %v11192_v6 = vpop.eup %7947 }
 0x8ca   : > { %7959 = vpow2.f32 %v5478_v36  ;;  %7410 = vmatpush3.bf16.msra.mxu1 %v4927_v38  ;;  %7421 = vmatprep.subr.bf16.mxu0 %v4929_v28  ;;  %v5433_v26 = vsub.f32 %v10884_v5, %v5373_v55  ;;  %v5484_v25 = vmul.f32 1.442695, %v5434_v52  ;;  %v4931_v38 = vld [vmem:[#allocation4 + $0x1f8] sm:$0xff] }
 0x8cb   : > { %v5370_v0 = vpop.xlane.xlu1 %5369  ;;  %7435 = vmatprep.subr.bf16.mxu1 %v11183_v32 }
 0x8cc   : > { %v5482_v16 = vmul.f32 1.442695, %v5433_v26  ;;  %v5432_v48 = vsub.f32 %v12182_v43, %v5370_v0  ;;  %v11194_v49 = vpop.eup %7949 }
 0x8cd   : > { %7422 = vmatpush3.bf16.msra.mxu0 %v4929_v28  ;;  %v5611_v28 = vpack.c.bf16 %v11194_v49, %v11190_v46  ;;  %v5382_v0 = vpop.xlane.xlu0 %5381 }
 0x8ce   : > { %v5480_v12 = vmul.f32 1.442695, %v5432_v48  ;;  %7423 = vmatprep.subr.bf16.mxu0 %v4930_v29  ;;  %7961 = vpow2.f32 %v5482_v16  ;;  %v12183_v48 = vld [vmem:[#allocation25_spill] sm:$0xff] }
 0x8cf   : > { %v5379_v5 = vpop.xlane.xlu1 %5378 }
 0x8d0   : > { %v11196_v18 = vpop.eup %7951  ;;  %7963 = vpow2.f32 %v5480_v12  ;;  %v5435_v56 = vsub.f32 %v10916_v15, %v5379_v5 }
 0x8d1   : > { %v11199_v19 = vpop.eup %7953  ;;  %7424 = vmatpush3.bf16.msra.mxu0 %v4930_v29  ;;  %v5610_v45 = vpack.c.bf16 %v11196_v18, %v11192_v6  ;;  %7965 = vpow2.f32 %v5484_v25  ;;  %v12184_v29 = vld [vmem:[#allocation16_spill] sm:$0xff] }
 0x8d2   : > { %v11203_v36 = vpop.eup %7955  ;;  %v5486_v35 = vmul.f32 1.442695, %v5435_v56  ;;  %7425 = vmatprep.subr.bf16.mxu0 %v4931_v38  ;;  %v12185_v12 = vpack.c.bf16 %v12183_v48, %v12184_v29 }
 0x8d3   : > { %v11207_v55 = vpop.eup %7957  ;;  %v5400_v26 = vpop.xlane.xlu1 %5399  ;;  %7383 = vmatprep.mubr.msk.bf16.mxu1 %vm1740_vm2, %v5610_v45  ;;  %v5614_v15 = vpack.c.bf16 %v11203_v36, %v11199_v19 }
 0x8d4   : > { %v11212_v52 = vpop.eup %7959  ;;  %7967 = vpow2.f32 %v5486_v35  ;;  %7384 = vmatmul.mubr.msk.bf16.gmra.mrb[108].mxu1 %vm1740_vm2, %v5611_v28  ;;  %v12186_v35 = vld [vmem:[#allocation27_spill] sm:$0xff]  ;;  %v12187_v28 = vld [vmem:[#allocation24_spill] sm:$0xff]  ;;  %v5442_v21 = vsub.f32 %v10935_v24, %v5400_v26  ;;  %v4332_v24 = vsel %vm1740_vm2, %v12192_v47, 0.0 }
 0x8d5   : > { %7426 = vmatpush3.bf16.msra.mxu0 %v4931_v38  ;;  %7399 = vmatprep.mubr.msk.bf16.mxu0 %vm1740_vm2, %v5614_v15  ;;  %v5615_v16 = vpack.c.bf16 %v11212_v52, %v11207_v55  ;;  %v12188_v15 = vpack.c.bf16 %v12186_v35, %v12187_v28  ;;  %v7560_v26 = vld [vmem:[%s11768_s4 + $0x8] sm:$0xff]  }
 0x8d7   : > { %v5394_v43 = vpop.xlane.xlu1 %5393  ;;  %2489 = vrot.lane.b32.xlu0 %v12185_v12, %s8096_s23  ;;  %7400 = vmatmul.mubr.msk.bf16.gmra.mrb[156].mxu0 %vm1740_vm2, %v5615_v16 }
 0x8d8   : > { %v11223_v25 = vpop.xlane.xlu0 %5405  ;;  %v11225_v5 = vpop.eup %7961  ;;  %v5440_v38 = vsub.f32 %v10950_v50, %v5394_v43 }
 0x8da   : > { %v11227_v56 = vpop.eup %7963  ;;  %v5496_v43 = vmul.f32 1.442695, %v5440_v38  ;;  %v5500_v38 = vmul.f32 1.442695, %v5442_v21 }
 0x8db   : > { %v5403_v45 = vpop.xlane.xlu1 %5402  ;;  %3630 = vrot.lane.b32.xlu0 %v12188_v15, %s8094_s19  ;;  %v5616_v48 = vpack.c.bf16 %v11225_v5, %v11227_v56  ;;  %v11237_v12 = vpop.eup %7965 }
 0x8dc   : > { %v5443_v16 = vsub.f32 %v10974_v40, %v5403_v45  ;;  %v2484_v29 = vpop.permute.xlu0 %2483  ;;  %v12190_v40 = vld [vmem:[#allocation71_spill] sm:$0xff]  ;;  %7969 = vpow2.f32 %v5496_v43 }
 0x8dd   : > { %2496 = vst.msk [vmem:[#allocation5] sm:$0xff] %vm2495_vm5, %v2484_v29  ;;  %7411 = vmatprep.mubr.msk.bf16.mxu1 %vm1740_vm2, %v5616_v48  ;;  %v12191_v45 = vpack.c.bf16 %v12189_v34, %v12190_v40  ;;  %v12193_v29 = vld [vmem:[#allocation73_spill] sm:$0xff]  ;;  %v12194_v40 = vld [vmem:[#allocation74_spill] sm:$0xff] }
 0x8de   : > { %v11242_v50 = vpop.eup %7967  ;;  %v5502_v28 = vmul.f32 1.442695, %v5443_v16  ;;  %v12195_v47 = vpack.c.bf16 %v12193_v29, %v12194_v40 }
 0x8df   : > { %v5617_v35 = vpack.c.bf16 %v11242_v50, %v11237_v12  ;;  %v5397_v15 = vpop.xlane.xlu1 %5396  ;;  %3652 = vrot.lane.b32.xlu0 %v12191_v45, %s8095_s20  ;;  %v12196_v45 = vld [vmem:[#allocation18_spill] sm:$0xff] }
 0x8e0   : > { %v5441_v48 = vsub.f32 %v10993_v60, %v5397_v15  ;;  %4333 = vadd.xlane.f32.xlu1 %v4332_v24  ;;  %7971 = vpow2.f32 %v5502_v28  ;;  %v4338_v20 = vsel %vm1740_vm2, %v12196_v45, 0.0  ;;  %v12197_v60 = vld [vmem:[#allocation43_spill] sm:$0xff]  ;;  %v12201_v15 = vld [vmem:[#allocation20_spill] sm:$0xff] }
 0x8e1   : > { %7412 = vmatmul.mubr.msk.bf16.vlgmr.msra.gmra.mrb[112].mxu1 %vm1740_vm2, %v5617_v35  ;;  %v5436_v21 = vsub.f32 %v12197_v60, %v5382_v0  ;;  %v12199_v35 = vld [vmem:[#allocation77_spill] sm:$0xff]  ;;  %v4341_v24 = vsel %vm1740_vm2, %v12201_v15, 0.0  ;;  %v12202_v0 = vld [vmem:[#allocation79_spill] sm:$0xff] }
 0x8e2   : > { %v5498_v16 = vmul.f32 1.442695, %v5441_v48  ;;  %7436 = vmatpush3.bf16.msra.mxu1 %v11183_v32  ;;  %v12198_v32 = vld [vmem:[#allocation115_spill] sm:$0xff] }
 0x8e3   : > { %v5388_v34 = vpop.xlane.xlu1 %5387  ;;  %3676 = vrot.lane.b32.xlu0 %v12195_v47, %s8096_s23  ;;  %7437 = vmatprep.subr.bf16.mxu1 %v7560_v26  ;;  %v12200_v28 = vpack.c.bf16 %v12198_v32, %v12199_v35 }
 0x8e4   : > { %7973 = vpow2.f32 %v5498_v16  ;;  %4339 = vadd.xlane.f32.xlu1 %v4338_v20  ;;  %v5438_v29 = vsub.f32 %v11009_v53, %v5388_v34  ;;  %v5488_v16 = vmul.f32 1.442695, %v5436_v21  ;;  %v12205_v21 = vld [vmem:[#allocation8_spill] sm:$0xff] }
 0x8e5   : > { %7975 = vpow2.f32 %v5500_v38 }
 0x8e6   : > { %7438 = vmatpush3.bf16.msra.mxu1 %v7560_v26  ;;  %v12203_v26 = vld [vmem:[#allocation70_spill] sm:$0xff]  ;;  %v11277_v47 = vpop.eup %7969  ;;  %v5492_v32 = vmul.f32 1.442695, %v5438_v29  ;;  %7977 = vpow2.f32 %v5488_v16 }
 0x8e7   : > { %v5391_v43 = vpop.xlane.xlu1 %5390  ;;  %3678 = vrot.lane.b32.xlu0 %v12200_v28, %s8096_s23  ;;  %v12204_v40 = vpack.c.bf16 %v12202_v0, %v12203_v26 }
 0x8e8   : > { %v5439_v48 = vsub.f32 %v11025_v23, %v5391_v43  ;;  %4342 = vadd.xlane.f32.xlu1 %v4341_v24  ;;  %v12206_v43 = vld [vmem:[#allocation75_spill] sm:$0xff]  ;;  %v5444_v24 = vsub.f32 %v10968_v33, %v11223_v25  ;;  %v12209_v33 = vld [vmem:[#allocation21_spill] sm:$0xff] }
 0x8e9   : > { %v12207_v28 = vpack.c.bf16 %v12205_v21, %v12206_v43 }
 0x8ea   : > { %v5494_v20 = vmul.f32 1.442695, %v5439_v48  ;;  %v11280_v60 = vpop.eup %7971 }
 0x8eb   : > { %v5385_v38 = vpop.xlane.xlu1 %5384  ;;  %3634 = vrot.lane.b32.xlu0 %v12204_v40, %s8094_s19 }
 0x8ec   : > { %v5437_v45 = vsub.f32 %v11041_v2, %v5385_v38  ;;  %7979 = vpow2.f32 %v5494_v20  ;;  %v5504_v20 = vmul.f32 1.442695, %v5444_v24  ;;  %v6076_v24 = vld [vmem:[#allocation5] sm:$0xff] }
 0x8ee   : > { %v11282_v35 = vpop.eup %7973  ;;  %v5490_v23 = vmul.f32 1.442695, %v5437_v45 }
 0x8ef   : > { %v11284_v53 = vpop.eup %7975  ;;  %v5412_v34 = vpop.xlane.xlu1 %5411  ;;  %3656 = vrot.lane.b32.xlu0 %v12207_v28, %s8095_s20  ;;  %v5620_v15 = vpack.c.bf16 %v11282_v35, %v11277_v47  ;;  %v12211_v28 = vld [vmem:[#allocation72_spill] sm:$0xff] }
 0x8f0   : > { %v5621_v2 = vpack.c.bf16 %v11280_v60, %v11284_v53  ;;  %7981 = vpow2.f32 %v5490_v23  ;;  %v5446_v16 = vsub.f32 %v11057_v8, %v5412_v34  ;;  %v11300_v26 = vpop.eup %7977  ;;  %v12208_v23 = vld [vmem:[#allocation22_spill] sm:$0xff] }
 0x8f1   : > { %7983 = vpow2.f32 %v5492_v32  ;;  %7427 = vmatprep.mubr.msk.bf16.mxu0 %vm1740_vm2, %v5620_v15  ;;  %v12210_v25 = vpack.c.bf16 %v12208_v23, %v12209_v33  ;;  %v12212_v15 = vld [vmem:[#allocation114_spill] sm:$0xff] }
 0x8f2   : > { %7428 = vmatmul.mubr.msk.bf16.vlgmr.msra.gmra.mrb[160].mxu0 %vm1740_vm2, %v5621_v2  ;;  %v5508_v32 = vmul.f32 1.442695, %v5446_v16  ;;  %7985 = vpow2.f32 %v5504_v20  ;;  %v12213_v2 = vpack.c.bf16 %v12211_v28, %v12212_v15  ;;  %v5542_v28 = vsel %vm1740_vm2, %v11172_v31, 0.0 }
 0x8f3   : > { %v5415_v48 = vpop.xlane.xlu1 %5414  ;;  %v5566_v31 = vsel %vm1740_vm2, %v11237_v12, 0.0  ;;  %v5584_v12 = vsel %vm1740_vm2, %v11277_v47, 0.0  ;;  %v5572_v47 = vsel %vm1740_vm2, %v11300_v26, 0.0 }
 0x8f4   : > { %v5447_v29 = vsub.f32 %v11073_v27, %v5415_v48  ;;  %v12214_v48 = vld [vmem:[#allocation80_spill] sm:$0xff] }
 0x8f6   : > { %v5510_v38 = vmul.f32 1.442695, %v5447_v29  ;;  %v11303_v45 = vpop.eup %7979  ;;  %v12215_v29 = vld [vmem:[#allocation68_spill] sm:$0xff] }
 0x8f7   : > { %v5409_v0 = vpop.xlane.xlu1 %5408  ;;  %v12216_v16 = vpack.c.bf16 %v12214_v48, %v12215_v29  ;;  %v5518_v29 = vsel %vm1740_vm2, %v11145_v44, 0.0  ;;  %v5521_v44 = vsel %vm1740_vm2, %v11148_v59, 0.0  ;;  %v5539_v59 = vsel %vm1740_vm2, %v11169_v7, 0.0 }
 0x8f8   : > { %v5445_v40 = vsub.f32 %v11093_v11, %v5409_v0  ;;  %7987 = vpow2.f32 %v5510_v38  ;;  %v12217_v0 = vld [vmem:[#allocation7_spill] sm:$0xff]  ;;  %v5557_v7 = vsel %vm1740_vm2, %v11212_v52, 0.0 }
 0x8f9   : > { %3628 = vrot.lane.b32.xlu1 %v12210_v25, %s8094_s19 }
 0x8fa   : > { %v11309_v21 = vpop.eup %7981  ;;  %v5506_v27 = vmul.f32 1.442695, %v5445_v40  ;;  %v12218_v40 = vld [vmem:[#allocation76_spill] sm:$0xff] }
 0x8fb   : > { %v7984_v8 = vpop.eup %7983  ;;  %v2461_v34 = vpop.permute.xlu1 %2460  ;;  %v5618_v43 = vpack.c.bf16 %v11309_v21, %v11300_v26 }
 0x8fc   : > { %7989 = vpow2.f32 %v5506_v27  ;;  %2472 = vst.msk [vmem:[#allocation5 + $0x8] sm:$0xff] %vm2470_vm4, %v2461_v34  ;;  %v5619_v11 = vpack.c.bf16 %v11303_v45, %v7984_v8  ;;  %v11326_v20 = vpop.eup %7985 }
 0x8fd   : > { %7991 = vpow2.f32 %v5508_v32  ;;  %3654 = vrot.lane.b32.xlu1 %v12213_v2, %s8095_s20  ;;  %7415 = vmatprep.mubr.msk.bf16.mxu1 %vm1740_vm2, %v5618_v43  ;;  %v12219_v32 = vpack.c.bf16 %v12217_v0, %v12218_v40  ;;  %v5515_v43 = vsel %vm1740_vm2, %v11134_v63, 0.0  ;;  %v5536_v2 = vsel %vm1740_vm2, %v11167_v4, 0.0 }
 0x8fe   : > { %7416 = vmatmul.mubr.msk.bf16.gmra.mrb[116].mxu1 %vm1740_vm2, %v5619_v11  ;;  %v5548_v63 = vsel %vm1740_vm2, %v11199_v19, 0.0  ;;  %v5560_v4 = vsel %vm1740_vm2, %v11227_v56, 0.0  ;;  %v5512_v19 = vsel %vm1740_vm2, %v11136_v61, 0.0  ;;  %v5578_v0 = vsel %vm1740_vm2, %v7984_v8, 0.0  ;;  %v12220_v8 = vld [vmem:[#allocation11_spill] sm:$0xff] }
 0x8ff   : > { %7439 = vmatprep.mubr.msk.bf16.mxu1 %vm332_vm0, %v6076_v24  ;;  %v5554_v24 = vsel %vm1740_vm2, %v11207_v55, 0.0  ;;  %v5590_v55 = vsel %vm1740_vm2, %v11284_v53, 0.0  ;;  %v5545_v61 = vsel %vm1740_vm2, %v11164_v17, 0.0 }
 0x901   : > { %3632 = vrot.lane.b32.xlu1 %v12216_v16, %s8094_s19 }
 0x902   : > { %v11328_v38 = vpop.eup %7987 }
 0x905   : > { %3658 = vrot.lane.b32.xlu1 %v12219_v32, %s8095_s20 }
 0x906   : > { %v11334_v23 = vpop.eup %7989 }
 0x907   : > { %v7992_v33 = vpop.eup %7991  ;;  %v5622_v25 = vpack.c.bf16 %v11334_v23, %v11326_v20 }
 0x908   : > { %v5623_v27 = vpack.c.bf16 %v11328_v38, %v7992_v33  ;;  %v5602_v17 = vsel %vm1740_vm2, %v7992_v33, 0.0  ;;  %v5596_v33 = vsel %vm1740_vm2, %v11326_v20, 0.0  ;;  %v5563_v20 = vsel %vm1740_vm2, %v11225_v5, 0.0 }
 0x909   : > { %7431 = vmatprep.mubr.msk.bf16.mxu0 %vm1740_vm2, %v5622_v25  ;;  %v5581_v5 = vsel %vm1740_vm2, %v11303_v45, 0.0  ;;  %v5605_v45 = vsel %vm1740_vm2, %v11328_v38, 0.0 }
 0x90a   : > { %7432 = vmatmul.mubr.msk.bf16.gmra.mrb[164].mxu0 %vm1740_vm2, %v5623_v27 }
 0x90d   : > { %v4325_v34 = vpop.xlane.xlu0 %4324 }
 0x90e   : > { %5516 = vadd.xlane.f32.xlu0 %v5515_v43  ;;  %7993 = vrcp.f32 %v4325_v34  ;;  %v12221_v43 = vld [vmem:[#allocation63_spill] sm:$0xff] }
 0x911   : > { %v2486_v11 = vpop.permute.xlu0 %2485 }
 0x912   : > { %2497 = vst.msk [vmem:[#allocation5 + $0x8] sm:$0xff] %vm2495_vm5, %v2486_v11  ;;  %5543 = vadd.xlane.f32.xlu0 %v5542_v28 }
 0x915   : > { %v2440_v15 = vpop.permute.xlu0 %2439 }
 0x916   : > { %2449 = vst.msk [vmem:[#allocation5 + $0x18] sm:$0xff] %vm2445_vm3, %v2440_v15  ;;  %5537 = vadd.xlane.f32.xlu0 %v5536_v2 }
 0x918   : > { %v7994_v32 = vpop.eup %7993 }
 0x919   : > { %v6077_v48 = vld [vmem:[#allocation5 + $0x8] sm:$0xff]  ;;  %v2463_v53 = vpop.permute.xlu0 %2462  ;;  %v4773_v11 = vmul.f32 %v7994_v32, %v12221_v43 }
 0x91a   : > { %5555 = vadd.xlane.f32.xlu0 %v5554_v24  ;;  %7440 = vmatmul.mubr.msk.bf16.vlgmr.msra.gmra.mrb[120].mxu1 %vm332_vm0, %v6077_v48  ;;  %v5551_v48 = vsel %vm1740_vm2, %v11203_v36, 0.0  ;;  %v5593_v36 = vsel %vm1740_vm2, %v11280_v60, 0.0  ;;  %v5575_v60 = vsel %vm1740_vm2, %v11309_v21, 0.0 }
 0x91d   : > { %v2488_v28 = vpop.permute.xlu0 %2487 }
 0x91e   : > { %5549 = vadd.xlane.f32.xlu0 %v5548_v63  ;;  %v12222_v63 = vld [vmem:[#allocation81_spill] sm:$0xff] }
 0x922   : > { %5567 = vadd.xlane.f32.xlu0 %v5566_v31 }
 0x926   : > { %5561 = vadd.xlane.f32.xlu0 %v5560_v4  ;;  %v12223_v4 = vld [vmem:[#allocation9_spill] sm:$0xff] }
 0x929   : > { %5519 = vadd.xlane.f32.xlu1 %v5518_v29 }
 0x92a   : > { %5591 = vadd.xlane.f32.xlu0 %v5590_v55 }
 0x92c   : > { %v4322_v16 = vpop.xlane.xlu1 %4321 }
 0x92d   : > { %7995 = vrcp.f32 %v4322_v16  ;;  %5513 = vadd.xlane.f32.xlu1 %v5512_v19  ;;  %v5569_v16 = vsel %vm1740_vm2, %v11242_v50, 0.0  ;;  %v12224_v50 = vld [vmem:[#allocation12_spill] sm:$0xff] }
 0x92e   : > { %5585 = vadd.xlane.f32.xlu0 %v5584_v12  ;;  %v5587_v12 = vsel %vm1740_vm2, %v11282_v35, 0.0 }
 0x930   : > { %v4328_v56 = vpop.xlane.xlu1 %4327 }
 0x931   : > { %5522 = vadd.xlane.f32.xlu1 %v5521_v44  ;;  %7997 = vrcp.f32 %v4328_v56  ;;  %v12225_v44 = vld [vmem:[#allocation78_spill] sm:$0xff] }
 0x932   : > { %5579 = vadd.xlane.f32.xlu0 %v5578_v0  ;;  %v12226_v0 = vpack.c.bf16 %v12224_v50, %v12225_v44  ;;  %v12239_v50 = vld [vmem:[#allocation40_spill] sm:$0xff] }
 0x934   : > { %v4331_v40 = vpop.xlane.xlu1 %4330 }
 0x935   : > { %7999 = vrcp.f32 %v4331_v40  ;;  %5546 = vadd.xlane.f32.xlu1 %v5545_v61  ;;  %v5524_v61 = vsel %vm1740_vm2, %v11192_v6, 0.0  ;;  %v5533_v6 = vsel %vm1740_vm2, %v11194_v49, 0.0 }
 0x936   : > { %5573 = vadd.xlane.f32.xlu0 %v5572_v47 }
 0x937   : > { %v7996_v25 = vpop.eup %7995 }
 0x938   : > { %v2438_v27 = vpop.permute.xlu1 %2437  ;;  %v4772_v34 = vmul.f32 %v7996_v25, %v12220_v8  ;;  %v5599_v25 = vsel %vm1740_vm2, %v11334_v23, 0.0  ;;  %v5527_v8 = vsel %vm1740_vm2, %v11196_v18, 0.0 }
 0x939   : > { %2448 = vst.msk [vmem:[#allocation5 + $0x10] sm:$0xff] %vm2445_vm3, %v2438_v27  ;;  %5540 = vadd.xlane.f32.xlu1 %v5539_v59  ;;  %v5530_v27 = vsel %vm1740_vm2, %v11190_v46, 0.0  ;;  %v12227_v46 = vld [vmem:[#allocation64_spill] sm:$0xff] }
 0x93a   : > { %2473 = vst.msk [vmem:[#allocation5 + $0x10] sm:$0xff] %vm2470_vm4, %v2463_v53  ;;  %5603 = vadd.xlane.f32.xlu0 %v5602_v17  ;;  %v4804_v26 = vpack.c.bf16 %v4773_v11, %v4772_v34 }
 0x93b   : > { %2498 = vst.msk [vmem:[#allocation5 + $0x10] sm:$0xff] %vm2495_vm5, %v2488_v28  ;;  %v7998_v2 = vpop.eup %7997  ;;  %v12228_v28 = vld [vmem:[#allocation67_spill] sm:$0xff] }
 0x93c   : > { %v2465_v15 = vpop.permute.xlu1 %2464  ;;  %4808 = vst.msk [vmem:[#allocation5 + $0x40] sm:$0xff] %vm558_vm1, %v4804_v26  ;;  %v4774_v31 = vmul.f32 %v7998_v2, %v12222_v63  ;;  %v12230_v2 = vld [vmem:[#allocation50_spill] sm:$0xff] }
 0x93d   : > { %2474 = vst.msk [vmem:[#allocation5 + $0x18] sm:$0xff] %vm2470_vm4, %v2465_v15  ;;  %5558 = vadd.xlane.f32.xlu1 %v5557_v7  ;;  %v12229_v7 = vld [vmem:[#allocation41_spill] sm:$0xff]  ;;  %v12232_v63 = vld [vmem:[#allocation10_spill] sm:$0xff] }
 0x93e   : > { %5597 = vadd.xlane.f32.xlu0 %v5596_v33  ;;  %v12231_v33 = vpack.c.bf16 %v12229_v7, %v12230_v2 }
 0x93f   : > { %v8000_v24 = vpop.eup %7999 }
 0x940   : > { %v4775_v29 = vmul.f32 %v8000_v24, %v12223_v4  ;;  %v12233_v4 = vld [vmem:[#allocation13_spill] sm:$0xff] }
 0x941   : > { %5552 = vadd.xlane.f32.xlu1 %v5551_v48 }
 0x942   : > { %v6078_v52 = vld [vmem:[#allocation5 + $0x10] sm:$0xff]  ;;  %v4805_v55 = vpack.c.bf16 %v4775_v29, %v4774_v31 }
 0x943   : > { %7443 = vmatprep.mubr.msk.bf16.mxu1 %vm332_vm0, %v6078_v52 }
 0x944   : > { %4809 = vst.msk [vmem:[#allocation5 + $0x48] sm:$0xff] %vm558_vm1, %v4805_v55  ;;  %v12234_v55 = vpack.c.bf16 %v10966_v14, %v10963_v42  ;;  %v12235_v42 = vld [vmem:[#allocation60_spill] sm:$0xff]  ;;  %v12236_v14 = vld [vmem:[#allocation6_spill] sm:$0xff] }
 0x945   : > { %5570 = vadd.xlane.f32.xlu1 %v5569_v16 }
 0x949   : > { %5564 = vadd.xlane.f32.xlu1 %v5563_v20 }
 0x94d   : > { %5594 = vadd.xlane.f32.xlu1 %v5593_v36 }
 0x94e   : > { %v4337_v19 = vpop.xlane.xlu0 %4336 }
 0x94f   : > { %8001 = vrcp.f32 %v4337_v19 }
 0x951   : > { %5588 = vadd.xlane.f32.xlu1 %v5587_v12  ;;  %v12237_v12 = vpack.c.bf16 %v12235_v42, %v12236_v14 }
 0x952   : > { %v2490_v56 = vpop.permute.xlu0 %2489 }
 0x953   : > { %2499 = vst.msk [vmem:[#allocation5 + $0x18] sm:$0xff] %vm2495_vm5, %v2490_v56  ;;  %v12238_v56 = vld [vmem:[#allocation42_spill] sm:$0xff] }
 0x954   : > { %3680 = vrot.lane.b32.xlu0 %v12226_v0, %s8096_s23  ;;  %v12240_v44 = vpack.c.bf16 %v12238_v56, %v12239_v50  ;;  %v12241_v0 = vld [vmem:[#allocation51_spill] sm:$0xff] }
 0x955   : > { %5582 = vadd.xlane.f32.xlu1 %v5581_v5  ;;  %v12242_v5 = vld [vmem:[#allocation49_spill] sm:$0xff] }
 0x956   : > { %v3631_v53 = vpop.permute.xlu0 %3630 }
 0x957   : > { %3641 = vst.msk [vmem:[#allocation5 + $0x28] sm:$0xff] %vm2445_vm3, %v3631_v53  ;;  %v12243_v53 = vpack.c.bf16 %v12241_v0, %v12242_v5 }
 0x959   : > { %5576 = vadd.xlane.f32.xlu1 %v5575_v60  ;;  %v8002_v34 = vpop.eup %8001  ;;  %v12245_v60 = vpack.c.bf16 %v10989_v3, %v10986_v37 }
 0x95a   : > { %v3653_v35 = vpop.permute.xlu0 %3652  ;;  %v6079_v40 = vld [vmem:[#allocation5 + $0x18] sm:$0xff]  ;;  %v4777_v26 = vmul.f32 %v8002_v34, %v12228_v28 }
 0x95b   : > { %7444 = vmatmul.mubr.msk.bf16.gmra.mrb[124].mxu1 %vm332_vm0, %v6079_v40  ;;  %v12246_v40 = vpack.c.bf16 %v11068_v58, %v11065_v1  ;;  %v12251_v1 = vpack.c.bf16 %v11052_v9, %v11049_v41 }
 0x95d   : > { %5525 = vadd.xlane.f32.xlu1 %v5524_v61 }
 0x95e   : > { %v3677_v32 = vpop.permute.xlu0 %3676 }
 0x961   : > { %5606 = vadd.xlane.f32.xlu1 %v5605_v45 }
 0x962   : > { %v3679_v47 = vpop.permute.xlu0 %3678 }
 0x965   : > { %5600 = vadd.xlane.f32.xlu1 %v5599_v25 }
 0x966   : > { %v3635_v21 = vpop.permute.xlu0 %3634 }
 0x967   : > { %3643 = vst.msk [vmem:[#allocation5 + $0x38] sm:$0xff] %vm2445_vm3, %v3635_v21 }
 0x969   : > { %5531 = vadd.xlane.f32.xlu1 %v5530_v27 }
 0x96a   : > { %v3657_v52 = vpop.permute.xlu0 %3656 }
 0x96d   : > { %v4334_v59 = vpop.xlane.xlu1 %4333  ;;  %5534 = vadd.xlane.f32.xlu1 %v5533_v6 }
 0x96e   : > { %8003 = vrcp.f32 %v4334_v59 }
 0x971   : > { %v4340_v38 = vpop.xlane.xlu1 %4339 }
 0x972   : > { %8005 = vrcp.f32 %v4340_v38 }
 0x973   : > { %5528 = vadd.xlane.f32.xlu0 %v5527_v8 }
 0x975   : > { %v4343_v23 = vpop.xlane.xlu1 %4342 }
 0x976   : > { %8007 = vrcp.f32 %v4343_v23 }
 0x978   : > { %v8004_v43 = vpop.eup %8003 }
 0x979   : > { %v3629_v11 = vpop.permute.xlu1 %3628  ;;  %v4776_v17 = vmul.f32 %v8004_v43, %v12227_v46 }
 0x97a   : > { %3640 = vst.msk [vmem:[#allocation5 + $0x20] sm:$0xff] %vm2445_vm3, %v3629_v11 }
 0x97b   : > { %3664 = vst.msk [vmem:[#allocation5 + $0x20] sm:$0xff] %vm2470_vm4, %v3653_v35  ;;  %v4806_v49 = vpack.c.bf16 %v4777_v26, %v4776_v17 }
 0x97c   : > { %3688 = vst.msk [vmem:[#allocation5 + $0x20] sm:$0xff] %vm2495_vm5, %v3677_v32  ;;  %v8006_v18 = vpop.eup %8005  ;;  %v12249_v32 = vld [vmem:[#allocation53_spill] sm:$0xff] }
 0x97d   : > { %v3655_v15 = vpop.permute.xlu1 %3654  ;;  %4810 = vst.msk [vmem:[#allocation5 + $0x50] sm:$0xff] %vm558_vm1, %v4806_v49  ;;  %v4778_v31 = vmul.f32 %v8006_v18, %v12232_v63  ;;  %v12250_v45 = vpack.c.bf16 %v12248_v13, %v12249_v32 }
 0x97e   : > { %3665 = vst.msk [vmem:[#allocation5 + $0x28] sm:$0xff] %vm2470_vm4, %v3655_v15  ;;  %4820 = vrot.lane.b32.xlu1 %v12231_v33, %s8094_s19 }
 0x97f   : > { %3689 = vst.msk [vmem:[#allocation5 + $0x28] sm:$0xff] %vm2495_vm5, %v3679_v47 }
 0x980   : > { %v8008_v24 = vpop.eup %8007 }
 0x981   : > { %v3633_v48 = vpop.permute.xlu1 %3632  ;;  %v4779_v29 = vmul.f32 %v8008_v24, %v12233_v4 }
 0x982   : > { %3642 = vst.msk [vmem:[#allocation5 + $0x30] sm:$0xff] %vm2445_vm3, %v3633_v48  ;;  %4846 = vrot.lane.b32.xlu1 %v12234_v55, %s8095_s20 }
 0x983   : > { %3666 = vst.msk [vmem:[#allocation5 + $0x30] sm:$0xff] %vm2470_vm4, %v3657_v52  ;;  %v6080_v16 = vld [vmem:[#allocation5 + $0x20] sm:$0xff]  ;;  %v4807_v20 = vpack.c.bf16 %v4779_v29, %v4778_v31 }
 0x984   : > { %7447 = vmatprep.mubr.msk.bf16.mxu1 %vm332_vm0, %v6080_v16 }
 0x985   : > { %v3659_v36 = vpop.permute.xlu1 %3658  ;;  %4811 = vst.msk [vmem:[#allocation5 + $0x58] sm:$0xff] %vm558_vm1, %v4807_v20 }
 0x986   : > { %3667 = vst.msk [vmem:[#allocation5 + $0x38] sm:$0xff] %vm2470_vm4, %v3659_v36  ;;  %4870 = vrot.lane.b32.xlu1 %v4861_v51, %s8096_s23  ;;  %v6081_v19 = vld [vmem:[#allocation5 + $0x28] sm:$0xff] }
 0x987   : > { %7448 = vmatmul.mubr.msk.bf16.gmra.mrb[128].mxu1 %vm332_vm0, %v6081_v19 }
 0x989   : > { %3682 = vrot.lane.b32.xlu0 %v12237_v12, %s8096_s23 }
 0x98a   : > { %4826 = vrot.lane.b32.xlu1 %v12240_v44, %s8094_s19 }
 0x98d   : > { %4822 = vrot.lane.b32.xlu0 %v12243_v53, %s8094_s19 }
 0x98e   : > { %4850 = vrot.lane.b32.xlu1 %v12244_v22, %s8095_s20 }
 0x990   : > { %v11469_v57 = vpop.f32.mrb[104].mxu1 }
 0x991   : > { %v5670_v51 = vpop.f32.mrb[105].mxu1  ;;  %4844 = vrot.lane.b32.xlu0 %v12245_v60, %s8095_s20 }
 0x992   : > { %v7382_v35 = vpop.f32.mrb[106].mxu1  ;;  %4874 = vrot.lane.b32.xlu1 %v12246_v40, %s8096_s23 }
 0x993   : > { %v5673_v61 = vpop.f32.mrb[107].mxu1 }
 0x995   : > { %4868 = vrot.lane.b32.xlu0 %v12247_v39, %s8096_s23 }
 0x999   : > { %4824 = vrot.lane.b32.xlu0 %v12250_v45, %s8094_s19 }
 0x99b   : > { %v11487_v47 = vpop.f32.mrb[152].mxu0  ;;  %v5517_v37 = vpop.xlane.xlu0 %5516 }
 0x99c   : > { %v11489_v3 = vpop.f32.mrb[153].mxu0  ;;  %8009 = vrcp.f32 %v5517_v37 }
 0x99d   : > { %v11491_v25 = vpop.f32.mrb[154].mxu0  ;;  %4848 = vrot.lane.b32.xlu0 %v12251_v1, %s8095_s20 }
 0x99e   : > { %v11497_v58 = vpop.f32.mrb[155].mxu0 }
 0x99f   : > { %v5544_v30 = vpop.xlane.xlu0 %5543 }
 0x9a1   : > { %4872 = vrot.lane.b32.xlu0 %v12252_v62, %s8096_s23 }
 0x9a3   : > { %v5538_v21 = vpop.xlane.xlu0 %5537 }
 0x9a6   : > { %v8010_v24 = vpop.eup %8009 }
 0x9a7   : > { %v11503_v27 = vpop.f32.mrb[108].mxu1  ;;  %v5556_v6 = vpop.xlane.xlu0 %5555  ;;  %v5965_v55 = vmul.f32 %v8010_v24, %v5673_v61 }
 0x9a8   : > { %v11505_v59 = vpop.f32.mrb[109].mxu1 }
 0x9a9   : > { %v11507_v38 = vpop.f32.mrb[110].mxu1 }
 0x9aa   : > { %v11509_v8 = vpop.f32.mrb[111].mxu1  ;;  %v11511_v41 = vpop.f32.mrb[156].mxu0 }
 0x9ab   : > { %v11513_v9 = vpop.f32.mrb[157].mxu0  ;;  %v5550_v23 = vpop.xlane.xlu0 %5549 }
 0x9ac   : > { %v11515_v34 = vpop.f32.mrb[158].mxu0 }
 0x9ad   : > { %v11517_v43 = vpop.f32.mrb[159].mxu0 }
 0x9af   : > { %v5568_v10 = vpop.xlane.xlu0 %5567 }
 0x9b3   : > { %v11519_v54 = vpop.xlane.xlu0 %5561 }
 0x9b4   : > { %v11521_v11 = vpop.f32.mrb[112].mxu1 }
 0x9b5   : > { %v11523_v46 = vpop.f32.mrb[113].mxu1 }
 0x9b6   : > { %v5520_v17 = vpop.xlane.xlu1 %5519  ;;  %v11525_v28 = vpop.f32.mrb[114].mxu1 }
 0x9b7   : > { %v11527_v26 = vpop.f32.mrb[115].mxu1  ;;  %v11529_v49 = vpop.xlane.xlu0 %5591 }
 0x9ba   : > { %v5514_v15 = vpop.xlane.xlu1 %5513 }
 0x9bb   : > { %8011 = vrcp.f32 %v5514_v15  ;;  %v11531_v18 = vpop.xlane.xlu0 %5585 }
 0x9bc   : > { %8013 = vrcp.f32 %v5520_v17 }
 0x9be   : > { %v5523_v7 = vpop.xlane.xlu1 %5522 }
 0x9bf   : > { %8015 = vrcp.f32 %v5523_v7  ;;  %v11533_v2 = vpop.xlane.xlu0 %5579 }
 0x9c0   : > { %8017 = vrcp.f32 %v5544_v30 }
 0x9c2   : > { %v5547_v33 = vpop.xlane.xlu1 %5546 }
 0x9c3   : > { %8019 = vrcp.f32 %v5547_v33  ;;  %v11535_v48 = vpop.xlane.xlu0 %5573 }
 0x9c4   : > { %8021 = vrcp.f32 %v5538_v21 }
 0x9c5   : > { %v8012_v63 = vpop.eup %8011  ;;  %v11537_v31 = vpop.f32.mrb[160].mxu0 }
 0x9c6   : > { %v5541_v4 = vpop.xlane.xlu1 %5540  ;;  %v11539_v29 = vpop.f32.mrb[161].mxu0  ;;  %v5964_v52 = vmul.f32 %v8012_v63, %v5670_v51 }
 0x9c7   : > { %v8014_v16 = vpop.eup %8013  ;;  %8023 = vrcp.f32 %v5541_v4  ;;  %v11541_v20 = vpop.f32.mrb[162].mxu0 }
 0x9c8   : > { %v11543_v36 = vpop.xlane.xlu0 %5603  ;;  %v11545_v19 = vpop.f32.mrb[163].mxu0  ;;  %v5996_v42 = vpack.c.bf16 %v5965_v55, %v5964_v52  ;;  %8025 = vrcp.f32 %v5556_v6  ;;  %v5966_v56 = vmul.f32 %v8014_v16, %v11469_v57 }
 0x9c9   : > { %v8016_v14 = vpop.eup %8015 }
 0x9ca   : > { %v5559_v12 = vpop.xlane.xlu1 %5558  ;;  %v5967_v50 = vmul.f32 %v8016_v14, %v7382_v35  ;;  %6000 = vst.msk [vmem:[#allocation5 + $0x60] sm:$0xff] %vm558_vm1, %v5996_v42  ;;  %v8018_v44 = vpop.eup %8017 }
 0x9cb   : > { %8027 = vrcp.f32 %v5559_v12  ;;  %v5974_v51 = vmul.f32 %v8018_v44, %v11487_v47 }
 0x9cc   : > { %v11549_v0 = vpop.xlane.xlu0 %5597  ;;  %v5997_v5 = vpack.c.bf16 %v5967_v50, %v5966_v56  ;;  %8029 = vrcp.f32 %v5550_v23 }
 0x9cd   : > { %v8020_v53 = vpop.eup %8019 }
 0x9ce   : > { %v5553_v22 = vpop.xlane.xlu1 %5552  ;;  %v5975_v60 = vmul.f32 %v8020_v53, %v11491_v25  ;;  %6001 = vst.msk [vmem:[#allocation5 + $0x68] sm:$0xff] %vm558_vm1, %v5997_v5  ;;  %v8022_v40 = vpop.eup %8021 }
 0x9cf   : > { %8031 = vrcp.f32 %v5553_v22  ;;  %v5972_v45 = vmul.f32 %v8022_v40, %v11489_v3 }
 0x9d0   : > { %v3681_v57 = vpop.permute.xlu0 %3680  ;;  %v6005_v35 = vpack.c.bf16 %v5975_v60, %v5974_v51  ;;  %8033 = vrcp.f32 %v5568_v10 }
 0x9d1   : > { %3690 = vst.msk [vmem:[#allocation5 + $0x30] sm:$0xff] %vm2495_vm5, %v3681_v57  ;;  %v8024_v61 = vpop.eup %8023  ;;  %v11555_v39 = vpop.f32.mrb[116].mxu1 }
 0x9d2   : > { %v5571_v13 = vpop.xlane.xlu1 %5570  ;;  %v11557_v32 = vpop.f32.mrb[117].mxu1  ;;  %6014 = vrot.lane.b32.xlu1 %v6005_v35, %s8094_s19  ;;  %v5973_v47 = vmul.f32 %v8024_v61, %v11497_v58 }
 0x9d3   : > { %v8026_v37 = vpop.eup %8025  ;;  %8035 = vrcp.f32 %v5571_v13  ;;  %v11562_v25 = vpop.f32.mrb[118].mxu1 }
 0x9d4   : > { %v11564_v1 = vpop.f32.mrb[119].mxu1  ;;  %v6004_v30 = vpack.c.bf16 %v5973_v47, %v5972_v45  ;;  %8037 = vrcp.f32 %v11519_v54  ;;  %v5978_v21 = vmul.f32 %v8026_v37, %v11511_v41 }
 0x9d5   : > { %v8028_v62 = vpop.eup %8027 }
 0x9d6   : > { %v5565_v6 = vpop.xlane.xlu1 %5564  ;;  %6012 = vrot.lane.b32.xlu0 %v6004_v30, %s8094_s19  ;;  %v5979_v23 = vmul.f32 %v8028_v62, %v11515_v34  ;;  %v8030_v3 = vpop.eup %8029 }
 0x9d7   : > { %8039 = vrcp.f32 %v5565_v6  ;;  %v5976_v54 = vmul.f32 %v8030_v3, %v11513_v9 }
 0x9d8   : > { %v6082_v58 = vld [vmem:[#allocation5 + $0x30] sm:$0xff]  ;;  %v6007_v10 = vpack.c.bf16 %v5979_v23, %v5978_v21  ;;  %8041 = vrcp.f32 %v11529_v49 }
 0x9d9   : > { %7451 = vmatprep.mubr.msk.bf16.mxu1 %vm332_vm0, %v6082_v58  ;;  %v8032_v17 = vpop.eup %8031 }
 0x9da   : > { %v5595_v15 = vpop.xlane.xlu1 %5594  ;;  %6018 = vrot.lane.b32.xlu1 %v6007_v10, %s8094_s19  ;;  %v5977_v41 = vmul.f32 %v8032_v17, %v11517_v43  ;;  %v8034_v7 = vpop.eup %8033 }
 0x9db   : > { %8043 = vrcp.f32 %v5595_v15  ;;  %v5982_v63 = vmul.f32 %v8034_v7, %v11521_v11 }
 0x9dc   : > { %v6006_v33 = vpack.c.bf16 %v5977_v41, %v5976_v54  ;;  %8045 = vrcp.f32 %v11531_v18 }
 0x9dd   : > { %v8036_v34 = vpop.eup %8035  ;;  %v11576_v24 = vpop.f32.mrb[164].mxu0 }
 0x9de   : > { %v5589_v4 = vpop.xlane.xlu1 %5588  ;;  %v11579_v52 = vpop.f32.mrb[165].mxu0  ;;  %6016 = vrot.lane.b32.xlu0 %v6006_v33, %s8094_s19  ;;  %v5983_v49 = vmul.f32 %v8036_v34, %v11525_v28 }
 0x9df   : > { %v8038_v9 = vpop.eup %8037  ;;  %8047 = vrcp.f32 %v5589_v4  ;;  %v11583_v43 = vpop.f32.mrb[166].mxu0 }
 0x9e0   : > { %v11585_v55 = vpop.f32.mrb[167].mxu0  ;;  %v6029_v16 = vpack.c.bf16 %v5983_v49, %v5982_v63  ;;  %v5980_v18 = vmul.f32 %v8038_v9, %v11523_v46  ;;  %8049 = vrcp.f32 %v11533_v2 }
 0x9e1   : > { %v8040_v42 = vpop.eup %8039 }
 0x9e2   : > { %v5583_v11 = vpop.xlane.xlu1 %5582  ;;  %6038 = vrot.lane.b32.xlu1 %v6029_v16, %s8095_s20  ;;  %v5981_v14 = vmul.f32 %v8040_v42, %v11527_v26  ;;  %v8042_v12 = vpop.eup %8041 }
 0x9e3   : > { %8051 = vrcp.f32 %v5583_v11  ;;  %v5990_v50 = vmul.f32 %v8042_v12, %v11537_v31 }
 0x9e4   : > { %v6028_v28 = vpack.c.bf16 %v5981_v14, %v5980_v18  ;;  %8053 = vrcp.f32 %v11535_v48  ;;  %v11601_v48 = vld [vmem:[%s11769_s5] ss:$0 sm:$0xff] }
 0x9e5   : > { %v8044_v56 = vpop.eup %8043 }
 0x9e6   : > { %v5577_v44 = vpop.xlane.xlu1 %5576  ;;  %6036 = vrot.lane.b32.xlu0 %v6028_v28, %s8095_s20  ;;  %v5991_v46 = vmul.f32 %v8044_v56, %v11541_v20  ;;  %v8046_v2 = vpop.eup %8045 }
 0x9e7   : > { %8055 = vrcp.f32 %v5577_v44  ;;  %v5988_v26 = vmul.f32 %v8046_v2, %v11539_v29 }
 0x9e8   : > { %v6053_v5 = vpack.c.bf16 %v5991_v46, %v5990_v50  ;;  %8057 = vrcp.f32 %v11543_v36 }
 0x9e9   : > { %v8048_v53 = vpop.eup %8047 }
 0x9ea   : > { %v5526_v22 = vpop.xlane.xlu1 %5525  ;;  %6062 = vrot.lane.b32.xlu1 %v6053_v5, %s8096_s23  ;;  %v5989_v51 = vmul.f32 %v8048_v53, %v11545_v19  ;;  %v8050_v31 = vpop.eup %8049 }
 0x9eb   : > { %v5986_v20 = vmul.f32 %v8050_v31, %v11555_v39 }
 0x9ec   : > { %v6052_v60 = vpack.c.bf16 %v5989_v51, %v5988_v26 }
 0x9ed   : > { %v8052_v40 = vpop.eup %8051  ;;  %v7441_v29 = vpop.f32.mrb[120].mxu1 }
 0x9ee   : > { %v6206_v19 = vadd.f32 %v7441_v29, %v11601_v48  ;;  %v5607_v57 = vpop.xlane.xlu1 %5606  ;;  %v6197_v35 = vpop.f32.mrb[121].mxu1  ;;  %6060 = vrot.lane.b32.xlu0 %v6052_v60, %s8096_s23  ;;  %v5987_v61 = vmul.f32 %v8052_v40, %v11562_v25 }
 0x9ef   : > { %8059 = vrcp.f32 %v5607_v57  ;;  %v6198_v13 = vadd.f32 %v11601_v48, %v6197_v35  ;;  %v7442_v45 = vpop.f32.mrb[122].mxu1  ;;  %v8054_v47 = vpop.eup %8053 }
 0x9f0   : > { %6326 = vst.msk [vmem:[%s11608_s13 + $0x10] sm:$0xff] %vm332_vm0, %v6206_v19  ;;  %v6209_v36 = vadd.f32 %v7442_v45, %v11601_v48  ;;  %v6200_v39 = vpop.f32.mrb[123].mxu1  ;;  %v6031_v37 = vpack.c.bf16 %v5987_v61, %v5986_v20  ;;  %8061 = vrcp.f32 %v11549_v0  ;;  %v5984_v25 = vmul.f32 %v8054_v47, %v11557_v32 }
 0x9f1   : > { %v8056_v30 = vpop.eup %8055  ;;  %6324 = vst.msk [vmem:[%s11608_s13] sm:$0xff] %vm332_vm0, %v6198_v13  ;;  %v6201_v62 = vadd.f32 %v11601_v48, %v6200_v39 }
 0x9f2   : > { %6327 = vst.msk [vmem:[%s11608_s13 + $0x18] sm:$0xff] %vm332_vm0, %v6209_v36  ;;  %v5601_v21 = vpop.xlane.xlu1 %5600  ;;  %6042 = vrot.lane.b32.xlu1 %v6031_v37, %s8095_s20  ;;  %v5985_v6 = vmul.f32 %v8056_v30, %v11564_v1  ;;  %v8058_v58 = vpop.eup %8057 }
 0x9f3   : > { %6325 = vst.msk [vmem:[%s11608_s13 + $0x8] sm:$0xff] %vm332_vm0, %v6201_v62  ;;  %8063 = vrcp.f32 %v5601_v21  ;;  %v5994_v0 = vmul.f32 %v8058_v58, %v11576_v24 }
 0x9f4   : > { %v6030_v23 = vpack.c.bf16 %v5985_v6, %v5984_v25 }
 0x9f6   : > { %v5532_v3 = vpop.xlane.xlu1 %5531  ;;  %6040 = vrot.lane.b32.xlu0 %v6030_v23, %s8095_s20 }
 0x9f7   : > { %8065 = vrcp.f32 %v5532_v3 }
 0x9f9   : > { %v8060_v10 = vpop.eup %8059 }
 0x9fa   : > { %v5535_v32 = vpop.xlane.xlu1 %5534  ;;  %v5995_v17 = vmul.f32 %v8060_v10, %v11583_v43  ;;  %v8062_v15 = vpop.eup %8061 }
 0x9fb   : > { %8067 = vrcp.f32 %v5535_v32  ;;  %v5992_v1 = vmul.f32 %v8062_v15, %v11579_v52 }
 0x9fc   : > { %v6055_v54 = vpack.c.bf16 %v5995_v17, %v5994_v0  ;;  %8069 = vrcp.f32 %v5526_v22 }
 0x9fd   : > { %v8064_v41 = vpop.eup %8063 }
 0x9fe   : > { %v4821_v7 = vpop.permute.xlu1 %4820  ;;  %6066 = vrot.lane.b32.xlu1 %v6055_v54, %s8096_s23  ;;  %v5993_v33 = vmul.f32 %v8064_v41, %v11585_v55 }
 0x9ff   : > { %4832 = vst.msk [vmem:[#allocation5 + $0x40] sm:$0xff] %vm2445_vm3, %v4821_v7 }
 0xa00   : > { %v5529_v34 = vpop.xlane.xlu0 %5528  ;;  %v6054_v63 = vpack.c.bf16 %v5993_v33, %v5992_v1 }
 0xa01   : > { %8071 = vrcp.f32 %v5529_v34  ;;  %v8066_v4 = vpop.eup %8065 }
 0xa02   : > { %v4847_v24 = vpop.permute.xlu1 %4846  ;;  %6064 = vrot.lane.b32.xlu0 %v6054_v63, %s8096_s23  ;;  %v5970_v43 = vmul.f32 %v8066_v4, %v11503_v27 }
 0xa04   : > { %v3683_v49 = vpop.permute.xlu0 %3682 }
 0xa05   : > { %v8068_v9 = vpop.eup %8067  ;;  %3691 = vst.msk [vmem:[#allocation5 + $0x38] sm:$0xff] %vm2495_vm5, %v3683_v49 }
 0xa06   : > { %v4871_v52 = vpop.permute.xlu1 %4870  ;;  %v5971_v16 = vmul.f32 %v8068_v9, %v11507_v38  ;;  %v8070_v18 = vpop.eup %8069 }
 0xa07   : > { %v5968_v27 = vmul.f32 %v8070_v18, %v11505_v59 }
 0xa08   : > { %v4823_v55 = vpop.permute.xlu0 %4822  ;;  %v5999_v42 = vpack.c.bf16 %v5971_v16, %v5970_v43 }
 0xa09   : > { %4833 = vst.msk [vmem:[#allocation5 + $0x48] sm:$0xff] %vm2445_vm3, %v4823_v55 }
 0xa0a   : > { %4857 = vst.msk [vmem:[#allocation5 + $0x48] sm:$0xff] %vm2470_vm4, %v4847_v24  ;;  %v4827_v11 = vpop.permute.xlu1 %4826 }
 0xa0b   : > { %6003 = vst.msk [vmem:[#allocation5 + $0x78] sm:$0xff] %vm558_vm1, %v5999_v42  ;;  %v8072_v14 = vpop.eup %8071 }
 0xa0c   : > { %4881 = vst.msk [vmem:[#allocation5 + $0x48] sm:$0xff] %vm2495_vm5, %v4871_v52  ;;  %v4845_v12 = vpop.permute.xlu0 %4844  ;;  %v6083_v28 = vld [vmem:[#allocation5 + $0x38] sm:$0xff]  ;;  %v5969_v38 = vmul.f32 %v8072_v14, %v11509_v8 }
 0xa0d   : > { %4835 = vst.msk [vmem:[#allocation5 + $0x58] sm:$0xff] %vm2445_vm3, %v4827_v11  ;;  %7452 = vmatmul.mubr.msk.bf16.gmra.mrb[132].mxu1 %vm332_vm0, %v6083_v28 }
 0xa0e   : > { %4856 = vst.msk [vmem:[#allocation5 + $0x40] sm:$0xff] %vm2470_vm4, %v4845_v12  ;;  %v4851_v56 = vpop.permute.xlu1 %4850  ;;  %v5998_v50 = vpack.c.bf16 %v5969_v38, %v5968_v27 }
 0xa0f   : > { %4859 = vst.msk [vmem:[#allocation5 + $0x58] sm:$0xff] %vm2470_vm4, %v4851_v56 }
 0xa10   : > { %v4869_v44 = vpop.permute.xlu0 %4868  ;;  %6002 = vst.msk [vmem:[#allocation5 + $0x70] sm:$0xff] %vm558_vm1, %v5998_v50 }
 0xa11   : > { %4880 = vst.msk [vmem:[#allocation5 + $0x40] sm:$0xff] %vm2495_vm5, %v4869_v44 }
 0xa12   : > { %v4875_v46 = vpop.permute.xlu1 %4874 }
 0xa13   : > { %4883 = vst.msk [vmem:[#allocation5 + $0x58] sm:$0xff] %vm2495_vm5, %v4875_v46  ;;  %v6085_v5 = vld [vmem:[#allocation5 + $0x48] sm:$0xff] }
 0xa14   : > { %v4825_v2 = vpop.permute.xlu0 %4824 }
 0xa15   : > { %4834 = vst.msk [vmem:[#allocation5 + $0x50] sm:$0xff] %vm2445_vm3, %v4825_v2 }
 0xa18   : > { %v4849_v59 = vpop.permute.xlu0 %4848  ;;  %v6084_v8 = vld [vmem:[#allocation5 + $0x40] sm:$0xff] }
 0xa19   : > { %4858 = vst.msk [vmem:[#allocation5 + $0x50] sm:$0xff] %vm2470_vm4, %v4849_v59  ;;  %7455 = vmatprep.mubr.msk.bf16.mxu1 %vm332_vm0, %v6084_v8 }
 0xa1a   : > { %7456 = vmatmul.mubr.msk.bf16.gmra.mrb[136].mxu1 %vm332_vm0, %v6085_v5  ;;  %v6087_v22 = vld [vmem:[#allocation5 + $0x58] sm:$0xff] }
 0xa1c   : > { %v4873_v53 = vpop.permute.xlu0 %4872 }
 0xa1d   : > { %4882 = vst.msk [vmem:[#allocation5 + $0x50] sm:$0xff] %vm2495_vm5, %v4873_v53 }
 0xa24   : > { %v6086_v26 = vld [vmem:[#allocation5 + $0x50] sm:$0xff] }
 0xa25   : > { %7459 = vmatprep.mubr.msk.bf16.mxu1 %vm332_vm0, %v6086_v26 }
 0xa26   : > { %7460 = vmatmul.mubr.msk.bf16.gmra.mrb[140].mxu1 %vm332_vm0, %v6087_v22 }
 0xa2e   : > { %v7445_v51 = vpop.f32.mrb[124].mxu1 }
 0xa2f   : > { %v6222_v31 = vadd.f32 %v7445_v51, %v11601_v48  ;;  %v6213_v60 = vpop.f32.mrb[125].mxu1 }
 0xa30   : > { %v6214_v40 = vadd.f32 %v11601_v48, %v6213_v60  ;;  %v7446_v29 = vpop.f32.mrb[126].mxu1 }
 0xa31   : > { %6330 = vst.msk [vmem:[%s11608_s13 + $0x30] sm:$0xff] %vm332_vm0, %v6222_v31  ;;  %v6225_v20 = vadd.f32 %v7446_v29, %v11601_v48  ;;  %v6216_v19 = vpop.f32.mrb[127].mxu1 }
 0xa32   : > { %6328 = vst.msk [vmem:[%s11608_s13 + $0x20] sm:$0xff] %vm332_vm0, %v6214_v40  ;;  %v6217_v57 = vadd.f32 %v11601_v48, %v6216_v19 }
 0xa33   : > { %6331 = vst.msk [vmem:[%s11608_s13 + $0x38] sm:$0xff] %vm332_vm0, %v6225_v20 }
 0xa34   : > { %6329 = vst.msk [vmem:[%s11608_s13 + $0x28] sm:$0xff] %vm332_vm0, %v6217_v57 }
 0xa44   : > { %v6015_v35 = vpop.permute.xlu1 %6014 }
 0xa45   : > { %6025 = vst.msk [vmem:[#allocation5 + $0x68] sm:$0xff] %vm2445_vm3, %v6015_v35 }
 0xa48   : > { %v6013_v61 = vpop.permute.xlu0 %6012 }
 0xa49   : > { %6024 = vst.msk [vmem:[#allocation5 + $0x60] sm:$0xff] %vm2445_vm3, %v6013_v61 }
 0xa4c   : > { %v6019_v13 = vpop.permute.xlu1 %6018 }
 0xa4d   : > { %6027 = vst.msk [vmem:[#allocation5 + $0x78] sm:$0xff] %vm2445_vm3, %v6019_v13 }
 0xa50   : > { %v6017_v45 = vpop.permute.xlu0 %6016 }
 0xa51   : > { %6026 = vst.msk [vmem:[#allocation5 + $0x70] sm:$0xff] %vm2445_vm3, %v6017_v45 }
 0xa54   : > { %v6039_v47 = vpop.permute.xlu1 %6038 }
 0xa55   : > { %6049 = vst.msk [vmem:[#allocation5 + $0x68] sm:$0xff] %vm2470_vm4, %v6039_v47 }
 0xa58   : > { %v6037_v36 = vpop.permute.xlu0 %6036 }
 0xa59   : > { %6048 = vst.msk [vmem:[#allocation5 + $0x60] sm:$0xff] %vm2470_vm4, %v6037_v36 }
 0xa5a   : > { %v7449_v39 = vpop.f32.mrb[128].mxu1 }
 0xa5b   : > { %v6238_v37 = vadd.f32 %v7449_v39, %v11601_v48  ;;  %v6229_v30 = vpop.f32.mrb[129].mxu1 }
 0xa5c   : > { %v6230_v62 = vadd.f32 %v11601_v48, %v6229_v30  ;;  %v7450_v25 = vpop.f32.mrb[130].mxu1  ;;  %v6063_v21 = vpop.permute.xlu1 %6062 }
 0xa5d   : > { %6334 = vst.msk [vmem:[%s11608_s13 + $0x50] sm:$0xff] %vm332_vm0, %v6238_v37  ;;  %v6241_v6 = vadd.f32 %v7450_v25, %v11601_v48  ;;  %v6232_v23 = vpop.f32.mrb[131].mxu1 }
 0xa5e   : > { %6073 = vst.msk [vmem:[#allocation5 + $0x68] sm:$0xff] %vm2495_vm5, %v6063_v21  ;;  %v6233_v3 = vadd.f32 %v11601_v48, %v6232_v23 }
 0xa5f   : > { %6332 = vst.msk [vmem:[%s11608_s13 + $0x40] sm:$0xff] %vm332_vm0, %v6230_v62  ;;  %6335 = vst.msk [vmem:[%s11608_s13 + $0x58] sm:$0xff] %vm332_vm0, %v6241_v6 }
 0xa60   : > { %6333 = vst.msk [vmem:[%s11608_s13 + $0x48] sm:$0xff] %vm332_vm0, %v6233_v3  ;;  %v6061_v58 = vpop.permute.xlu0 %6060 }
 0xa61   : > { %6072 = vst.msk [vmem:[#allocation5 + $0x60] sm:$0xff] %vm2495_vm5, %v6061_v58 }
 0xa64   : > { %v6043_v10 = vpop.permute.xlu1 %6042 }
 0xa65   : > { %6051 = vst.msk [vmem:[#allocation5 + $0x78] sm:$0xff] %vm2470_vm4, %v6043_v10  ;;  %v6089_v17 = vld [vmem:[#allocation5 + $0x68] sm:$0xff] }
 0xa68   : > { %v6041_v0 = vpop.permute.xlu0 %6040  ;;  %v6088_v32 = vld [vmem:[#allocation5 + $0x60] sm:$0xff] }
 0xa69   : > { %6050 = vst.msk [vmem:[#allocation5 + $0x70] sm:$0xff] %vm2470_vm4, %v6041_v0  ;;  %7463 = vmatprep.mubr.msk.bf16.mxu1 %vm332_vm0, %v6088_v32 }
 0xa6a   : > { %7464 = vmatmul.mubr.msk.bf16.gmra.mrb[144].mxu1 %vm332_vm0, %v6089_v17 }
 0xa70   : > { %v6067_v15 = vpop.permute.xlu1 %6066 }
 0xa71   : > { %6075 = vst.msk [vmem:[#allocation5 + $0x78] sm:$0xff] %vm2495_vm5, %v6067_v15 }
 0xa74   : > { %v6065_v54 = vpop.permute.xlu0 %6064 }
 0xa75   : > { %6074 = vst.msk [vmem:[#allocation5 + $0x70] sm:$0xff] %vm2495_vm5, %v6065_v54 }
 0xa78   : > { %v6091_v1 = vld [vmem:[#allocation5 + $0x78] sm:$0xff] }
 0xa7c   : > { %v6090_v41 = vld [vmem:[#allocation5 + $0x70] sm:$0xff] }
 0xa7d   : > { %7467 = vmatprep.mubr.msk.bf16.mxu1 %vm332_vm0, %v6090_v41 }
 0xa7e   : > { %7468 = vmatmul.mubr.msk.bf16.gmra.mrb[148].mxu1 %vm332_vm0, %v6091_v1 }
 0xae0   : > { %v7453_v7 = vpop.f32.mrb[132].mxu1 }
 0xae1   : > { %v6254_v33 = vadd.f32 %v7453_v7, %v11601_v48  ;;  %v6245_v34 = vpop.f32.mrb[133].mxu1 }
 0xae2   : > { %v6246_v63 = vadd.f32 %v11601_v48, %v6245_v34  ;;  %v7454_v24 = vpop.f32.mrb[134].mxu1 }
 0xae3   : > { %6338 = vst.msk [vmem:[%s11608_s13 + $0x70] sm:$0xff] %vm332_vm0, %v6254_v33  ;;  %v6257_v4 = vadd.f32 %v7454_v24, %v11601_v48  ;;  %v6248_v49 = vpop.f32.mrb[135].mxu1 }
 0xae4   : > { %6336 = vst.msk [vmem:[%s11608_s13 + $0x60] sm:$0xff] %vm332_vm0, %v6246_v63  ;;  %v6249_v9 = vadd.f32 %v11601_v48, %v6248_v49 }
 0xae5   : > { %6339 = vst.msk [vmem:[%s11608_s13 + $0x78] sm:$0xff] %vm332_vm0, %v6257_v4 }
 0xae6   : > { %6337 = vst.msk [vmem:[%s11608_s13 + $0x68] sm:$0xff] %vm332_vm0, %v6249_v9 }
 0xaed   : > { %v7457_v52 = vpop.f32.mrb[136].mxu1 }
 0xaee   : > { %v6270_v43 = vadd.f32 %v7457_v52, %v11601_v48  ;;  %v6261_v16 = vpop.f32.mrb[137].mxu1 }
 0xaef   : > { %v6262_v55 = vadd.f32 %v11601_v48, %v6261_v16  ;;  %v7458_v42 = vpop.f32.mrb[138].mxu1 }
 0xaf0   : > { %6342 = vst.msk [vmem:[%s11608_s13 + $0x90] sm:$0xff] %vm332_vm0, %v6270_v43  ;;  %v6273_v18 = vadd.f32 %v7458_v42, %v11601_v48  ;;  %v6264_v11 = vpop.f32.mrb[139].mxu1 }
 0xaf1   : > { %6340 = vst.msk [vmem:[%s11608_s13 + $0x80] sm:$0xff] %vm332_vm0, %v6262_v55  ;;  %v6265_v14 = vadd.f32 %v11601_v48, %v6264_v11 }
 0xaf2   : > { %6343 = vst.msk [vmem:[%s11608_s13 + $0x98] sm:$0xff] %vm332_vm0, %v6273_v18 }
 0xaf3   : > { %6341 = vst.msk [vmem:[%s11608_s13 + $0x88] sm:$0xff] %vm332_vm0, %v6265_v14 }
 0xaf9   : > { %v7461_v12 = vpop.f32.mrb[140].mxu1 }
 0xafa   : > { %v6286_v28 = vadd.f32 %v7461_v12, %v11601_v48  ;;  %v6277_v27 = vpop.f32.mrb[141].mxu1 }
 0xafb   : > { %v6278_v38 = vadd.f32 %v11601_v48, %v6277_v27  ;;  %v7462_v56 = vpop.f32.mrb[142].mxu1 }
 0xafc   : > { %6346 = vst.msk [vmem:[%s11608_s13 + $0xb0] sm:$0xff] %vm332_vm0, %v6286_v28  ;;  %v6289_v50 = vadd.f32 %v7462_v56, %v11601_v48  ;;  %v6280_v44 = vpop.f32.mrb[143].mxu1 }
 0xafd   : > { %6344 = vst.msk [vmem:[%s11608_s13 + $0xa0] sm:$0xff] %vm332_vm0, %v6278_v38  ;;  %v6281_v46 = vadd.f32 %v11601_v48, %v6280_v44 }
 0xafe   : > { %6347 = vst.msk [vmem:[%s11608_s13 + $0xb8] sm:$0xff] %vm332_vm0, %v6289_v50 }
 0xaff   : > { %6345 = vst.msk [vmem:[%s11608_s13 + $0xa8] sm:$0xff] %vm332_vm0, %v6281_v46 }
 0xb3d   : > { %v7465_v2 = vpop.f32.mrb[144].mxu1 }
 0xb3e   : > { %v6302_v59 = vadd.f32 %v7465_v2, %v11601_v48  ;;  %v6293_v8 = vpop.f32.mrb[145].mxu1 }
 0xb3f   : > { %v6294_v5 = vadd.f32 %v11601_v48, %v6293_v8  ;;  %v7466_v53 = vpop.f32.mrb[146].mxu1 }
 0xb40   : > { %6350 = vst.msk [vmem:[%s11608_s13 + $0xd0] sm:$0xff] %vm332_vm0, %v6302_v59  ;;  %v6305_v26 = vadd.f32 %v7466_v53, %v11601_v48  ;;  %v6296_v22 = vpop.f32.mrb[147].mxu1 }
 0xb41   : > { %6348 = vst.msk [vmem:[%s11608_s13 + $0xc0] sm:$0xff] %vm332_vm0, %v6294_v5  ;;  %v6297_v51 = vadd.f32 %v11601_v48, %v6296_v22 }
 0xb42   : > { %6351 = vst.msk [vmem:[%s11608_s13 + $0xd8] sm:$0xff] %vm332_vm0, %v6305_v26 }
 0xb43   : > { %6349 = vst.msk [vmem:[%s11608_s13 + $0xc8] sm:$0xff] %vm332_vm0, %v6297_v51 }
 0xb51   : > { %v7469_v31 = vpop.f32.mrb[148].mxu1 }
 0xb52   : > { %v6318_v60 = vadd.f32 %v7469_v31, %v11601_v48  ;;  %v6309_v40 = vpop.f32.mrb[149].mxu1 }
 0xb53   : > { %v6310_v29 = vadd.f32 %v11601_v48, %v6309_v40  ;;  %v7470_v20 = vpop.f32.mrb[150].mxu1 }
 0xb54   : > { %6354 = vst.msk [vmem:[%s11608_s13 + $0xf0] sm:$0xff] %vm332_vm0, %v6318_v60  ;;  %v6321_v19 = vadd.f32 %v7470_v20, %v11601_v48  ;;  %v6312_v57 = vpop.f32.mrb[151].mxu1 }
 0xb55   : > { %6352 = vst.msk [vmem:[%s11608_s13 + $0xe0] sm:$0xff] %vm332_vm0, %v6310_v29  ;;  %v6313_v35 = vadd.f32 %v11601_v48, %v6312_v57 }
 0xb56   : > { %6355 = vst.msk [vmem:[%s11608_s13 + $0xf8] sm:$0xff] %vm332_vm0, %v6321_v19 }
 0xb57   : > { %6353 = vst.msk [vmem:[%s11608_s13 + $0xe8] sm:$0xff] %vm332_vm0, %v6313_v35 }
 0xb58 PF: > { %s16_s21 = sadd.s32 1, %s8081_s21  }
 0xb59   : > { %p13_p4 = scmp.ge.s32.totalorder %s16_s21, 4  }
 0xb5b   :  { %15 = sbr.rel (!%p13_p4) target bundleno = 1 (0x1), region = 83 }

</bundles_post_ra>
